<compile_context>
chip_gen: v5e
topology: v5e:2x2
jax: 0.10.0
libtpu: 0.0.40
codegen_flags: <defaults>
</compile_context>

<pallas_src>
import jax
import jax.numpy as jnp
from jax.experimental import pallas as pl
from jax.experimental.pallas import tpu as pltpu

# ---- model hyper-parameters (match the PyTorch module defaults) ------------
INPUT_DIM = 16
NUM_CLASSES = 8
D_MODEL = 64
NHEAD = 4
NUM_LAYERS = 2
HEAD_DIM = D_MODEL // NHEAD
DIM_FF = D_MODEL * 4
LN_EPS = 1e-5

SEQS_PER_STEP = 16          # 128 activation rows per grid step
EXACT_SOFTMAX_RECIPROCAL = False
NEG_INF = -1e30

# rows of the packed per-layer vector stack (L, 9, D_MODEL)
_BQ, _BK, _BV, _BO, _BF2, _N1W, _N1B, _N2W, _N2B = range(9)


def _layernorm(x, w, b):
    # PyTorch nn.LayerNorm over the last dim, biased variance, eps=1e-5 (f32).
    mu = jnp.mean(x, axis=-1, keepdims=True)
    xc = x - mu
    var = jnp.mean(xc * xc, axis=-1, keepdims=True)
    return xc * jax.lax.rsqrt(var + LN_EPS) * w + b


def _mm(a, w_bf16):
    # bf16 MXU matmul with f32 accumulation; weights are stored in bf16.
    return jnp.dot(a.astype(jnp.bfloat16), w_bf16,
                   preferred_element_type=jnp.float32)


def transformer_kernel(
    x_ref,            # (R, D)        f32  input rows (features zero-padded to D)
    mask_ref,         # (R, R)        f32  additive block-diag within-sequence mask
    front_w_ref,      # (4, D, D)     bf16 [emb_w_pad, p1_w, p2_w, fc_w_pad]
    front_vecs_ref,   # (4, 1, D)     f32  [emb_b, p1_b, p2_b, fc_b_pad]
    hmask_ref,        # (NHEAD, 1, D) f32  per-head 0/1 lane masks
    wqkv_ref,         # (L, D, 3D)    bf16 fused [Wq*scale | Wk | Wv]
    wo_ref,           # (L, D, D)     bf16
    f1w_ref,          # (L, D, 4D)    bf16
    f2w_ref,          # (L, 4D, D)    bf16
    f1b_ref,          # (L, 1, 4D)    f32
    vecs_ref,         # (L, 9, D)     f32  packed per-layer 1xD vectors
    out_ref,          # (R, D)        f32  lane-dense logits (cols >= C are 0)
):
    x = x_ref[...]                                   # (R, D) f32
    mask = mask_ref[...]                             # (R, R) f32

    # embedding (rows >= INPUT_DIM of the padded weight are zero)
    h = _mm(x, front_w_ref[0]) + front_vecs_ref[0]

    # pos_encoder: Linear -> ReLU -> Linear ; residual add
    p = jnp.maximum(_mm(h, front_w_ref[1]) + front_vecs_ref[1], 0.0)
    p = _mm(p, front_w_ref[2]) + front_vecs_ref[2]
    h = h + p

    for layer in range(NUM_LAYERS):
        vec = vecs_ref[layer]                        # (9, D) f32

        # ---- fused QKV projection: one wide MXU matmul (N = 3*D) -----------
        qkv = _mm(h, wqkv_ref[layer])                # (R, 3D) f32
        q = qkv[:, 0 * D_MODEL:1 * D_MODEL] + vec[_BQ:_BQ + 1]   # pre-scaled
        k = qkv[:, 1 * D_MODEL:2 * D_MODEL] + vec[_BK:_BK + 1]
        v = qkv[:, 2 * D_MODEL:3 * D_MODEL] + vec[_BV:_BV + 1]
        kb = k.astype(jnp.bfloat16)

        # ---- attention, head by head, with zero relayouts -------------------
        # scores_h = (q * head_mask_h) . k  (cross-head terms vanish)
        # concat_h(a_h @ v_h)  ==  sum_h a_h @ (v * head_mask_h)
        attn_cat = None
        for hd in range(NHEAD):
            hm = hmask_ref[hd]                       # (1, D) 0/1 lane mask
            qm = (q * hm).astype(jnp.bfloat16)
            s = jnp.einsum("rd,sd->rs", qm, kb,
                           preferred_element_type=jnp.float32)   # (R, R)
            s = s + mask                             # block-diag per sequence
            s = s - jnp.max(s, axis=-1, keepdims=True)
            e = jnp.exp(s)
            denom = jnp.sum(e, axis=-1, keepdims=True)
            if EXACT_SOFTMAX_RECIPROCAL:
                a = e / denom
            else:
                a = e * pl.reciprocal(denom, approx=True)
            vm = (v * hm).astype(jnp.bfloat16)
            o = jnp.dot(a.astype(jnp.bfloat16), vm,
                        preferred_element_type=jnp.float32)      # (R, D)
            attn_cat = o if attn_cat is None else attn_cat + o

        attn = _mm(attn_cat, wo_ref[layer]) + vec[_BO:_BO + 1]

        # residual + norm1  (dropout is identity in eval mode)
        h = _layernorm(h + attn, vec[_N1W:_N1W + 1], vec[_N1B:_N1B + 1])

        # ---- feed-forward: Linear -> ReLU -> Linear -------------------------
        ff = jnp.maximum(_mm(h, f1w_ref[layer]) + f1b_ref[layer], 0.0)
        ff = _mm(ff, f2w_ref[layer]) + vec[_BF2:_BF2 + 1]

        # residual + norm2
        h = _layernorm(h + ff, vec[_N2W:_N2W + 1], vec[_N2B:_N2B + 1])

    # mean over the size-1 axis is identity; final classifier (padded weight,
    # only the first NUM_CLASSES output columns are meaningful -> sliced in
    # the wrapper so the kernel's store stays lane-dense).
    out_ref[...] = _mm(h, front_w_ref[3]) + front_vecs_ref[3]    # (R, D)


def init_params(key):
    """Deterministic synthetic parameters, packed for the kernel.

    NOTE: if loading real PyTorch weights, MHA `in_proj_weight` must be split
    row-wise into q/k/v BEFORE the transpose, then concatenated along the
    output (column) axis to build `wqkv` (with the q block scaled by
    1/sqrt(head_dim), as below).
    """
    ks = iter(jax.random.split(key, 64))

    def lin(in_f, out_f):
        w = jax.random.normal(next(ks), (out_f, in_f), jnp.float32) * 0.05
        b = jax.random.normal(next(ks), (out_f,), jnp.float32) * 0.05
        return w.T, b                         # pre-transposed: (in_f, out_f)

    emb_w, emb_b = lin(INPUT_DIM, D_MODEL)
    p1_w, p1_b = lin(D_MODEL, D_MODEL)
    p2_w, p2_b = lin(D_MODEL, D_MODEL)
    fc_w, fc_b = lin(D_MODEL, NUM_CLASSES)

    emb_w_pad = jnp.zeros((D_MODEL, D_MODEL), jnp.float32).at[:INPUT_DIM].set(emb_w)
    fc_w_pad = jnp.zeros((D_MODEL, D_MODEL), jnp.float32).at[:, :NUM_CLASSES].set(fc_w)
    fc_b_pad = jnp.zeros((D_MODEL,), jnp.float32).at[:NUM_CLASSES].set(fc_b)

    front_w = jnp.stack([emb_w_pad, p1_w, p2_w, fc_w_pad]).astype(jnp.bfloat16)
    front_vecs = jnp.stack([emb_b, p1_b, p2_b, fc_b_pad])[:, None, :]   # (4,1,D)

    scale = 1.0 / (HEAD_DIM ** 0.5)
    wqkv, wo, f1w, f2w, f1b, vecs = [], [], [], [], [], []
    ones = jnp.ones((D_MODEL,), jnp.float32)
    zeros = jnp.zeros((D_MODEL,), jnp.float32)
    for _ in range(NUM_LAYERS):
        wq, bq = lin(D_MODEL, D_MODEL)
        wk, bk = lin(D_MODEL, D_MODEL)
        wv, bv = lin(D_MODEL, D_MODEL)
        wo_l, bo = lin(D_MODEL, D_MODEL)
        w1, b1 = lin(D_MODEL, DIM_FF)
        w2, b2 = lin(DIM_FF, D_MODEL)
        # attention scale folded into the q projection (as PyTorch does).
        wqkv.append(jnp.concatenate([wq * scale, wk, wv], axis=1))   # (D, 3D)
        wo.append(wo_l)
        f1w.append(w1)
        f2w.append(w2)
        f1b.append(b1[None, :])                                      # (1, 4D)
        vecs.append(jnp.stack([bq * scale, bk, bv, bo, b2,
                               ones, zeros, ones, zeros]))

    return dict(
        front_w=front_w,
        front_vecs=front_vecs,
        wqkv=jnp.stack(wqkv).astype(jnp.bfloat16),
        wo=jnp.stack(wo).astype(jnp.bfloat16),
        f1_w=jnp.stack(f1w).astype(jnp.bfloat16),
        f2_w=jnp.stack(f2w).astype(jnp.bfloat16),
        f1_b=jnp.stack(f1b),
        layer_vecs=jnp.stack(vecs),
    )


def _resident(shape):
    # Whole-array block with a grid-constant index_map: DMA'd once and kept
    # resident in VMEM across all grid iterations.
    n = len(shape)
    return pl.BlockSpec(shape, lambda g: (0,) * n)


@jax.jit
def transformer_forward(x, params):
    """x: (B, INPUT_DIM) — one sequence (the PyTorch forward signature) — or
    (NSEQ, B, INPUT_DIM) — NSEQ independent sequences.  Sequences are packed
    SEQS_PER_STEP at a time into 128-row activation tiles per grid step."""
    squeeze = x.ndim == 2
    x3 = x[None] if squeeze else x
    nseq, batch, in_dim = x3.shape

    num_steps = -(-nseq // SEQS_PER_STEP)          # cdiv
    nseq_pad = num_steps * SEQS_PER_STEP
    rows_per_step = SEQS_PER_STEP * batch          # 128 for batch=8
    rows = nseq_pad * batch

    # zero-pad the feature dim to D_MODEL (padded embedding weight) and pad
    # the sequence count up to a multiple of SEQS_PER_STEP (padding sequences
    # are independent thanks to the block-diagonal mask and are sliced away).
    x_pad = jnp.zeros((nseq_pad, batch, D_MODEL), jnp.float32)
    x_pad = x_pad.at[:nseq, :, :in_dim].set(x3.astype(jnp.float32))
    x_rows = x_pad.reshape(rows, D_MODEL)

    # additive within-sequence (block-diagonal) attention mask, shared by all
    # heads / layers / grid steps.
    seq_id = jnp.arange(rows_per_step, dtype=jnp.int32) // batch
    mask = jnp.where(seq_id[:, None] == seq_id[None, :], 0.0,
                     NEG_INF).astype(jnp.float32)

    # per-head 0/1 lane masks (NHEAD, 1, D_MODEL)
    lane = jnp.arange(D_MODEL, dtype=jnp.int32)
    hmask = jnp.stack(
        [((lane >= hd * HEAD_DIM) & (lane < (hd + 1) * HEAD_DIM))
         .astype(jnp.float32) for hd in range(NHEAD)])[:, None, :]

    out = pl.pallas_call(
        transformer_kernel,
        out_shape=jax.ShapeDtypeStruct((rows, D_MODEL), jnp.float32),
        grid=(num_steps,),
        in_specs=[
            pl.BlockSpec((rows_per_step, D_MODEL), lambda g: (g, 0)),
            _resident((rows_per_step, rows_per_step)),
            _resident(params["front_w"].shape),
            _resident(params["front_vecs"].shape),
            _resident(hmask.shape),
            _resident(params["wqkv"].shape),
            _resident(params["wo"].shape),
            _resident(params["f1_w"].shape),
            _resident(params["f2_w"].shape),
            _resident(params["f1_b"].shape),
            _resident(params["layer_vecs"].shape),
        ],
        out_specs=pl.BlockSpec((rows_per_step, D_MODEL), lambda g: (g, 0)),
        compiler_params=pltpu.CompilerParams(
            dimension_semantics=("parallel",)),
    )(x_rows, mask, params["front_w"], params["front_vecs"], hmask,
      params["wqkv"], params["wo"], params["f1_w"], params["f2_w"],
      params["f1_b"], params["layer_vecs"])

    out = out.reshape(nseq_pad, batch, D_MODEL)[:nseq, :, :NUM_CLASSES]
    return out[0] if squeeze else out


if __name__ == "__main__":
    key = jax.random.PRNGKey(0)
    kx, kp = jax.random.split(key)
    params = init_params(kp)

    # Single call, exactly the PyTorch module's signature: (B, input_dim).
    batch = 8
    x = jax.random.normal(kx, (batch, INPUT_DIM), jnp.float32)
    out = jax.block_until_ready(transformer_forward(x, params))
    assert out.shape == (batch, NUM_CLASSES), out.shape
    assert bool(jnp.all(jnp.isfinite(out)))

    # Batched path: 64 independent sequences -> 4 grid steps of 128 rows each
    # (even, >=2 steps so both v7x TensorCores get work).
    nseq = 4 * SEQS_PER_STEP
    xb = jax.random.normal(kx, (nseq, batch, INPUT_DIM), jnp.float32)
    outb = jax.block_until_ready(transformer_forward(xb, params))
    assert outb.shape == (nseq, batch, NUM_CLASSES), outb.shape
    assert bool(jnp.all(jnp.isfinite(outb)))

    # Sequences are independent (block-diagonal mask): the row-batched path
    # must reproduce the single-call path.
    out0 = jax.block_until_ready(transformer_forward(xb[0], params))
    assert bool(jnp.allclose(out0, outb[0], atol=2e-2, rtol=2e-2))

    print("KERNEL_OK")
</pallas_src>

<mosaic_0001>
module attributes {stable_mosaic.version = 11 : i64} {
  func.func @transformer_kernel(%arg0: i32, %arg1: memref<128x64xf32, #tpu.memory_space<vmem>>, %arg2: memref<128x128xf32, #tpu.memory_space<vmem>>, %arg3: memref<4x64x64xbf16, #tpu.memory_space<vmem>>, %arg4: memref<4x1x64xf32, #tpu.memory_space<vmem>>, %arg5: memref<4x1x64xf32, #tpu.memory_space<vmem>>, %arg6: memref<2x64x192xbf16, #tpu.memory_space<vmem>>, %arg7: memref<2x64x64xbf16, #tpu.memory_space<vmem>>, %arg8: memref<2x64x256xbf16, #tpu.memory_space<vmem>>, %arg9: memref<2x256x64xbf16, #tpu.memory_space<vmem>>, %arg10: memref<2x1x256xf32, #tpu.memory_space<vmem>>, %arg11: memref<2x9x64xf32, #tpu.memory_space<vmem>>, %arg12: memref<128x64xf32, #tpu.memory_space<vmem>>) attributes {dimension_semantics = [#tpu.dimension_semantics<parallel>], iteration_bounds = array<i64: 1>, scalar_prefetch = 0 : i64, scratch_operands = 0 : i64, tpu.core_type = #tpu.core_type<tc>, window_params = [{transform_indices = @transform_0, window_bounds = array<i64: 128, 64>}, {pipeline_mode = #tpu.pipeline_mode<synchronous>, transform_indices = @transform_1, window_bounds = array<i64: 128, 128>}, {pipeline_mode = #tpu.pipeline_mode<synchronous>, transform_indices = @transform_2, window_bounds = array<i64: 4, 64, 64>}, {pipeline_mode = #tpu.pipeline_mode<synchronous>, transform_indices = @transform_3, window_bounds = array<i64: 4, 1, 64>}, {pipeline_mode = #tpu.pipeline_mode<synchronous>, transform_indices = @transform_4, window_bounds = array<i64: 4, 1, 64>}, {pipeline_mode = #tpu.pipeline_mode<synchronous>, transform_indices = @transform_5, window_bounds = array<i64: 2, 64, 192>}, {pipeline_mode = #tpu.pipeline_mode<synchronous>, transform_indices = @transform_6, window_bounds = array<i64: 2, 64, 64>}, {pipeline_mode = #tpu.pipeline_mode<synchronous>, transform_indices = @transform_7, window_bounds = array<i64: 2, 64, 256>}, {pipeline_mode = #tpu.pipeline_mode<synchronous>, transform_indices = @transform_8, window_bounds = array<i64: 2, 256, 64>}, {pipeline_mode = #tpu.pipeline_mode<synchronous>, transform_indices = @transform_9, window_bounds = array<i64: 2, 1, 256>}, {pipeline_mode = #tpu.pipeline_mode<synchronous>, transform_indices = @transform_10, window_bounds = array<i64: 2, 9, 64>}, {transform_indices = @transform_11, window_bounds = array<i64: 128, 64>}]} {
    %c0 = arith.constant 0 : index
    %c0_0 = arith.constant 0 : index
    %0 = vector.load %arg1[%c0, %c0_0] : memref<128x64xf32, #tpu.memory_space<vmem>>, vector<128x64xf32>
    %c0_1 = arith.constant 0 : index
    %c0_2 = arith.constant 0 : index
    %1 = vector.load %arg2[%c0_1, %c0_2] : memref<128x128xf32, #tpu.memory_space<vmem>>, vector<128x128xf32>
    %c0_3 = arith.constant 0 : index
    %c0_4 = arith.constant 0 : index
    %c0_5 = arith.constant 0 : index
    %2 = vector.load %arg3[%c0_3, %c0_4, %c0_5] : memref<4x64x64xbf16, #tpu.memory_space<vmem>>, vector<1x64x64xbf16>
    %3 = vector.shape_cast %2 : vector<1x64x64xbf16> to vector<64x64xbf16>
    %4 = arith.truncf %0 : vector<128x64xf32> to vector<128x64xbf16>
    %cst = arith.constant dense<0.000000e+00> : vector<128x64xf32>
    %5 = tpu.matmul %4, %3, %cst {dimension_numbers = #tpu.dot_dimension_numbers<[1], [0], [0], [1], [0, 0, 1, 1], [], []>} : vector<128x64xbf16>, vector<64x64xbf16>, vector<128x64xf32> -> vector<128x64xf32>
    %c0_6 = arith.constant 0 : index
    %c0_7 = arith.constant 0 : index
    %c0_8 = arith.constant 0 : index
    %6 = vector.load %arg4[%c0_6, %c0_7, %c0_8] : memref<4x1x64xf32, #tpu.memory_space<vmem>>, vector<1x1x64xf32>
    %7 = vector.shape_cast %6 : vector<1x1x64xf32> to vector<1x64xf32>
    %8 = vector.broadcast %7 : vector<1x64xf32> to vector<128x64xf32>
    %9 = arith.addf %5, %8 : vector<128x64xf32>
    %c1 = arith.constant 1 : index
    %c0_9 = arith.constant 0 : index
    %c0_10 = arith.constant 0 : index
    %10 = vector.load %arg3[%c1, %c0_9, %c0_10] : memref<4x64x64xbf16, #tpu.memory_space<vmem>>, vector<1x64x64xbf16>
    %11 = vector.shape_cast %10 : vector<1x64x64xbf16> to vector<64x64xbf16>
    %12 = arith.truncf %9 : vector<128x64xf32> to vector<128x64xbf16>
    %cst_11 = arith.constant dense<0.000000e+00> : vector<128x64xf32>
    %13 = tpu.matmul %12, %11, %cst_11 {dimension_numbers = #tpu.dot_dimension_numbers<[1], [0], [0], [1], [0, 0, 1, 1], [], []>} : vector<128x64xbf16>, vector<64x64xbf16>, vector<128x64xf32> -> vector<128x64xf32>
    %c1_12 = arith.constant 1 : index
    %c0_13 = arith.constant 0 : index
    %c0_14 = arith.constant 0 : index
    %14 = vector.load %arg4[%c1_12, %c0_13, %c0_14] : memref<4x1x64xf32, #tpu.memory_space<vmem>>, vector<1x1x64xf32>
    %15 = vector.shape_cast %14 : vector<1x1x64xf32> to vector<1x64xf32>
    %16 = vector.broadcast %15 : vector<1x64xf32> to vector<128x64xf32>
    %17 = arith.addf %13, %16 : vector<128x64xf32>
    %cst_15 = arith.constant 0.000000e+00 : f32
    %18 = vector.broadcast %cst_15 : f32 to vector<128x64xf32>
    %19 = arith.maximumf %17, %18 : vector<128x64xf32>
    %c2 = arith.constant 2 : index
    %c0_16 = arith.constant 0 : index
    %c0_17 = arith.constant 0 : index
    %20 = vector.load %arg3[%c2, %c0_16, %c0_17] : memref<4x64x64xbf16, #tpu.memory_space<vmem>>, vector<1x64x64xbf16>
    %21 = vector.shape_cast %20 : vector<1x64x64xbf16> to vector<64x64xbf16>
    %22 = arith.truncf %19 : vector<128x64xf32> to vector<128x64xbf16>
    %cst_18 = arith.constant dense<0.000000e+00> : vector<128x64xf32>
    %23 = tpu.matmul %22, %21, %cst_18 {dimension_numbers = #tpu.dot_dimension_numbers<[1], [0], [0], [1], [0, 0, 1, 1], [], []>} : vector<128x64xbf16>, vector<64x64xbf16>, vector<128x64xf32> -> vector<128x64xf32>
    %c2_19 = arith.constant 2 : index
    %c0_20 = arith.constant 0 : index
    %c0_21 = arith.constant 0 : index
    %24 = vector.load %arg4[%c2_19, %c0_20, %c0_21] : memref<4x1x64xf32, #tpu.memory_space<vmem>>, vector<1x1x64xf32>
    %25 = vector.shape_cast %24 : vector<1x1x64xf32> to vector<1x64xf32>
    %26 = vector.broadcast %25 : vector<1x64xf32> to vector<128x64xf32>
    %27 = arith.addf %23, %26 : vector<128x64xf32>
    %28 = arith.addf %9, %27 : vector<128x64xf32>
    %c0_22 = arith.constant 0 : index
    %c0_23 = arith.constant 0 : index
    %c0_24 = arith.constant 0 : index
    %29 = vector.load %arg11[%c0_22, %c0_23, %c0_24] : memref<2x9x64xf32, #tpu.memory_space<vmem>>, vector<1x9x64xf32>
    %30 = vector.shape_cast %29 : vector<1x9x64xf32> to vector<9x64xf32>
    %c0_25 = arith.constant 0 : index
    %c0_26 = arith.constant 0 : index
    %c0_27 = arith.constant 0 : index
    %31 = vector.load %arg6[%c0_25, %c0_26, %c0_27] : memref<2x64x192xbf16, #tpu.memory_space<vmem>>, vector<1x64x192xbf16>
    %32 = vector.shape_cast %31 : vector<1x64x192xbf16> to vector<64x192xbf16>
    %33 = arith.truncf %28 : vector<128x64xf32> to vector<128x64xbf16>
    %cst_28 = arith.constant dense<0.000000e+00> : vector<128x192xf32>
    %34 = tpu.matmul %33, %32, %cst_28 {dimension_numbers = #tpu.dot_dimension_numbers<[1], [0], [0], [1], [0, 0, 1, 1], [], []>} : vector<128x64xbf16>, vector<64x192xbf16>, vector<128x192xf32> -> vector<128x192xf32>
    %35 = vector.extract_strided_slice %34 {offsets = [0, 0], sizes = [128, 64], strides = [1, 1]} : vector<128x192xf32> to vector<128x64xf32>
    %36 = vector.extract_strided_slice %30 {offsets = [0, 0], sizes = [1, 64], strides = [1, 1]} : vector<9x64xf32> to vector<1x64xf32>
    %37 = vector.broadcast %36 : vector<1x64xf32> to vector<128x64xf32>
    %38 = arith.addf %35, %37 : vector<128x64xf32>
    %39 = vector.extract_strided_slice %34 {offsets = [0, 64], sizes = [128, 64], strides = [1, 1]} : vector<128x192xf32> to vector<128x64xf32>
    %40 = vector.extract_strided_slice %30 {offsets = [1, 0], sizes = [1, 64], strides = [1, 1]} : vector<9x64xf32> to vector<1x64xf32>
    %41 = vector.broadcast %40 : vector<1x64xf32> to vector<128x64xf32>
    %42 = arith.addf %39, %41 : vector<128x64xf32>
    %43 = vector.extract_strided_slice %34 {offsets = [0, 128], sizes = [128, 64], strides = [1, 1]} : vector<128x192xf32> to vector<128x64xf32>
    %44 = vector.extract_strided_slice %30 {offsets = [2, 0], sizes = [1, 64], strides = [1, 1]} : vector<9x64xf32> to vector<1x64xf32>
    %45 = vector.broadcast %44 : vector<1x64xf32> to vector<128x64xf32>
    %46 = arith.addf %43, %45 : vector<128x64xf32>
    %47 = arith.truncf %42 : vector<128x64xf32> to vector<128x64xbf16>
    %c0_29 = arith.constant 0 : index
    %c0_30 = arith.constant 0 : index
    %c0_31 = arith.constant 0 : index
    %48 = vector.load %arg5[%c0_29, %c0_30, %c0_31] : memref<4x1x64xf32, #tpu.memory_space<vmem>>, vector<1x1x64xf32>
    %49 = vector.shape_cast %48 : vector<1x1x64xf32> to vector<1x64xf32>
    %50 = vector.broadcast %49 : vector<1x64xf32> to vector<128x64xf32>
    %51 = arith.mulf %38, %50 : vector<128x64xf32>
    %52 = arith.truncf %51 : vector<128x64xf32> to vector<128x64xbf16>
    "tpu.trace_start"() <{level = 10 : i32, message = "rd,sd->rs"}> : () -> ()
    %cst_32 = arith.constant dense<0.000000e+00> : vector<128x128xf32>
    %53 = tpu.matmul %52, %47, %cst_32 {dimension_numbers = #tpu.dot_dimension_numbers<[1], [1], [0], [0], [0, 0, 1, 0], [], []>} : vector<128x64xbf16>, vector<128x64xbf16>, vector<128x128xf32> -> vector<128x128xf32>
    "tpu.trace_stop"() : () -> ()
    %54 = arith.addf %53, %1 : vector<128x128xf32>
    %cst_33 = arith.constant dense<0xFF800000> : vector<128xf32>
    %55 = vector.multi_reduction <maximumf>, %54, %cst_33 [1] : vector<128x128xf32> to vector<128xf32>
    %56 = vector.shape_cast %55 : vector<128xf32> to vector<128x1xf32>
    %57 = vector.broadcast %56 : vector<128x1xf32> to vector<128x128xf32>
    %58 = arith.subf %54, %57 : vector<128x128xf32>
    %59 = math.exp %58 : vector<128x128xf32>
    %cst_34 = arith.constant dense<0.000000e+00> : vector<128xf32>
    %60 = vector.multi_reduction <add>, %59, %cst_34 [1] : vector<128x128xf32> to vector<128xf32>
    %61 = vector.shape_cast %60 : vector<128xf32> to vector<128x1xf32>
    %62 = tpu.reciprocal %61 {approx = true} : vector<128x1xf32> -> vector<128x1xf32>
    %63 = vector.broadcast %62 : vector<128x1xf32> to vector<128x128xf32>
    %64 = arith.mulf %59, %63 : vector<128x128xf32>
    %65 = vector.broadcast %49 : vector<1x64xf32> to vector<128x64xf32>
    %66 = arith.mulf %46, %65 : vector<128x64xf32>
    %67 = arith.truncf %66 : vector<128x64xf32> to vector<128x64xbf16>
    %68 = arith.truncf %64 : vector<128x128xf32> to vector<128x128xbf16>
    %cst_35 = arith.constant dense<0.000000e+00> : vector<128x64xf32>
    %69 = tpu.matmul %68, %67, %cst_35 {dimension_numbers = #tpu.dot_dimension_numbers<[1], [0], [0], [1], [0, 0, 1, 1], [], []>} : vector<128x128xbf16>, vector<128x64xbf16>, vector<128x64xf32> -> vector<128x64xf32>
    %c1_36 = arith.constant 1 : index
    %c0_37 = arith.constant 0 : index
    %c0_38 = arith.constant 0 : index
    %70 = vector.load %arg5[%c1_36, %c0_37, %c0_38] : memref<4x1x64xf32, #tpu.memory_space<vmem>>, vector<1x1x64xf32>
    %71 = vector.shape_cast %70 : vector<1x1x64xf32> to vector<1x64xf32>
    %72 = vector.broadcast %71 : vector<1x64xf32> to vector<128x64xf32>
    %73 = arith.mulf %38, %72 : vector<128x64xf32>
    %74 = arith.truncf %73 : vector<128x64xf32> to vector<128x64xbf16>
    "tpu.trace_start"() <{level = 10 : i32, message = "rd,sd->rs"}> : () -> ()
    %cst_39 = arith.constant dense<0.000000e+00> : vector<128x128xf32>
    %75 = tpu.matmul %74, %47, %cst_39 {dimension_numbers = #tpu.dot_dimension_numbers<[1], [1], [0], [0], [0, 0, 1, 0], [], []>} : vector<128x64xbf16>, vector<128x64xbf16>, vector<128x128xf32> -> vector<128x128xf32>
    "tpu.trace_stop"() : () -> ()
    %76 = arith.addf %75, %1 : vector<128x128xf32>
    %cst_40 = arith.constant dense<0xFF800000> : vector<128xf32>
    %77 = vector.multi_reduction <maximumf>, %76, %cst_40 [1] : vector<128x128xf32> to vector<128xf32>
    %78 = vector.shape_cast %77 : vector<128xf32> to vector<128x1xf32>
    %79 = vector.broadcast %78 : vector<128x1xf32> to vector<128x128xf32>
    %80 = arith.subf %76, %79 : vector<128x128xf32>
    %81 = math.exp %80 : vector<128x128xf32>
    %cst_41 = arith.constant dense<0.000000e+00> : vector<128xf32>
    %82 = vector.multi_reduction <add>, %81, %cst_41 [1] : vector<128x128xf32> to vector<128xf32>
    %83 = vector.shape_cast %82 : vector<128xf32> to vector<128x1xf32>
    %84 = tpu.reciprocal %83 {approx = true} : vector<128x1xf32> -> vector<128x1xf32>
    %85 = vector.broadcast %84 : vector<128x1xf32> to vector<128x128xf32>
    %86 = arith.mulf %81, %85 : vector<128x128xf32>
    %87 = vector.broadcast %71 : vector<1x64xf32> to vector<128x64xf32>
    %88 = arith.mulf %46, %87 : vector<128x64xf32>
    %89 = arith.truncf %88 : vector<128x64xf32> to vector<128x64xbf16>
    %90 = arith.truncf %86 : vector<128x128xf32> to vector<128x128xbf16>
    %cst_42 = arith.constant dense<0.000000e+00> : vector<128x64xf32>
    %91 = tpu.matmul %90, %89, %cst_42 {dimension_numbers = #tpu.dot_dimension_numbers<[1], [0], [0], [1], [0, 0, 1, 1], [], []>} : vector<128x128xbf16>, vector<128x64xbf16>, vector<128x64xf32> -> vector<128x64xf32>
    %92 = arith.addf %69, %91 : vector<128x64xf32>
    %c2_43 = arith.constant 2 : index
    %c0_44 = arith.constant 0 : index
    %c0_45 = arith.constant 0 : index
    %93 = vector.load %arg5[%c2_43, %c0_44, %c0_45] : memref<4x1x64xf32, #tpu.memory_space<vmem>>, vector<1x1x64xf32>
    %94 = vector.shape_cast %93 : vector<1x1x64xf32> to vector<1x64xf32>
    %95 = vector.broadcast %94 : vector<1x64xf32> to vector<128x64xf32>
    %96 = arith.mulf %38, %95 : vector<128x64xf32>
    %97 = arith.truncf %96 : vector<128x64xf32> to vector<128x64xbf16>
    "tpu.trace_start"() <{level = 10 : i32, message = "rd,sd->rs"}> : () -> ()
    %cst_46 = arith.constant dense<0.000000e+00> : vector<128x128xf32>
    %98 = tpu.matmul %97, %47, %cst_46 {dimension_numbers = #tpu.dot_dimension_numbers<[1], [1], [0], [0], [0, 0, 1, 0], [], []>} : vector<128x64xbf16>, vector<128x64xbf16>, vector<128x128xf32> -> vector<128x128xf32>
    "tpu.trace_stop"() : () -> ()
    %99 = arith.addf %98, %1 : vector<128x128xf32>
    %cst_47 = arith.constant dense<0xFF800000> : vector<128xf32>
    %100 = vector.multi_reduction <maximumf>, %99, %cst_47 [1] : vector<128x128xf32> to vector<128xf32>
    %101 = vector.shape_cast %100 : vector<128xf32> to vector<128x1xf32>
    %102 = vector.broadcast %101 : vector<128x1xf32> to vector<128x128xf32>
    %103 = arith.subf %99, %102 : vector<128x128xf32>
    %104 = math.exp %103 : vector<128x128xf32>
    %cst_48 = arith.constant dense<0.000000e+00> : vector<128xf32>
    %105 = vector.multi_reduction <add>, %104, %cst_48 [1] : vector<128x128xf32> to vector<128xf32>
    %106 = vector.shape_cast %105 : vector<128xf32> to vector<128x1xf32>
    %107 = tpu.reciprocal %106 {approx = true} : vector<128x1xf32> -> vector<128x1xf32>
    %108 = vector.broadcast %107 : vector<128x1xf32> to vector<128x128xf32>
    %109 = arith.mulf %104, %108 : vector<128x128xf32>
    %110 = vector.broadcast %94 : vector<1x64xf32> to vector<128x64xf32>
    %111 = arith.mulf %46, %110 : vector<128x64xf32>
    %112 = arith.truncf %111 : vector<128x64xf32> to vector<128x64xbf16>
    %113 = arith.truncf %109 : vector<128x128xf32> to vector<128x128xbf16>
    %cst_49 = arith.constant dense<0.000000e+00> : vector<128x64xf32>
    %114 = tpu.matmul %113, %112, %cst_49 {dimension_numbers = #tpu.dot_dimension_numbers<[1], [0], [0], [1], [0, 0, 1, 1], [], []>} : vector<128x128xbf16>, vector<128x64xbf16>, vector<128x64xf32> -> vector<128x64xf32>
    %115 = arith.addf %92, %114 : vector<128x64xf32>
    %c3 = arith.constant 3 : index
    %c0_50 = arith.constant 0 : index
    %c0_51 = arith.constant 0 : index
    %116 = vector.load %arg5[%c3, %c0_50, %c0_51] : memref<4x1x64xf32, #tpu.memory_space<vmem>>, vector<1x1x64xf32>
    %117 = vector.shape_cast %116 : vector<1x1x64xf32> to vector<1x64xf32>
    %118 = vector.broadcast %117 : vector<1x64xf32> to vector<128x64xf32>
    %119 = arith.mulf %38, %118 : vector<128x64xf32>
    %120 = arith.truncf %119 : vector<128x64xf32> to vector<128x64xbf16>
    "tpu.trace_start"() <{level = 10 : i32, message = "rd,sd->rs"}> : () -> ()
    %cst_52 = arith.constant dense<0.000000e+00> : vector<128x128xf32>
    %121 = tpu.matmul %120, %47, %cst_52 {dimension_numbers = #tpu.dot_dimension_numbers<[1], [1], [0], [0], [0, 0, 1, 0], [], []>} : vector<128x64xbf16>, vector<128x64xbf16>, vector<128x128xf32> -> vector<128x128xf32>
    "tpu.trace_stop"() : () -> ()
    %122 = arith.addf %121, %1 : vector<128x128xf32>
    %cst_53 = arith.constant dense<0xFF800000> : vector<128xf32>
    %123 = vector.multi_reduction <maximumf>, %122, %cst_53 [1] : vector<128x128xf32> to vector<128xf32>
    %124 = vector.shape_cast %123 : vector<128xf32> to vector<128x1xf32>
    %125 = vector.broadcast %124 : vector<128x1xf32> to vector<128x128xf32>
    %126 = arith.subf %122, %125 : vector<128x128xf32>
    %127 = math.exp %126 : vector<128x128xf32>
    %cst_54 = arith.constant dense<0.000000e+00> : vector<128xf32>
    %128 = vector.multi_reduction <add>, %127, %cst_54 [1] : vector<128x128xf32> to vector<128xf32>
    %129 = vector.shape_cast %128 : vector<128xf32> to vector<128x1xf32>
    %130 = tpu.reciprocal %129 {approx = true} : vector<128x1xf32> -> vector<128x1xf32>
    %131 = vector.broadcast %130 : vector<128x1xf32> to vector<128x128xf32>
    %132 = arith.mulf %127, %131 : vector<128x128xf32>
    %133 = vector.broadcast %117 : vector<1x64xf32> to vector<128x64xf32>
    %134 = arith.mulf %46, %133 : vector<128x64xf32>
    %135 = arith.truncf %134 : vector<128x64xf32> to vector<128x64xbf16>
    %136 = arith.truncf %132 : vector<128x128xf32> to vector<128x128xbf16>
    %cst_55 = arith.constant dense<0.000000e+00> : vector<128x64xf32>
    %137 = tpu.matmul %136, %135, %cst_55 {dimension_numbers = #tpu.dot_dimension_numbers<[1], [0], [0], [1], [0, 0, 1, 1], [], []>} : vector<128x128xbf16>, vector<128x64xbf16>, vector<128x64xf32> -> vector<128x64xf32>
    %138 = arith.addf %115, %137 : vector<128x64xf32>
    %c0_56 = arith.constant 0 : index
    %c0_57 = arith.constant 0 : index
    %c0_58 = arith.constant 0 : index
    %139 = vector.load %arg7[%c0_56, %c0_57, %c0_58] : memref<2x64x64xbf16, #tpu.memory_space<vmem>>, vector<1x64x64xbf16>
    %140 = vector.shape_cast %139 : vector<1x64x64xbf16> to vector<64x64xbf16>
    %141 = arith.truncf %138 : vector<128x64xf32> to vector<128x64xbf16>
    %cst_59 = arith.constant dense<0.000000e+00> : vector<128x64xf32>
    %142 = tpu.matmul %141, %140, %cst_59 {dimension_numbers = #tpu.dot_dimension_numbers<[1], [0], [0], [1], [0, 0, 1, 1], [], []>} : vector<128x64xbf16>, vector<64x64xbf16>, vector<128x64xf32> -> vector<128x64xf32>
    %143 = vector.extract_strided_slice %30 {offsets = [3, 0], sizes = [1, 64], strides = [1, 1]} : vector<9x64xf32> to vector<1x64xf32>
    %144 = vector.broadcast %143 : vector<1x64xf32> to vector<128x64xf32>
    %145 = arith.addf %142, %144 : vector<128x64xf32>
    %146 = arith.addf %28, %145 : vector<128x64xf32>
    %147 = vector.extract_strided_slice %30 {offsets = [5, 0], sizes = [1, 64], strides = [1, 1]} : vector<9x64xf32> to vector<1x64xf32>
    %148 = vector.extract_strided_slice %30 {offsets = [6, 0], sizes = [1, 64], strides = [1, 1]} : vector<9x64xf32> to vector<1x64xf32>
    %cst_60 = arith.constant dense<0.000000e+00> : vector<128xf32>
    %149 = vector.multi_reduction <add>, %146, %cst_60 [1] : vector<128x64xf32> to vector<128xf32>
    %150 = vector.shape_cast %149 : vector<128xf32> to vector<128x1xf32>
    %cst_61 = arith.constant 6.400000e+01 : f32
    %151 = vector.broadcast %cst_61 : f32 to vector<128x1xf32>
    %152 = arith.divf %150, %151 : vector<128x1xf32>
    %153 = vector.broadcast %152 : vector<128x1xf32> to vector<128x64xf32>
    %154 = arith.subf %146, %153 : vector<128x64xf32>
    %155 = arith.mulf %154, %154 : vector<128x64xf32>
    %cst_62 = arith.constant dense<0.000000e+00> : vector<128xf32>
    %156 = vector.multi_reduction <add>, %155, %cst_62 [1] : vector<128x64xf32> to vector<128xf32>
    %157 = vector.shape_cast %156 : vector<128xf32> to vector<128x1xf32>
    %cst_63 = arith.constant 6.400000e+01 : f32
    %158 = vector.broadcast %cst_63 : f32 to vector<128x1xf32>
    %159 = arith.divf %157, %158 : vector<128x1xf32>
    %cst_64 = arith.constant 9.99999974E-6 : f32
    %160 = vector.broadcast %cst_64 : f32 to vector<128x1xf32>
    %161 = arith.addf %159, %160 : vector<128x1xf32>
    %162 = math.rsqrt %161 : vector<128x1xf32>
    %163 = vector.broadcast %162 : vector<128x1xf32> to vector<128x64xf32>
    %164 = arith.mulf %154, %163 : vector<128x64xf32>
    %165 = vector.broadcast %147 : vector<1x64xf32> to vector<128x64xf32>
    %166 = arith.mulf %164, %165 : vector<128x64xf32>
    %167 = vector.broadcast %148 : vector<1x64xf32> to vector<128x64xf32>
    %168 = arith.addf %166, %167 : vector<128x64xf32>
    %c0_65 = arith.constant 0 : index
    %c0_66 = arith.constant 0 : index
    %c0_67 = arith.constant 0 : index
    %169 = vector.load %arg8[%c0_65, %c0_66, %c0_67] : memref<2x64x256xbf16, #tpu.memory_space<vmem>>, vector<1x64x256xbf16>
    %170 = vector.shape_cast %169 : vector<1x64x256xbf16> to vector<64x256xbf16>
    %171 = arith.truncf %168 : vector<128x64xf32> to vector<128x64xbf16>
    %cst_68 = arith.constant dense<0.000000e+00> : vector<128x256xf32>
    %172 = tpu.matmul %171, %170, %cst_68 {dimension_numbers = #tpu.dot_dimension_numbers<[1], [0], [0], [1], [0, 0, 1, 1], [], []>} : vector<128x64xbf16>, vector<64x256xbf16>, vector<128x256xf32> -> vector<128x256xf32>
    %c0_69 = arith.constant 0 : index
    %c0_70 = arith.constant 0 : index
    %c0_71 = arith.constant 0 : index
    %173 = vector.load %arg10[%c0_69, %c0_70, %c0_71] : memref<2x1x256xf32, #tpu.memory_space<vmem>>, vector<1x1x256xf32>
    %174 = vector.shape_cast %173 : vector<1x1x256xf32> to vector<1x256xf32>
    %175 = vector.broadcast %174 : vector<1x256xf32> to vector<128x256xf32>
    %176 = arith.addf %172, %175 : vector<128x256xf32>
    %cst_72 = arith.constant 0.000000e+00 : f32
    %177 = vector.broadcast %cst_72 : f32 to vector<128x256xf32>
    %178 = arith.maximumf %176, %177 : vector<128x256xf32>
    %c0_73 = arith.constant 0 : index
    %c0_74 = arith.constant 0 : index
    %c0_75 = arith.constant 0 : index
    %179 = vector.load %arg9[%c0_73, %c0_74, %c0_75] : memref<2x256x64xbf16, #tpu.memory_space<vmem>>, vector<1x256x64xbf16>
    %180 = vector.shape_cast %179 : vector<1x256x64xbf16> to vector<256x64xbf16>
    %181 = arith.truncf %178 : vector<128x256xf32> to vector<128x256xbf16>
    %cst_76 = arith.constant dense<0.000000e+00> : vector<128x64xf32>
    %182 = tpu.matmul %181, %180, %cst_76 {dimension_numbers = #tpu.dot_dimension_numbers<[1], [0], [0], [1], [0, 0, 1, 1], [], []>} : vector<128x256xbf16>, vector<256x64xbf16>, vector<128x64xf32> -> vector<128x64xf32>
    %183 = vector.extract_strided_slice %30 {offsets = [4, 0], sizes = [1, 64], strides = [1, 1]} : vector<9x64xf32> to vector<1x64xf32>
    %184 = vector.broadcast %183 : vector<1x64xf32> to vector<128x64xf32>
    %185 = arith.addf %182, %184 : vector<128x64xf32>
    %186 = arith.addf %168, %185 : vector<128x64xf32>
    %187 = vector.extract_strided_slice %30 {offsets = [7, 0], sizes = [1, 64], strides = [1, 1]} : vector<9x64xf32> to vector<1x64xf32>
    %188 = vector.extract_strided_slice %30 {offsets = [8, 0], sizes = [1, 64], strides = [1, 1]} : vector<9x64xf32> to vector<1x64xf32>
    %cst_77 = arith.constant dense<0.000000e+00> : vector<128xf32>
    %189 = vector.multi_reduction <add>, %186, %cst_77 [1] : vector<128x64xf32> to vector<128xf32>
    %190 = vector.shape_cast %189 : vector<128xf32> to vector<128x1xf32>
    %cst_78 = arith.constant 6.400000e+01 : f32
    %191 = vector.broadcast %cst_78 : f32 to vector<128x1xf32>
    %192 = arith.divf %190, %191 : vector<128x1xf32>
    %193 = vector.broadcast %192 : vector<128x1xf32> to vector<128x64xf32>
    %194 = arith.subf %186, %193 : vector<128x64xf32>
    %195 = arith.mulf %194, %194 : vector<128x64xf32>
    %cst_79 = arith.constant dense<0.000000e+00> : vector<128xf32>
    %196 = vector.multi_reduction <add>, %195, %cst_79 [1] : vector<128x64xf32> to vector<128xf32>
    %197 = vector.shape_cast %196 : vector<128xf32> to vector<128x1xf32>
    %cst_80 = arith.constant 6.400000e+01 : f32
    %198 = vector.broadcast %cst_80 : f32 to vector<128x1xf32>
    %199 = arith.divf %197, %198 : vector<128x1xf32>
    %cst_81 = arith.constant 9.99999974E-6 : f32
    %200 = vector.broadcast %cst_81 : f32 to vector<128x1xf32>
    %201 = arith.addf %199, %200 : vector<128x1xf32>
    %202 = math.rsqrt %201 : vector<128x1xf32>
    %203 = vector.broadcast %202 : vector<128x1xf32> to vector<128x64xf32>
    %204 = arith.mulf %194, %203 : vector<128x64xf32>
    %205 = vector.broadcast %187 : vector<1x64xf32> to vector<128x64xf32>
    %206 = arith.mulf %204, %205 : vector<128x64xf32>
    %207 = vector.broadcast %188 : vector<1x64xf32> to vector<128x64xf32>
    %208 = arith.addf %206, %207 : vector<128x64xf32>
    %c1_82 = arith.constant 1 : index
    %c0_83 = arith.constant 0 : index
    %c0_84 = arith.constant 0 : index
    %209 = vector.load %arg11[%c1_82, %c0_83, %c0_84] : memref<2x9x64xf32, #tpu.memory_space<vmem>>, vector<1x9x64xf32>
    %210 = vector.shape_cast %209 : vector<1x9x64xf32> to vector<9x64xf32>
    %c1_85 = arith.constant 1 : index
    %c0_86 = arith.constant 0 : index
    %c0_87 = arith.constant 0 : index
    %211 = vector.load %arg6[%c1_85, %c0_86, %c0_87] : memref<2x64x192xbf16, #tpu.memory_space<vmem>>, vector<1x64x192xbf16>
    %212 = vector.shape_cast %211 : vector<1x64x192xbf16> to vector<64x192xbf16>
    %213 = arith.truncf %208 : vector<128x64xf32> to vector<128x64xbf16>
    %cst_88 = arith.constant dense<0.000000e+00> : vector<128x192xf32>
    %214 = tpu.matmul %213, %212, %cst_88 {dimension_numbers = #tpu.dot_dimension_numbers<[1], [0], [0], [1], [0, 0, 1, 1], [], []>} : vector<128x64xbf16>, vector<64x192xbf16>, vector<128x192xf32> -> vector<128x192xf32>
    %215 = vector.extract_strided_slice %214 {offsets = [0, 0], sizes = [128, 64], strides = [1, 1]} : vector<128x192xf32> to vector<128x64xf32>
    %216 = vector.extract_strided_slice %210 {offsets = [0, 0], sizes = [1, 64], strides = [1, 1]} : vector<9x64xf32> to vector<1x64xf32>
    %217 = vector.broadcast %216 : vector<1x64xf32> to vector<128x64xf32>
    %218 = arith.addf %215, %217 : vector<128x64xf32>
    %219 = vector.extract_strided_slice %214 {offsets = [0, 64], sizes = [128, 64], strides = [1, 1]} : vector<128x192xf32> to vector<128x64xf32>
    %220 = vector.extract_strided_slice %210 {offsets = [1, 0], sizes = [1, 64], strides = [1, 1]} : vector<9x64xf32> to vector<1x64xf32>
    %221 = vector.broadcast %220 : vector<1x64xf32> to vector<128x64xf32>
    %222 = arith.addf %219, %221 : vector<128x64xf32>
    %223 = vector.extract_strided_slice %214 {offsets = [0, 128], sizes = [128, 64], strides = [1, 1]} : vector<128x192xf32> to vector<128x64xf32>
    %224 = vector.extract_strided_slice %210 {offsets = [2, 0], sizes = [1, 64], strides = [1, 1]} : vector<9x64xf32> to vector<1x64xf32>
    %225 = vector.broadcast %224 : vector<1x64xf32> to vector<128x64xf32>
    %226 = arith.addf %223, %225 : vector<128x64xf32>
    %227 = arith.truncf %222 : vector<128x64xf32> to vector<128x64xbf16>
    %c0_89 = arith.constant 0 : index
    %c0_90 = arith.constant 0 : index
    %c0_91 = arith.constant 0 : index
    %228 = vector.load %arg5[%c0_89, %c0_90, %c0_91] : memref<4x1x64xf32, #tpu.memory_space<vmem>>, vector<1x1x64xf32>
    %229 = vector.shape_cast %228 : vector<1x1x64xf32> to vector<1x64xf32>
    %230 = vector.broadcast %229 : vector<1x64xf32> to vector<128x64xf32>
    %231 = arith.mulf %218, %230 : vector<128x64xf32>
    %232 = arith.truncf %231 : vector<128x64xf32> to vector<128x64xbf16>
    "tpu.trace_start"() <{level = 10 : i32, message = "rd,sd->rs"}> : () -> ()
    %cst_92 = arith.constant dense<0.000000e+00> : vector<128x128xf32>
    %233 = tpu.matmul %232, %227, %cst_92 {dimension_numbers = #tpu.dot_dimension_numbers<[1], [1], [0], [0], [0, 0, 1, 0], [], []>} : vector<128x64xbf16>, vector<128x64xbf16>, vector<128x128xf32> -> vector<128x128xf32>
    "tpu.trace_stop"() : () -> ()
    %234 = arith.addf %233, %1 : vector<128x128xf32>
    %cst_93 = arith.constant dense<0xFF800000> : vector<128xf32>
    %235 = vector.multi_reduction <maximumf>, %234, %cst_93 [1] : vector<128x128xf32> to vector<128xf32>
    %236 = vector.shape_cast %235 : vector<128xf32> to vector<128x1xf32>
    %237 = vector.broadcast %236 : vector<128x1xf32> to vector<128x128xf32>
    %238 = arith.subf %234, %237 : vector<128x128xf32>
    %239 = math.exp %238 : vector<128x128xf32>
    %cst_94 = arith.constant dense<0.000000e+00> : vector<128xf32>
    %240 = vector.multi_reduction <add>, %239, %cst_94 [1] : vector<128x128xf32> to vector<128xf32>
    %241 = vector.shape_cast %240 : vector<128xf32> to vector<128x1xf32>
    %242 = tpu.reciprocal %241 {approx = true} : vector<128x1xf32> -> vector<128x1xf32>
    %243 = vector.broadcast %242 : vector<128x1xf32> to vector<128x128xf32>
    %244 = arith.mulf %239, %243 : vector<128x128xf32>
    %245 = vector.broadcast %229 : vector<1x64xf32> to vector<128x64xf32>
    %246 = arith.mulf %226, %245 : vector<128x64xf32>
    %247 = arith.truncf %246 : vector<128x64xf32> to vector<128x64xbf16>
    %248 = arith.truncf %244 : vector<128x128xf32> to vector<128x128xbf16>
    %cst_95 = arith.constant dense<0.000000e+00> : vector<128x64xf32>
    %249 = tpu.matmul %248, %247, %cst_95 {dimension_numbers = #tpu.dot_dimension_numbers<[1], [0], [0], [1], [0, 0, 1, 1], [], []>} : vector<128x128xbf16>, vector<128x64xbf16>, vector<128x64xf32> -> vector<128x64xf32>
    %c1_96 = arith.constant 1 : index
    %c0_97 = arith.constant 0 : index
    %c0_98 = arith.constant 0 : index
    %250 = vector.load %arg5[%c1_96, %c0_97, %c0_98] : memref<4x1x64xf32, #tpu.memory_space<vmem>>, vector<1x1x64xf32>
    %251 = vector.shape_cast %250 : vector<1x1x64xf32> to vector<1x64xf32>
    %252 = vector.broadcast %251 : vector<1x64xf32> to vector<128x64xf32>
    %253 = arith.mulf %218, %252 : vector<128x64xf32>
    %254 = arith.truncf %253 : vector<128x64xf32> to vector<128x64xbf16>
    "tpu.trace_start"() <{level = 10 : i32, message = "rd,sd->rs"}> : () -> ()
    %cst_99 = arith.constant dense<0.000000e+00> : vector<128x128xf32>
    %255 = tpu.matmul %254, %227, %cst_99 {dimension_numbers = #tpu.dot_dimension_numbers<[1], [1], [0], [0], [0, 0, 1, 0], [], []>} : vector<128x64xbf16>, vector<128x64xbf16>, vector<128x128xf32> -> vector<128x128xf32>
    "tpu.trace_stop"() : () -> ()
    %256 = arith.addf %255, %1 : vector<128x128xf32>
    %cst_100 = arith.constant dense<0xFF800000> : vector<128xf32>
    %257 = vector.multi_reduction <maximumf>, %256, %cst_100 [1] : vector<128x128xf32> to vector<128xf32>
    %258 = vector.shape_cast %257 : vector<128xf32> to vector<128x1xf32>
    %259 = vector.broadcast %258 : vector<128x1xf32> to vector<128x128xf32>
    %260 = arith.subf %256, %259 : vector<128x128xf32>
    %261 = math.exp %260 : vector<128x128xf32>
    %cst_101 = arith.constant dense<0.000000e+00> : vector<128xf32>
    %262 = vector.multi_reduction <add>, %261, %cst_101 [1] : vector<128x128xf32> to vector<128xf32>
    %263 = vector.shape_cast %262 : vector<128xf32> to vector<128x1xf32>
    %264 = tpu.reciprocal %263 {approx = true} : vector<128x1xf32> -> vector<128x1xf32>
    %265 = vector.broadcast %264 : vector<128x1xf32> to vector<128x128xf32>
    %266 = arith.mulf %261, %265 : vector<128x128xf32>
    %267 = vector.broadcast %251 : vector<1x64xf32> to vector<128x64xf32>
    %268 = arith.mulf %226, %267 : vector<128x64xf32>
    %269 = arith.truncf %268 : vector<128x64xf32> to vector<128x64xbf16>
    %270 = arith.truncf %266 : vector<128x128xf32> to vector<128x128xbf16>
    %cst_102 = arith.constant dense<0.000000e+00> : vector<128x64xf32>
    %271 = tpu.matmul %270, %269, %cst_102 {dimension_numbers = #tpu.dot_dimension_numbers<[1], [0], [0], [1], [0, 0, 1, 1], [], []>} : vector<128x128xbf16>, vector<128x64xbf16>, vector<128x64xf32> -> vector<128x64xf32>
    %272 = arith.addf %249, %271 : vector<128x64xf32>
    %c2_103 = arith.constant 2 : index
    %c0_104 = arith.constant 0 : index
    %c0_105 = arith.constant 0 : index
    %273 = vector.load %arg5[%c2_103, %c0_104, %c0_105] : memref<4x1x64xf32, #tpu.memory_space<vmem>>, vector<1x1x64xf32>
    %274 = vector.shape_cast %273 : vector<1x1x64xf32> to vector<1x64xf32>
    %275 = vector.broadcast %274 : vector<1x64xf32> to vector<128x64xf32>
    %276 = arith.mulf %218, %275 : vector<128x64xf32>
    %277 = arith.truncf %276 : vector<128x64xf32> to vector<128x64xbf16>
    "tpu.trace_start"() <{level = 10 : i32, message = "rd,sd->rs"}> : () -> ()
    %cst_106 = arith.constant dense<0.000000e+00> : vector<128x128xf32>
    %278 = tpu.matmul %277, %227, %cst_106 {dimension_numbers = #tpu.dot_dimension_numbers<[1], [1], [0], [0], [0, 0, 1, 0], [], []>} : vector<128x64xbf16>, vector<128x64xbf16>, vector<128x128xf32> -> vector<128x128xf32>
    "tpu.trace_stop"() : () -> ()
    %279 = arith.addf %278, %1 : vector<128x128xf32>
    %cst_107 = arith.constant dense<0xFF800000> : vector<128xf32>
    %280 = vector.multi_reduction <maximumf>, %279, %cst_107 [1] : vector<128x128xf32> to vector<128xf32>
    %281 = vector.shape_cast %280 : vector<128xf32> to vector<128x1xf32>
    %282 = vector.broadcast %281 : vector<128x1xf32> to vector<128x128xf32>
    %283 = arith.subf %279, %282 : vector<128x128xf32>
    %284 = math.exp %283 : vector<128x128xf32>
    %cst_108 = arith.constant dense<0.000000e+00> : vector<128xf32>
    %285 = vector.multi_reduction <add>, %284, %cst_108 [1] : vector<128x128xf32> to vector<128xf32>
    %286 = vector.shape_cast %285 : vector<128xf32> to vector<128x1xf32>
    %287 = tpu.reciprocal %286 {approx = true} : vector<128x1xf32> -> vector<128x1xf32>
    %288 = vector.broadcast %287 : vector<128x1xf32> to vector<128x128xf32>
    %289 = arith.mulf %284, %288 : vector<128x128xf32>
    %290 = vector.broadcast %274 : vector<1x64xf32> to vector<128x64xf32>
    %291 = arith.mulf %226, %290 : vector<128x64xf32>
    %292 = arith.truncf %291 : vector<128x64xf32> to vector<128x64xbf16>
    %293 = arith.truncf %289 : vector<128x128xf32> to vector<128x128xbf16>
    %cst_109 = arith.constant dense<0.000000e+00> : vector<128x64xf32>
    %294 = tpu.matmul %293, %292, %cst_109 {dimension_numbers = #tpu.dot_dimension_numbers<[1], [0], [0], [1], [0, 0, 1, 1], [], []>} : vector<128x128xbf16>, vector<128x64xbf16>, vector<128x64xf32> -> vector<128x64xf32>
    %295 = arith.addf %272, %294 : vector<128x64xf32>
    %c3_110 = arith.constant 3 : index
    %c0_111 = arith.constant 0 : index
    %c0_112 = arith.constant 0 : index
    %296 = vector.load %arg5[%c3_110, %c0_111, %c0_112] : memref<4x1x64xf32, #tpu.memory_space<vmem>>, vector<1x1x64xf32>
    %297 = vector.shape_cast %296 : vector<1x1x64xf32> to vector<1x64xf32>
    %298 = vector.broadcast %297 : vector<1x64xf32> to vector<128x64xf32>
    %299 = arith.mulf %218, %298 : vector<128x64xf32>
    %300 = arith.truncf %299 : vector<128x64xf32> to vector<128x64xbf16>
    "tpu.trace_start"() <{level = 10 : i32, message = "rd,sd->rs"}> : () -> ()
    %cst_113 = arith.constant dense<0.000000e+00> : vector<128x128xf32>
    %301 = tpu.matmul %300, %227, %cst_113 {dimension_numbers = #tpu.dot_dimension_numbers<[1], [1], [0], [0], [0, 0, 1, 0], [], []>} : vector<128x64xbf16>, vector<128x64xbf16>, vector<128x128xf32> -> vector<128x128xf32>
    "tpu.trace_stop"() : () -> ()
    %302 = arith.addf %301, %1 : vector<128x128xf32>
    %cst_114 = arith.constant dense<0xFF800000> : vector<128xf32>
    %303 = vector.multi_reduction <maximumf>, %302, %cst_114 [1] : vector<128x128xf32> to vector<128xf32>
    %304 = vector.shape_cast %303 : vector<128xf32> to vector<128x1xf32>
    %305 = vector.broadcast %304 : vector<128x1xf32> to vector<128x128xf32>
    %306 = arith.subf %302, %305 : vector<128x128xf32>
    %307 = math.exp %306 : vector<128x128xf32>
    %cst_115 = arith.constant dense<0.000000e+00> : vector<128xf32>
    %308 = vector.multi_reduction <add>, %307, %cst_115 [1] : vector<128x128xf32> to vector<128xf32>
    %309 = vector.shape_cast %308 : vector<128xf32> to vector<128x1xf32>
    %310 = tpu.reciprocal %309 {approx = true} : vector<128x1xf32> -> vector<128x1xf32>
    %311 = vector.broadcast %310 : vector<128x1xf32> to vector<128x128xf32>
    %312 = arith.mulf %307, %311 : vector<128x128xf32>
    %313 = vector.broadcast %297 : vector<1x64xf32> to vector<128x64xf32>
    %314 = arith.mulf %226, %313 : vector<128x64xf32>
    %315 = arith.truncf %314 : vector<128x64xf32> to vector<128x64xbf16>
    %316 = arith.truncf %312 : vector<128x128xf32> to vector<128x128xbf16>
    %cst_116 = arith.constant dense<0.000000e+00> : vector<128x64xf32>
    %317 = tpu.matmul %316, %315, %cst_116 {dimension_numbers = #tpu.dot_dimension_numbers<[1], [0], [0], [1], [0, 0, 1, 1], [], []>} : vector<128x128xbf16>, vector<128x64xbf16>, vector<128x64xf32> -> vector<128x64xf32>
    %318 = arith.addf %295, %317 : vector<128x64xf32>
    %c1_117 = arith.constant 1 : index
    %c0_118 = arith.constant 0 : index
    %c0_119 = arith.constant 0 : index
    %319 = vector.load %arg7[%c1_117, %c0_118, %c0_119] : memref<2x64x64xbf16, #tpu.memory_space<vmem>>, vector<1x64x64xbf16>
    %320 = vector.shape_cast %319 : vector<1x64x64xbf16> to vector<64x64xbf16>
    %321 = arith.truncf %318 : vector<128x64xf32> to vector<128x64xbf16>
    %cst_120 = arith.constant dense<0.000000e+00> : vector<128x64xf32>
    %322 = tpu.matmul %321, %320, %cst_120 {dimension_numbers = #tpu.dot_dimension_numbers<[1], [0], [0], [1], [0, 0, 1, 1], [], []>} : vector<128x64xbf16>, vector<64x64xbf16>, vector<128x64xf32> -> vector<128x64xf32>
    %323 = vector.extract_strided_slice %210 {offsets = [3, 0], sizes = [1, 64], strides = [1, 1]} : vector<9x64xf32> to vector<1x64xf32>
    %324 = vector.broadcast %323 : vector<1x64xf32> to vector<128x64xf32>
    %325 = arith.addf %322, %324 : vector<128x64xf32>
    %326 = arith.addf %208, %325 : vector<128x64xf32>
    %327 = vector.extract_strided_slice %210 {offsets = [5, 0], sizes = [1, 64], strides = [1, 1]} : vector<9x64xf32> to vector<1x64xf32>
    %328 = vector.extract_strided_slice %210 {offsets = [6, 0], sizes = [1, 64], strides = [1, 1]} : vector<9x64xf32> to vector<1x64xf32>
    %cst_121 = arith.constant dense<0.000000e+00> : vector<128xf32>
    %329 = vector.multi_reduction <add>, %326, %cst_121 [1] : vector<128x64xf32> to vector<128xf32>
    %330 = vector.shape_cast %329 : vector<128xf32> to vector<128x1xf32>
    %cst_122 = arith.constant 6.400000e+01 : f32
    %331 = vector.broadcast %cst_122 : f32 to vector<128x1xf32>
    %332 = arith.divf %330, %331 : vector<128x1xf32>
    %333 = vector.broadcast %332 : vector<128x1xf32> to vector<128x64xf32>
    %334 = arith.subf %326, %333 : vector<128x64xf32>
    %335 = arith.mulf %334, %334 : vector<128x64xf32>
    %cst_123 = arith.constant dense<0.000000e+00> : vector<128xf32>
    %336 = vector.multi_reduction <add>, %335, %cst_123 [1] : vector<128x64xf32> to vector<128xf32>
    %337 = vector.shape_cast %336 : vector<128xf32> to vector<128x1xf32>
    %cst_124 = arith.constant 6.400000e+01 : f32
    %338 = vector.broadcast %cst_124 : f32 to vector<128x1xf32>
    %339 = arith.divf %337, %338 : vector<128x1xf32>
    %cst_125 = arith.constant 9.99999974E-6 : f32
    %340 = vector.broadcast %cst_125 : f32 to vector<128x1xf32>
    %341 = arith.addf %339, %340 : vector<128x1xf32>
    %342 = math.rsqrt %341 : vector<128x1xf32>
    %343 = vector.broadcast %342 : vector<128x1xf32> to vector<128x64xf32>
    %344 = arith.mulf %334, %343 : vector<128x64xf32>
    %345 = vector.broadcast %327 : vector<1x64xf32> to vector<128x64xf32>
    %346 = arith.mulf %344, %345 : vector<128x64xf32>
    %347 = vector.broadcast %328 : vector<1x64xf32> to vector<128x64xf32>
    %348 = arith.addf %346, %347 : vector<128x64xf32>
    %c1_126 = arith.constant 1 : index
    %c0_127 = arith.constant 0 : index
    %c0_128 = arith.constant 0 : index
    %349 = vector.load %arg8[%c1_126, %c0_127, %c0_128] : memref<2x64x256xbf16, #tpu.memory_space<vmem>>, vector<1x64x256xbf16>
    %350 = vector.shape_cast %349 : vector<1x64x256xbf16> to vector<64x256xbf16>
    %351 = arith.truncf %348 : vector<128x64xf32> to vector<128x64xbf16>
    %cst_129 = arith.constant dense<0.000000e+00> : vector<128x256xf32>
    %352 = tpu.matmul %351, %350, %cst_129 {dimension_numbers = #tpu.dot_dimension_numbers<[1], [0], [0], [1], [0, 0, 1, 1], [], []>} : vector<128x64xbf16>, vector<64x256xbf16>, vector<128x256xf32> -> vector<128x256xf32>
    %c1_130 = arith.constant 1 : index
    %c0_131 = arith.constant 0 : index
    %c0_132 = arith.constant 0 : index
    %353 = vector.load %arg10[%c1_130, %c0_131, %c0_132] : memref<2x1x256xf32, #tpu.memory_space<vmem>>, vector<1x1x256xf32>
    %354 = vector.shape_cast %353 : vector<1x1x256xf32> to vector<1x256xf32>
    %355 = vector.broadcast %354 : vector<1x256xf32> to vector<128x256xf32>
    %356 = arith.addf %352, %355 : vector<128x256xf32>
    %cst_133 = arith.constant 0.000000e+00 : f32
    %357 = vector.broadcast %cst_133 : f32 to vector<128x256xf32>
    %358 = arith.maximumf %356, %357 : vector<128x256xf32>
    %c1_134 = arith.constant 1 : index
    %c0_135 = arith.constant 0 : index
    %c0_136 = arith.constant 0 : index
    %359 = vector.load %arg9[%c1_134, %c0_135, %c0_136] : memref<2x256x64xbf16, #tpu.memory_space<vmem>>, vector<1x256x64xbf16>
    %360 = vector.shape_cast %359 : vector<1x256x64xbf16> to vector<256x64xbf16>
    %361 = arith.truncf %358 : vector<128x256xf32> to vector<128x256xbf16>
    %cst_137 = arith.constant dense<0.000000e+00> : vector<128x64xf32>
    %362 = tpu.matmul %361, %360, %cst_137 {dimension_numbers = #tpu.dot_dimension_numbers<[1], [0], [0], [1], [0, 0, 1, 1], [], []>} : vector<128x256xbf16>, vector<256x64xbf16>, vector<128x64xf32> -> vector<128x64xf32>
    %363 = vector.extract_strided_slice %210 {offsets = [4, 0], sizes = [1, 64], strides = [1, 1]} : vector<9x64xf32> to vector<1x64xf32>
    %364 = vector.broadcast %363 : vector<1x64xf32> to vector<128x64xf32>
    %365 = arith.addf %362, %364 : vector<128x64xf32>
    %366 = arith.addf %348, %365 : vector<128x64xf32>
    %367 = vector.extract_strided_slice %210 {offsets = [7, 0], sizes = [1, 64], strides = [1, 1]} : vector<9x64xf32> to vector<1x64xf32>
    %368 = vector.extract_strided_slice %210 {offsets = [8, 0], sizes = [1, 64], strides = [1, 1]} : vector<9x64xf32> to vector<1x64xf32>
    %cst_138 = arith.constant dense<0.000000e+00> : vector<128xf32>
    %369 = vector.multi_reduction <add>, %366, %cst_138 [1] : vector<128x64xf32> to vector<128xf32>
    %370 = vector.shape_cast %369 : vector<128xf32> to vector<128x1xf32>
    %cst_139 = arith.constant 6.400000e+01 : f32
    %371 = vector.broadcast %cst_139 : f32 to vector<128x1xf32>
    %372 = arith.divf %370, %371 : vector<128x1xf32>
    %373 = vector.broadcast %372 : vector<128x1xf32> to vector<128x64xf32>
    %374 = arith.subf %366, %373 : vector<128x64xf32>
    %375 = arith.mulf %374, %374 : vector<128x64xf32>
    %cst_140 = arith.constant dense<0.000000e+00> : vector<128xf32>
    %376 = vector.multi_reduction <add>, %375, %cst_140 [1] : vector<128x64xf32> to vector<128xf32>
    %377 = vector.shape_cast %376 : vector<128xf32> to vector<128x1xf32>
    %cst_141 = arith.constant 6.400000e+01 : f32
    %378 = vector.broadcast %cst_141 : f32 to vector<128x1xf32>
    %379 = arith.divf %377, %378 : vector<128x1xf32>
    %cst_142 = arith.constant 9.99999974E-6 : f32
    %380 = vector.broadcast %cst_142 : f32 to vector<128x1xf32>
    %381 = arith.addf %379, %380 : vector<128x1xf32>
    %382 = math.rsqrt %381 : vector<128x1xf32>
    %383 = vector.broadcast %382 : vector<128x1xf32> to vector<128x64xf32>
    %384 = arith.mulf %374, %383 : vector<128x64xf32>
    %385 = vector.broadcast %367 : vector<1x64xf32> to vector<128x64xf32>
    %386 = arith.mulf %384, %385 : vector<128x64xf32>
    %387 = vector.broadcast %368 : vector<1x64xf32> to vector<128x64xf32>
    %388 = arith.addf %386, %387 : vector<128x64xf32>
    %c3_143 = arith.constant 3 : index
    %c0_144 = arith.constant 0 : index
    %c0_145 = arith.constant 0 : index
    %389 = vector.load %arg3[%c3_143, %c0_144, %c0_145] : memref<4x64x64xbf16, #tpu.memory_space<vmem>>, vector<1x64x64xbf16>
    %390 = vector.shape_cast %389 : vector<1x64x64xbf16> to vector<64x64xbf16>
    %391 = arith.truncf %388 : vector<128x64xf32> to vector<128x64xbf16>
    %cst_146 = arith.constant dense<0.000000e+00> : vector<128x64xf32>
    %392 = tpu.matmul %391, %390, %cst_146 {dimension_numbers = #tpu.dot_dimension_numbers<[1], [0], [0], [1], [0, 0, 1, 1], [], []>} : vector<128x64xbf16>, vector<64x64xbf16>, vector<128x64xf32> -> vector<128x64xf32>
    %c3_147 = arith.constant 3 : index
    %c0_148 = arith.constant 0 : index
    %c0_149 = arith.constant 0 : index
    %393 = vector.load %arg4[%c3_147, %c0_148, %c0_149] : memref<4x1x64xf32, #tpu.memory_space<vmem>>, vector<1x1x64xf32>
    %394 = vector.shape_cast %393 : vector<1x1x64xf32> to vector<1x64xf32>
    %395 = vector.broadcast %394 : vector<1x64xf32> to vector<128x64xf32>
    %396 = arith.addf %392, %395 : vector<128x64xf32>
    %c0_150 = arith.constant 0 : index
    %c0_151 = arith.constant 0 : index
    %397 = vector.load %arg12[%c0_150, %c0_151] : memref<128x64xf32, #tpu.memory_space<vmem>>, vector<128x64xf32>
    tpu.vector_store %arg12[%c0_150, %c0_151], %396 {strides = array<i32>} : memref<128x64xf32, #tpu.memory_space<vmem>>, vector<128x64xf32>,
    return
  }
  func.func @transform_0(%arg0: i32) -> (i32, i32) {
    %c0_i32 = arith.constant 0 : i32
    %c0_i32_0 = arith.constant 0 : i32
    return %arg0, %c0_i32 : i32, i32
  }
  func.func @transform_1(%arg0: i32) -> (i32, i32) {
    %c0_i32 = arith.constant 0 : i32
    %c0_i32_0 = arith.constant 0 : i32
    %c0_i32_1 = arith.constant 0 : i32
    return %c0_i32, %c0_i32_0 : i32, i32
  }
  func.func @transform_2(%arg0: i32) -> (i32, i32, i32) {
    %c0_i32 = arith.constant 0 : i32
    %c0_i32_0 = arith.constant 0 : i32
    %c0_i32_1 = arith.constant 0 : i32
    %c0_i32_2 = arith.constant 0 : i32
    return %c0_i32, %c0_i32_0, %c0_i32_1 : i32, i32, i32
  }
  func.func @transform_3(%arg0: i32) -> (i32, i32, i32) {
    %c0_i32 = arith.constant 0 : i32
    %c0_i32_0 = arith.constant 0 : i32
    %c0_i32_1 = arith.constant 0 : i32
    %c0_i32_2 = arith.constant 0 : i32
    return %c0_i32, %c0_i32_0, %c0_i32_1 : i32, i32, i32
  }
  func.func @transform_4(%arg0: i32) -> (i32, i32, i32) {
    %c0_i32 = arith.constant 0 : i32
    %c0_i32_0 = arith.constant 0 : i32
    %c0_i32_1 = arith.constant 0 : i32
    %c0_i32_2 = arith.constant 0 : i32
    return %c0_i32, %c0_i32_0, %c0_i32_1 : i32, i32, i32
  }
  func.func @transform_5(%arg0: i32) -> (i32, i32, i32) {
    %c0_i32 = arith.constant 0 : i32
    %c0_i32_0 = arith.constant 0 : i32
    %c0_i32_1 = arith.constant 0 : i32
    %c0_i32_2 = arith.constant 0 : i32
    return %c0_i32, %c0_i32_0, %c0_i32_1 : i32, i32, i32
  }
  func.func @transform_6(%arg0: i32) -> (i32, i32, i32) {
    %c0_i32 = arith.constant 0 : i32
    %c0_i32_0 = arith.constant 0 : i32
    %c0_i32_1 = arith.constant 0 : i32
    %c0_i32_2 = arith.constant 0 : i32
    return %c0_i32, %c0_i32_0, %c0_i32_1 : i32, i32, i32
  }
  func.func @transform_7(%arg0: i32) -> (i32, i32, i32) {
    %c0_i32 = arith.constant 0 : i32
    %c0_i32_0 = arith.constant 0 : i32
    %c0_i32_1 = arith.constant 0 : i32
    %c0_i32_2 = arith.constant 0 : i32
    return %c0_i32, %c0_i32_0, %c0_i32_1 : i32, i32, i32
  }
  func.func @transform_8(%arg0: i32) -> (i32, i32, i32) {
    %c0_i32 = arith.constant 0 : i32
    %c0_i32_0 = arith.constant 0 : i32
    %c0_i32_1 = arith.constant 0 : i32
    %c0_i32_2 = arith.constant 0 : i32
    return %c0_i32, %c0_i32_0, %c0_i32_1 : i32, i32, i32
  }
  func.func @transform_9(%arg0: i32) -> (i32, i32, i32) {
    %c0_i32 = arith.constant 0 : i32
    %c0_i32_0 = arith.constant 0 : i32
    %c0_i32_1 = arith.constant 0 : i32
    %c0_i32_2 = arith.constant 0 : i32
    return %c0_i32, %c0_i32_0, %c0_i32_1 : i32, i32, i32
  }
  func.func @transform_10(%arg0: i32) -> (i32, i32, i32) {
    %c0_i32 = arith.constant 0 : i32
    %c0_i32_0 = arith.constant 0 : i32
    %c0_i32_1 = arith.constant 0 : i32
    %c0_i32_2 = arith.constant 0 : i32
    return %c0_i32, %c0_i32_0, %c0_i32_1 : i32, i32, i32
  }
  func.func @transform_11(%arg0: i32) -> (i32, i32) {
    %c0_i32 = arith.constant 0 : i32
    %c0_i32_0 = arith.constant 0 : i32
    return %arg0, %c0_i32 : i32, i32
  }
}

</mosaic_0001>

<bundles_post_ra>
// kernel: transformer_forward.1
= control target key start
LH: loop header
LB: loop body
LE: loop exit
PB: predicated region body
PF: predicated region fallthrough
CT: control target
= control target key end

     0   :  { %vm115_vm0 = vcmask 523264   ;;  %s8031_s13 = smov 64   ;;  %s13275_s2 = inlined_call_operand.vmem [shape: bf16[4,64,64], index: 2, kind: input, shape index: {}]   ;;  %s13276_s3 = inlined_call_operand.vmem [shape: f32[4,1,64], index: 3, kind: input, shape index: {}]   ;;  %s13277_s0 = inlined_call_operand.vmem [shape: f32[128,64], index: 0, kind: input, shape index: {}]   ;;  %s13278_s10 = inlined_call_operand.vmem [shape: f32[2,9,64], index: 10, kind: input, shape index: {}]   ;;  %s13279_s5 = inlined_call_operand.vmem [shape: bf16[2,64,192], index: 5, kind: input, shape index: {}]   ;;  %s13280_s4 = inlined_call_operand.vmem [shape: f32[4,1,64], index: 4, kind: input, shape index: {}]   ;;  %s13281_s1 = inlined_call_operand.vmem [shape: f32[128,128], index: 1, kind: input, shape index: {}]   ;;  %s13282_s6 = inlined_call_operand.vmem [shape: bf16[2,64,64], index: 6, kind: input, shape index: {}]   ;;  %s13283_s7 = inlined_call_operand.vmem [shape: bf16[2,64,256], index: 7, kind: input, shape index: {}]   ;;  %s13284_s8 = inlined_call_operand.vmem [shape: bf16[2,256,64], index: 8, kind: input, shape index: {}]   ;;  %s13285_s9 = inlined_call_operand.vmem [shape: f32[2,1,256], index: 9, kind: input, shape index: {}]   ;;  %s13286_s11 = inlined_call_operand.vmem [shape: f32[128,64], index: 11, kind: output, shape index: {}]  }
   0x1   :  { %v7245_v0 = vld [vmem:[%s13275_s2 + $0x18] sm:$0xff]  ;;  %v7244_v1 = vld [vmem:[%s13275_s2 + $0x10] sm:$0xff]  ;;  %v7243_v2 = vld [vmem:[%s13275_s2 + $0x8] sm:$0xff] }
   0x2   :  { %144 = vmatpush.bf16.msra.mxu0 %v7245_v0  ;;  %7330 = vmatpush.bf16.msra.mxu2 %v7245_v0  ;;  %v7242_v3 = vld [vmem:[%s13275_s2] sm:$0xff]  ;;  %v40_v5 = vld [vmem:[%s13277_s0 + $0x8] sm:$0xff]  ;;  %v41_v10 = vld [vmem:[%s13277_s0 + $0x10] sm:$0xff] }
   0x3   :  { %v39_v4 = vld [vmem:[%s13277_s0] sm:$0xff]  ;;  %v48_v8 = vld [vmem:[%s13277_s0 + $0x48] sm:$0xff]  ;;  %v42_v11 = vld [vmem:[%s13277_s0 + $0x18] sm:$0xff] }
   0x4   :  { %v79_v6 = vpack.c.bf16 %v40_v5, %v39_v4  ;;  %v47_v7 = vld [vmem:[%s13277_s0 + $0x40] sm:$0xff]  ;;  %v80_v12 = vpack.c.bf16 %v42_v11, %v41_v10  ;;  %v49_v13 = vld [vmem:[%s13277_s0 + $0x50] sm:$0xff]  ;;  %v50_v14 = vld [vmem:[%s13277_s0 + $0x58] sm:$0xff] }
   0x5   :  { %v83_v9 = vpack.c.bf16 %v48_v8, %v47_v7  ;;  %v84_v15 = vpack.c.bf16 %v50_v14, %v49_v13  ;;  %v7249_v16 = vld [vmem:[%s13275_s2 + $0x38] sm:$0xff]  ;;  %v43_v17 = vld [vmem:[%s13277_s0 + $0x20] sm:$0xff]  ;;  %v44_v18 = vld [vmem:[%s13277_s0 + $0x28] sm:$0xff] }
   0x6   :  { %145 = vmatpush.bf16.msra.mxu0 %v7244_v1  ;;  %7331 = vmatpush.bf16.msra.mxu2 %v7244_v1  ;;  %v81_v19 = vpack.c.bf16 %v44_v18, %v43_v17  ;;  %v51_v20 = vld [vmem:[%s13277_s0 + $0x60] sm:$0xff]  ;;  %v52_v21 = vld [vmem:[%s13277_s0 + $0x68] sm:$0xff]  ;;  %v45_v23 = vld [vmem:[%s13277_s0 + $0x30] sm:$0xff] }
   0x7   :  { %263 = vmatpush.bf16.msra.mxu1 %v7249_v16  ;;  %7334 = vmatpush.bf16.msra.mxu3 %v7249_v16  ;;  %v85_v22 = vpack.c.bf16 %v52_v21, %v51_v20  ;;  %v46_v24 = vld [vmem:[%s13277_s0 + $0x38] sm:$0xff]  ;;  %v53_v26 = vld [vmem:[%s13277_s0 + $0x70] sm:$0xff]  ;;  %v7247_v30 = vld [vmem:[%s13275_s2 + $0x28] sm:$0xff] }
   0x8   :  { %v82_v25 = vpack.c.bf16 %v46_v24, %v45_v23  ;;  %v54_v27 = vld [vmem:[%s13277_s0 + $0x78] sm:$0xff]  ;;  %v7248_v29 = vld [vmem:[%s13275_s2 + $0x30] sm:$0xff]  ;;  %v7246_v31 = vld [vmem:[%s13275_s2 + $0x20] sm:$0xff] }
   0x9   :  { %v86_v28 = vpack.c.bf16 %v54_v27, %v53_v26  ;;  %v7340_v33 = vld [vmem:[%s13276_s3] ss:$0 sm:$0xff]  ;;  %v7252_v10 = vld [vmem:[%s13275_s2 + $0x50] sm:$0xff]  ;;  %v7251_v11 = vld [vmem:[%s13275_s2 + $0x48] sm:$0xff] }
   0xa   :  { %146 = vmatpush.bf16.msra.mxu0 %v7243_v2  ;;  %7332 = vmatpush.bf16.msra.mxu2 %v7243_v2  ;;  %v8247_v14 = vld [vmem:[%s13276_s3 + $0x1] ss:$0 sm:$0xff] }
   0xb   :  { %264 = vmatpush.bf16.msra.mxu1 %v7248_v29  ;;  %7335 = vmatpush.bf16.msra.mxu3 %v7248_v29 }
   0xe   :  { %147 = vmatpush.bf16.msra.mxu0 %v7242_v3  ;;  %7333 = vmatpush.bf16.msra.mxu2 %v7242_v3 }
   0xf   :  { %265 = vmatpush.bf16.msra.mxu1 %v7247_v30  ;;  %7336 = vmatpush.bf16.msra.mxu3 %v7247_v30 }
  0x11   :  { %6638 = vmatmul.msk.bf16.vlgmr.msra.gmra.mxu0 %vm115_vm0, %v79_v6  ;;  %6642 = vmatmul.msk.bf16.vlgmr.msra.gmra.mxu2 %vm115_vm0, %v83_v9  ;;  %v7253_v9 = vld [vmem:[%s13275_s2 + $0x58] sm:$0xff] }
  0x12   :  { %398 = vmatpush.bf16.msrb.mxu2 %v7253_v9 }
  0x13   :  { %266 = vmatpush.bf16.msra.mxu1 %v7246_v31  ;;  %7337 = vmatpush.bf16.msra.mxu3 %v7246_v31 }
  0x16   :  { %399 = vmatpush.bf16.msrb.mxu2 %v7252_v10 }
  0x1a   :  { %400 = vmatpush.bf16.msrb.mxu2 %v7251_v11 }
  0x21   :  { %6639 = vmatmul.msk.bf16.gmra.mxu0 %vm115_vm0, %v80_v12  ;;  %6643 = vmatmul.msk.bf16.gmra.mxu2 %vm115_vm0, %v84_v15  ;;  %v7250_v12 = vld [vmem:[%s13275_s2 + $0x40] sm:$0xff] }
  0x22   :  { %401 = vmatpush.bf16.msrb.mxu2 %v7250_v12 }
  0x31   :  { %6640 = vmatmul.msk.bf16.gmra.mxu0 %vm115_vm0, %v81_v19  ;;  %6644 = vmatmul.msk.bf16.gmra.mxu2 %vm115_vm0, %v85_v22 }
  0x41   :  { %6641 = vmatmul.msk.bf16.gmra.mxu0 %vm115_vm0, %v82_v25  ;;  %6645 = vmatmul.msk.bf16.gmra.mxu2 %vm115_vm0, %v86_v28 }
  0x8e   :  { %v149_v32 = vpop.f32.mrf.mxu0 }
  0x8f   :  { %v8176_v35 = vadd.f32 %v7340_v33, %v149_v32 }
  0x94   :  { %v169_v37 = vpop.f32.mrf.mxu2 }
  0x95   :  { %v8183_v40 = vadd.f32 %v7340_v33, %v169_v37 }
  0x96   :  { %v151_v34 = vpop.f32.mrf.mxu0 }
  0x97   :  { %v8178_v36 = vadd.f32 %v7340_v33, %v151_v34 }
  0x99   :  { %v198_v38 = vpack.c.bf16 %v8178_v36, %v8176_v35 }
  0x9b   :  { %6671 = vmatmul.msk.bf16.vlgmr.msra.gmra.mxu1 %vm115_vm0, %v198_v38 }
  0x9c   :  { %v171_v41 = vpop.f32.mrf.mxu2 }
  0x9d   :  { %v8185_v42 = vadd.f32 %v7340_v33, %v171_v41 }
  0x9e   :  { %v154_v39 = vpop.f32.mrf.mxu0 }
  0x9f   :  { %v202_v43 = vpack.c.bf16 %v8185_v42, %v8183_v40  ;;  %v8190_v45 = vadd.f32 %v7340_v33, %v154_v39 }
  0xa1   :  { %6675 = vmatmul.msk.bf16.vlgmr.msra.gmra.mxu3 %vm115_vm0, %v202_v43 }
  0xa4   :  { %v174_v47 = vpop.f32.mrf.mxu2 }
  0xa5   :  { %v8197_v50 = vadd.f32 %v7340_v33, %v174_v47 }
  0xa6   :  { %v156_v44 = vpop.f32.mrf.mxu0 }
  0xa7   :  { %v8192_v46 = vadd.f32 %v7340_v33, %v156_v44 }
  0xa9   :  { %v199_v48 = vpack.c.bf16 %v8192_v46, %v8190_v45 }
  0xab   :  { %6672 = vmatmul.msk.bf16.gmra.mxu1 %vm115_vm0, %v199_v48 }
  0xac   :  { %v176_v51 = vpop.f32.mrf.mxu2 }
  0xad   :  { %v8199_v52 = vadd.f32 %v7340_v33, %v176_v51 }
  0xae   :  { %v159_v49 = vpop.f32.mrf.mxu0 }
  0xaf   :  { %v203_v53 = vpack.c.bf16 %v8199_v52, %v8197_v50  ;;  %v8204_v55 = vadd.f32 %v7340_v33, %v159_v49 }
  0xb1   :  { %6676 = vmatmul.msk.bf16.gmra.mxu3 %vm115_vm0, %v203_v53 }
  0xb4   :  { %v179_v57 = vpop.f32.mrf.mxu2 }
  0xb5   :  { %v8211_v60 = vadd.f32 %v7340_v33, %v179_v57 }
  0xb6   :  { %v161_v54 = vpop.f32.mrf.mxu0 }
  0xb7   :  { %v8206_v56 = vadd.f32 %v7340_v33, %v161_v54 }
  0xb9   :  { %v200_v58 = vpack.c.bf16 %v8206_v56, %v8204_v55 }
  0xbb   :  { %6673 = vmatmul.msk.bf16.gmra.mxu1 %vm115_vm0, %v200_v58 }
  0xbc   :  { %v181_v61 = vpop.f32.mrf.mxu2 }
  0xbd   :  { %v8213_v62 = vadd.f32 %v7340_v33, %v181_v61 }
  0xbe   :  { %v164_v59 = vpop.f32.mrf.mxu0 }
  0xbf   :  { %v204_v63 = vpack.c.bf16 %v8213_v62, %v8211_v60  ;;  %v8218_v1 = vadd.f32 %v7340_v33, %v164_v59 }
  0xc1   :  { %6677 = vmatmul.msk.bf16.gmra.mxu3 %vm115_vm0, %v204_v63 }
  0xc4   :  { %v184_v3 = vpop.f32.mrf.mxu2 }
  0xc5   :  { %v8225_v5 = vadd.f32 %v7340_v33, %v184_v3 }
  0xc6   :  { %v166_v0 = vpop.f32.mrf.mxu0 }
  0xc7   :  { %v8220_v2 = vadd.f32 %v7340_v33, %v166_v0 }
  0xc9   :  { %v201_v4 = vpack.c.bf16 %v8220_v2, %v8218_v1 }
  0xcb   :  { %6674 = vmatmul.msk.bf16.gmra.mxu1 %vm115_vm0, %v201_v4 }
  0xcc   :  { %v186_v6 = vpop.f32.mrf.mxu2 }
  0xcd   :  { %v8227_v7 = vadd.f32 %v7340_v33, %v186_v6 }
  0xcf   :  { %v205_v8 = vpack.c.bf16 %v8227_v7, %v8225_v5 }
  0xd1   :  { %6678 = vmatmul.msk.bf16.gmra.mxu3 %vm115_vm0, %v205_v8 }
 0x118   :  { %v268_v13 = vpop.f32.mrf.mxu1 }
 0x119   :  { %v269_v15 = vadd.f32 %v8247_v14, %v268_v13 }
 0x11b   :  { %v308_v18 = vmax.f32 %v269_v15, 0.0 }
 0x120   :  { %v270_v16 = vpop.f32.mrf.mxu1 }
 0x121   :  { %v271_v17 = vadd.f32 %v8247_v14, %v270_v16 }
 0x123   :  { %v309_v19 = vmax.f32 %v271_v17, 0.0  ;;  %v6738_v17 = vld [vmem:[%s13279_s5 + $0x30] sm:$0xf] }
 0x124   :  { %v288_v34 = vpop.f32.mrf.mxu3 }
 0x125   :  { %v333_v20 = vpack.c.bf16 %v309_v19, %v308_v18  ;;  %v289_v53 = vadd.f32 %v8247_v14, %v288_v34  ;;  %v7261_v18 = vld [vmem:[%s13279_s5 + $0x34] sm:$0xf0]  ;;  %v7260_v19 = vld [vmem:[%s13279_s5 + $0x34] sm:$0xf] }
 0x126   :  { %v7256_v34 = vld [vmem:[%s13279_s5 + $0x14] sm:$0xf] }
 0x127   :  { %6704 = vmatmul.msk.bf16.vlgmr.msrb.gmra.mxu2 %vm115_vm0, %v333_v20  ;;  %v316_v57 = vmax.f32 %v289_v53, 0.0  ;;  %v6739_v20 = vor.u32 %v7261_v18, %v6738_v17 }
 0x128   :  { %v273_v21 = vpop.f32.mrf.mxu1 }
 0x129   :  { %v274_v22 = vadd.f32 %v8247_v14, %v273_v21  ;;  %v6740_v21 = vld [vmem:[%s13279_s5 + $0x38] sm:$0xf0]  ;;  %545 = vmatpush.bf16.msrb.mxu3 %v6739_v20 }
 0x12b   :  { %v310_v25 = vmax.f32 %v274_v22, 0.0  ;;  %v6743_v22 = vor.u32 %v7260_v19, %v6740_v21 }
 0x12c   :  { %v290_v39 = vpop.f32.mrf.mxu3 }
 0x12d   :  { %v291_v54 = vadd.f32 %v8247_v14, %v290_v39  ;;  %594 = vmatpush.bf16.msrb.mxu0 %v6743_v22 }
 0x12f   :  { %v317_v58 = vmax.f32 %v291_v54, 0.0  ;;  %v8324_v54 = vld [vmem:[%s13278_s10] sm:$0xff] }
 0x130   :  { %v275_v23 = vpop.f32.mrf.mxu1 }
 0x131   :  { %v276_v24 = vadd.f32 %v8247_v14, %v275_v23  ;;  %v337_v61 = vpack.c.bf16 %v317_v58, %v316_v57  ;;  %v656_v57 = vperm.slane %v8324_v54, 1 }
 0x133   :  { %v311_v26 = vmax.f32 %v276_v24, 0.0  ;;  %v6730_v24 = vld [vmem:[%s13279_s5 + $0x20] sm:$0xf]  ;;  %658 = vrot.lane.b32.xlu0 %v656_v57, %s8031_s13 }
 0x134   :  { %v293_v51 = vpop.f32.mrf.mxu3 }
 0x135   :  { %v334_v27 = vpack.c.bf16 %v311_v26, %v310_v25  ;;  %v294_v0 = vadd.f32 %v8247_v14, %v293_v51  ;;  %v7259_v25 = vld [vmem:[%s13279_s5 + $0x24] sm:$0xf0]  ;;  %v7258_v26 = vld [vmem:[%s13279_s5 + $0x24] sm:$0xf] }
 0x137   :  { %6705 = vmatmul.msk.bf16.gmra.mxu2 %vm115_vm0, %v334_v27  ;;  %v318_v4 = vmax.f32 %v294_v0, 0.0  ;;  %v6731_v27 = vor.u32 %v7259_v25, %v6730_v24 }
 0x138   :  { %v278_v28 = vpop.f32.mrf.mxu1 }
 0x139   :  { %v279_v29 = vadd.f32 %v8247_v14, %v278_v28  ;;  %v6732_v28 = vld [vmem:[%s13279_s5 + $0x28] sm:$0xf0]  ;;  %546 = vmatpush.bf16.msrb.mxu3 %v6731_v27 }
 0x13b   :  { %v312_v32 = vmax.f32 %v279_v29, 0.0 }
 0x13c   :  { %v295_v59 = vpop.f32.mrf.mxu3 }
 0x13d   :  { %v296_v3 = vadd.f32 %v8247_v14, %v295_v59  ;;  %v8331_v59 = vld [vmem:[%s13276_s3 + $0x2] ss:$0 sm:$0xff] }
 0x13f   :  { %v319_v6 = vmax.f32 %v296_v3, 0.0 }
 0x140   :  { %v280_v30 = vpop.f32.mrf.mxu1 }
 0x141   :  { %v281_v31 = vadd.f32 %v8247_v14, %v280_v30  ;;  %v338_v8 = vpack.c.bf16 %v319_v6, %v318_v4 }
 0x143   :  { %v313_v33 = vmax.f32 %v281_v31, 0.0  ;;  %v6735_v31 = vor.u32 %v7258_v26, %v6732_v28 }
 0x144   :  { %v298_v63 = vpop.f32.mrf.mxu3 }
 0x145   :  { %v335_v37 = vpack.c.bf16 %v313_v33, %v312_v32  ;;  %v299_v10 = vadd.f32 %v8247_v14, %v298_v63  ;;  %595 = vmatpush.bf16.msrb.mxu0 %v6735_v31  ;;  %v6722_v32 = vld [vmem:[%s13279_s5 + $0x10] sm:$0xf]  ;;  %v7257_v33 = vld [vmem:[%s13279_s5 + $0x14] sm:$0xf0] }
 0x147   :  { %6706 = vmatmul.msk.bf16.gmra.mxu2 %vm115_vm0, %v335_v37  ;;  %v320_v13 = vmax.f32 %v299_v10, 0.0  ;;  %v6723_v37 = vor.u32 %v7257_v33, %v6722_v32 }
 0x148   :  { %v283_v38 = vpop.f32.mrf.mxu1 }
 0x149   :  { %v284_v41 = vadd.f32 %v8247_v14, %v283_v38  ;;  %547 = vmatpush.bf16.msrb.mxu3 %v6723_v37 }
 0x14b   :  { %v314_v47 = vmax.f32 %v284_v41, 0.0 }
 0x14c   :  { %v300_v9 = vpop.f32.mrf.mxu3 }
 0x14d   :  { %v301_v11 = vadd.f32 %v8247_v14, %v300_v9 }
 0x14f   :  { %v321_v15 = vmax.f32 %v301_v11, 0.0 }
 0x150   :  { %v285_v43 = vpop.f32.mrf.mxu1 }
 0x151   :  { %v286_v44 = vadd.f32 %v8247_v14, %v285_v43  ;;  %v339_v16 = vpack.c.bf16 %v321_v15, %v320_v13  ;;  %v6714_v43 = vld [vmem:[%s13279_s5] sm:$0xf] }
 0x153   :  { %v315_v48 = vmax.f32 %v286_v44, 0.0  ;;  %v7255_v44 = vld [vmem:[%s13279_s5 + $0x4] sm:$0xf0] }
 0x154   :  { %v303_v12 = vpop.f32.mrf.mxu3 }
 0x155   :  { %v336_v49 = vpack.c.bf16 %v315_v48, %v314_v47  ;;  %v304_v29 = vadd.f32 %v8247_v14, %v303_v12  ;;  %v7254_v47 = vld [vmem:[%s13279_s5 + $0x4] sm:$0xf]  ;;  %v6715_v48 = vor.u32 %v7255_v44, %v6714_v43 }
 0x157   :  { %6707 = vmatmul.msk.bf16.gmra.mxu2 %vm115_vm0, %v336_v49  ;;  %v322_v38 = vmax.f32 %v304_v29, 0.0  ;;  %v6716_v49 = vld [vmem:[%s13279_s5 + $0x8] sm:$0xf0]  ;;  %548 = vmatpush.bf16.msrb.mxu3 %v6715_v48 }
 0x158   :  { %v6719_v53 = vor.u32 %v7254_v47, %v6716_v49 }
 0x15c   :  { %v305_v23 = vpop.f32.mrf.mxu3 }
 0x15d   :  { %v306_v30 = vadd.f32 %v8247_v14, %v305_v23  ;;  %v6724_v14 = vld [vmem:[%s13279_s5 + $0x18] sm:$0xf0] }
 0x15e   :  { %v6727_v41 = vor.u32 %v7256_v34, %v6724_v14 }
 0x15f   :  { %v323_v39 = vmax.f32 %v306_v30, 0.0 }
 0x160   :  { %596 = vmatpush.bf16.msrb.mxu0 %v6727_v41 }
 0x161   :  { %v340_v51 = vpack.c.bf16 %v323_v39, %v322_v38 }
 0x164   :  { %597 = vmatpush.bf16.msrb.mxu0 %v6719_v53 }
 0x167   :  { %6708 = vmatmul.msk.bf16.gmra.mxu2 %vm115_vm0, %v337_v61 }
 0x177   :  { %6709 = vmatmul.msk.bf16.gmra.mxu2 %vm115_vm0, %v338_v8 }
 0x187   :  { %6710 = vmatmul.msk.bf16.gmra.mxu2 %vm115_vm0, %v339_v16 }
 0x197   :  { %6711 = vmatmul.msk.bf16.gmra.mxu2 %vm115_vm0, %v340_v51  ;;  %v8430_v51 = vperm.slane %v8324_v54, 2 }
 0x1aa   :  { %v403_v58 = vpop.f32.mrf.mxu2 }
 0x1ab   :  { %v404_v61 = vadd.f32 %v8331_v59, %v403_v58  ;;  %v8443_v58 = vperm.slane %v8324_v54, 0 }
 0x1ad   :  { %v8336_v3 = vadd.f32 %v404_v61, %v8176_v35 }
 0x1af   :  { %13413 = vst [vmem:[#allocation2_spill] sm:$0xff] %v8336_v3 }
 0x1b2   :  { %v405_v63 = vpop.f32.mrf.mxu2 }
 0x1b3   :  { %v406_v0 = vadd.f32 %v8331_v59, %v405_v63 }
 0x1b5   :  { %v8339_v4 = vadd.f32 %v406_v0, %v8178_v36 }
 0x1b7   :  { %13414 = vst [vmem:[#allocation3_spill] sm:$0xff] %v8339_v4  ;;  %v469_v6 = vpack.c.bf16 %v8339_v4, %v8336_v3 }
 0x1b9   :  { %6744 = vmatmul.msk.bf16.vlgmr.msrb.gmra.mxu3 %vm115_vm0, %v469_v6  ;;  %6752 = vmatmul.msk.bf16.vlgmr.msrb.gmra.mxu0 %vm115_vm0, %v469_v6 }
 0x1ba   :  { %v408_v8 = vpop.f32.mrf.mxu2 }
 0x1bb   :  { %v409_v9 = vadd.f32 %v8331_v59, %v408_v8  ;;  %v8467_v8 = vld [vmem:[%s13280_s4 + $0x3] ss:$0 sm:$0xff] }
 0x1bd   :  { %v8348_v12 = vadd.f32 %v409_v9, %v8190_v45 }
 0x1bf   :  { %13415 = vst [vmem:[#allocation4_spill] sm:$0xff] %v8348_v12 }
 0x1c2   :  { %v410_v10 = vpop.f32.mrf.mxu2 }
 0x1c3   :  { %v411_v11 = vadd.f32 %v8331_v59, %v410_v10 }
 0x1c5   :  { %v8351_v35 = vadd.f32 %v411_v11, %v8192_v46 }
 0x1c7   :  { %13416 = vst [vmem:[#allocation5_spill] sm:$0xff] %v8351_v35  ;;  %v470_v36 = vpack.c.bf16 %v8351_v35, %v8348_v12 }
 0x1c9   :  { %6745 = vmatmul.msk.bf16.gmra.mxu3 %vm115_vm0, %v470_v36  ;;  %6753 = vmatmul.msk.bf16.gmra.mxu0 %vm115_vm0, %v470_v36 }
 0x1ca   :  { %v413_v13 = vpop.f32.mrf.mxu2 }
 0x1cb   :  { %v414_v15 = vadd.f32 %v8331_v59, %v413_v13 }
 0x1cd   :  { %v8360_v18 = vadd.f32 %v414_v15, %v8204_v55 }
 0x1cf   :  { %13417 = vst [vmem:[#allocation6_spill] sm:$0xff] %v8360_v18 }
 0x1d2   :  { %v415_v16 = vpop.f32.mrf.mxu2 }
 0x1d3   :  { %v416_v17 = vadd.f32 %v8331_v59, %v415_v16 }
 0x1d5   :  { %v8363_v45 = vadd.f32 %v416_v17, %v8206_v56 }
 0x1d7   :  { %13418 = vst [vmem:[#allocation7_spill] sm:$0xff] %v8363_v45  ;;  %v471_v46 = vpack.c.bf16 %v8363_v45, %v8360_v18 }
 0x1d9   :  { %6746 = vmatmul.msk.bf16.gmra.mxu3 %vm115_vm0, %v471_v46  ;;  %6754 = vmatmul.msk.bf16.gmra.mxu0 %vm115_vm0, %v471_v46 }
 0x1da   :  { %v418_v19 = vpop.f32.mrf.mxu2 }
 0x1db   :  { %v419_v20 = vadd.f32 %v8331_v59, %v418_v19 }
 0x1dd   :  { %v8372_v23 = vadd.f32 %v419_v20, %v8218_v1 }
 0x1df   :  { %13419 = vst [vmem:[#allocation8_spill] sm:$0xff] %v8372_v23 }
 0x1e2   :  { %v420_v21 = vpop.f32.mrf.mxu2 }
 0x1e3   :  { %v421_v22 = vadd.f32 %v8331_v59, %v420_v21 }
 0x1e5   :  { %v8375_v55 = vadd.f32 %v421_v22, %v8220_v2 }
 0x1e7   :  { %13420 = vst [vmem:[#allocation9_spill] sm:$0xff] %v8375_v55  ;;  %v472_v56 = vpack.c.bf16 %v8375_v55, %v8372_v23 }
 0x1e9   :  { %6747 = vmatmul.msk.bf16.gmra.mxu3 %vm115_vm0, %v472_v56  ;;  %6755 = vmatmul.msk.bf16.gmra.mxu0 %vm115_vm0, %v472_v56 }
 0x1ea   :  { %v423_v24 = vpop.f32.mrf.mxu2 }
 0x1eb   :  { %v424_v25 = vadd.f32 %v8331_v59, %v423_v24 }
 0x1ed   :  { %v8384_v28 = vadd.f32 %v424_v25, %v8183_v40 }
 0x1ef   :  { %13421 = vst [vmem:[#allocation10_spill] sm:$0xff] %v8384_v28 }
 0x1f2   :  { %v425_v26 = vpop.f32.mrf.mxu2 }
 0x1f3   :  { %v426_v27 = vadd.f32 %v8331_v59, %v425_v26 }
 0x1f5   :  { %v8387_v1 = vadd.f32 %v426_v27, %v8185_v42 }
 0x1f7   :  { %13422 = vst [vmem:[#allocation11_spill] sm:$0xff] %v8387_v1  ;;  %v473_v2 = vpack.c.bf16 %v8387_v1, %v8384_v28  ;;  %v8647_v1 = vpop.permute.xlu0 %658 }
 0x1f9   :  { %6748 = vmatmul.msk.bf16.gmra.mxu3 %vm115_vm0, %v473_v2  ;;  %6756 = vmatmul.msk.bf16.gmra.mxu0 %vm115_vm0, %v473_v2 }
 0x1fa   :  { %v428_v29 = vpop.f32.mrf.mxu2 }
 0x1fb   :  { %v429_v30 = vadd.f32 %v8331_v59, %v428_v29 }
 0x1fd   :  { %v8396_v33 = vadd.f32 %v429_v30, %v8197_v50 }
 0x1ff   :  { %13423 = vst [vmem:[#allocation12_spill] sm:$0xff] %v8396_v33 }
 0x202   :  { %v430_v31 = vpop.f32.mrf.mxu2 }
 0x203   :  { %v431_v32 = vadd.f32 %v8331_v59, %v430_v31 }
 0x205   :  { %v8399_v40 = vadd.f32 %v431_v32, %v8199_v52 }
 0x207   :  { %13424 = vst [vmem:[#allocation13_spill] sm:$0xff] %v8399_v40  ;;  %v474_v42 = vpack.c.bf16 %v8399_v40, %v8396_v33 }
 0x209   :  { %6749 = vmatmul.msk.bf16.gmra.mxu3 %vm115_vm0, %v474_v42  ;;  %6757 = vmatmul.msk.bf16.gmra.mxu0 %vm115_vm0, %v474_v42 }
 0x20a   :  { %v433_v34 = vpop.f32.mrf.mxu2 }
 0x20b   :  { %v434_v37 = vadd.f32 %v8331_v59, %v433_v34 }
 0x20d   :  { %v8408_v39 = vadd.f32 %v434_v37, %v8211_v60 }
 0x20f   :  { %13425 = vst [vmem:[#allocation14_spill] sm:$0xff] %v8408_v39 }
 0x212   :  { %v435_v14 = vpop.f32.mrf.mxu2 }
 0x213   :  { %v436_v38 = vadd.f32 %v8331_v59, %v435_v14 }
 0x215   :  { %v8411_v50 = vadd.f32 %v436_v38, %v8213_v62 }
 0x217   :  { %13426 = vst [vmem:[#allocation15_spill] sm:$0xff] %v8411_v50  ;;  %v475_v52 = vpack.c.bf16 %v8411_v50, %v8408_v39 }
 0x219   :  { %6750 = vmatmul.msk.bf16.gmra.mxu3 %vm115_vm0, %v475_v52  ;;  %6758 = vmatmul.msk.bf16.gmra.mxu0 %vm115_vm0, %v475_v52 }
 0x21a   :  { %v438_v41 = vpop.f32.mrf.mxu2 }
 0x21b   :  { %v439_v43 = vadd.f32 %v8331_v59, %v438_v41 }
 0x21d   :  { %v8420_v48 = vadd.f32 %v439_v43, %v8225_v5  ;;  %v8440_v5 = vld [vmem:[%s13280_s4 + $0x2] ss:$0 sm:$0xff] }
 0x21f   :  { %13427 = vst [vmem:[#allocation16_spill] sm:$0xff] %v8420_v48 }
 0x222   :  { %v440_v44 = vpop.f32.mrf.mxu2 }
 0x223   :  { %v441_v47 = vadd.f32 %v8331_v59, %v440_v44 }
 0x225   :  { %v8423_v60 = vadd.f32 %v441_v47, %v8227_v7 }
 0x227   :  { %13428 = vst [vmem:[#allocation17_spill] sm:$0xff] %v8423_v60  ;;  %v476_v62 = vpack.c.bf16 %v8423_v60, %v8420_v48 }
 0x229   :  { %6751 = vmatmul.msk.bf16.gmra.mxu3 %vm115_vm0, %v476_v62  ;;  %6759 = vmatmul.msk.bf16.gmra.mxu0 %vm115_vm0, %v476_v62 }
 0x236   :  { %v599_v49 = vpop.f32.mrf.mxu0 }
 0x237   :  { %v8435_v57 = vadd.f32 %v8430_v51, %v599_v49 }
 0x239   :  { %v8450_v61 = vmul.f32 %v8440_v5, %v8435_v57 }
 0x23c   :  { %v8432_v53 = vpop.f32.mrf.mxu3 }
 0x23d   :  { %v8458_v0 = vadd.f32 %v8443_v58, %v8432_v53 }
 0x23e   :  { %v601_v7 = vpop.f32.mrf.mxu0 }
 0x23f   :  { %v8446_v59 = vadd.f32 %v8430_v51, %v601_v7  ;;  %v8475_v11 = vmul.f32 %v8440_v5, %v8458_v0  ;;  %v8479_v36 = vmul.f32 %v8467_v8, %v8458_v0 }
 0x241   :  { %v8454_v63 = vmul.f32 %v8440_v5, %v8446_v59  ;;  %13429 = vst [vmem:[#allocation18_spill] sm:$0xff] %v8475_v11 }
 0x242   :  { %13430 = vst [vmem:[#allocation19_spill] sm:$0xff] %v8479_v36 }
 0x244   :  { %v8462_v54 = vpop.f32.mrf.mxu3 }
 0x245   :  { %v8471_v9 = vadd.f32 %v8443_v58, %v8462_v54 }
 0x246   :  { %v604_v10 = vpop.f32.mrf.mxu0 }
 0x247   :  { %v8483_v13 = vmul.f32 %v8440_v5, %v8471_v9  ;;  %v8487_v15 = vmul.f32 %v8467_v8, %v8471_v9  ;;  %v8496_v19 = vadd.f32 %v8430_v51, %v604_v10 }
 0x249   :  { %13431 = vst [vmem:[#allocation20_spill] sm:$0xff] %v8483_v13  ;;  %v8503_v22 = vmul.f32 %v8440_v5, %v8496_v19 }
 0x24a   :  { %13432 = vst [vmem:[#allocation21_spill] sm:$0xff] %v8487_v15 }
 0x24c   :  { %v8493_v46 = vpop.f32.mrf.mxu3 }
 0x24d   :  { %v8513_v25 = vadd.f32 %v8443_v58, %v8493_v46 }
 0x24e   :  { %v606_v20 = vpop.f32.mrf.mxu0 }
 0x24f   :  { %v8499_v21 = vadd.f32 %v8430_v51, %v606_v20  ;;  %v8523_v29 = vmul.f32 %v8440_v5, %v8513_v25  ;;  %v8531_v31 = vmul.f32 %v8467_v8, %v8513_v25 }
 0x251   :  { %v8507_v56 = vmul.f32 %v8440_v5, %v8499_v21  ;;  %13433 = vst [vmem:[#allocation22_spill] sm:$0xff] %v8523_v29 }
 0x252   :  { %13435 = vst [vmem:[#allocation24_spill] sm:$0xff] %v8531_v31 }
 0x254   :  { %v8515_v26 = vpop.f32.mrf.mxu3 }
 0x255   :  { %v8519_v27 = vadd.f32 %v8443_v58, %v8515_v26 }
 0x256   :  { %v609_v2 = vpop.f32.mrf.mxu0 }
 0x257   :  { %v8527_v30 = vmul.f32 %v8440_v5, %v8519_v27  ;;  %v8535_v32 = vmul.f32 %v8467_v8, %v8519_v27  ;;  %v8544_v14 = vadd.f32 %v8430_v51, %v609_v2 }
 0x259   :  { %13434 = vst [vmem:[#allocation23_spill] sm:$0xff] %v8527_v30  ;;  %v8551_v41 = vmul.f32 %v8440_v5, %v8544_v14 }
 0x25a   :  { %13436 = vst [vmem:[#allocation25_spill] sm:$0xff] %v8535_v32 }
 0x25c   :  { %v8541_v37 = vpop.f32.mrf.mxu3 }
 0x25d   :  { %v8561_v47 = vadd.f32 %v8443_v58, %v8541_v37 }
 0x25e   :  { %v611_v38 = vpop.f32.mrf.mxu0 }
 0x25f   :  { %v8547_v52 = vadd.f32 %v8430_v51, %v611_v38  ;;  %13437 = vst [vmem:[#allocation26_spill] sm:$0xff] %v8561_v47  ;;  %v8571_v10 = vmul.f32 %v8440_v5, %v8561_v47  ;;  %v8579_v2 = vmul.f32 %v8467_v8, %v8561_v47 }
 0x261   :  { %v8555_v43 = vmul.f32 %v8440_v5, %v8547_v52  ;;  %13439 = vst [vmem:[#allocation28_spill] sm:$0xff] %v8571_v10 }
 0x262   :  { %13441 = vst [vmem:[#allocation30_spill] sm:$0xff] %v8579_v2 }
 0x264   :  { %v8563_v62 = vpop.f32.mrf.mxu3 }
 0x265   :  { %v8567_v49 = vadd.f32 %v8443_v58, %v8563_v62 }
 0x266   :  { %v614_v7 = vpop.f32.mrf.mxu0 }
 0x267   :  { %13438 = vst [vmem:[#allocation27_spill] sm:$0xff] %v8567_v49  ;;  %v8575_v20 = vmul.f32 %v8440_v5, %v8567_v49  ;;  %v8583_v38 = vmul.f32 %v8467_v8, %v8567_v49  ;;  %v8590_v16 = vadd.f32 %v8430_v51, %v614_v7 }
 0x269   :  { %13440 = vst [vmem:[#allocation29_spill] sm:$0xff] %v8575_v20  ;;  %v8597_v44 = vmul.f32 %v8440_v5, %v8590_v16 }
 0x26a   :  { %13442 = vst [vmem:[#allocation31_spill] sm:$0xff] %v8583_v38 }
 0x26c   :  { %v565_v42 = vpop.f32.mrf.mxu3 }
 0x26d   :  { %v8606_v17 = vadd.f32 %v8443_v58, %v565_v42  ;;  %v667_v32 = vadd.f32 %v8647_v1, %v565_v42  ;;  %v662_v42 = vadd.f32 %v8647_v1, %v8462_v54 }
 0x26e   :  { %v616_v6 = vpop.f32.mrf.mxu0 }
 0x26f   :  { %v8593_v24 = vadd.f32 %v8430_v51, %v616_v6  ;;  %13443 = vst [vmem:[#allocation32_spill] sm:$0xff] %v8606_v17  ;;  %v8613_v50 = vmul.f32 %v8440_v5, %v8606_v17  ;;  %v8621_v40 = vmul.f32 %v8467_v8, %v8606_v17 }
 0x271   :  { %v8601_v60 = vmul.f32 %v8440_v5, %v8593_v24  ;;  %13445 = vst [vmem:[#allocation34_spill] sm:$0xff] %v8613_v50 }
 0x272   :  { %13447 = vst [vmem:[#allocation36_spill] sm:$0xff] %v8621_v40 }
 0x274   :  { %v567_v7 = vpop.f32.mrf.mxu3 }
 0x275   :  { %v8609_v48 = vadd.f32 %v8443_v58, %v567_v7 }
 0x276   :  { %v619_v6 = vpop.f32.mrf.mxu0 }
 0x277   :  { %13444 = vst [vmem:[#allocation33_spill] sm:$0xff] %v8609_v48  ;;  %v8617_v39 = vmul.f32 %v8440_v5, %v8609_v48  ;;  %v8625_v34 = vmul.f32 %v8467_v8, %v8609_v48  ;;  %v8632_v55 = vadd.f32 %v8430_v51, %v619_v6 }
 0x279   :  { %13446 = vst [vmem:[#allocation35_spill] sm:$0xff] %v8617_v39  ;;  %v8639_v18 = vmul.f32 %v8440_v5, %v8632_v55 }
 0x27a   :  { %13448 = vst [vmem:[#allocation37_spill] sm:$0xff] %v8625_v34 }
 0x27c   :  { %v570_v28 = vpop.f32.mrf.mxu3 }
 0x27d   :  { %v8650_v6 = vadd.f32 %v8443_v58, %v570_v28 }
 0x27e   :  { %v621_v23 = vpop.f32.mrf.mxu0 }
 0x27f   :  { %v8635_v45 = vadd.f32 %v8430_v51, %v621_v23  ;;  %13449 = vst [vmem:[#allocation38_spill] sm:$0xff] %v8650_v6  ;;  %v669_v23 = vadd.f32 %v8647_v1, %v570_v28  ;;  %v8659_v2 = vmul.f32 %v8440_v5, %v8650_v6  ;;  %v8667_v38 = vmul.f32 %v8467_v8, %v8650_v6 }
 0x281   :  { %v8643_v35 = vmul.f32 %v8440_v5, %v8635_v45  ;;  %13451 = vst [vmem:[#allocation40_spill] sm:$0xff] %v8659_v2 }
 0x282   :  { %13453 = vst [vmem:[#allocation42_spill] sm:$0xff] %v8667_v38 }
 0x284   :  { %v572_v12 = vpop.f32.mrf.mxu3 }
 0x285   :  { %v8654_v4 = vadd.f32 %v8443_v58, %v572_v12  ;;  %v670_v3 = vadd.f32 %v8647_v1, %v572_v12 }
 0x286   :  { %v624_v40 = vpop.f32.mrf.mxu0 }
 0x287   :  { %13450 = vst [vmem:[#allocation39_spill] sm:$0xff] %v8654_v4  ;;  %v698_v34 = vpack.c.bf16 %v670_v3, %v669_v23  ;;  %v8663_v33 = vmul.f32 %v8440_v5, %v8654_v4  ;;  %v8671_v28 = vmul.f32 %v8467_v8, %v8654_v4  ;;  %v668_v23 = vadd.f32 %v8647_v1, %v567_v7 }
 0x288   :  { %v8681_v36 = vadd.f32 %v8430_v51, %v624_v40 }
 0x289   :  { %13452 = vst [vmem:[#allocation41_spill] sm:$0xff] %v8663_v33  ;;  %746 = vrot.lane.b32.xlu2 %v698_v34, %s8031_s13  ;;  %v697_v39 = vpack.c.bf16 %v668_v23, %v667_v32 }
 0x28a   :  { %13454 = vst [vmem:[#allocation43_spill] sm:$0xff] %v8671_v28  ;;  %v8689_v34 = vmul.f32 %v8440_v5, %v8681_v36 }
 0x28c   :  { %v575_v31 = vpop.f32.mrf.mxu3 }
 0x28e   :  { %v626_v15 = vpop.f32.mrf.mxu0 }
 0x28f   :  { %v8684_v50 = vadd.f32 %v8430_v51, %v626_v15  ;;  %v8700_v15 = vadd.f32 %v8443_v58, %v575_v31 }
 0x291   :  { %744 = vrot.lane.b32.xlu2 %v697_v39, %s8031_s13  ;;  %v8693_v7 = vmul.f32 %v8440_v5, %v8684_v50  ;;  %13455 = vst [vmem:[#allocation44_spill] sm:$0xff] %v8700_v15  ;;  %v661_v39 = vadd.f32 %v8647_v1, %v8432_v53  ;;  %v8709_v38 = vmul.f32 %v8440_v5, %v8700_v15 }
 0x292   :  { %v8717_v40 = vmul.f32 %v8467_v8, %v8700_v15 }
 0x293   :  { %v694_v3 = vpack.c.bf16 %v662_v42, %v661_v39  ;;  %13457 = vst [vmem:[#allocation46_spill] sm:$0xff] %v8709_v38 }
 0x294   :  { %v577_v32 = vpop.f32.mrf.mxu3  ;;  %13459 = vst [vmem:[#allocation48_spill] sm:$0xff] %v8717_v40 }
 0x295   :  { %v8705_v23 = vadd.f32 %v8443_v58, %v577_v32 }
 0x296   :  { %v629_v12 = vpop.f32.mrf.mxu0 }
 0x297   :  { %13456 = vst [vmem:[#allocation45_spill] sm:$0xff] %v8705_v23  ;;  %v8713_v54 = vmul.f32 %v8440_v5, %v8705_v23  ;;  %v8721_v53 = vmul.f32 %v8467_v8, %v8705_v23  ;;  %v8729_v2 = vadd.f32 %v8430_v51, %v629_v12  ;;  %v664_v23 = vadd.f32 %v8647_v1, %v8515_v26 }
 0x299   :  { %13458 = vst [vmem:[#allocation47_spill] sm:$0xff] %v8713_v54  ;;  %738 = vrot.lane.b32.xlu2 %v694_v3, %s8031_s13  ;;  %v8736_v20 = vmul.f32 %v8440_v5, %v8729_v2 }
 0x29a   :  { %13460 = vst [vmem:[#allocation49_spill] sm:$0xff] %v8721_v53 }
 0x29c   :  { %v580_v28 = vpop.f32.mrf.mxu3 }
 0x29d   :  { %v8745_v39 = vadd.f32 %v8443_v58, %v580_v28  ;;  %v673_v40 = vadd.f32 %v8647_v1, %v580_v28 }
 0x29e   :  { %v631_v33 = vpop.f32.mrf.mxu0 }
 0x29f   :  { %v8732_v10 = vadd.f32 %v8430_v51, %v631_v33  ;;  %13461 = vst [vmem:[#allocation50_spill] sm:$0xff] %v8745_v39  ;;  %v8754_v29 = vmul.f32 %v8440_v5, %v8745_v39  ;;  %v8762_v30 = vmul.f32 %v8467_v8, %v8745_v39  ;;  %v671_v39 = vadd.f32 %v8647_v1, %v575_v31 }
 0x2a1   :  { %v8740_v3 = vmul.f32 %v8440_v5, %v8732_v10  ;;  %13463 = vst [vmem:[#allocation52_spill] sm:$0xff] %v8754_v29 }
 0x2a2   :  { %13465 = vst [vmem:[#allocation54_spill] sm:$0xff] %v8762_v30 }
 0x2a4   :  { %v582_v12 = vpop.f32.mrf.mxu3 }
 0x2a5   :  { %v8749_v33 = vadd.f32 %v8443_v58, %v582_v12  ;;  %v674_v53 = vadd.f32 %v8647_v1, %v582_v12  ;;  %v672_v12 = vadd.f32 %v8647_v1, %v577_v32 }
 0x2a6   :  { %v634_v38 = vpop.f32.mrf.mxu0 }
 0x2a7   :  { %13462 = vst [vmem:[#allocation51_spill] sm:$0xff] %v8749_v33  ;;  %v700_v54 = vpack.c.bf16 %v674_v53, %v673_v40  ;;  %v8758_v42 = vmul.f32 %v8440_v5, %v8749_v33  ;;  %v8766_v28 = vmul.f32 %v8467_v8, %v8749_v33  ;;  %v8775_v11 = vadd.f32 %v8430_v51, %v634_v38  ;;  %v8781_v33 = vld [vmem:[%s13280_s4 + $0x1] ss:$0 sm:$0xff] }
 0x2a8   :  { %v699_v32 = vpack.c.bf16 %v672_v12, %v671_v39  ;;  %v1285_v4 = vmul.f32 %v8781_v33, %v8729_v2 }
 0x2a9   :  { %13464 = vst [vmem:[#allocation53_spill] sm:$0xff] %v8758_v42  ;;  %750 = vrot.lane.b32.xlu1 %v700_v54, %s8031_s13  ;;  %v8786_v54 = vld [vmem:[%s13280_s4] ss:$0 sm:$0xff]  ;;  %v1287_v31 = vmul.f32 %v8781_v33, %v8775_v11  ;;  %v8797_v30 = vmul.f32 %v8440_v5, %v8775_v11 }
 0x2aa   :  { %13466 = vst [vmem:[#allocation55_spill] sm:$0xff] %v8766_v28  ;;  %v1009_v38 = vmul.f32 %v8786_v54, %v8775_v11  ;;  %v1008_v12 = vmul.f32 %v8786_v54, %v8732_v10  ;;  %v1007_v17 = vmul.f32 %v8786_v54, %v8729_v2 }
 0x2ac   :  { %v585_v13 = vpop.f32.mrf.mxu3  ;;  %v1017_v15 = vpack.c.bf16 %v1008_v12, %v1007_v17  ;;  %v1005_v17 = vmul.f32 %v8786_v54, %v8681_v36  ;;  %v1004_v12 = vmul.f32 %v8786_v54, %v8635_v45 }
 0x2ad   :  { %v8813_v29 = vadd.f32 %v8443_v58, %v585_v13  ;;  %v675_v48 = vadd.f32 %v8647_v1, %v585_v13 }
 0x2ae   :  { %v636_v40 = vpop.f32.mrf.mxu0 }
 0x2af   :  { %v8789_v53 = vadd.f32 %v8430_v51, %v636_v40  ;;  %v1286_v40 = vmul.f32 %v8781_v33, %v8732_v10 }
 0x2b1   :  { %748 = vrot.lane.b32.xlu1 %v699_v32, %s8031_s13  ;;  %v1288_v28 = vmul.f32 %v8781_v33, %v8789_v53  ;;  %v1010_v51 = vmul.f32 %v8786_v54, %v8789_v53  ;;  %v8806_v39 = vmul.f32 %v8440_v5, %v8789_v53  ;;  %v1295_v26 = vpack.c.bf16 %v1286_v40, %v1285_v4 }
 0x2b2   :  { %v8844_v4 = vmul.f32 %v8467_v8, %v8813_v29 }
 0x2b3   :  { %v1296_v32 = vpack.c.bf16 %v1288_v28, %v1287_v31  ;;  %v1018_v42 = vpack.c.bf16 %v1010_v51, %v1009_v38  ;;  %v663_v38 = vadd.f32 %v8647_v1, %v8493_v46  ;;  %v1284_v31 = vmul.f32 %v8781_v33, %v8684_v50 }
 0x2b4   :  { %v587_v6 = vpop.f32.mrf.mxu3  ;;  %v1006_v51 = vmul.f32 %v8786_v54, %v8684_v50 }
 0x2b5   :  { %v8825_v47 = vadd.f32 %v8443_v58, %v587_v6  ;;  %v676_v28 = vadd.f32 %v8647_v1, %v587_v6  ;;  %1305 = vmatpush.bf16.msra.mxu3 %v1296_v32  ;;  %1354 = vmatpush.bf16.msra.mxu0 %v1018_v42  ;;  %v8836_v58 = vmul.f32 %v8440_v5, %v8813_v29 }
 0x2b6   :  { %v695_v6 = vpack.c.bf16 %v664_v23, %v663_v38  ;;  %v1016_v40 = vpack.c.bf16 %v1006_v51, %v1005_v17  ;;  %v666_v32 = vadd.f32 %v8647_v1, %v8563_v62  ;;  %v665_v38 = vadd.f32 %v8647_v1, %v8541_v37 }
 0x2b7   :  { %v701_v49 = vpack.c.bf16 %v676_v28, %v675_v48  ;;  %v8840_v13 = vmul.f32 %v8440_v5, %v8825_v47  ;;  %v8848_v46 = vmul.f32 %v8467_v8, %v8825_v47  ;;  %v1283_v48 = vmul.f32 %v8781_v33, %v8681_v36 }
 0x2b8   :  { %v1281_v28 = vmul.f32 %v8781_v33, %v8632_v55  ;;  %v1280_v51 = vmul.f32 %v8781_v33, %v8593_v24  ;;  %v696_v62 = vpack.c.bf16 %v666_v32, %v665_v38  ;;  %v1001_v17 = vmul.f32 %v8786_v54, %v8590_v16 }
 0x2b9   :  { %1306 = vmatpush.bf16.msra.mxu3 %v1295_v26  ;;  %1355 = vmatpush.bf16.msra.mxu0 %v1017_v15  ;;  %v1431_v5 = vpack.c.bf16 %v8840_v13, %v8836_v58  ;;  %v1294_v42 = vpack.c.bf16 %v1284_v31, %v1283_v48  ;;  %v1282_v15 = vmul.f32 %v8781_v33, %v8635_v45  ;;  %v9175_v58 = vld [vmem:[%s13281_s1 + $0x48] sm:$0xff] }
 0x2ba   :  { %740 = vrot.lane.b32.xlu1 %v695_v6, %s8031_s13  ;;  %752 = vrot.lane.b32.xlu0 %v701_v49, %s8031_s13  ;;  %v1003_v49 = vmul.f32 %v8786_v54, %v8632_v55  ;;  %v1002_v6 = vmul.f32 %v8786_v54, %v8593_v24  ;;  %v1279_v48 = vmul.f32 %v8781_v33, %v8590_v16 }
 0x2bb   :  { %v1293_v26 = vpack.c.bf16 %v1282_v15, %v1281_v28  ;;  %v1277_v15 = vmul.f32 %v8781_v33, %v8544_v14  ;;  %v998_v38 = vmul.f32 %v8786_v54, %v8499_v21 }
 0x2bc   :  { %v1015_v31 = vpack.c.bf16 %v1004_v12, %v1003_v49  ;;  %v1292_v1 = vpack.c.bf16 %v1280_v51, %v1279_v48  ;;  %v1014_v37 = vpack.c.bf16 %v1002_v6, %v1001_v17  ;;  %v999_v12 = vmul.f32 %v8786_v54, %v8544_v14 }
 0x2bd   :  { %1307 = vmatpush.bf16.msra.mxu3 %v1294_v42  ;;  %1356 = vmatpush.bf16.msra.mxu0 %v1016_v40  ;;  %v1278_v42 = vmul.f32 %v8781_v33, %v8547_v52  ;;  %v1000_v40 = vmul.f32 %v8786_v54, %v8547_v52  ;;  %v1276_v49 = vmul.f32 %v8781_v33, %v8499_v21 }
 0x2be   :  { %v996_v48 = vmul.f32 %v8786_v54, %v8446_v59  ;;  %v2007_v17 = vmul.f32 %v8467_v8, %v8789_v53  ;;  %v2004_v53 = vmul.f32 %v8467_v8, %v8729_v2  ;;  %v1999_v2 = vmul.f32 %v8467_v8, %v8593_v24 }
 0x2bf   :  { %v1291_v32 = vpack.c.bf16 %v1278_v42, %v1277_v15  ;;  %v1013_v28 = vpack.c.bf16 %v1000_v40, %v999_v12  ;;  %v2006_v42 = vmul.f32 %v8467_v8, %v8775_v11  ;;  %v2002_v11 = vmul.f32 %v8467_v8, %v8681_v36 }
 0x2c0   :  { %v1997_v36 = vmul.f32 %v8467_v8, %v8547_v52  ;;  %v1994_v24 = vmul.f32 %v8467_v8, %v8496_v19  ;;  %v1992_v52 = vmul.f32 %v8467_v8, %v8435_v57 }
 0x2c1   :  { %1308 = vmatpush.bf16.msra.mxu3 %v1293_v26  ;;  %1357 = vmatpush.bf16.msra.mxu0 %v1015_v31  ;;  %v1275_v26 = vmul.f32 %v8781_v33, %v8496_v19  ;;  %v997_v31 = vmul.f32 %v8786_v54, %v8496_v19  ;;  %v2015_v12 = vpack.c.bf16 %v2007_v17, %v2006_v42 }
 0x2c2   :  { %742 = vrot.lane.b32.xlu0 %v696_v62, %s8031_s13  ;;  %v1274_v62 = vmul.f32 %v8781_v33, %v8446_v59 }
 0x2c3   :  { %v1290_v51 = vpack.c.bf16 %v1276_v49, %v1275_v26  ;;  %v1012_v6 = vpack.c.bf16 %v998_v38, %v997_v31  ;;  %v2003_v49 = vmul.f32 %v8467_v8, %v8684_v50  ;;  %v2001_v26 = vmul.f32 %v8467_v8, %v8635_v45 }
 0x2c4   :  { %v1998_v50 = vmul.f32 %v8467_v8, %v8590_v16  ;;  %v1996_v45 = vmul.f32 %v8467_v8, %v8544_v14  ;;  %v1993_v16 = vmul.f32 %v8467_v8, %v8446_v59 }
 0x2c5   :  { %1309 = vmatpush.bf16.msra.mxu3 %v1292_v1  ;;  %1358 = vmatpush.bf16.msra.mxu0 %v1014_v37  ;;  %v1273_v1 = vmul.f32 %v8781_v33, %v8435_v57  ;;  %v995_v37 = vmul.f32 %v8786_v54, %v8435_v57  ;;  %v2013_v38 = vpack.c.bf16 %v2003_v49, %v2002_v11 }
 0x2c6   :  { %v1033_v49 = vmul.f32 %v8781_v33, %v8471_v9  ;;  %v707_v11 = vmul.f32 %v8786_v54, %v8471_v9  ;;  %v13469_v9 = vpack.c.bf16 %v8693_v7, %v8689_v34  ;;  %v1034_v34 = vmul.f32 %v8781_v33, %v8513_v25 }
 0x2c7   :  { %v1289_v40 = vpack.c.bf16 %v1274_v62, %v1273_v1  ;;  %v1011_v15 = vpack.c.bf16 %v996_v48, %v995_v37  ;;  %v2008_v48 = vpack.c.bf16 %v1993_v16, %v1992_v52  ;;  %v13479_v52 = vld [vmem:[#allocation39_spill] sm:$0xff] }
 0x2c9   :  { %1310 = vmatpush.bf16.msra.mxu3 %v1291_v32  ;;  %1359 = vmatpush.bf16.msra.mxu0 %v1013_v28  ;;  %v2005_v32 = vmul.f32 %v8467_v8, %v8732_v10  ;;  %v2000_v10 = vmul.f32 %v8467_v8, %v8632_v55  ;;  %v1995_v55 = vmul.f32 %v8467_v8, %v8499_v21 }
 0x2cb   :  { %v2014_v28 = vpack.c.bf16 %v2005_v32, %v2004_v53  ;;  %v2012_v31 = vpack.c.bf16 %v2001_v26, %v2000_v10  ;;  %v2009_v62 = vpack.c.bf16 %v1995_v55, %v1994_v24  ;;  %v1032_v26 = vmul.f32 %v8781_v33, %v8458_v0 }
 0x2cc   :  { %v706_v10 = vmul.f32 %v8786_v54, %v8458_v0  ;;  %v709_v0 = vmul.f32 %v8786_v54, %v8519_v27 }
 0x2cd   :  { %1311 = vmatpush.bf16.msra.mxu3 %v1290_v51  ;;  %1360 = vmatpush.bf16.msra.mxu0 %v1012_v6  ;;  %v2011_v51 = vpack.c.bf16 %v1999_v2, %v1998_v50  ;;  %v2010_v6 = vpack.c.bf16 %v1997_v36, %v1996_v45  ;;  %v13468_v50 = vpack.c.bf16 %v8740_v3, %v8736_v20 }
 0x2ce   :  { %v722_v2 = vpack.c.bf16 %v707_v11, %v706_v10  ;;  %v1035_v20 = vmul.f32 %v8781_v33, %v8519_v27  ;;  %v13471_v3 = vpack.c.bf16 %v8601_v60, %v8597_v44  ;;  %v13473_v60 = vpack.c.bf16 %v8507_v56, %v8503_v22  ;;  %v13484_v11 = vld [vmem:[#allocation50_spill] sm:$0xff] }
 0x2cf   :  { %v13474_v27 = vpack.c.bf16 %v8454_v63, %v8450_v61  ;;  %v13477_v61 = vld [vmem:[#allocation33_spill] sm:$0xff] }
 0x2d0   :  { %v713_v63 = vmul.f32 %v8786_v54, %v13477_v61  ;;  %v1039_v56 = vmul.f32 %v8781_v33, %v13477_v61 }
 0x2d1   :  { %1312 = vmatpush.bf16.msra.mxu3 %v1289_v40  ;;  %1361 = vmatpush.bf16.msra.mxu0 %v1011_v15 }
 0x2d5   :  { %2024 = vmatpush.bf16.msrb.mxu0 %v2015_v12 }
 0x2d9   :  { %2025 = vmatpush.bf16.msrb.mxu0 %v2014_v28 }
 0x2dd   :  { %2026 = vmatpush.bf16.msrb.mxu0 %v2013_v38  ;;  %v13467_v38 = vpack.c.bf16 %v8806_v39, %v8797_v30  ;;  %v13470_v30 = vpack.c.bf16 %v8643_v35, %v8639_v18  ;;  %v708_v39 = vmul.f32 %v8786_v54, %v8513_v25  ;;  %v1049_v35 = vpack.c.bf16 %v1035_v20, %v1034_v34  ;;  %v13475_v25 = vld [vmem:[#allocation27_spill] sm:$0xff] }
 0x2de   :  { %v13472_v18 = vpack.c.bf16 %v8555_v43, %v8551_v41  ;;  %v711_v44 = vmul.f32 %v8786_v54, %v13475_v25  ;;  %v1037_v41 = vmul.f32 %v8781_v33, %v13475_v25  ;;  %v13476_v43 = vld [vmem:[#allocation26_spill] sm:$0xff]  ;;  %v9072_v25 = vld [vmem:[%s13281_s1 + $0x10] sm:$0xff] }
 0x2df   :  { %v723_v7 = vpack.c.bf16 %v709_v0, %v708_v39  ;;  %v1036_v36 = vmul.f32 %v8781_v33, %v13476_v43  ;;  %v13486_v39 = vld [vmem:[#allocation18_spill] sm:$0xff] }
 0x2e1   :  { %2027 = vmatpush.bf16.msrb.mxu0 %v2012_v31  ;;  %v1048_v31 = vpack.c.bf16 %v1033_v49, %v1032_v26  ;;  %v1050_v22 = vpack.c.bf16 %v1037_v41, %v1036_v36  ;;  %v1044_v26 = vmul.f32 %v8781_v33, %v13484_v11 }
 0x2e3   :  { %v747_v57 = vpop.permute.xlu2 %746 }
 0x2e4   :  { %v791_v8 = vsel %vm115_vm0, %v747_v57, 0  ;;  %v13481_v57 = vld [vmem:[#allocation45_spill] sm:$0xff] }
 0x2e5   :  { %2028 = vmatpush.bf16.msrb.mxu0 %v2011_v51  ;;  %v710_v51 = vmul.f32 %v8786_v54, %v13476_v43 }
 0x2e7   :  { %v724_v45 = vpack.c.bf16 %v711_v44, %v710_v51  ;;  %v9078_v51 = vld [vmem:[%s13281_s1 + $0x18] sm:$0xff] }
 0x2e9   :  { %2029 = vmatpush.bf16.msrb.mxu0 %v2010_v6  ;;  %v13478_v6 = vld [vmem:[#allocation32_spill] sm:$0xff] }
 0x2ea   :  { %v712_v55 = vmul.f32 %v8786_v54, %v13478_v6  ;;  %v1038_v24 = vmul.f32 %v8781_v33, %v13478_v6 }
 0x2eb   :  { %v745_v37 = vpop.permute.xlu2 %744 }
 0x2ec   :  { %v788_v42 = vsel %vm115_vm0, %v745_v37, 0  ;;  %v1051_v16 = vpack.c.bf16 %v1039_v56, %v1038_v24  ;;  %v1043_v37 = vmul.f32 %v8781_v33, %v13481_v57 }
 0x2ed   :  { %2030 = vmatpush.bf16.msrb.mxu0 %v2009_v62  ;;  %v725_v62 = vpack.c.bf16 %v713_v63, %v712_v55  ;;  %v9091_v63 = vld [vmem:[%s13281_s1 + $0x20] sm:$0xff] }
 0x2f1   :  { %2031 = vmatpush.bf16.msrb.mxu0 %v2008_v48  ;;  %v715_v48 = vmul.f32 %v8786_v54, %v13479_v52 }
 0x2f3   :  { %v739_v53 = vpop.permute.xlu2 %738 }
 0x2f4   :  { %v779_v28 = vsel %vm115_vm0, %v739_v53, 0  ;;  %v13483_v53 = vld [vmem:[#allocation51_spill] sm:$0xff] }
 0x2f5   :  { %v1045_v49 = vmul.f32 %v8781_v33, %v13483_v53 }
 0x31b   :  { %v751_v21 = vpop.permute.xlu1 %750 }
 0x31c   :  { %v797_v1 = vsel %vm115_vm0, %v751_v21, 0 }
 0x323   :  { %v749_v19 = vpop.permute.xlu1 %748 }
 0x324   :  { %v794_v59 = vsel %vm115_vm0, %v749_v19, 0 }
 0x32c   :  { %v753_v17 = vpop.permute.xlu0 %752  ;;  %v741_v12 = vpop.permute.xlu1 %740 }
 0x32d   :  { %v800_v14 = vsel %vm115_vm0, %v753_v17, 0  ;;  %v782_v32 = vsel %vm115_vm0, %v741_v12, 0  ;;  %v1041_v17 = vmul.f32 %v8781_v33, %v13479_v52  ;;  %v13494_v52 = vld [vmem:[#allocation35_spill] sm:$0xff] }
 0x32e   :  { %802 = vmatpush.bf16.xpose.msrb.mxu1 %v800_v14  ;;  %1080 = vmatpush.bf16.xpose.msra.mxu2 %v800_v14 }
 0x32f   :  { %1799 = vmatpush.bf16.xpose.msrb.mxu3 %v800_v14 }
 0x334   :  { %v743_v40 = vpop.permute.xlu0 %742 }
 0x335   :  { %v785_v15 = vsel %vm115_vm0, %v743_v40, 0 }
 0x336   :  { %803 = vmatpush.bf16.xpose.msrb.mxu1 %v797_v1  ;;  %1081 = vmatpush.bf16.xpose.msra.mxu2 %v797_v1 }
 0x337   :  { %1800 = vmatpush.bf16.xpose.msrb.mxu3 %v797_v1 }
 0x33e   :  { %804 = vmatpush.bf16.xpose.msrb.mxu1 %v794_v59  ;;  %1082 = vmatpush.bf16.xpose.msra.mxu2 %v794_v59 }
 0x33f   :  { %1801 = vmatpush.bf16.xpose.msrb.mxu3 %v794_v59 }
 0x346   :  { %805 = vmatpush.bf16.xpose.msrb.mxu1 %v791_v8  ;;  %1083 = vmatpush.bf16.xpose.msra.mxu2 %v791_v8 }
 0x347   :  { %1802 = vmatpush.bf16.xpose.msrb.mxu3 %v791_v8 }
 0x34e   :  { %806 = vmatpush.bf16.xpose.msrb.mxu1 %v788_v42  ;;  %1084 = vmatpush.bf16.xpose.msra.mxu2 %v788_v42 }
 0x34f   :  { %1803 = vmatpush.bf16.xpose.msrb.mxu3 %v788_v42 }
 0x356   :  { %807 = vmatpush.bf16.xpose.msrb.mxu1 %v785_v15  ;;  %1085 = vmatpush.bf16.xpose.msra.mxu2 %v785_v15 }
 0x357   :  { %1804 = vmatpush.bf16.xpose.msrb.mxu3 %v785_v15 }
 0x35e   :  { %808 = vmatpush.bf16.xpose.msrb.mxu1 %v782_v32  ;;  %1086 = vmatpush.bf16.xpose.msra.mxu2 %v782_v32 }
 0x35f   :  { %1805 = vmatpush.bf16.xpose.msrb.mxu3 %v782_v32 }
 0x366   :  { %809 = vmatpush.bf16.xpose.msrb.mxu1 %v779_v28  ;;  %1087 = vmatpush.bf16.xpose.msra.mxu2 %v779_v28 }
 0x367   :  { %1806 = vmatpush.bf16.xpose.msrb.mxu3 %v779_v28 }
 0x36d   :  { %6760 = vmatmul.msk.bf16.vlgmr.msrb.gmra.mxu1 %vm115_vm0, %v722_v2  ;;  %6769 = vmatmul.msk.bf16.vlgmr.msra.gmra.mxu2 %vm115_vm0, %v1048_v31  ;;  %v1054_v31 = vpack.c.bf16 %v1045_v49, %v1044_v26  ;;  %v721_v2 = vmul.f32 %v8786_v54, %v8825_v47  ;;  %v13500_v49 = vld [vmem:[#allocation47_spill] sm:$0xff] }
 0x36e   :  { %1456 = vmatpush.bf16.xpose.msra.mxu1 %v800_v14  ;;  %1681 = vmatpush.bf16.msrb.mxu2 %v13467_v38  ;;  %v13480_v14 = vld [vmem:[#allocation38_spill] sm:$0xff]  ;;  %v718_v38 = vmul.f32 %v8786_v54, %v13484_v11 }
 0x36f   :  { %v714_v21 = vmul.f32 %v8786_v54, %v13480_v14  ;;  %v13501_v11 = vld [vmem:[#allocation46_spill] sm:$0xff] }
 0x371   :  { %v726_v19 = vpack.c.bf16 %v715_v48, %v714_v21  ;;  %v13495_v48 = vld [vmem:[#allocation34_spill] sm:$0xff] }
 0x372   :  { %1682 = vmatpush.bf16.msrb.mxu2 %v13468_v50  ;;  %v1047_v50 = vmul.f32 %v8781_v33, %v8825_v47  ;;  %v9056_v47 = vld [vmem:[%s13281_s1] sm:$0xff] }
 0x376   :  { %1457 = vmatpush.bf16.xpose.msra.mxu1 %v797_v1  ;;  %1683 = vmatpush.bf16.msrb.mxu2 %v13469_v9  ;;  %v1040_v1 = vmul.f32 %v8781_v33, %v13480_v14  ;;  %v720_v9 = vmul.f32 %v8786_v54, %v8813_v29  ;;  %v9115_v14 = vld [vmem:[%s13281_s1 + $0x30] sm:$0xff] }
 0x378   :  { %v729_v0 = vpack.c.bf16 %v721_v2, %v720_v9  ;;  %v13504_v2 = vld [vmem:[#allocation52_spill] sm:$0xff] }
 0x37a   :  { %1684 = vmatpush.bf16.msrb.mxu2 %v13470_v30  ;;  %v1046_v30 = vmul.f32 %v8781_v33, %v8813_v29 }
 0x37c   :  { %v1055_v20 = vpack.c.bf16 %v1047_v50, %v1046_v30 }
 0x37d   :  { %6761 = vmatmul.msk.bf16.gmra.mxu1 %vm115_vm0, %v723_v7  ;;  %6770 = vmatmul.msk.bf16.gmra.mxu2 %vm115_vm0, %v1049_v35 }
 0x37e   :  { %1458 = vmatpush.bf16.xpose.msra.mxu1 %v794_v59  ;;  %1685 = vmatpush.bf16.msrb.mxu2 %v13471_v3  ;;  %v1052_v59 = vpack.c.bf16 %v1041_v17, %v1040_v1  ;;  %v13485_v3 = vld [vmem:[#allocation20_spill] sm:$0xff]  ;;  %v13496_v17 = vpack.c.bf16 %v13494_v52, %v13495_v48 }
 0x37f   :  { %v13487_v34 = vpack.c.bf16 %v13485_v3, %v13486_v39 }
 0x382   :  { %1686 = vmatpush.bf16.msrb.mxu2 %v13472_v18  ;;  %v13488_v18 = vld [vmem:[#allocation23_spill] sm:$0xff] }
 0x386   :  { %1459 = vmatpush.bf16.xpose.msra.mxu1 %v791_v8  ;;  %1687 = vmatpush.bf16.msrb.mxu2 %v13473_v60  ;;  %v717_v8 = vmul.f32 %v8786_v54, %v13481_v57  ;;  %v13489_v60 = vld [vmem:[#allocation22_spill] sm:$0xff]  ;;  %v9126_v57 = vld [vmem:[%s13281_s1 + $0x38] sm:$0xff] }
 0x38a   :  { %1688 = vmatpush.bf16.msrb.mxu2 %v13474_v27  ;;  %v13490_v27 = vpack.c.bf16 %v13488_v18, %v13489_v60 }
 0x38d   :  { %6762 = vmatmul.msk.bf16.gmra.mxu1 %vm115_vm0, %v724_v45  ;;  %6771 = vmatmul.msk.bf16.gmra.mxu2 %vm115_vm0, %v1050_v22  ;;  %v13491_v45 = vld [vmem:[#allocation29_spill] sm:$0xff]  ;;  %v13492_v22 = vld [vmem:[#allocation28_spill] sm:$0xff] }
 0x38e   :  { %1460 = vmatpush.bf16.xpose.msra.mxu1 %v788_v42  ;;  %v13482_v42 = vld [vmem:[#allocation44_spill] sm:$0xff]  ;;  %v13493_v61 = vpack.c.bf16 %v13491_v45, %v13492_v22 }
 0x38f   :  { %v716_v40 = vmul.f32 %v8786_v54, %v13482_v42 }
 0x391   :  { %v727_v12 = vpack.c.bf16 %v717_v8, %v716_v40  ;;  %v13498_v40 = vld [vmem:[#allocation40_spill] sm:$0xff] }
 0x396   :  { %1461 = vmatpush.bf16.xpose.msra.mxu1 %v785_v15  ;;  %v1042_v15 = vmul.f32 %v8781_v33, %v13482_v42  ;;  %v9062_v33 = vld [vmem:[%s13281_s1 + $0x8] sm:$0xff]  ;;  %v13497_v42 = vld [vmem:[#allocation41_spill] sm:$0xff] }
 0x39d   :  { %6763 = vmatmul.msk.bf16.gmra.mxu1 %vm115_vm0, %v725_v62  ;;  %6772 = vmatmul.msk.bf16.gmra.mxu2 %vm115_vm0, %v1051_v16  ;;  %v9102_v62 = vld [vmem:[%s13281_s1 + $0x28] sm:$0xff] }
 0x39e   :  { %1462 = vmatpush.bf16.xpose.msra.mxu1 %v782_v32  ;;  %v1053_v32 = vpack.c.bf16 %v1043_v37, %v1042_v15  ;;  %v13499_v15 = vpack.c.bf16 %v13497_v42, %v13498_v40 }
 0x3a6   :  { %1463 = vmatpush.bf16.xpose.msra.mxu1 %v779_v28  ;;  %v719_v28 = vmul.f32 %v8786_v54, %v13483_v53 }
 0x3a8   :  { %v728_v10 = vpack.c.bf16 %v719_v28, %v718_v38  ;;  %v13502_v38 = vpack.c.bf16 %v13500_v49, %v13501_v11 }
 0x3ad   :  { %6764 = vmatmul.msk.bf16.gmra.mxu1 %vm115_vm0, %v726_v19  ;;  %6773 = vmatmul.msk.bf16.gmra.mxu2 %vm115_vm0, %v1052_v59 }
 0x3bd   :  { %6765 = vmatmul.msk.bf16.gmra.mxu1 %vm115_vm0, %v727_v12  ;;  %6774 = vmatmul.msk.bf16.gmra.mxu2 %vm115_vm0, %v1053_v32  ;;  %v9141_v12 = vld [vmem:[%s13281_s1 + $0x40] sm:$0xff] }
 0x3cd   :  { %6766 = vmatmul.msk.bf16.gmra.mxu1 %vm115_vm0, %v728_v10  ;;  %6775 = vmatmul.msk.bf16.gmra.mxu2 %vm115_vm0, %v1054_v31  ;;  %v13503_v31 = vld [vmem:[#allocation53_spill] sm:$0xff] }
 0x3ce   :  { %v13505_v50 = vpack.c.bf16 %v13503_v31, %v13504_v2  ;;  %v9227_v2 = vld [vmem:[%s13281_s1 + $0x68] sm:$0xff] }
 0x3dd   :  { %6767 = vmatmul.msk.bf16.gmra.mxu1 %vm115_vm0, %v729_v0  ;;  %6776 = vmatmul.msk.bf16.gmra.mxu2 %vm115_vm0, %v1055_v20 }
 0x3ea   :  { %v9097_v55 = vpop.f32.mrf.mxu1 }
 0x3ed   :  { %6778 = vmatmul.msk.bf16.vlgmr.msra.gmra.mxu1 %vm115_vm0, %v13487_v34 }
 0x3f0   :  { %v1089_v54 = vpop.f32.mrf.mxu2 }
 0x3f1   :  { %v1090_v7 = vadd.f32 %v1089_v54, %v9056_v47 }
 0x3f2   :  { %v9117_v1 = vpop.f32.mrf.mxu1 }
 0x3f3   :  { %1129 = vmax.xlane.f32.xlu0 %v1090_v7 }
 0x3f8   :  { %v1091_v29 = vpop.f32.mrf.mxu2 }
 0x3f9   :  { %v1092_v35 = vadd.f32 %v1091_v29, %v9062_v33 }
 0x3fa   :  { %v9131_v37 = vpop.f32.mrf.mxu1 }
 0x3fb   :  { %1131 = vmax.xlane.f32.xlu1 %v1092_v35 }
 0x3fd   :  { %6779 = vmatmul.msk.bf16.gmra.mxu1 %vm115_vm0, %v13490_v27 }
 0x400   :  { %v1094_v44 = vpop.f32.mrf.mxu2 }
 0x401   :  { %v1095_v41 = vadd.f32 %v1094_v44, %v9072_v25 }
 0x402   :  { %v9147_v28 = vpop.f32.mrf.mxu1 }
 0x403   :  { %1133 = vmax.xlane.f32.xlu2 %v1095_v41 }
 0x408   :  { %v1096_v43 = vpop.f32.mrf.mxu2 }
 0x409   :  { %v9081_v36 = vadd.f32 %v1096_v43, %v9078_v51 }
 0x40a   :  { %v9153_v26 = vpop.f32.mrf.mxu1 }
 0x40b   :  { %1135 = vmax.xlane.f32.xlu2 %v9081_v36 }
 0x40d   :  { %6780 = vmatmul.msk.bf16.gmra.mxu1 %vm115_vm0, %v13493_v61 }
 0x410   :  { %v1099_v56 = vpop.f32.mrf.mxu2 }
 0x411   :  { %v9094_v6 = vadd.f32 %v1099_v56, %v9091_v63 }
 0x412   :  { %v9155_v10 = vpop.f32.mrf.mxu1 }
 0x413   :  { %1137 = vmax.xlane.f32.xlu0 %v9094_v6 }
 0x418   :  { %v1101_v24 = vpop.f32.mrf.mxu2 }
 0x419   :  { %v9105_v16 = vadd.f32 %v1101_v24, %v9102_v62 }
 0x41a   :  { %v9161_v9 = vpop.f32.mrf.mxu1 }
 0x41b   :  { %1139 = vmax.xlane.f32.xlu1 %v9105_v16 }
 0x41d   :  { %6781 = vmatmul.msk.bf16.gmra.mxu1 %vm115_vm0, %v13496_v17  ;;  %v9201_v17 = vld [vmem:[%s13281_s1 + $0x58] sm:$0xff] }
 0x420   :  { %v1104_v21 = vpop.f32.mrf.mxu2 }
 0x421   :  { %v9120_v19 = vadd.f32 %v1104_v21, %v9115_v14 }
 0x422   :  { %v9163_v30 = vpop.f32.mrf.mxu1 }
 0x423   :  { %1141 = vmax.xlane.f32.xlu2 %v9120_v19 }
 0x428   :  { %v1106_v59 = vpop.f32.mrf.mxu2 }
 0x429   :  { %v9129_v8 = vadd.f32 %v1106_v59, %v9126_v57 }
 0x42b   :  { %1143 = vmax.xlane.f32.xlu0 %v9129_v8 }
 0x42d   :  { %6782 = vmatmul.msk.bf16.gmra.mxu1 %vm115_vm0, %v13499_v15 }
 0x430   :  { %v1109_v32 = vpop.f32.mrf.mxu2 }
 0x431   :  { %v9144_v53 = vadd.f32 %v1109_v32, %v9141_v12 }
 0x433   :  { %1145 = vmax.xlane.f32.xlu0 %v9144_v53 }
 0x438   :  { %v1111_v3 = vpop.f32.mrf.mxu2 }
 0x439   :  { %v9178_v13 = vadd.f32 %v1111_v3, %v9175_v58 }
 0x43d   :  { %6783 = vmatmul.msk.bf16.gmra.mxu1 %vm115_vm0, %v13502_v38 }
 0x440   :  { %v1114_v60 = vpop.f32.mrf.mxu2 }
 0x44d   :  { %6784 = vmatmul.msk.bf16.gmra.mxu1 %vm115_vm0, %v13505_v50 }
 0x45d   :  { %6785 = vmatmul.msk.bf16.gmra.mxu1 %vm115_vm0, %v1431_v5 }
 0x466   :  { %v1130_v0 = vpop.xlane.xlu0 %1129 }
 0x467   :  { %v1161_v20 = vsub.f32 %v1090_v7, %v1130_v0 }
 0x469   :  { %v1177_v39 = vmul.f32 1.442695, %v1161_v20 }
 0x46b   :  { %7354 = vpow2.f32 %v1177_v39 }
 0x46e   :  { %v1132_v34 = vpop.xlane.xlu1 %1131 }
 0x46f   :  { %v1162_v54 = vsub.f32 %v1092_v35, %v1132_v34  ;;  %v1116_v35 = vpop.f32.mrf.mxu2 }
 0x471   :  { %v9169_v29 = vpop.eup %7354  ;;  %v1179_v18 = vmul.f32 1.442695, %v1162_v54 }
 0x472   :  { %1209 = vadd.xlane.f32.xlu1 %v9169_v29 }
 0x473   :  { %7356 = vpow2.f32 %v1179_v18 }
 0x476   :  { %v1134_v27 = vpop.xlane.xlu2 %1133 }
 0x477   :  { %v1163_v44 = vsub.f32 %v1095_v41, %v1134_v27  ;;  %v9187_v41 = vld [vmem:[%s13281_s1 + $0x50] sm:$0xff]  ;;  %v1119_v52 = vpop.f32.mrf.mxu2 }
 0x478   :  { %v9191_v22 = vadd.f32 %v1114_v60, %v9187_v41 }
 0x479   :  { %v9180_v5 = vpop.eup %7356  ;;  %v1181_v7 = vmul.f32 1.442695, %v1163_v44 }
 0x47a   :  { %1211 = vadd.xlane.f32.xlu2 %v9180_v5  ;;  %1147 = vmax.xlane.f32.xlu1 %v9178_v13 }
 0x47b   :  { %7358 = vpow2.f32 %v1181_v7  ;;  %v9253_v7 = vld [vmem:[%s13281_s1 + $0x78] sm:$0xff] }
 0x47e   :  { %v1136_v43 = vpop.xlane.xlu2 %1135 }
 0x47f   :  { %v1164_v45 = vsub.f32 %v9081_v36, %v1136_v43  ;;  %v9204_v36 = vadd.f32 %v1116_v35, %v9201_v17  ;;  %v1121_v49 = vpop.f32.mrf.mxu2 }
 0x481   :  { %v9193_v61 = vpop.eup %7358  ;;  %v1183_v56 = vmul.f32 1.442695, %v1164_v45 }
 0x482   :  { %1213 = vadd.xlane.f32.xlu2 %v9193_v61  ;;  %1149 = vmax.xlane.f32.xlu1 %v9191_v22 }
 0x483   :  { %7360 = vpow2.f32 %v1183_v56 }
 0x486   :  { %v1138_v24 = vpop.xlane.xlu0 %1137 }
 0x487   :  { %v1165_v48 = vsub.f32 %v9094_v6, %v1138_v24  ;;  %v9213_v6 = vld [vmem:[%s13281_s1 + $0x60] sm:$0xff]  ;;  %v1124_v20 = vpop.f32.mrf.mxu2 }
 0x488   :  { %v9217_v15 = vadd.f32 %v1119_v52, %v9213_v6 }
 0x489   :  { %v9206_v21 = vpop.eup %7360  ;;  %v1185_v59 = vmul.f32 1.442695, %v1165_v48 }
 0x48a   :  { %1151 = vmax.xlane.f32.xlu2 %v9204_v36  ;;  %1215 = vadd.xlane.f32.xlu0 %v9206_v21 }
 0x48b   :  { %7362 = vpow2.f32 %v1185_v59 }
 0x48e   :  { %v1140_v42 = vpop.xlane.xlu1 %1139 }
 0x48f   :  { %v1166_v40 = vsub.f32 %v9105_v16, %v1140_v42  ;;  %v9230_v16 = vadd.f32 %v1121_v49, %v9227_v2  ;;  %v1126_v60 = vpop.f32.mrf.mxu2 }
 0x491   :  { %v9219_v32 = vpop.eup %7362  ;;  %v1187_v11 = vmul.f32 1.442695, %v1166_v40 }
 0x492   :  { %1153 = vmax.xlane.f32.xlu2 %v9217_v15  ;;  %1217 = vadd.xlane.f32.xlu0 %v9219_v32 }
 0x493   :  { %7364 = vpow2.f32 %v1187_v11 }
 0x496   :  { %v1142_v38 = vpop.xlane.xlu2 %1141 }
 0x497   :  { %v1167_v31 = vsub.f32 %v9120_v19, %v1142_v38  ;;  %v9239_v19 = vld [vmem:[%s13281_s1 + $0x70] sm:$0xff] }
 0x498   :  { %v9243_v34 = vadd.f32 %v1124_v20, %v9239_v19 }
 0x499   :  { %v9232_v50 = vpop.eup %7364  ;;  %v1189_v0 = vmul.f32 1.442695, %v1167_v31 }
 0x49a   :  { %1219 = vadd.xlane.f32.xlu1 %v9232_v50  ;;  %1155 = vmax.xlane.f32.xlu0 %v9230_v16 }
 0x49b   :  { %7366 = vpow2.f32 %v1189_v0 }
 0x49e   :  { %v1144_v3 = vpop.xlane.xlu0 %1143 }
 0x49f   :  { %v1168_v39 = vsub.f32 %v9129_v8, %v1144_v3  ;;  %v9256_v8 = vadd.f32 %v1126_v60, %v9253_v7 }
 0x4a1   :  { %v9245_v54 = vpop.eup %7366  ;;  %v1191_v18 = vmul.f32 1.442695, %v1168_v39 }
 0x4a2   :  { %1221 = vadd.xlane.f32.xlu1 %v9245_v54  ;;  %1157 = vmax.xlane.f32.xlu0 %v9243_v34 }
 0x4a3   :  { %7368 = vpow2.f32 %v1191_v18 }
 0x4a6   :  { %v1146_v27 = vpop.xlane.xlu0 %1145 }
 0x4a7   :  { %v1169_v44 = vsub.f32 %v9144_v53, %v1146_v27 }
 0x4a9   :  { %v9258_v35 = vpop.eup %7368  ;;  %v1193_v43 = vmul.f32 1.442695, %v1169_v44 }
 0x4aa   :  { %1223 = vadd.xlane.f32.xlu2 %v9258_v35  ;;  %1159 = vmax.xlane.f32.xlu1 %v9256_v8 }
 0x4ab   :  { %7370 = vpow2.f32 %v1193_v43 }
 0x4b1   :  { %v9262_v45 = vpop.eup %7370 }
 0x4b2   :  { %1225 = vadd.xlane.f32.xlu2 %v9262_v45 }
 0x4e5   :  { %v1210_v53 = vpop.xlane.xlu1 %1209 }
 0x4e6   :  { %7372 = vrcp.f32 %v1210_v53 }
 0x4ec   :  { %v7373_v59 = vpop.eup %7372 }
 0x4ed   :  { %v1212_v56 = vpop.xlane.xlu2 %1211  ;;  %v1148_v24 = vpop.xlane.xlu1 %1147  ;;  %v1257_v40 = vmul.f32 %v7373_v59, %v9169_v29 }
 0x4ee   :  { %7374 = vrcp.f32 %v1212_v56  ;;  %v1170_v52 = vsub.f32 %v9178_v13, %v1148_v24 }
 0x4f0   :  { %v1195_v48 = vmul.f32 1.442695, %v1170_v52 }
 0x4f2   :  { %7376 = vpow2.f32 %v1195_v48 }
 0x4f4   :  { %v7375_v42 = vpop.eup %7374 }
 0x4f5   :  { %v1258_v49 = vmul.f32 %v7375_v42, %v9180_v5  ;;  %v1214_v11 = vpop.xlane.xlu2 %1213  ;;  %v1150_v38 = vpop.xlane.xlu1 %1149 }
 0x4f6   :  { %v1171_v31 = vsub.f32 %v9191_v22, %v1150_v38 }
 0x4f7   :  { %v1297_v0 = vpack.c.bf16 %v1258_v49, %v1257_v40 }
 0x4f8   :  { %v9269_v20 = vpop.eup %7376  ;;  %v1197_v3 = vmul.f32 1.442695, %v1171_v31 }
 0x4f9   :  { %1313 = vmatmul.bf16.vlgmr.msra.gmra.mxu3 %v1297_v0  ;;  %1227 = vadd.xlane.f32.xlu0 %v9269_v20 }
 0x4fa   :  { %7378 = vpow2.f32 %v1197_v3 }
 0x4fb   :  { %7380 = vrcp.f32 %v1214_v11 }
 0x4fd   :  { %v1152_v13 = vpop.xlane.xlu2 %1151  ;;  %v1216_v39 = vpop.xlane.xlu0 %1215 }
 0x4fe   :  { %v1172_v18 = vsub.f32 %v9204_v36, %v1152_v13  ;;  %7382 = vrcp.f32 %v1216_v39 }
 0x500   :  { %v9273_v29 = vpop.eup %7378  ;;  %v1199_v5 = vmul.f32 1.442695, %v1172_v18 }
 0x501   :  { %1229 = vadd.xlane.f32.xlu1 %v9273_v29  ;;  %v7381_v22 = vpop.eup %7380 }
 0x502   :  { %7384 = vpow2.f32 %v1199_v5  ;;  %v1259_v43 = vmul.f32 %v7381_v22, %v9193_v61 }
 0x504   :  { %v7383_v60 = vpop.eup %7382 }
 0x505   :  { %v1154_v27 = vpop.xlane.xlu2 %1153  ;;  %v1218_v44 = vpop.xlane.xlu0 %1217  ;;  %v1260_v53 = vmul.f32 %v7383_v60, %v9206_v21 }
 0x506   :  { %v1173_v56 = vsub.f32 %v9217_v15, %v1154_v27 }
 0x507   :  { %v1298_v24 = vpack.c.bf16 %v1260_v53, %v1259_v43  ;;  %v9311_v53 = vadd.f32 %v9117_v1, %v9062_v33  ;;  %v9333_v1 = vadd.f32 %v9155_v10, %v9102_v62 }
 0x508   :  { %v9279_v52 = vpop.eup %7384  ;;  %v1201_v36 = vmul.f32 1.442695, %v1173_v56 }
 0x509   :  { %1231 = vadd.xlane.f32.xlu2 %v9279_v52  ;;  %1318 = vmatmul.bf16.gmra.mxu3 %v1298_v24 }
 0x50a   :  { %7386 = vpow2.f32 %v1201_v36 }
 0x50b   :  { %7388 = vrcp.f32 %v1218_v44 }
 0x50d   :  { %v1220_v48 = vpop.xlane.xlu1 %1219  ;;  %v1156_v59 = vpop.xlane.xlu0 %1155 }
 0x50e   :  { %7390 = vrcp.f32 %v1220_v48  ;;  %v1174_v42 = vsub.f32 %v9230_v16, %v1156_v59 }
 0x510   :  { %v9283_v40 = vpop.eup %7386  ;;  %v1203_v61 = vmul.f32 1.442695, %v1174_v42 }
 0x511   :  { %1233 = vadd.xlane.f32.xlu0 %v9283_v40  ;;  %v7389_v21 = vpop.eup %7388 }
 0x512   :  { %7392 = vpow2.f32 %v1203_v61  ;;  %v1261_v38 = vmul.f32 %v7389_v21, %v9219_v32  ;;  %v9295_v32 = vadd.f32 %v9097_v55, %v9056_v47 }
 0x514   :  { %v7391_v15 = vpop.eup %7390 }
 0x515   :  { %v1222_v49 = vpop.xlane.xlu1 %1221  ;;  %v1158_v11 = vpop.xlane.xlu0 %1157  ;;  %v1262_v31 = vmul.f32 %v7391_v15, %v9232_v50 }
 0x516   :  { %v1175_v0 = vsub.f32 %v9243_v34, %v1158_v11 }
 0x517   :  { %v1299_v3 = vpack.c.bf16 %v1262_v31, %v1261_v38 }
 0x518   :  { %v9289_v13 = vpop.eup %7392  ;;  %v1205_v16 = vmul.f32 1.442695, %v1175_v0 }
 0x519   :  { %1323 = vmatmul.bf16.gmra.mxu3 %v1299_v3  ;;  %1235 = vadd.xlane.f32.xlu1 %v9289_v13 }
 0x51a   :  { %7394 = vpow2.f32 %v1205_v16 }
 0x51b   :  { %7396 = vrcp.f32 %v1222_v49 }
 0x51d   :  { %v1224_v39 = vpop.xlane.xlu2 %1223  ;;  %v1160_v18 = vpop.xlane.xlu1 %1159 }
 0x51e   :  { %7398 = vrcp.f32 %v1224_v39  ;;  %v1176_v5 = vsub.f32 %v9256_v8, %v1160_v18  ;;  %v9305_v8 = vadd.f32 %v9147_v28, %v9078_v51  ;;  %v9322_v28 = vadd.f32 %v9131_v37, %v9072_v25  ;;  %v831_v37 = vpop.f32.mrf.mxu1 }
 0x520   :  { %v9297_v50 = vpop.eup %7394  ;;  %v1207_v34 = vmul.f32 1.442695, %v1176_v5 }
 0x521   :  { %851 = vmax.xlane.f32.xlu1 %v9295_v32  ;;  %1237 = vadd.xlane.f32.xlu2 %v9297_v50  ;;  %v7397_v22 = vpop.eup %7396 }
 0x522   :  { %7400 = vpow2.f32 %v1207_v34  ;;  %v1263_v27 = vmul.f32 %v7397_v22, %v9245_v54  ;;  %v9318_v54 = vadd.f32 %v9161_v9, %v9115_v14  ;;  %v9337_v9 = vadd.f32 %v9163_v30, %v9126_v57 }
 0x524   :  { %v7399_v60 = vpop.eup %7398 }
 0x525   :  { %v1264_v44 = vmul.f32 %v7399_v60, %v9258_v35  ;;  %v9326_v35 = vadd.f32 %v9153_v26, %v9091_v63  ;;  %v9342_v26 = vadd.f32 %v831_v37, %v9141_v12  ;;  %v1226_v24 = vpop.xlane.xlu2 %1225 }
 0x526   :  { %v9345_v56 = vpop.f32.mrf.mxu1  ;;  %7402 = vrcp.f32 %v1226_v24 }
 0x527   :  { %v1300_v43 = vpack.c.bf16 %v1264_v44, %v1263_v27 }
 0x528   :  { %v9307_v55 = vpop.eup %7400 }
 0x529   :  { %1328 = vmatmul.bf16.gmra.mxu3 %v1300_v43  ;;  %857 = vmax.xlane.f32.xlu1 %v9305_v8 }
 0x52a   :  { %1239 = vadd.xlane.f32.xlu0 %v9307_v55  ;;  %853 = vmax.xlane.f32.xlu2 %v9311_v53 }
 0x52c   :  { %v7403_v30 = vpop.eup %7402 }
 0x52d   :  { %v1265_v59 = vmul.f32 %v7403_v30, %v9262_v45 }
 0x52e   :  { %v9347_v36 = vpop.f32.mrf.mxu1 }
 0x531   :  { %863 = vmax.xlane.f32.xlu1 %v9318_v54 }
 0x532   :  { %855 = vmax.xlane.f32.xlu0 %v9322_v28  ;;  %859 = vmax.xlane.f32.xlu2 %v9326_v35 }
 0x536   :  { %v9351_v21 = vpop.f32.mrf.mxu1 }
 0x53a   :  { %861 = vmax.xlane.f32.xlu0 %v9333_v1  ;;  %865 = vmax.xlane.f32.xlu2 %v9337_v9 }
 0x53e   :  { %v9353_v38 = vpop.f32.mrf.mxu1 }
 0x542   :  { %867 = vmax.xlane.f32.xlu2 %v9342_v26 }
 0x56c   :  { %v1228_v10 = vpop.xlane.xlu0 %1227 }
 0x56d   :  { %7404 = vrcp.f32 %v1228_v10 }
 0x573   :  { %v7405_v48 = vpop.eup %7404 }
 0x574   :  { %v1266_v42 = vmul.f32 %v7405_v48, %v9269_v20  ;;  %v1230_v15 = vpop.xlane.xlu1 %1229  ;;  %v9357_v20 = vpop.f32.mrf.mxu1 }
 0x575   :  { %7406 = vrcp.f32 %v1230_v15 }
 0x576   :  { %v1301_v61 = vpack.c.bf16 %v1266_v42, %v1265_v59 }
 0x578   :  { %1333 = vmatmul.bf16.gmra.mxu3 %v1301_v61 }
 0x57b   :  { %v7407_v11 = vpop.eup %7406 }
 0x57c   :  { %v1232_v49 = vpop.xlane.xlu2 %1231  ;;  %v1267_v0 = vmul.f32 %v7407_v11, %v9273_v29  ;;  %v9361_v27 = vpop.f32.mrf.mxu1 }
 0x57d   :  { %7408 = vrcp.f32 %v1232_v49 }
 0x583   :  { %v7409_v31 = vpop.eup %7408 }
 0x584   :  { %v1268_v3 = vmul.f32 %v7409_v31, %v9279_v52  ;;  %v1234_v45 = vpop.xlane.xlu0 %1233 }
 0x585   :  { %7410 = vrcp.f32 %v1234_v45 }
 0x586   :  { %v1302_v16 = vpack.c.bf16 %v1268_v3, %v1267_v0  ;;  %v9377_v0 = vadd.f32 %v9345_v56, %v9175_v58 }
 0x588   :  { %1338 = vmatmul.bf16.gmra.mxu3 %v1302_v16 }
 0x58b   :  { %v7411_v18 = vpop.eup %7410 }
 0x58c   :  { %v1236_v39 = vpop.xlane.xlu1 %1235  ;;  %v1269_v22 = vmul.f32 %v7411_v18, %v9283_v40 }
 0x58d   :  { %7412 = vrcp.f32 %v1236_v39 }
 0x593   :  { %v7413_v5 = vpop.eup %7412 }
 0x594   :  { %v852_v34 = vpop.xlane.xlu1 %851  ;;  %v1270_v60 = vmul.f32 %v7413_v5, %v9289_v13  ;;  %v1238_v52 = vpop.xlane.xlu2 %1237 }
 0x595   :  { %v883_v29 = vsub.f32 %v9295_v32, %v852_v34  ;;  %v9368_v13 = vpop.f32.mrf.mxu1 }
 0x596   :  { %v1303_v44 = vpack.c.bf16 %v1270_v60, %v1269_v22 }
 0x597   :  { %v899_v43 = vmul.f32 1.442695, %v883_v29 }
 0x598   :  { %1343 = vmatmul.bf16.gmra.mxu3 %v1303_v44  ;;  %v9405_v44 = vadd.f32 %v9357_v20, %v9227_v2 }
 0x599   :  { %7414 = vpow2.f32 %v899_v43  ;;  %v9409_v43 = vadd.f32 %v9351_v21, %v9201_v17  ;;  %v9423_v21 = vadd.f32 %v9361_v27, %v9239_v19 }
 0x59a   :  { %7416 = vrcp.f32 %v1238_v52 }
 0x59c   :  { %v858_v37 = vpop.xlane.xlu1 %857 }
 0x59d   :  { %v886_v24 = vsub.f32 %v9305_v8, %v858_v37  ;;  %v854_v10 = vpop.xlane.xlu2 %853  ;;  %v1240_v30 = vpop.xlane.xlu0 %1239 }
 0x59e   :  { %v884_v48 = vsub.f32 %v9311_v53, %v854_v10  ;;  %7418 = vrcp.f32 %v1240_v30  ;;  %v13507_v10 = vld [vmem:[#allocation19_spill] sm:$0xff] }
 0x59f   :  { %v9366_v40 = vpop.eup %7414  ;;  %v905_v59 = vmul.f32 1.442695, %v886_v24  ;;  %v13506_v24 = vld [vmem:[#allocation21_spill] sm:$0xff] }
 0x5a0   :  { %v901_v32 = vmul.f32 1.442695, %v884_v48  ;;  %931 = vadd.xlane.f32.xlu0 %v9366_v40  ;;  %v7417_v42 = vpop.eup %7416  ;;  %v9427_v48 = vadd.f32 %v9353_v38, %v9213_v6  ;;  %v9441_v6 = vadd.f32 %v9368_v13, %v9253_v7 }
 0x5a1   :  { %7420 = vpow2.f32 %v905_v59  ;;  %v1271_v8 = vmul.f32 %v7417_v42, %v9297_v50  ;;  %v1465_v50 = vpop.f32.mrf.mxu1 }
 0x5a2   :  { %7422 = vpow2.f32 %v901_v32 }
 0x5a4   :  { %v7419_v61 = vpop.eup %7418  ;;  %v864_v34 = vpop.xlane.xlu1 %863 }
 0x5a5   :  { %v860_v15 = vpop.xlane.xlu2 %859  ;;  %v856_v49 = vpop.xlane.xlu0 %855  ;;  %v1272_v11 = vmul.f32 %v7419_v61, %v9307_v55  ;;  %v889_v52 = vsub.f32 %v9318_v54, %v864_v34  ;;  %v13508_v54 = vpack.c.bf16 %v13506_v24, %v13507_v10  ;;  %v13509_v61 = vld [vmem:[#allocation25_spill] sm:$0xff]  ;;  %v13518_v10 = vld [vmem:[#allocation43_spill] sm:$0xff] }
 0x5a6   :  { %v887_v53 = vsub.f32 %v9326_v35, %v860_v15  ;;  %v885_v31 = vsub.f32 %v9322_v28, %v856_v49  ;;  %v9386_v55 = vpop.f32.mrf.mxu3  ;;  %v9390_v35 = vadd.f32 %v9347_v36, %v9187_v41  ;;  %v13510_v15 = vld [vmem:[#allocation24_spill] sm:$0xff] }
 0x5a7   :  { %v9379_v3 = vpop.eup %7420  ;;  %v1304_v16 = vpack.c.bf16 %v1272_v11, %v1271_v8  ;;  %v13511_v49 = vpack.c.bf16 %v13509_v61, %v13510_v15 }
 0x5a8   :  { %v9381_v45 = vpop.eup %7422  ;;  %v907_v39 = vmul.f32 1.442695, %v887_v53  ;;  %v903_v18 = vmul.f32 1.442695, %v885_v31  ;;  %869 = vmax.xlane.f32.xlu0 %v9377_v0  ;;  %937 = vadd.xlane.f32.xlu2 %v9379_v3 }
 0x5a9   :  { %933 = vadd.xlane.f32.xlu1 %v9381_v45  ;;  %1348 = vmatmul.bf16.gmra.mxu3 %v1304_v16  ;;  %v1467_v29 = vpop.f32.mrf.mxu1  ;;  %v13512_v16 = vld [vmem:[#allocation31_spill] sm:$0xff] }
 0x5aa   :  { %7424 = vpow2.f32 %v907_v39  ;;  %v9466_v31 = vadd.f32 %v1467_v29, %v9062_v33  ;;  %v13513_v39 = vld [vmem:[#allocation30_spill] sm:$0xff] }
 0x5ab   :  { %7426 = vpow2.f32 %v903_v18  ;;  %v13514_v18 = vpack.c.bf16 %v13512_v16, %v13513_v39  ;;  %v13525_v16 = vld [vmem:[#allocation54_spill] sm:$0xff] }
 0x5ad   :  { %v862_v28 = vpop.xlane.xlu0 %861  ;;  %v866_v41 = vpop.xlane.xlu2 %865 }
 0x5ae   :  { %v888_v56 = vsub.f32 %v9333_v1, %v862_v28  ;;  %v9401_v36 = vpop.f32.mrf.mxu3  ;;  %v911_v1 = vmul.f32 1.442695, %v889_v52  ;;  %v890_v2 = vsub.f32 %v9337_v9, %v866_v41  ;;  %v13515_v52 = vld [vmem:[#allocation37_spill] sm:$0xff]  ;;  %v13516_v41 = vld [vmem:[#allocation36_spill] sm:$0xff] }
 0x5b0   :  { %v9393_v5 = vpop.eup %7424  ;;  %v909_v22 = vmul.f32 1.442695, %v888_v56  ;;  %871 = vmax.xlane.f32.xlu0 %v9390_v35  ;;  %v913_v30 = vmul.f32 1.442695, %v890_v2 }
 0x5b1   :  { %v9396_v60 = vpop.eup %7426  ;;  %939 = vadd.xlane.f32.xlu2 %v9393_v5  ;;  %v1470_v20 = vpop.f32.mrf.mxu1 }
 0x5b2   :  { %935 = vadd.xlane.f32.xlu1 %v9396_v60  ;;  %7428 = vpow2.f32 %v909_v22  ;;  %v9463_v53 = vadd.f32 %v1470_v20, %v9072_v25 }
 0x5b3   :  { %7430 = vpow2.f32 %v911_v1  ;;  %v13517_v1 = vpack.c.bf16 %v13515_v52, %v13516_v41 }
 0x5b4   :  { %7432 = vpow2.f32 %v913_v30 }
 0x5b5   :  { %v868_v59 = vpop.xlane.xlu2 %867 }
 0x5b6   :  { %v9431_v42 = vpop.f32.mrf.mxu3  ;;  %v891_v19 = vsub.f32 %v9342_v26, %v868_v59  ;;  %v9454_v26 = vadd.f32 %v1465_v50, %v9056_v47  ;;  %v13521_v59 = vld [vmem:[#allocation49_spill] sm:$0xff] }
 0x5b8   :  { %v9411_v37 = vpop.eup %7428  ;;  %v915_v27 = vmul.f32 1.442695, %v891_v19  ;;  %v13522_v19 = vld [vmem:[#allocation48_spill] sm:$0xff] }
 0x5b9   :  { %877 = vmax.xlane.f32.xlu2 %v9405_v44  ;;  %6787 = vmatmul.msk.bf16.vlgmr.msrb.gmra.mxu3 %vm115_vm0, %v13508_v54  ;;  %v9429_v32 = vpop.eup %7430  ;;  %v9437_v9 = vpop.f32.mrf.mxu1  ;;  %v13519_v54 = vld [vmem:[#allocation42_spill] sm:$0xff] }
 0x5ba   :  { %873 = vmax.xlane.f32.xlu1 %v9409_v43  ;;  %941 = vadd.xlane.f32.xlu0 %v9411_v37  ;;  %v9443_v38 = vpop.eup %7432  ;;  %7434 = vpow2.f32 %v915_v27  ;;  %v13520_v2 = vpack.c.bf16 %v13518_v10, %v13519_v54  ;;  %v13523_v27 = vpack.c.bf16 %v13521_v59, %v13522_v19 }
 0x5be   :  { %v9451_v8 = vpop.f32.mrf.mxu3 }
 0x5c0   :  { %v9456_v11 = vpop.eup %7434 }
 0x5c1   :  { %879 = vmax.xlane.f32.xlu2 %v9423_v21  ;;  %v1475_v7 = vpop.f32.mrf.mxu1 }
 0x5c2   :  { %875 = vmax.xlane.f32.xlu1 %v9427_v48  ;;  %943 = vadd.xlane.f32.xlu0 %v9429_v32  ;;  %v9479_v56 = vadd.f32 %v1475_v7, %v9091_v63  ;;  %v13524_v7 = vld [vmem:[#allocation55_spill] sm:$0xff] }
 0x5c3   :  { %v13526_v39 = vpack.c.bf16 %v13524_v7, %v13525_v16 }
 0x5c6   :  { %v9460_v13 = vpop.f32.mrf.mxu3 }
 0x5c9   :  { %6788 = vmatmul.msk.bf16.gmra.mxu3 %vm115_vm0, %v13511_v49  ;;  %v9474_v50 = vpop.f32.mrf.mxu1 }
 0x5ca   :  { %945 = vadd.xlane.f32.xlu1 %v9443_v38  ;;  %881 = vmax.xlane.f32.xlu0 %v9441_v6 }
 0x5ce   :  { %v9476_v28 = vpop.f32.mrf.mxu3 }
 0x5d1   :  { %v1480_v34 = vpop.f32.mrf.mxu1 }
 0x5d2   :  { %947 = vadd.xlane.f32.xlu1 %v9456_v11  ;;  %1505 = vmax.xlane.f32.xlu0 %v9454_v26  ;;  %v9483_v22 = vadd.f32 %v1480_v34, %v9115_v14 }
 0x5d6   :  { %v9485_v29 = vpop.f32.mrf.mxu3 }
 0x5d9   :  { %6789 = vmatmul.msk.bf16.gmra.mxu3 %vm115_vm0, %v13514_v18 }
 0x5da   :  { %1507 = vmax.xlane.f32.xlu1 %v9466_v31  ;;  %1509 = vmax.xlane.f32.xlu0 %v9463_v53 }
 0x5de   :  { %v9492_v24 = vpop.f32.mrf.mxu3 }
 0x5e2   :  { %1513 = vmax.xlane.f32.xlu0 %v9479_v56 }
 0x5e9   :  { %6790 = vmatmul.msk.bf16.gmra.mxu3 %vm115_vm0, %v13517_v1 }
 0x5ea   :  { %1517 = vmax.xlane.f32.xlu0 %v9483_v22 }
 0x5f9   :  { %6791 = vmatmul.msk.bf16.gmra.mxu3 %vm115_vm0, %v13520_v2 }
 0x5fb   :  { %v9498_v20 = vpop.f32.mrf.mxu3 }
 0x603   :  { %v9500_v30 = vpop.f32.mrf.mxu3 }
 0x609   :  { %6792 = vmatmul.msk.bf16.gmra.mxu3 %vm115_vm0, %v13523_v27 }
 0x60b   :  { %v9506_v61 = vpop.f32.mrf.mxu3 }
 0x613   :  { %v9508_v15 = vpop.f32.mrf.mxu3  ;;  %v932_v49 = vpop.xlane.xlu0 %931 }
 0x614   :  { %7436 = vrcp.f32 %v932_v49 }
 0x619   :  { %6793 = vmatmul.msk.bf16.gmra.mxu3 %vm115_vm0, %v13526_v39 }
 0x61a   :  { %v7437_v54 = vpop.eup %7436 }
 0x61b   :  { %v938_v18 = vpop.xlane.xlu2 %937  ;;  %v9514_v34 = vpop.f32.mrf.mxu3  ;;  %v979_v19 = vmul.f32 %v7437_v54, %v9366_v40 }
 0x61c   :  { %13527 = vst [vmem:[#allocation27_spill] sm:$0xff] %v9514_v34  ;;  %v934_v52 = vpop.xlane.xlu1 %933  ;;  %v870_v41 = vpop.xlane.xlu0 %869 }
 0x61d   :  { %7438 = vrcp.f32 %v934_v52  ;;  %v892_v1 = vsub.f32 %v9377_v0, %v870_v41  ;;  %v13528_v0 = vpack.c.bf16 %v8848_v46, %v8844_v4 }
 0x61f   :  { %v917_v10 = vmul.f32 1.442695, %v892_v1 }
 0x621   :  { %7440 = vpow2.f32 %v917_v10 }
 0x623   :  { %v7439_v2 = vpop.eup %7438  ;;  %v9517_v59 = vpop.f32.mrf.mxu3 }
 0x624   :  { %v980_v27 = vmul.f32 %v7439_v2, %v9381_v45  ;;  %v940_v7 = vpop.xlane.xlu2 %939  ;;  %v872_v49 = vpop.xlane.xlu0 %871 }
 0x625   :  { %v936_v16 = vpop.xlane.xlu1 %935  ;;  %v893_v39 = vsub.f32 %v9390_v35, %v872_v49 }
 0x626   :  { %v1019_v23 = vpack.c.bf16 %v980_v27, %v979_v19  ;;  %7442 = vrcp.f32 %v936_v16 }
 0x627   :  { %v9522_v34 = vpop.eup %7440  ;;  %v919_v52 = vmul.f32 1.442695, %v893_v39 }
 0x628   :  { %1362 = vmatmul.bf16.vlgmr.msra.gmra.mxu0 %v1019_v23  ;;  %949 = vadd.xlane.f32.xlu2 %v9522_v34 }
 0x629   :  { %7444 = vpow2.f32 %v919_v52  ;;  %6794 = vmatmul.msk.bf16.gmra.mxu3 %vm115_vm0, %v13528_v0  ;;  %v9543_v52 = vadd.f32 %v9437_v9, %v9078_v51 }
 0x62a   :  { %7446 = vrcp.f32 %v938_v18 }
 0x62c   :  { %v9529_v40 = vpop.f32.mrf.mxu3  ;;  %v7443_v35 = vpop.eup %7442 }
 0x62d   :  { %v874_v45 = vpop.xlane.xlu1 %873  ;;  %v942_v41 = vpop.xlane.xlu0 %941  ;;  %v981_v4 = vmul.f32 %v7443_v35, %v9396_v60 }
 0x62e   :  { %v878_v1 = vpop.xlane.xlu2 %877  ;;  %v894_v10 = vsub.f32 %v9409_v43, %v874_v45 }
 0x62f   :  { %v9532_v54 = vpop.eup %7444  ;;  %v896_v19 = vsub.f32 %v9405_v44, %v878_v1 }
 0x630   :  { %v921_v23 = vmul.f32 1.442695, %v894_v10  ;;  %951 = vadd.xlane.f32.xlu1 %v9532_v54  ;;  %v7447_v2 = vpop.eup %7446 }
 0x631   :  { %v982_v18 = vmul.f32 %v7447_v2, %v9379_v3  ;;  %v925_v27 = vmul.f32 1.442695, %v896_v19 }
 0x632   :  { %7448 = vpow2.f32 %v921_v23 }
 0x633   :  { %v1020_v39 = vpack.c.bf16 %v982_v18, %v981_v4  ;;  %7450 = vrcp.f32 %v942_v41 }
 0x634   :  { %v9537_v46 = vpop.f32.mrf.mxu3  ;;  %7452 = vpow2.f32 %v925_v27 }
 0x635   :  { %v876_v49 = vpop.xlane.xlu1 %875  ;;  %v944_v16 = vpop.xlane.xlu0 %943 }
 0x636   :  { %v895_v43 = vsub.f32 %v9427_v48, %v876_v49  ;;  %v880_v1 = vpop.xlane.xlu2 %879 }
 0x637   :  { %v897_v2 = vsub.f32 %v9423_v21, %v880_v1 }
 0x638   :  { %v9545_v0 = vpop.eup %7448  ;;  %v923_v44 = vmul.f32 1.442695, %v895_v43  ;;  %1367 = vmatmul.bf16.gmra.mxu0 %v1020_v39  ;;  %1511 = vmax.xlane.f32.xlu1 %v9543_v52  ;;  %v9567_v39 = vadd.f32 %v9474_v50, %v9102_v62 }
 0x639   :  { %953 = vadd.xlane.f32.xlu2 %v9545_v0  ;;  %v7451_v45 = vpop.eup %7450  ;;  %v927_v27 = vmul.f32 1.442695, %v897_v2 }
 0x63a   :  { %7454 = vpow2.f32 %v923_v44  ;;  %v9550_v9 = vpop.eup %7452 }
 0x63b   :  { %7456 = vrcp.f32 %v940_v7  ;;  %v984_v7 = vmul.f32 %v7451_v45, %v9411_v37 }
 0x63c   :  { %v1808_v3 = vpop.f32.mrf.mxu3 }
 0x63d   :  { %v946_v60 = vpop.xlane.xlu1 %945  ;;  %v882_v48 = vpop.xlane.xlu0 %881  ;;  %v9576_v50 = vadd.f32 %v1808_v3, %v9056_v47 }
 0x63e   :  { %v898_v35 = vsub.f32 %v9441_v6, %v882_v48 }
 0x640   :  { %v9552_v10 = vpop.eup %7454  ;;  %v929_v41 = vmul.f32 1.442695, %v898_v35 }
 0x641   :  { %v7457_v23 = vpop.eup %7456  ;;  %955 = vadd.xlane.f32.xlu1 %v9552_v10  ;;  %957 = vadd.xlane.f32.xlu2 %v9550_v9 }
 0x642   :  { %7458 = vpow2.f32 %v929_v41  ;;  %v983_v4 = vmul.f32 %v7457_v23, %v9393_v5 }
 0x643   :  { %7460 = vrcp.f32 %v946_v60  ;;  %v1482_v60 = vpop.f32.mrf.mxu1 }
 0x644   :  { %v1810_v19 = vpop.f32.mrf.mxu3  ;;  %v1021_v43 = vpack.c.bf16 %v984_v7, %v983_v4  ;;  %7462 = vpow2.f32 %v927_v27  ;;  %v9590_v4 = vadd.f32 %v1482_v60, %v9126_v57 }
 0x645   :  { %v9559_v6 = vpop.xlane.xlu1 %947  ;;  %v9562_v18 = vadd.f32 %v1810_v19, %v9062_v33  ;;  %v1506_v49 = vpop.xlane.xlu0 %1505  ;;  %7464 = vrcp.f32 %v944_v16 }
 0x646   :  { %v1537_v5 = vsub.f32 %v9454_v26, %v1506_v49 }
 0x647   :  { %1850 = vmax.xlane.f32.xlu0 %v9562_v18 }
 0x648   :  { %v9569_v21 = vpop.eup %7458  ;;  %1372 = vmatmul.bf16.gmra.mxu0 %v1021_v43  ;;  %v1553_v37 = vmul.f32 1.442695, %v1537_v5 }
 0x649   :  { %1515 = vmax.xlane.f32.xlu1 %v9567_v39  ;;  %961 = vadd.xlane.f32.xlu2 %v9569_v21  ;;  %v7461_v45 = vpop.eup %7460 }
 0x64a   :  { %v9578_v35 = vpop.eup %7462  ;;  %7466 = vpow2.f32 %v1553_v37  ;;  %v986_v16 = vmul.f32 %v7461_v45, %v9443_v38 }
 0x64b   :  { %v7465_v41 = vpop.eup %7464  ;;  %v1485_v38 = vpop.f32.mrf.mxu1 }
 0x64c   :  { %v1813_v33 = vpop.f32.mrf.mxu3  ;;  %v985_v47 = vmul.f32 %v7465_v41, %v9429_v32  ;;  %v9607_v5 = vadd.f32 %v1485_v38, %v9141_v12 }
 0x64d   :  { %v1508_v44 = vpop.xlane.xlu1 %1507  ;;  %v1510_v26 = vpop.xlane.xlu0 %1509  ;;  %v9596_v32 = vadd.f32 %v1813_v33, %v9072_v25 }
 0x64e   :  { %v1538_v48 = vsub.f32 %v9466_v31, %v1508_v44  ;;  %v1539_v31 = vsub.f32 %v9463_v53, %v1510_v26  ;;  %v1022_v3 = vpack.c.bf16 %v986_v16, %v985_v47 }
 0x650   :  { %v1555_v1 = vmul.f32 1.442695, %v1538_v48  ;;  %v9585_v2 = vpop.eup %7466  ;;  %v1557_v7 = vmul.f32 1.442695, %v1539_v31 }
 0x651   :  { %1848 = vmax.xlane.f32.xlu2 %v9576_v50  ;;  %959 = vadd.xlane.f32.xlu1 %v9578_v35 }
 0x652   :  { %7468 = vpow2.f32 %v1555_v1 }
 0x653   :  { %7470 = vpow2.f32 %v1557_v7  ;;  %v1487_v57 = vpop.f32.mrf.mxu1 }
 0x654   :  { %v1815_v23 = vpop.f32.mrf.mxu3  ;;  %v9610_v37 = vadd.f32 %v1487_v57, %v9175_v58  ;;  %7472 = vrcp.f32 %v9559_v6 }
 0x655   :  { %v9599_v27 = vadd.f32 %v1815_v23, %v9078_v51  ;;  %v1514_v23 = vpop.xlane.xlu0 %1513 }
 0x658   :  { %v9587_v19 = vpop.eup %7468  ;;  %1377 = vmatmul.bf16.gmra.mxu0 %v1022_v3 }
 0x659   :  { %1587 = vadd.xlane.f32.xlu0 %v9587_v19  ;;  %1585 = vadd.xlane.f32.xlu2 %v9585_v2  ;;  %v9601_v49 = vpop.eup %7470 }
 0x65a   :  { %1519 = vmax.xlane.f32.xlu1 %v9590_v4  ;;  %v7473_v1 = vpop.eup %7472 }
 0x65b   :  { %v987_v16 = vmul.f32 %v7473_v1, %v9456_v11 }
 0x65c   :  { %v1818_v53 = vpop.f32.mrf.mxu3 }
 0x65d   :  { %v9618_v33 = vadd.f32 %v1818_v53, %v9091_v63  ;;  %v9638_v38 = vpop.xlane.xlu0 %1517 }
 0x661   :  { %1854 = vmax.xlane.f32.xlu0 %v9599_v27  ;;  %1852 = vmax.xlane.f32.xlu2 %v9596_v32 }
 0x662   :  { %1589 = vadd.xlane.f32.xlu1 %v9601_v49 }
 0x664   :  { %v1820_v43 = vpop.f32.mrf.mxu3 }
 0x665   :  { %v9622_v44 = vadd.f32 %v1820_v43, %v9102_v62 }
 0x669   :  { %1523 = vmax.xlane.f32.xlu0 %v9610_v37  ;;  %1521 = vmax.xlane.f32.xlu2 %v9607_v5 }
 0x66c   :  { %v1823_v25 = vpop.f32.mrf.mxu3 }
 0x66d   :  { %v9615_v51 = vadd.f32 %v1823_v25, %v9115_v14 }
 0x66f   :  { %1860 = vmax.xlane.f32.xlu1 %v9615_v51 }
 0x671   :  { %1858 = vmax.xlane.f32.xlu0 %v9622_v44  ;;  %1856 = vmax.xlane.f32.xlu2 %v9618_v33 }
 0x674   :  { %v1825_v48 = vpop.f32.mrf.mxu3 }
 0x67c   :  { %v1828_v45 = vpop.f32.mrf.mxu3 }
 0x67d   :  { %v9627_v60 = vadd.f32 %v1828_v45, %v9141_v12 }
 0x67f   :  { %1864 = vmax.xlane.f32.xlu0 %v9627_v60 }
 0x684   :  { %v1830_v14 = vpop.f32.mrf.mxu3 }
 0x685   :  { %v9631_v63 = vadd.f32 %v1830_v14, %v9175_v58 }
 0x687   :  { %1866 = vmax.xlane.f32.xlu1 %v9631_v63 }
 0x69b   :  { %v950_v62 = vpop.xlane.xlu2 %949 }
 0x69c   :  { %7474 = vrcp.f32 %v950_v62 }
 0x6a2   :  { %v7475_v26 = vpop.eup %7474 }
 0x6a3   :  { %v952_v41 = vpop.xlane.xlu1 %951  ;;  %v988_v12 = vmul.f32 %v7475_v26, %v9522_v34 }
 0x6a4   :  { %7476 = vrcp.f32 %v952_v41 }
 0x6a5   :  { %v1023_v31 = vpack.c.bf16 %v988_v12, %v987_v16 }
 0x6a7   :  { %1382 = vmatmul.bf16.gmra.mxu0 %v1023_v31 }
 0x6aa   :  { %v7477_v6 = vpop.eup %7476 }
 0x6ab   :  { %v1512_v47 = vpop.xlane.xlu1 %1511  ;;  %v989_v11 = vmul.f32 %v7477_v6, %v9532_v54  ;;  %v7996_v54 = vld [vmem:[%s13281_s1 + $0x38] sm:$0xff] }
 0x6ac   :  { %v1540_v58 = vsub.f32 %v9543_v52, %v1512_v47  ;;  %v954_v3 = vpop.xlane.xlu2 %953  ;;  %v1490_v52 = vpop.f32.mrf.mxu1 }
 0x6ad   :  { %7478 = vrcp.f32 %v954_v3 }
 0x6ae   :  { %v1559_v7 = vmul.f32 1.442695, %v1540_v58 }
 0x6b0   :  { %7480 = vpow2.f32 %v1559_v7 }
 0x6b3   :  { %v7479_v53 = vpop.eup %7478 }
 0x6b4   :  { %v956_v57 = vpop.xlane.xlu1 %955  ;;  %v958_v43 = vpop.xlane.xlu2 %957  ;;  %v990_v34 = vmul.f32 %v7479_v53, %v9545_v0  ;;  %v9649_v0 = vadd.f32 %v7996_v54, %v1825_v48 }
 0x6b5   :  { %7482 = vrcp.f32 %v956_v57  ;;  %v1492_v31 = vpop.f32.mrf.mxu1 }
 0x6b6   :  { %v9642_v25 = vpop.eup %7480  ;;  %v1024_v45 = vpack.c.bf16 %v990_v34, %v989_v11  ;;  %7484 = vrcp.f32 %v958_v43  ;;  %v9658_v53 = vadd.f32 %v1492_v31, %v9201_v17  ;;  %v7997_v17 = vld [vmem:[%s13281_s1 + $0x50] sm:$0xff] }
 0x6b7   :  { %1591 = vadd.xlane.f32.xlu2 %v9642_v25 }
 0x6b8   :  { %1387 = vmatmul.bf16.gmra.mxu0 %v1024_v45 }
 0x6ba   :  { %v1851_v14 = vpop.xlane.xlu0 %1850 }
 0x6bb   :  { %v1881_v62 = vsub.f32 %v9562_v18, %v1851_v14  ;;  %v7483_v16 = vpop.eup %7482 }
 0x6bc   :  { %v1516_v1 = vpop.xlane.xlu1 %1515  ;;  %v962_v26 = vpop.xlane.xlu2 %961  ;;  %v991_v47 = vmul.f32 %v7483_v16, %v9552_v10 }
 0x6bd   :  { %v1898_v41 = vmul.f32 1.442695, %v1881_v62  ;;  %v7485_v12 = vpop.eup %7484  ;;  %v1542_v57 = vsub.f32 %v9567_v39, %v1516_v1  ;;  %v1833_v10 = vpop.f32.mrf.mxu3 }
 0x6be   :  { %v992_v58 = vmul.f32 %v7485_v12, %v9550_v9  ;;  %v1541_v9 = vsub.f32 %v9479_v56, %v1514_v23  ;;  %v9669_v14 = vadd.f32 %v7997_v17, %v1833_v10  ;;  %v1495_v23 = vpop.f32.mrf.mxu1 }
 0x6bf   :  { %7486 = vpow2.f32 %v1898_v41  ;;  %1862 = vmax.xlane.f32.xlu2 %v9649_v0  ;;  %v1563_v11 = vmul.f32 1.442695, %v1542_v57 }
 0x6c0   :  { %v1025_v48 = vpack.c.bf16 %v992_v58, %v991_v47  ;;  %v1561_v39 = vmul.f32 1.442695, %v1541_v9  ;;  %v7998_v9 = vld [vmem:[%s13281_s1 + $0x68] sm:$0xff] }
 0x6c4   :  { %v1849_v18 = vpop.xlane.xlu2 %1848  ;;  %v960_v7 = vpop.xlane.xlu1 %959 }
 0x6c5   :  { %v9654_v3 = vpop.eup %7486  ;;  %v1880_v6 = vsub.f32 %v9576_v50, %v1849_v18  ;;  %7488 = vrcp.f32 %v960_v7  ;;  %v9667_v50 = vadd.f32 %v7997_v17, %v1490_v52 }
 0x6c6   :  { %1930 = vadd.xlane.f32.xlu1 %v9654_v3 }
 0x6c7   :  { %v1896_v43 = vmul.f32 1.442695, %v1880_v6  ;;  %1527 = vmax.xlane.f32.xlu2 %v9658_v53 }
 0x6c8   :  { %1392 = vmatmul.bf16.gmra.mxu0 %v1025_v48 }
 0x6c9   :  { %7490 = vpow2.f32 %v1896_v43 }
 0x6ca   :  { %7492 = vrcp.f32 %v962_v26 }
 0x6cb   :  { %v7489_v62 = vpop.eup %7488 }
 0x6cc   :  { %v1588_v34 = vpop.xlane.xlu0 %1587  ;;  %v1586_v45 = vpop.xlane.xlu2 %1585  ;;  %v993_v1 = vmul.f32 %v7489_v62, %v9578_v35 }
 0x6cd   :  { %7494 = vrcp.f32 %v1588_v34  ;;  %v1520_v34 = vpop.xlane.xlu1 %1519 }
 0x6ce   :  { %7496 = vrcp.f32 %v1586_v45  ;;  %1525 = vmax.xlane.f32.xlu1 %v9667_v50 }
 0x6cf   :  { %v9672_v56 = vpop.eup %7490  ;;  %7498 = vpow2.f32 %v1563_v11  ;;  %1868 = vmax.xlane.f32.xlu2 %v9669_v14 }
 0x6d0   :  { %1928 = vadd.xlane.f32.xlu0 %v9672_v56  ;;  %v7493_v52 = vpop.eup %7492  ;;  %7500 = vpow2.f32 %v1561_v39 }
 0x6d1   :  { %v994_v31 = vmul.f32 %v7493_v52, %v9569_v21  ;;  %v1543_v21 = vsub.f32 %v9483_v22, %v9638_v38 }
 0x6d3   :  { %v7495_v26 = vpop.eup %7494  ;;  %v1026_v7 = vpack.c.bf16 %v994_v31, %v993_v1  ;;  %v1565_v17 = vmul.f32 1.442695, %v1543_v21 }
 0x6d4   :  { %v7497_v41 = vpop.eup %7496  ;;  %v1634_v54 = vmul.f32 %v7495_v26, %v9587_v19  ;;  %v1855_v16 = vpop.xlane.xlu0 %1854 }
 0x6d5   :  { %v1853_v12 = vpop.xlane.xlu2 %1852  ;;  %v9679_v47 = vpop.eup %7498  ;;  %v1633_v58 = vmul.f32 %v7497_v41, %v9585_v2  ;;  %v1883_v57 = vsub.f32 %v9599_v27, %v1855_v16  ;;  %v7999_v27 = vld [vmem:[%s13281_s1 + $0x58] sm:$0xff]  ;;  %v1544_v16 = vsub.f32 %v9590_v4, %v1520_v34 }
 0x6d6   :  { %v1882_v18 = vsub.f32 %v9596_v32, %v1853_v12  ;;  %1595 = vadd.xlane.f32.xlu1 %v9679_v47  ;;  %v9684_v6 = vpop.eup %7500  ;;  %v1497_v19 = vpop.f32.mrf.mxu1  ;;  %v9742_v34 = vld [vmem:[%s13281_s1 + $0x78] sm:$0xff] }
 0x6d7   :  { %v1673_v35 = vpack.c.bf16 %v1634_v54, %v1633_v58  ;;  %v1835_v2 = vpop.f32.mrf.mxu3  ;;  %v9695_v10 = vadd.f32 %v7998_v9, %v1497_v19  ;;  %v1902_v11 = vmul.f32 1.442695, %v1883_v57  ;;  %v1567_v31 = vmul.f32 1.442695, %v1544_v16  ;;  %v1590_v58 = vpop.xlane.xlu1 %1589 }
 0x6d8   :  { %v1900_v48 = vmul.f32 1.442695, %v1882_v18  ;;  %1397 = vmatmul.bf16.gmra.mxu0 %v1026_v7  ;;  %1593 = vadd.xlane.f32.xlu0 %v9684_v6  ;;  %v9701_v22 = vadd.f32 %v7999_v27, %v1835_v2 }
 0x6d9   :  { %1689 = vmatmul.bf16.vlgmr.msrb.gmra.mxu2 %v1673_v35 }
 0x6da   :  { %7502 = vpow2.f32 %v1900_v48 }
 0x6db   :  { %7504 = vpow2.f32 %v1902_v11 }
 0x6dc   :  { %v1524_v32 = vpop.xlane.xlu0 %1523  ;;  %7506 = vpow2.f32 %v1565_v17 }
 0x6dd   :  { %v9690_v43 = vpop.xlane.xlu2 %1521  ;;  %v1546_v2 = vsub.f32 %v9610_v37, %v1524_v32 }
 0x6de   :  { %1531 = vmax.xlane.f32.xlu1 %v9695_v10  ;;  %v1500_v4 = vpop.f32.mrf.mxu1 }
 0x6df   :  { %v1838_v12 = vpop.f32.mrf.mxu3  ;;  %v1571_v27 = vmul.f32 1.442695, %v1546_v2 }
 0x6e0   :  { %v9703_v38 = vpop.eup %7502  ;;  %1870 = vmax.xlane.f32.xlu0 %v9701_v22 }
 0x6e1   :  { %1932 = vadd.xlane.f32.xlu2 %v9703_v38  ;;  %v9709_v1 = vpop.eup %7504 }
 0x6e2   :  { %v9711_v54 = vpop.eup %7506  ;;  %v1861_v48 = vpop.xlane.xlu1 %1860 }
 0x6e3   :  { %v1886_v21 = vsub.f32 %v9615_v51, %v1861_v48  ;;  %v8002_v51 = vld [vmem:[%s13281_s1 + $0x70] sm:$0xff] }
 0x6e4   :  { %v1859_v45 = vpop.xlane.xlu0 %1858 }
 0x6e5   :  { %v1857_v39 = vpop.xlane.xlu2 %1856  ;;  %v1885_v62 = vsub.f32 %v9622_v44, %v1859_v45  ;;  %v1908_v17 = vmul.f32 1.442695, %v1886_v21  ;;  %v9750_v45 = vadd.f32 %v8002_v51, %v1500_v4 }
 0x6e6   :  { %v1884_v52 = vsub.f32 %v9618_v33, %v1857_v39  ;;  %v8000_v33 = vld [vmem:[%s13281_s1 + $0x60] sm:$0xff]  ;;  %v1502_v11 = vpop.f32.mrf.mxu1 }
 0x6e7   :  { %v1906_v26 = vmul.f32 1.442695, %v1885_v62  ;;  %v9719_v44 = vadd.f32 %v8000_v33, %v1495_v23  ;;  %v1840_v35 = vpop.f32.mrf.mxu3  ;;  %v9730_v57 = vadd.f32 %v8000_v33, %v1838_v12 }
 0x6e8   :  { %v1904_v41 = vmul.f32 1.442695, %v1884_v52  ;;  %1934 = vadd.xlane.f32.xlu0 %v9709_v1  ;;  %v9732_v23 = vadd.f32 %v7998_v9, %v1840_v35  ;;  %v9745_v9 = vadd.f32 %v9742_v34, %v1502_v11  ;;  %v9771_v35 = vpop.f32.mrf.mxu0 }
 0x6e9   :  { %7508 = vpow2.f32 %v1906_v26  ;;  %1597 = vadd.xlane.f32.xlu2 %v9711_v54 }
 0x6ea   :  { %7510 = vpow2.f32 %v1904_v41 }
 0x6eb   :  { %7512 = vpow2.f32 %v1567_v31 }
 0x6ec   :  { %7514 = vpow2.f32 %v1908_v17 }
 0x6ed   :  { %7516 = vpow2.f32 %v1571_v27 }
 0x6ef   :  { %v9721_v18 = vpop.eup %7508  ;;  %v1843_v16 = vpop.f32.mrf.mxu3 }
 0x6f0   :  { %v9723_v7 = vpop.eup %7510  ;;  %1529 = vmax.xlane.f32.xlu0 %v9719_v44  ;;  %v9762_v31 = vadd.f32 %v8002_v51, %v1843_v16 }
 0x6f1   :  { %1938 = vadd.xlane.f32.xlu2 %v9721_v18  ;;  %1936 = vadd.xlane.f32.xlu1 %v9723_v7  ;;  %v9728_v19 = vpop.eup %7512 }
 0x6f2   :  { %v1865_v39 = vpop.xlane.xlu0 %1864  ;;  %v9755_v52 = vpop.eup %7514 }
 0x6f3   :  { %v1888_v37 = vsub.f32 %v9627_v60, %v1865_v39  ;;  %v9757_v26 = vpop.eup %7516  ;;  %v1545_v39 = vsub.f32 %v9607_v5, %v9690_v43 }
 0x6f5   :  { %v1912_v32 = vmul.f32 1.442695, %v1888_v37  ;;  %v9778_v37 = vpop.f32.mrf.mxu0 }
 0x6f7   :  { %7518 = vpow2.f32 %v1912_v32  ;;  %v1569_v32 = vmul.f32 1.442695, %v1545_v39 }
 0x6f8   :  { %1599 = vadd.xlane.f32.xlu0 %v9728_v19 }
 0x6f9   :  { %1874 = vmax.xlane.f32.xlu2 %v9732_v23  ;;  %1872 = vmax.xlane.f32.xlu1 %v9730_v57 }
 0x6fa   :  { %v1867_v62 = vpop.xlane.xlu1 %1866 }
 0x6fb   :  { %v1889_v41 = vsub.f32 %v9631_v63, %v1867_v62 }
 0x6fd   :  { %v1914_v12 = vmul.f32 1.442695, %v1889_v41  ;;  %v9764_v33 = vpop.eup %7518 }
 0x6ff   :  { %7520 = vpow2.f32 %v1914_v12 }
 0x700   :  { %1535 = vmax.xlane.f32.xlu0 %v9745_v9  ;;  %7522 = vrcp.f32 %v1590_v58 }
 0x701   :  { %1533 = vmax.xlane.f32.xlu2 %v9750_v45 }
 0x705   :  { %v9768_v60 = vpop.eup %7520 }
 0x706   :  { %v7523_v4 = vpop.eup %7522 }
 0x707   :  { %v1635_v2 = vmul.f32 %v7523_v4, %v9601_v49 }
 0x708   :  { %1940 = vadd.xlane.f32.xlu0 %v9755_v52 }
 0x709   :  { %1603 = vadd.xlane.f32.xlu2 %v9757_v26 }
 0x710   :  { %1876 = vmax.xlane.f32.xlu0 %v9762_v31 }
 0x711   :  { %1944 = vadd.xlane.f32.xlu2 %v9764_v33 }
 0x718   :  { %1946 = vadd.xlane.f32.xlu0 %v9768_v60 }
 0x72a   :  { %v1592_v63 = vpop.xlane.xlu2 %1591 }
 0x72b   :  { %7524 = vrcp.f32 %v1592_v63  ;;  %v9787_v63 = vpop.f32.mrf.mxu0 }
 0x731   :  { %v7525_v48 = vpop.eup %7524 }
 0x732   :  { %v1863_v21 = vpop.xlane.xlu2 %1862  ;;  %v1636_v11 = vmul.f32 %v7525_v48, %v9642_v25 }
 0x733   :  { %v1887_v17 = vsub.f32 %v9649_v0, %v1863_v21 }
 0x734   :  { %v1674_v27 = vpack.c.bf16 %v1636_v11, %v1635_v2  ;;  %v1845_v2 = vpop.f32.mrf.mxu3 }
 0x735   :  { %v1910_v51 = vmul.f32 1.442695, %v1887_v17 }
 0x736   :  { %1694 = vmatmul.bf16.gmra.mxu2 %v1674_v27 }
 0x737   :  { %7526 = vpow2.f32 %v1910_v51 }
 0x738   :  { %7528 = vpow2.f32 %v1569_v32 }
 0x739   :  { %v1931_v58 = vpop.xlane.xlu1 %1930 }
 0x73a   :  { %v1528_v62 = vpop.xlane.xlu2 %1527 }
 0x73b   :  { %v1548_v41 = vsub.f32 %v9658_v53, %v1528_v62 }
 0x73d   :  { %v9781_v16 = vpop.eup %7526  ;;  %v1575_v49 = vmul.f32 1.442695, %v1548_v41 }
 0x73e   :  { %1942 = vadd.xlane.f32.xlu1 %v9781_v16  ;;  %v9785_v12 = vpop.eup %7528 }
 0x73f   :  { %7530 = vpow2.f32 %v1575_v49 }
 0x740   :  { %7532 = vrcp.f32 %v1931_v58  ;;  %v9797_v58 = vadd.f32 %v9742_v34, %v1845_v2 }
 0x741   :  { %v1526_v25 = vpop.xlane.xlu1 %1525 }
 0x742   :  { %v1869_v0 = vpop.xlane.xlu2 %1868  ;;  %v1547_v48 = vsub.f32 %v9667_v50, %v1526_v25  ;;  %v9801_v50 = vpop.f32.mrf.mxu0 }
 0x743   :  { %v1929_v5 = vpop.xlane.xlu0 %1928  ;;  %v1890_v43 = vsub.f32 %v9669_v14, %v1869_v0 }
 0x744   :  { %7534 = vrcp.f32 %v1929_v5  ;;  %v1573_v27 = vmul.f32 1.442695, %v1547_v48 }
 0x745   :  { %v9789_v4 = vpop.eup %7530  ;;  %v1916_v53 = vmul.f32 1.442695, %v1890_v43 }
 0x746   :  { %1601 = vadd.xlane.f32.xlu1 %v9785_v12  ;;  %1607 = vadd.xlane.f32.xlu2 %v9789_v4  ;;  %v7533_v21 = vpop.eup %7532 }
 0x747   :  { %7536 = vpow2.f32 %v1916_v53  ;;  %v1977_v14 = vmul.f32 %v7533_v21, %v9654_v3 }
 0x749   :  { %v1596_v11 = vpop.xlane.xlu1 %1595 }
 0x74a   :  { %v7535_v17 = vpop.eup %7534  ;;  %7538 = vrcp.f32 %v1596_v11  ;;  %v9812_v11 = vpop.f32.mrf.mxu0 }
 0x74b   :  { %v1976_v51 = vmul.f32 %v7535_v17, %v9672_v56  ;;  %v1594_v39 = vpop.xlane.xlu0 %1593 }
 0x74c   :  { %7540 = vrcp.f32 %v1594_v39 }
 0x74d   :  { %v9799_v32 = vpop.eup %7536  ;;  %v2016_v62 = vpack.c.bf16 %v1977_v14, %v1976_v51  ;;  %7542 = vpow2.f32 %v1573_v27 }
 0x74e   :  { %1878 = vmax.xlane.f32.xlu1 %v9797_v58  ;;  %1948 = vadd.xlane.f32.xlu0 %v9799_v32 }
 0x74f   :  { %2032 = vmatmul.bf16.vlgmr.msrb.gmra.mxu0 %v2016_v62 }
 0x750   :  { %v7539_v3 = vpop.eup %7538 }
 0x751   :  { %v1532_v41 = vpop.xlane.xlu1 %1531  ;;  %v1638_v56 = vmul.f32 %v7539_v3, %v9679_v47 }
 0x752   :  { %v7541_v49 = vpop.eup %7540  ;;  %v1550_v25 = vsub.f32 %v9695_v10, %v1532_v41  ;;  %v9820_v27 = vpop.f32.mrf.mxu0 }
 0x753   :  { %v1871_v34 = vpop.xlane.xlu0 %1870  ;;  %v1637_v0 = vmul.f32 %v7541_v49, %v9684_v6  ;;  %v9809_v48 = vpop.eup %7542 }
 0x754   :  { %v1579_v5 = vmul.f32 1.442695, %v1550_v25  ;;  %v1891_v43 = vsub.f32 %v9701_v22, %v1871_v34  ;;  %v1933_v53 = vpop.xlane.xlu2 %1932 }
 0x755   :  { %v1675_v21 = vpack.c.bf16 %v1638_v56, %v1637_v0 }
 0x756   :  { %7544 = vpow2.f32 %v1579_v5  ;;  %v1918_v2 = vmul.f32 1.442695, %v1891_v43  ;;  %1605 = vadd.xlane.f32.xlu1 %v9809_v48 }
 0x757   :  { %1699 = vmatmul.bf16.gmra.mxu2 %v1675_v21 }
 0x758   :  { %7546 = vpow2.f32 %v1918_v2 }
 0x759   :  { %7548 = vrcp.f32 %v1933_v53 }
 0x75a   :  { %v9825_v5 = vpop.f32.mrf.mxu0 }
 0x75b   :  { %v1935_v47 = vpop.xlane.xlu0 %1934 }
 0x75c   :  { %v9814_v10 = vpop.eup %7544  ;;  %7550 = vrcp.f32 %v1935_v47  ;;  %v1598_v6 = vpop.xlane.xlu2 %1597  ;;  %v7265_v47 = vld [vmem:[%s13282_s6 + $0x18] sm:$0xff] }
 0x75d   :  { %1611 = vadd.xlane.f32.xlu0 %v9814_v10  ;;  %2158 = vmatpush.bf16.msrb.mxu1 %v7265_v47 }
 0x75e   :  { %v9817_v22 = vpop.eup %7546 }
 0x75f   :  { %1950 = vadd.xlane.f32.xlu1 %v9817_v22  ;;  %v7549_v17 = vpop.eup %7548 }
 0x760   :  { %v1978_v39 = vmul.f32 %v7549_v17, %v9703_v38 }
 0x762   :  { %v7551_v14 = vpop.eup %7550 }
 0x763   :  { %v1530_v51 = vpop.xlane.xlu0 %1529  ;;  %v1979_v62 = vmul.f32 %v7551_v14, %v9709_v1 }
 0x764   :  { %v1549_v3 = vsub.f32 %v9719_v44, %v1530_v51  ;;  %v1937_v41 = vpop.xlane.xlu1 %1936  ;;  %v1939_v56 = vpop.xlane.xlu2 %1938 }
 0x765   :  { %v2017_v49 = vpack.c.bf16 %v1979_v62, %v1978_v39  ;;  %7552 = vrcp.f32 %v1937_v41 }
 0x766   :  { %v1577_v25 = vmul.f32 1.442695, %v1549_v3  ;;  %7554 = vrcp.f32 %v1939_v56 }
 0x767   :  { %2037 = vmatmul.bf16.gmra.mxu0 %v2017_v49 }
 0x768   :  { %7556 = vpow2.f32 %v1577_v25  ;;  %v9840_v25 = vpop.f32.mrf.mxu0 }
 0x769   :  { %7558 = vrcp.f32 %v1598_v6 }
 0x76b   :  { %v1600_v34 = vpop.xlane.xlu0 %1599  ;;  %v7553_v0 = vpop.eup %7552 }
 0x76c   :  { %7560 = vrcp.f32 %v1600_v34  ;;  %v1873_v43 = vpop.xlane.xlu1 %1872  ;;  %v7555_v38 = vpop.eup %7554  ;;  %v1980_v14 = vmul.f32 %v7553_v0, %v9723_v7 }
 0x76d   :  { %v1892_v1 = vsub.f32 %v9730_v57, %v1873_v43  ;;  %v1875_v53 = vpop.xlane.xlu2 %1874  ;;  %v1981_v51 = vmul.f32 %v7555_v38, %v9721_v18 }
 0x76e   :  { %v9828_v44 = vpop.eup %7556  ;;  %v1893_v21 = vsub.f32 %v9732_v23, %v1875_v53 }
 0x76f   :  { %v1920_v2 = vmul.f32 1.442695, %v1892_v1  ;;  %1609 = vadd.xlane.f32.xlu2 %v9828_v44  ;;  %v7559_v6 = vpop.eup %7558  ;;  %v2018_v49 = vpack.c.bf16 %v1981_v51, %v1980_v14 }
 0x770   :  { %v1922_v17 = vmul.f32 1.442695, %v1893_v21  ;;  %v1639_v23 = vmul.f32 %v7559_v6, %v9711_v54  ;;  %v9851_v43 = vpop.f32.mrf.mxu0 }
 0x771   :  { %7562 = vpow2.f32 %v1920_v2 }
 0x772   :  { %v7561_v57 = vpop.eup %7560  ;;  %7564 = vpow2.f32 %v1922_v17  ;;  %v7264_v17 = vld [vmem:[%s13282_s6 + $0x10] sm:$0xff] }
 0x773   :  { %v1536_v39 = vpop.xlane.xlu0 %1535  ;;  %v1640_v62 = vmul.f32 %v7561_v57, %v9728_v19  ;;  %2159 = vmatpush.bf16.msrb.mxu1 %v7264_v17  ;;  %v7263_v57 = vld [vmem:[%s13282_s6 + $0x8] sm:$0xff] }
 0x774   :  { %v1552_v3 = vsub.f32 %v9745_v9, %v1536_v39 }
 0x775   :  { %v1534_v41 = vpop.xlane.xlu2 %1533  ;;  %v1676_v56 = vpack.c.bf16 %v1640_v62, %v1639_v23  ;;  %v7262_v62 = vld [vmem:[%s13282_s6] sm:$0xff] }
 0x776   :  { %v1583_v34 = vmul.f32 1.442695, %v1552_v3  ;;  %v1551_v7 = vsub.f32 %v9750_v45, %v1534_v41 }
 0x777   :  { %v9843_v0 = vpop.eup %7562  ;;  %1704 = vmatmul.bf16.gmra.mxu2 %v1676_v56  ;;  %2042 = vmatmul.bf16.gmra.mxu0 %v2018_v49 }
 0x778   :  { %v9845_v18 = vpop.eup %7564  ;;  %7566 = vpow2.f32 %v1583_v34  ;;  %v1581_v54 = vmul.f32 1.442695, %v1551_v7  ;;  %1952 = vadd.xlane.f32.xlu1 %v9843_v0  ;;  %v9858_v21 = vpop.f32.mrf.mxu0  ;;  %2160 = vmatpush.bf16.msrb.mxu1 %v7263_v57 }
 0x779   :  { %1954 = vadd.xlane.f32.xlu2 %v9845_v18 }
 0x77a   :  { %7568 = vpow2.f32 %v1581_v54 }
 0x77b   :  { %v1941_v19 = vpop.xlane.xlu0 %1940 }
 0x77c   :  { %2161 = vmatpush.bf16.msrb.mxu1 %v7262_v62 }
 0x77d   :  { %v1604_v39 = vpop.xlane.xlu2 %1603 }
 0x77e   :  { %v9849_v9 = vpop.eup %7566 }
 0x780   :  { %v9853_v38 = vpop.eup %7568  ;;  %1615 = vadd.xlane.f32.xlu1 %v9849_v9  ;;  %v9863_v47 = vpop.f32.mrf.mxu0 }
 0x781   :  { %1613 = vadd.xlane.f32.xlu0 %v9853_v38 }
 0x783   :  { %v1877_v45 = vpop.xlane.xlu0 %1876 }
 0x784   :  { %v1894_v1 = vsub.f32 %v9762_v31, %v1877_v45 }
 0x786   :  { %v1924_v53 = vmul.f32 1.442695, %v1894_v1 }
 0x788   :  { %7570 = vpow2.f32 %v1924_v53  ;;  %v9865_v6 = vpop.f32.mrf.mxu0 }
 0x789   :  { %7572 = vrcp.f32 %v1941_v19  ;;  %v1945_v19 = vpop.xlane.xlu2 %1944 }
 0x78b   :  { %v1947_v7 = vpop.xlane.xlu0 %1946 }
 0x78e   :  { %v9860_v2 = vpop.eup %7570 }
 0x78f   :  { %1956 = vadd.xlane.f32.xlu2 %v9860_v2  ;;  %v7573_v23 = vpop.eup %7572 }
 0x790   :  { %v9870_v14 = vpop.f32.mrf.mxu0  ;;  %v1982_v56 = vmul.f32 %v7573_v23, %v9755_v52 }
 0x798   :  { %v9872_v31 = vpop.f32.mrf.mxu0 }
 0x7a0   :  { %v9882_v34 = vpop.f32.mrf.mxu0 }
 0x7b1   :  { %v1943_v51 = vpop.xlane.xlu1 %1942 }
 0x7b2   :  { %7574 = vrcp.f32 %v1943_v51 }
 0x7b3   :  { %7576 = vrcp.f32 %v1604_v39  ;;  %v9887_v39 = vpop.f32.mrf.mxu0 }
 0x7b8   :  { %v7575_v3 = vpop.eup %7574 }
 0x7b9   :  { %v1602_v41 = vpop.xlane.xlu1 %1601  ;;  %v1983_v49 = vmul.f32 %v7575_v3, %v9781_v16  ;;  %v7577_v45 = vpop.eup %7576 }
 0x7ba   :  { %7578 = vrcp.f32 %v1602_v41  ;;  %v1642_v51 = vmul.f32 %v7577_v45, %v9757_v26  ;;  %v1608_v62 = vpop.xlane.xlu2 %1607  ;;  %v1690_v41 = vpop.f32.mrf.mxu2 }
 0x7bb   :  { %v2019_v54 = vpack.c.bf16 %v1983_v49, %v1982_v56  ;;  %7580 = vrcp.f32 %v1947_v7 }
 0x7bc   :  { %7582 = vrcp.f32 %v1945_v19 }
 0x7bd   :  { %2047 = vmatmul.bf16.gmra.mxu0 %v2019_v54 }
 0x7c0   :  { %v7579_v1 = vpop.eup %7578 }
 0x7c1   :  { %v1879_v53 = vpop.xlane.xlu1 %1878  ;;  %v1641_v17 = vmul.f32 %v7579_v1, %v9785_v12  ;;  %v7581_v16 = vpop.eup %7580  ;;  %v1364_v1 = vadd.f32 %v9771_v35, %v9386_v55 }
 0x7c2   :  { %v1895_v52 = vsub.f32 %v9797_v58, %v1879_v53  ;;  %v7583_v3 = vpop.eup %7582  ;;  %v1985_v56 = vmul.f32 %v7581_v16, %v9768_v60  ;;  %v1949_v19 = vpop.xlane.xlu0 %1948  ;;  %v1366_v60 = vadd.f32 %v9778_v37, %v9401_v36 }
 0x7c3   :  { %v1677_v57 = vpack.c.bf16 %v1642_v51, %v1641_v17  ;;  %v1984_v12 = vmul.f32 %v7583_v3, %v9764_v33  ;;  %v1692_v53 = vpop.f32.mrf.mxu2 }
 0x7c4   :  { %v1926_v23 = vmul.f32 1.442695, %v1895_v52  ;;  %v1730_v52 = vadd.f32 %v1690_v41, %v1364_v1 }
 0x7c5   :  { %1709 = vmatmul.bf16.gmra.mxu2 %v1677_v57  ;;  %v2020_v26 = vpack.c.bf16 %v1985_v56, %v1984_v12  ;;  %v1731_v57 = vadd.f32 %v1692_v53, %v1366_v60 }
 0x7c6   :  { %7584 = vpow2.f32 %v1926_v23 }
 0x7c7   :  { %7586 = vrcp.f32 %v1608_v62 }
 0x7c9   :  { %v1606_v49 = vpop.xlane.xlu1 %1605 }
 0x7ca   :  { %7588 = vrcp.f32 %v1606_v49 }
 0x7cb   :  { %7590 = vrcp.f32 %v1949_v19  ;;  %v1369_v19 = vadd.f32 %v9787_v63, %v9431_v42 }
 0x7cc   :  { %v9891_v7 = vpop.eup %7584  ;;  %v2033_v58 = vpop.f32.mrf.mxu0 }
 0x7cd   :  { %1958 = vadd.xlane.f32.xlu0 %v9891_v7  ;;  %2052 = vmatmul.bf16.gmra.mxu0 %v2020_v26  ;;  %v7587_v54 = vpop.eup %7586  ;;  %v2073_v62 = vadd.f32 %v2033_v58, %v1730_v52 }
 0x7ce   :  { %v1644_v17 = vmul.f32 %v7587_v54, %v9789_v4 }
 0x7d0   :  { %v7589_v45 = vpop.eup %7588  ;;  %v1612_v49 = vpop.xlane.xlu0 %1611 }
 0x7d1   :  { %v1643_v33 = vmul.f32 %v7589_v45, %v9809_v48  ;;  %v7591_v56 = vpop.eup %7590  ;;  %v1695_v48 = vpop.f32.mrf.mxu2  ;;  %v1371_v45 = vadd.f32 %v9801_v50, %v9451_v8 }
 0x7d2   :  { %v1951_v51 = vpop.xlane.xlu1 %1950  ;;  %v1986_v36 = vmul.f32 %v7591_v56, %v9799_v32  ;;  %v1732_v1 = vadd.f32 %v1695_v48, %v1369_v19 }
 0x7d3   :  { %7592 = vrcp.f32 %v1951_v51  ;;  %v1678_v16 = vpack.c.bf16 %v1644_v17, %v1643_v33 }
 0x7d4   :  { %v2035_v23 = vpop.f32.mrf.mxu0  ;;  %7594 = vrcp.f32 %v1612_v49 }
 0x7d5   :  { %v2074_v3 = vadd.f32 %v2035_v23, %v1731_v57  ;;  %1714 = vmatmul.bf16.gmra.mxu2 %v1678_v16 }
 0x7d7   :  { %v2097_v55 = vpack.c.bf16 %v2074_v3, %v2073_v62 }
 0x7d9   :  { %v7593_v35 = vpop.eup %7592  ;;  %6811 = vmatmul.msk.bf16.vlgmr.msrb.gmra.mxu1 %vm115_vm0, %v2097_v55  ;;  %v1697_v26 = vpop.f32.mrf.mxu2  ;;  %v1374_v55 = vadd.f32 %v9812_v11, %v9460_v13 }
 0x7da   :  { %v1987_v37 = vmul.f32 %v7593_v35, %v9817_v22  ;;  %v7595_v58 = vpop.eup %7594  ;;  %v1733_v53 = vadd.f32 %v1697_v26, %v1371_v45  ;;  %v1376_v35 = vadd.f32 %v9820_v27, %v9476_v28  ;;  %v1379_v27 = vadd.f32 %v9825_v5, %v9485_v29 }
 0x7db   :  { %v1646_v22 = vmul.f32 %v7595_v58, %v9814_v10 }
 0x7dc   :  { %v2021_v4 = vpack.c.bf16 %v1987_v37, %v1986_v36 }
 0x7de   :  { %2057 = vmatmul.bf16.gmra.mxu0 %v2021_v4 }
 0x7e1   :  { %v1700_v16 = vpop.f32.mrf.mxu2 }
 0x7e2   :  { %v1610_v41 = vpop.xlane.xlu2 %1609  ;;  %v1734_v48 = vadd.f32 %v1700_v16, %v1374_v55  ;;  %v1391_v55 = vadd.f32 %v9865_v6, %v9508_v15 }
 0x7e3   :  { %7596 = vrcp.f32 %v1610_v41 }
 0x7e4   :  { %v2038_v12 = vpop.f32.mrf.mxu0 }
 0x7e5   :  { %v2075_v52 = vadd.f32 %v2038_v12, %v1732_v1 }
 0x7e9   :  { %v7597_v54 = vpop.eup %7596  ;;  %v1702_v56 = vpop.f32.mrf.mxu2 }
 0x7ea   :  { %v1645_v32 = vmul.f32 %v7597_v54, %v9828_v44  ;;  %v1735_v4 = vadd.f32 %v1702_v56, %v1376_v35 }
 0x7eb   :  { %v1953_v60 = vpop.xlane.xlu1 %1952 }
 0x7ec   :  { %7598 = vrcp.f32 %v1953_v60  ;;  %v1955_v33 = vpop.xlane.xlu2 %1954  ;;  %v2040_v17 = vpop.f32.mrf.mxu0  ;;  %v1679_v51 = vpack.c.bf16 %v1646_v22, %v1645_v32 }
 0x7ed   :  { %7600 = vrcp.f32 %v1955_v33  ;;  %v2076_v57 = vadd.f32 %v2040_v17, %v1733_v53 }
 0x7ee   :  { %1719 = vmatmul.bf16.gmra.mxu2 %v1679_v51 }
 0x7ef   :  { %v2098_v42 = vpack.c.bf16 %v2076_v57, %v2075_v52  ;;  %v1386_v52 = vadd.f32 %v9858_v21, %v9500_v30 }
 0x7f1   :  { %6812 = vmatmul.msk.bf16.gmra.mxu1 %vm115_vm0, %v2098_v42 }
 0x7f2   :  { %v7599_v8 = vpop.eup %7598 }
 0x7f3   :  { %v7601_v63 = vpop.eup %7600  ;;  %v1616_v50 = vpop.xlane.xlu1 %1615  ;;  %v1988_v10 = vmul.f32 %v7599_v8, %v9843_v0 }
 0x7f4   :  { %7602 = vrcp.f32 %v1616_v50  ;;  %v1614_v44 = vpop.xlane.xlu0 %1613  ;;  %v2043_v23 = vpop.f32.mrf.mxu0  ;;  %v1989_v62 = vmul.f32 %v7601_v63, %v9845_v18 }
 0x7f5   :  { %7604 = vrcp.f32 %v1614_v44  ;;  %v2077_v18 = vadd.f32 %v2043_v23, %v1734_v48 }
 0x7f6   :  { %v2022_v3 = vpack.c.bf16 %v1989_v62, %v1988_v10 }
 0x7f8   :  { %2062 = vmatmul.bf16.gmra.mxu0 %v2022_v3  ;;  %v1389_v3 = vadd.f32 %v9863_v47, %v9506_v61 }
 0x7fa   :  { %v7603_v36 = vpop.eup %7602  ;;  %v1705_v13 = vpop.f32.mrf.mxu2 }
 0x7fb   :  { %v7605_v37 = vpop.eup %7604  ;;  %v1648_v0 = vmul.f32 %v7603_v36, %v9849_v9  ;;  %v1381_v9 = vadd.f32 %v9840_v25, %v9492_v24  ;;  %v1384_v25 = vadd.f32 %v9851_v43, %v9498_v20  ;;  %v13529_v43 = vld [vmem:[#allocation2_spill] sm:$0xff] }
 0x7fc   :  { %v2045_v49 = vpop.f32.mrf.mxu0  ;;  %v1647_v41 = vmul.f32 %v7605_v37, %v9853_v38  ;;  %v1736_v38 = vadd.f32 %v1705_v13, %v1379_v27  ;;  %v13532_v27 = vld [vmem:[#allocation27_spill] sm:$0xff] }
 0x7fd   :  { %v2078_v12 = vadd.f32 %v2045_v49, %v1735_v4  ;;  %v13530_v4 = vld [vmem:[#allocation3_spill] sm:$0xff] }
 0x7fe   :  { %v1680_v26 = vpack.c.bf16 %v1648_v0, %v1647_v41 }
 0x7ff   :  { %v2099_v58 = vpack.c.bf16 %v2078_v12, %v2077_v18 }
 0x800   :  { %1724 = vmatmul.bf16.gmra.mxu2 %v1680_v26  ;;  %v13531_v26 = vld [vmem:[#allocation4_spill] sm:$0xff] }
 0x801   :  { %6813 = vmatmul.msk.bf16.gmra.mxu1 %vm115_vm0, %v2099_v58 }
 0x802   :  { %v1957_v54 = vpop.xlane.xlu2 %1956  ;;  %v1707_v28 = vpop.f32.mrf.mxu2 }
 0x803   :  { %7606 = vrcp.f32 %v1957_v54  ;;  %v1737_v45 = vadd.f32 %v1707_v28, %v1381_v9  ;;  %v1394_v9 = vadd.f32 %v9870_v14, %v13532_v27 }
 0x809   :  { %v7607_v53 = vpop.eup %7606 }
 0x80a   :  { %v1990_v51 = vmul.f32 %v7607_v53, %v9860_v2  ;;  %v9933_v2 = vld [vmem:[%s13278_s10] sm:$0xff] }
 0x83a   :  { %v2048_v11 = vpop.f32.mrf.mxu0 }
 0x83b   :  { %v2079_v22 = vadd.f32 %v2048_v11, %v1736_v38 }
 0x840   :  { %v1959_v19 = vpop.xlane.xlu0 %1958 }
 0x841   :  { %7608 = vrcp.f32 %v1959_v19  ;;  %v1396_v19 = vadd.f32 %v9872_v31, %v9517_v59 }
 0x842   :  { %v2050_v32 = vpop.f32.mrf.mxu0 }
 0x843   :  { %v2080_v1 = vadd.f32 %v2050_v32, %v1737_v45  ;;  %v13533_v45 = vld [vmem:[#allocation5_spill] sm:$0xff] }
 0x845   :  { %v2100_v60 = vpack.c.bf16 %v2080_v1, %v2079_v22 }
 0x847   :  { %v7609_v33 = vpop.eup %7608  ;;  %6814 = vmatmul.msk.bf16.gmra.mxu1 %vm115_vm0, %v2100_v60 }
 0x848   :  { %v1710_v17 = vpop.f32.mrf.mxu2  ;;  %v1991_v29 = vmul.f32 %v7609_v33, %v9891_v7  ;;  %v9936_v7 = vperm.slane %v9933_v2, 3 }
 0x849   :  { %v1738_v57 = vadd.f32 %v1710_v17, %v1384_v25 }
 0x84a   :  { %v2053_v5 = vpop.f32.mrf.mxu0  ;;  %v2023_v24 = vpack.c.bf16 %v1991_v29, %v1990_v51 }
 0x84b   :  { %v2081_v63 = vadd.f32 %v2053_v5, %v1738_v57  ;;  %v13534_v5 = vld [vmem:[#allocation6_spill] sm:$0xff] }
 0x84c   :  { %2067 = vmatmul.bf16.gmra.mxu0 %v2023_v24 }
 0x850   :  { %v1712_v16 = vpop.f32.mrf.mxu2 }
 0x851   :  { %v1739_v42 = vadd.f32 %v1712_v16, %v1386_v52  ;;  %v13535_v52 = vld [vmem:[#allocation7_spill] sm:$0xff] }
 0x852   :  { %v2055_v8 = vpop.f32.mrf.mxu0 }
 0x853   :  { %v2082_v50 = vadd.f32 %v2055_v8, %v1739_v42  ;;  %v8032_v42 = vmov 64.0  }
 0x854   :  { %7610 = vrcp.f32 %v8032_v42 }
 0x855   :  { %v2101_v10 = vpack.c.bf16 %v2082_v50, %v2081_v63 }
 0x856   :  { %v2163_v44 = vpop.f32.mrf.mxu1 }
 0x857   :  { %v2164_v20 = vadd.f32 %v2163_v44, %v9936_v7  ;;  %6815 = vmatmul.msk.bf16.gmra.mxu1 %vm115_vm0, %v2101_v10 }
 0x858   :  { %v1715_v30 = vpop.f32.mrf.mxu2 }
 0x859   :  { %v9941_v21 = vadd.f32 %v2164_v20, %v13529_v43  ;;  %v1740_v36 = vadd.f32 %v1715_v30, %v1389_v3  ;;  %v13536_v43 = vld [vmem:[#allocation8_spill] sm:$0xff] }
 0x85a   :  { %v7611_v8 = vpop.eup %7610 }
 0x85b   :  { %v2058_v23 = vpop.f32.mrf.mxu0  ;;  %v2219_v62 = vsel %vm115_vm0, %v9941_v21, 0.0  ;;  %v2268_v63 = vmul.f32 64.0, %v7611_v8  ;;  %vm2272_vm1 = vweird.f32 %v7611_v8 }
 0x85c   :  { %2220 = vadd.xlane.f32.xlu1 %v2219_v62  ;;  %v2083_v18 = vadd.f32 %v2058_v23, %v1740_v36  ;;  %v1399_v36 = vadd.f32 %v9882_v34, %v9529_v40 }
 0x85d   :  { %v2269_v50 = vsub.f32 1.0, %v2268_v63 }
 0x85e   :  { %v2165_v56 = vpop.f32.mrf.mxu1 }
 0x85f   :  { %v2166_v35 = vadd.f32 %v2165_v56, %v9936_v7  ;;  %v2270_v30 = vmul.f32 %v7611_v8, %v2269_v50 }
 0x860   :  { %v1717_v37 = vpop.f32.mrf.mxu2 }
 0x861   :  { %v1741_v48 = vadd.f32 %v1717_v37, %v1391_v55  ;;  %v9951_v0 = vadd.f32 %v2166_v35, %v13530_v4  ;;  %v2271_v56 = vadd.f32 %v7611_v8, %v2270_v30  ;;  %v1401_v37 = vadd.f32 %v9887_v39, %v9537_v46 }
 0x863   :  { %v2060_v49 = vpop.f32.mrf.mxu0  ;;  %v2222_v41 = vsel %vm115_vm0, %v9951_v0, 0.0  ;;  %v9991_v35 = vsel %vm2272_vm1, %v7611_v8, %v2271_v56  ;;  %v13540_v8 = vld [vmem:[#allocation11_spill] sm:$0xff] }
 0x864   :  { %v2084_v12 = vadd.f32 %v2060_v49, %v1741_v48  ;;  %2223 = vadd.xlane.f32.xlu2 %v2222_v41  ;;  %13537 = vst [vmem:[#allocation26_spill] sm:$0xff] %v9991_v35 }
 0x866   :  { %v2102_v61 = vpack.c.bf16 %v2084_v12, %v2083_v18 }
 0x868   :  { %6816 = vmatmul.msk.bf16.gmra.mxu1 %vm115_vm0, %v2102_v61 }
 0x86e   :  { %v2168_v47 = vpop.f32.mrf.mxu1 }
 0x86f   :  { %v2169_v15 = vadd.f32 %v2168_v47, %v9936_v7 }
 0x871   :  { %v1720_v6 = vpop.f32.mrf.mxu2  ;;  %v9958_v58 = vadd.f32 %v2169_v15, %v13531_v26 }
 0x872   :  { %v1742_v22 = vadd.f32 %v1720_v6, %v1394_v9 }
 0x873   :  { %v2225_v13 = vsel %vm115_vm0, %v9958_v58, 0.0 }
 0x874   :  { %2226 = vadd.xlane.f32.xlu0 %v2225_v13 }
 0x875   :  { %v2063_v11 = vpop.f32.mrf.mxu0 }
 0x876   :  { %v2170_v54 = vpop.f32.mrf.mxu1  ;;  %v2085_v33 = vadd.f32 %v2063_v11, %v1742_v22 }
 0x877   :  { %v2171_v28 = vadd.f32 %v2170_v54, %v9936_v7 }
 0x879   :  { %v1722_v38 = vpop.f32.mrf.mxu2  ;;  %v9968_v32 = vadd.f32 %v2171_v28, %v13533_v45 }
 0x87a   :  { %v1743_v1 = vadd.f32 %v1722_v38, %v1396_v19  ;;  %v13539_v38 = vld [vmem:[#allocation10_spill] sm:$0xff] }
 0x87b   :  { %v2228_v53 = vsel %vm115_vm0, %v9968_v32, 0.0 }
 0x87c   :  { %2229 = vadd.xlane.f32.xlu1 %v2228_v53 }
 0x87d   :  { %v2065_v60 = vpop.f32.mrf.mxu0 }
 0x87e   :  { %v2086_v17 = vadd.f32 %v2065_v60, %v1743_v1  ;;  %v2173_v51 = vpop.f32.mrf.mxu1 }
 0x87f   :  { %v2174_v29 = vadd.f32 %v2173_v51, %v9936_v7 }
 0x880   :  { %v2103_v14 = vpack.c.bf16 %v2086_v17, %v2085_v33 }
 0x881   :  { %v9974_v24 = vadd.f32 %v2174_v29, %v13534_v5  ;;  %v7273_v5 = vld [vmem:[%s13283_s7 + $0x34] sm:$0xf0] }
 0x882   :  { %6817 = vmatmul.msk.bf16.gmra.mxu1 %vm115_vm0, %v2103_v14  ;;  %v6845_v14 = vld [vmem:[%s13283_s7 + $0x30] sm:$0xf] }
 0x883   :  { %v2231_v59 = vsel %vm115_vm0, %v9974_v24, 0.0  ;;  %v1725_v10 = vpop.f32.mrf.mxu2 }
 0x884   :  { %2232 = vadd.xlane.f32.xlu2 %v2231_v59  ;;  %v1744_v4 = vadd.f32 %v1725_v10, %v1399_v36 }
 0x886   :  { %v2175_v31 = vpop.f32.mrf.mxu1 }
 0x887   :  { %v2176_v25 = vadd.f32 %v2175_v31, %v9936_v7  ;;  %v6846_v31 = vor.u32 %v7273_v5, %v6845_v14 }
 0x889   :  { %v9981_v57 = vadd.f32 %v2176_v25, %v13535_v52  ;;  %v6847_v25 = vld [vmem:[%s13283_s7 + $0x38] sm:$0xf0]  ;;  %2702 = vmatpush.bf16.msra.mxu2 %v6846_v31 }
 0x88b   :  { %v2234_v16 = vsel %vm115_vm0, %v9981_v57, 0.0  ;;  %v1727_v55 = vpop.f32.mrf.mxu2 }
 0x88c   :  { %2235 = vadd.xlane.f32.xlu0 %v2234_v16  ;;  %v1745_v49 = vadd.f32 %v1727_v55, %v1401_v37 }
 0x8c4   :  { %v2178_v44 = vpop.f32.mrf.mxu1 }
 0x8c5   :  { %v2179_v20 = vadd.f32 %v2178_v44, %v9936_v7 }
 0x8c7   :  { %v9987_v23 = vadd.f32 %v2179_v20, %v13536_v43  ;;  %v13541_v43 = vld [vmem:[#allocation12_spill] sm:$0xff] }
 0x8c9   :  { %v2068_v62 = vpop.f32.mrf.mxu0  ;;  %v2237_v3 = vsel %vm115_vm0, %v9987_v23, 0.0 }
 0x8ca   :  { %2238 = vadd.xlane.f32.xlu0 %v2237_v3  ;;  %v2087_v61 = vadd.f32 %v2068_v62, %v1744_v4 }
 0x8cc   :  { %v2180_v18 = vpop.f32.mrf.mxu1 }
 0x8cd   :  { %v2181_v40 = vadd.f32 %v2180_v18, %v9936_v7 }
 0x8cf   :  { %v2221_v48 = vpop.xlane.xlu1 %2220 }
 0x8d0   :  { %v2274_v41 = vmul.f32 %v9991_v35, %v2221_v48 }
 0x8d1   :  { %v2070_v12 = vpop.f32.mrf.mxu0 }
 0x8d2   :  { %v9999_v47 = vsub.f32 %v9941_v21, %v2274_v41  ;;  %v2088_v15 = vadd.f32 %v2070_v12, %v1745_v49  ;;  %v13538_v21 = vld [vmem:[#allocation9_spill] sm:$0xff] }
 0x8d3   :  { %v10011_v11 = vadd.f32 %v2181_v40, %v13538_v21  ;;  %v13543_v40 = vld [vmem:[#allocation14_spill] sm:$0xff] }
 0x8d4   :  { %v2104_v6 = vpack.c.bf16 %v2088_v15, %v2087_v61  ;;  %v2306_v26 = vmul.f32 %v9999_v47, %v9999_v47  ;;  %v2183_v54 = vpop.f32.mrf.mxu1 }
 0x8d5   :  { %v2184_v27 = vadd.f32 %v2183_v54, %v9936_v7  ;;  %v2240_v9 = vsel %vm115_vm0, %v10011_v11, 0.0 }
 0x8d6   :  { %v2322_v46 = vsel %vm115_vm0, %v2306_v26, 0.0  ;;  %6818 = vmatmul.msk.bf16.gmra.mxu1 %vm115_vm0, %v2104_v6 }
 0x8d7   :  { %2323 = vadd.xlane.f32.xlu1 %v2322_v46  ;;  %v2224_v34 = vpop.xlane.xlu2 %2223  ;;  %v10020_v45 = vadd.f32 %v2184_v27, %v13539_v38  ;;  %v7271_v38 = vld [vmem:[%s13283_s7 + $0x24] sm:$0xf0] }
 0x8d8   :  { %v2275_v39 = vmul.f32 %v9991_v35, %v2224_v34 }
 0x8da   :  { %v10008_v13 = vsub.f32 %v9951_v0, %v2275_v39  ;;  %v2243_v0 = vsel %vm115_vm0, %v10020_v45, 0.0 }
 0x8dc   :  { %v2307_v28 = vmul.f32 %v10008_v13, %v10008_v13  ;;  %v2185_v22 = vpop.f32.mrf.mxu1 }
 0x8dd   :  { %v2186_v17 = vadd.f32 %v2185_v22, %v9936_v7  ;;  %v6839_v22 = vld [vmem:[%s13283_s7 + $0x28] sm:$0xf0] }
 0x8de   :  { %v2325_v19 = vsel %vm115_vm0, %v2307_v28, 0.0 }
 0x8df   :  { %2241 = vadd.xlane.f32.xlu1 %v2240_v9  ;;  %2326 = vadd.xlane.f32.xlu2 %v2325_v19  ;;  %v10049_v63 = vadd.f32 %v2186_v17, %v13540_v8  ;;  %v6837_v19 = vld [vmem:[%s13283_s7 + $0x20] sm:$0xf]  ;;  %v6829_v17 = vld [vmem:[%s13283_s7 + $0x10] sm:$0xf]  ;;  %v7267_v8 = vld [vmem:[%s13283_s7 + $0x4] sm:$0xf0] }
 0x8e1   :  { %v2246_v20 = vsel %vm115_vm0, %v10049_v63, 0.0 }
 0x8e5   :  { %v2188_v52 = vpop.f32.mrf.mxu1 }
 0x8e6   :  { %v2189_v10 = vadd.f32 %v2188_v52, %v9936_v7 }
 0x8e7   :  { %v2227_v1 = vpop.xlane.xlu0 %2226  ;;  %2244 = vadd.xlane.f32.xlu1 %v2243_v0  ;;  %v6838_v0 = vor.u32 %v7271_v38, %v6837_v19 }
 0x8e8   :  { %v2276_v53 = vmul.f32 %v9991_v35, %v2227_v1  ;;  %v10059_v62 = vadd.f32 %v2189_v10, %v13541_v43  ;;  %v7266_v10 = vld [vmem:[%s13283_s7 + $0x4] sm:$0xf] }
 0x8e9   :  { %2703 = vmatpush.bf16.msra.mxu2 %v6838_v0 }
 0x8ea   :  { %v10026_v60 = vsub.f32 %v9958_v58, %v2276_v53  ;;  %v7272_v58 = vld [vmem:[%s13283_s7 + $0x34] sm:$0xf]  ;;  %v2249_v37 = vsel %vm115_vm0, %v10059_v62, 0.0  ;;  %v13544_v53 = vld [vmem:[#allocation15_spill] sm:$0xff] }
 0x8eb   :  { %v6850_v16 = vor.u32 %v7272_v58, %v6847_v25  ;;  %v6831_v58 = vld [vmem:[%s13283_s7 + $0x18] sm:$0xf0] }
 0x8ec   :  { %v2308_v33 = vmul.f32 %v10026_v60, %v10026_v60 }
 0x8ed   :  { %2751 = vmatpush.bf16.msra.mxu3 %v6850_v16  ;;  %v2190_v56 = vpop.f32.mrf.mxu1  ;;  %v6821_v16 = vld [vmem:[%s13283_s7] sm:$0xf] }
 0x8ee   :  { %v2328_v51 = vsel %vm115_vm0, %v2308_v33, 0.0  ;;  %v2191_v36 = vadd.f32 %v2190_v56, %v9936_v7 }
 0x8ef   :  { %v2230_v29 = vpop.xlane.xlu1 %2229  ;;  %2329 = vadd.xlane.f32.xlu2 %v2328_v51  ;;  %v7269_v51 = vld [vmem:[%s13283_s7 + $0x14] sm:$0xf0] }
 0x8f0   :  { %v2277_v59 = vmul.f32 %v9991_v35, %v2230_v29  ;;  %v7268_v29 = vld [vmem:[%s13283_s7 + $0x14] sm:$0xf]  ;;  %v6830_v5 = vor.u32 %v7269_v51, %v6829_v17  ;;  %v10162_v51 = vperm.slane %v9933_v2, 5 }
 0x8f1   :  { %v6834_v31 = vor.u32 %v7268_v29, %v6831_v58 }
 0x8f2   :  { %v10046_v42 = vsub.f32 %v9968_v32, %v2277_v59  ;;  %2704 = vmatpush.bf16.msra.mxu2 %v6830_v5  ;;  %v13546_v5 = vld [vmem:[#allocation17_spill] sm:$0xff] }
 0x8f4   :  { %v2309_v50 = vmul.f32 %v10046_v42, %v10046_v42 }
 0x8f6   :  { %v2331_v44 = vsel %vm115_vm0, %v2309_v50, 0.0  ;;  %v6822_v50 = vor.u32 %v7267_v8, %v6821_v16 }
 0x8f7   :  { %2332 = vadd.xlane.f32.xlu0 %v2331_v44  ;;  %2247 = vadd.xlane.f32.xlu2 %v2246_v20  ;;  %v2233_v30 = vpop.xlane.xlu2 %2232  ;;  %v6823_v44 = vld [vmem:[%s13283_s7 + $0x8] sm:$0xf0] }
 0x8f8   :  { %v2278_v32 = vmul.f32 %v9991_v35, %v2233_v30  ;;  %v6826_v20 = vor.u32 %v7266_v10, %v6823_v44  ;;  %2705 = vmatpush.bf16.msra.mxu2 %v6822_v50 }
 0x8fa   :  { %v10062_v3 = vsub.f32 %v9974_v24, %v2278_v32  ;;  %v13542_v24 = vld [vmem:[#allocation13_spill] sm:$0xff] }
 0x8fb   :  { %v10075_v18 = vadd.f32 %v2191_v36, %v13542_v24  ;;  %v13545_v24 = vld [vmem:[#allocation16_spill] sm:$0xff] }
 0x8fc   :  { %v2310_v55 = vmul.f32 %v10062_v3, %v10062_v3 }
 0x8fd   :  { %v2252_v26 = vsel %vm115_vm0, %v10075_v18, 0.0 }
 0x8fe   :  { %v2334_v48 = vsel %vm115_vm0, %v2310_v55, 0.0 }
 0x8ff   :  { %v2236_v4 = vpop.xlane.xlu0 %2235  ;;  %2250 = vadd.xlane.f32.xlu2 %v2249_v37  ;;  %2335 = vadd.xlane.f32.xlu0 %v2334_v48  ;;  %v2193_v12 = vpop.f32.mrf.mxu1 }
 0x900   :  { %v2279_v49 = vmul.f32 %v9991_v35, %v2236_v4  ;;  %v2194_v15 = vadd.f32 %v2193_v12, %v9936_v7 }
 0x902   :  { %v10072_v41 = vsub.f32 %v9981_v57, %v2279_v49  ;;  %v10084_v46 = vadd.f32 %v2194_v15, %v13543_v40 }
 0x904   :  { %v2311_v61 = vmul.f32 %v10072_v41, %v10072_v41  ;;  %v2255_v57 = vsel %vm115_vm0, %v10084_v46, 0.0 }
 0x906   :  { %v2337_v6 = vsel %vm115_vm0, %v2311_v61, 0.0 }
 0x907   :  { %2338 = vadd.xlane.f32.xlu1 %v2337_v6  ;;  %2253 = vadd.xlane.f32.xlu0 %v2252_v26  ;;  %v2195_v54 = vpop.f32.mrf.mxu1 }
 0x908   :  { %v2196_v27 = vadd.f32 %v2195_v54, %v9936_v7 }
 0x90a   :  { %v10109_v33 = vadd.f32 %v2196_v27, %v13544_v53 }
 0x90c   :  { %v2258_v25 = vsel %vm115_vm0, %v10109_v33, 0.0 }
 0x90f   :  { %2256 = vadd.xlane.f32.xlu0 %v2255_v57 }
 0x93d   :  { %v2239_v34 = vpop.xlane.xlu0 %2238 }
 0x93e   :  { %v2280_v39 = vmul.f32 %v9991_v35, %v2239_v34 }
 0x940   :  { %v10090_v21 = vsub.f32 %v9987_v23, %v2280_v39  ;;  %v7270_v23 = vld [vmem:[%s13283_s7 + $0x24] sm:$0xf] }
 0x941   :  { %v6842_v1 = vor.u32 %v7270_v23, %v6839_v22 }
 0x942   :  { %v2312_v28 = vmul.f32 %v10090_v21, %v10090_v21 }
 0x943   :  { %2752 = vmatpush.bf16.msra.mxu3 %v6842_v1 }
 0x944   :  { %v2340_v9 = vsel %vm115_vm0, %v2312_v28, 0.0 }
 0x945   :  { %2341 = vadd.xlane.f32.xlu1 %v2340_v9 }
 0x947   :  { %2753 = vmatpush.bf16.msra.mxu3 %v6834_v31  ;;  %v10169_v31 = vperm.slane %v9933_v2, 6 }
 0x94a   :  { %v2324_v14 = vpop.xlane.xlu1 %2323 }
 0x94b   :  { %v2370_v59 = vmul.f32 %v2324_v14, %v9991_v35  ;;  %2754 = vmatpush.bf16.msra.mxu3 %v6826_v20 }
 0x94d   :  { %v2386_v52 = vadd.f32 1e-05, %v2370_v59  ;;  %2259 = vadd.xlane.f32.xlu1 %v2258_v25 }
 0x94f   :  { %7612 = vrsqrt.f32 %v2386_v52  ;;  %vm2408_vm3 = vweird.f32 %v2386_v52 }
 0x952   :  { %v2242_v30 = vpop.xlane.xlu1 %2241  ;;  %v2327_v32 = vpop.xlane.xlu2 %2326 }
 0x953   :  { %v2281_v43 = vmul.f32 %v9991_v35, %v2242_v30  ;;  %v2371_v56 = vmul.f32 %v2327_v32, %v9991_v35  ;;  %v2198_v55 = vpop.f32.mrf.mxu1 }
 0x954   :  { %v2199_v36 = vadd.f32 %v2198_v55, %v9936_v7 }
 0x955   :  { %v7613_v37 = vpop.eup %7612  ;;  %v10142_v48 = vsub.f32 %v10011_v11, %v2281_v43  ;;  %v2387_v4 = vadd.f32 1e-05, %v2371_v56 }
 0x956   :  { %v2403_v49 = vmul.f32 %v7613_v37, %v2386_v52  ;;  %v10145_v12 = vadd.f32 %v2199_v36, %v13545_v24  ;;  %vm2409_vm2 = vweird.f32 %v7613_v37 }
 0x957   :  { %7614 = vrsqrt.f32 %v2387_v4  ;;  %v2313_v61 = vmul.f32 %v10142_v48, %v10142_v48  ;;  %vm2410_vm4 = vmor %vm2408_vm3, %vm2409_vm2  ;;  %vm2418_vm6 = vweird.f32 %v2387_v4 }
 0x958   :  { %v2404_v15 = vmul.f32 %v7613_v37, %v2403_v49  ;;  %v2261_v6 = vsel %vm115_vm0, %v10145_v12, 0.0 }
 0x959   :  { %2262 = vadd.xlane.f32.xlu1 %v2261_v6  ;;  %v2343_v26 = vsel %vm115_vm0, %v2313_v61, 0.0 }
 0x95a   :  { %v2405_v40 = vmul.f32 0.5, %v2404_v15  ;;  %v2245_v57 = vpop.xlane.xlu1 %2244  ;;  %2344 = vadd.xlane.f32.xlu2 %v2343_v26 }
 0x95b   :  { %v2282_v11 = vmul.f32 %v9991_v35, %v2245_v57  ;;  %v2200_v9 = vpop.f32.mrf.mxu1 }
 0x95c   :  { %v2406_v34 = vsub.f32 1.5, %v2405_v40  ;;  %v2201_v23 = vadd.f32 %v2200_v9, %v9936_v7 }
 0x95d   :  { %v7615_v39 = vpop.eup %7614  ;;  %v10154_v54 = vsub.f32 %v10020_v45, %v2282_v11 }
 0x95e   :  { %v2407_v28 = vmul.f32 %v7613_v37, %v2406_v34  ;;  %v2413_v27 = vmul.f32 %v7615_v39, %v2387_v4  ;;  %vm2419_vm5 = vweird.f32 %v7615_v39  ;;  %v10166_v58 = vadd.f32 %v2201_v23, %v13546_v5 }
 0x95f   :  { %v2314_v19 = vmul.f32 %v10154_v54, %v10154_v54  ;;  %vm2420_vm7 = vmor %vm2418_vm6, %vm2419_vm5 }
 0x960   :  { %v2414_v38 = vmul.f32 %v7615_v39, %v2413_v27  ;;  %v2411_v22 = vsel %vm2410_vm4, %v7613_v37, %v2407_v28  ;;  %v2264_v16 = vsel %vm115_vm0, %v10166_v58, 0.0 }
 0x961   :  { %v2346_v0 = vsel %vm115_vm0, %v2314_v19, 0.0  ;;  %v2562_v29 = vmul.f32 %v2411_v22, %v9999_v47 }
 0x962   :  { %v2415_v1 = vmul.f32 0.5, %v2414_v38  ;;  %2347 = vadd.xlane.f32.xlu2 %v2346_v0  ;;  %v2330_v53 = vpop.xlane.xlu2 %2329 }
 0x963   :  { %v2372_v45 = vmul.f32 %v2330_v53, %v9991_v35  ;;  %v2579_v25 = vmul.f32 %v10162_v51, %v2562_v29 }
 0x964   :  { %v2416_v17 = vsub.f32 1.5, %v2415_v1 }
 0x965   :  { %v2388_v14 = vadd.f32 1e-05, %v2372_v45  ;;  %v10179_v2 = vadd.f32 %v10169_v31, %v2579_v25 }
 0x966   :  { %v2417_v7 = vmul.f32 %v7615_v39, %v2416_v17 }
 0x967   :  { %7616 = vrsqrt.f32 %v2388_v14  ;;  %vm2428_vm9 = vweird.f32 %v2388_v14 }
 0x968   :  { %v2421_v59 = vsel %vm2420_vm7, %v7615_v39, %v2417_v7 }
 0x969   :  { %v2563_v52 = vmul.f32 %v2421_v59, %v10008_v13 }
 0x96a   :  { %v2333_v47 = vpop.xlane.xlu0 %2332  ;;  %2265 = vadd.xlane.f32.xlu2 %v2264_v16  ;;  %v2248_v8 = vpop.xlane.xlu2 %2247 }
 0x96b   :  { %v2580_v50 = vmul.f32 %v10162_v51, %v2563_v52  ;;  %v2373_v10 = vmul.f32 %v2333_v47, %v9991_v35  ;;  %v2283_v44 = vmul.f32 %v9991_v35, %v2248_v8 }
 0x96d   :  { %v7617_v20 = vpop.eup %7616  ;;  %v10182_v30 = vadd.f32 %v10169_v31, %v2580_v50  ;;  %v2389_v13 = vadd.f32 1e-05, %v2373_v10  ;;  %v10185_v32 = vsub.f32 %v10049_v63, %v2283_v44 }
 0x96e   :  { %v2423_v43 = vmul.f32 %v7617_v20, %v2388_v14  ;;  %vm2429_vm8 = vweird.f32 %v7617_v20 }
 0x96f   :  { %v2620_v56 = vpack.c.bf16 %v10182_v30, %v10179_v2  ;;  %7618 = vrsqrt.f32 %v2389_v13  ;;  %v2315_v55 = vmul.f32 %v10185_v32, %v10185_v32  ;;  %vm2430_vm10 = vmor %vm2428_vm9, %vm2429_vm8  ;;  %vm2438_vm12 = vweird.f32 %v2389_v13 }
 0x970   :  { %v2424_v36 = vmul.f32 %v7617_v20, %v2423_v43 }
 0x971   :  { %6851 = vmatmul.msk.bf16.vlgmr.msra.gmra.mxu2 %vm115_vm0, %v2620_v56  ;;  %6859 = vmatmul.msk.bf16.vlgmr.msra.gmra.mxu3 %vm115_vm0, %v2620_v56  ;;  %v2349_v37 = vsel %vm115_vm0, %v2315_v55, 0.0 }
 0x972   :  { %v2425_v4 = vmul.f32 0.5, %v2424_v36  ;;  %v2336_v49 = vpop.xlane.xlu0 %2335  ;;  %2350 = vadd.xlane.f32.xlu0 %v2349_v37  ;;  %v2251_v63 = vpop.xlane.xlu2 %2250 }
 0x973   :  { %v2374_v24 = vmul.f32 %v2336_v49, %v9991_v35  ;;  %v2284_v61 = vmul.f32 %v9991_v35, %v2251_v63 }
 0x974   :  { %v2426_v15 = vsub.f32 1.5, %v2425_v4 }
 0x975   :  { %v7619_v6 = vpop.eup %7618  ;;  %v2390_v26 = vadd.f32 1e-05, %v2374_v24  ;;  %v10197_v40 = vsub.f32 %v10059_v62, %v2284_v61 }
 0x976   :  { %v2427_v57 = vmul.f32 %v7617_v20, %v2426_v15  ;;  %v2433_v11 = vmul.f32 %v7619_v6, %v2389_v13  ;;  %vm2439_vm11 = vweird.f32 %v7619_v6 }
 0x977   :  { %7620 = vrsqrt.f32 %v2390_v26  ;;  %v2316_v34 = vmul.f32 %v10197_v40, %v10197_v40  ;;  %vm2440_vm13 = vmor %vm2438_vm12, %vm2439_vm11  ;;  %vm2448_vm15 = vweird.f32 %v2390_v26 }
 0x978   :  { %v2434_v39 = vmul.f32 %v7619_v6, %v2433_v11  ;;  %v2431_v27 = vsel %vm2430_vm10, %v7617_v20, %v2427_v57 }
 0x979   :  { %v2352_v28 = vsel %vm115_vm0, %v2316_v34, 0.0  ;;  %v2564_v1 = vmul.f32 %v2431_v27, %v10026_v60 }
 0x97a   :  { %v2435_v9 = vmul.f32 0.5, %v2434_v39  ;;  %v2339_v19 = vpop.xlane.xlu1 %2338  ;;  %v2254_v38 = vpop.xlane.xlu0 %2253  ;;  %2353 = vadd.xlane.f32.xlu0 %v2352_v28 }
 0x97b   :  { %v2375_v62 = vmul.f32 %v2339_v19, %v9991_v35  ;;  %v2285_v23 = vmul.f32 %v9991_v35, %v2254_v38  ;;  %v2581_v60 = vmul.f32 %v10162_v51, %v2564_v1  ;;  %v7289_v19 = vld [vmem:[%s13284_s8 + $0x78] sm:$0xff] }
 0x97c   :  { %v2436_v0 = vsub.f32 1.5, %v2435_v9  ;;  %3022 = vmatpush.bf16.msra.mxu1 %v7289_v19 }
 0x97d   :  { %v7621_v22 = vpop.eup %7620  ;;  %v2391_v53 = vadd.f32 1e-05, %v2375_v62  ;;  %v10206_v45 = vsub.f32 %v10075_v18, %v2285_v23  ;;  %v10219_v44 = vadd.f32 %v10169_v31, %v2581_v60  ;;  %v7278_v60 = vld [vmem:[%s13284_s8 + $0x20] sm:$0xff] }
 0x97e   :  { %v2437_v17 = vmul.f32 %v7619_v6, %v2436_v0  ;;  %v2443_v29 = vmul.f32 %v7621_v22, %v2390_v26  ;;  %vm2449_vm14 = vweird.f32 %v7621_v22  ;;  %v7280_v0 = vld [vmem:[%s13284_s8 + $0x30] sm:$0xff] }
 0x97f   :  { %7622 = vrsqrt.f32 %v2391_v53  ;;  %v2317_v14 = vmul.f32 %v10206_v45, %v10206_v45  ;;  %vm2450_vm1 = vmor %vm2448_vm15, %vm2449_vm14  ;;  %vm2458_vm3 = vweird.f32 %v2391_v53 }
 0x980   :  { %v2441_v5 = vsel %vm2440_vm13, %v7619_v6, %v2437_v17  ;;  %v2444_v7 = vmul.f32 %v7621_v22, %v2443_v29  ;;  %v7287_v17 = vld [vmem:[%s13284_s8 + $0x68] sm:$0xff] }
 0x981   :  { %v2565_v59 = vmul.f32 %v2441_v5, %v10046_v42  ;;  %v2355_v25 = vsel %vm115_vm0, %v2317_v14, 0.0 }
 0x982   :  { %v2445_v52 = vmul.f32 0.5, %v2444_v7  ;;  %2356 = vadd.xlane.f32.xlu1 %v2355_v25  ;;  %v2257_v18 = vpop.xlane.xlu0 %2256 }
 0x983   :  { %v2286_v16 = vmul.f32 %v9991_v35, %v2257_v18  ;;  %v2582_v47 = vmul.f32 %v10162_v51, %v2565_v59 }
 0x984   :  { %v2446_v8 = vsub.f32 1.5, %v2445_v52  ;;  %v7286_v52 = vld [vmem:[%s13284_s8 + $0x60] sm:$0xff] }
 0x985   :  { %v7623_v50 = vpop.eup %7622  ;;  %v10216_v10 = vsub.f32 %v10084_v46, %v2286_v16  ;;  %v10222_v42 = vadd.f32 %v10169_v31, %v2582_v47 }
 0x986   :  { %v2447_v20 = vmul.f32 %v7621_v22, %v2446_v8  ;;  %v2453_v13 = vmul.f32 %v7623_v50, %v2391_v53  ;;  %vm2459_vm2 = vweird.f32 %v7623_v50  ;;  %v7279_v53 = vld [vmem:[%s13284_s8 + $0x28] sm:$0xff]  ;;  %v7285_v8 = vld [vmem:[%s13284_s8 + $0x58] sm:$0xff] }
 0x987   :  { %v2621_v43 = vpack.c.bf16 %v10222_v42, %v10219_v44  ;;  %v2318_v56 = vmul.f32 %v10216_v10, %v10216_v10  ;;  %vm2460_vm4 = vmor %vm2458_vm3, %vm2459_vm2 }
 0x988   :  { %v2454_v55 = vmul.f32 %v7623_v50, %v2453_v13  ;;  %v2451_v36 = vsel %vm2450_vm1, %v7621_v22, %v2447_v20 }
 0x989   :  { %6852 = vmatmul.msk.bf16.gmra.mxu2 %vm115_vm0, %v2621_v43  ;;  %6860 = vmatmul.msk.bf16.gmra.mxu3 %vm115_vm0, %v2621_v43  ;;  %v2358_v46 = vsel %vm115_vm0, %v2318_v56, 0.0  ;;  %v2566_v49 = vmul.f32 %v2451_v36, %v10062_v3  ;;  %v7281_v3 = vld [vmem:[%s13284_s8 + $0x38] sm:$0xff] }
 0x98a   :  { %v2455_v37 = vmul.f32 0.5, %v2454_v55  ;;  %2359 = vadd.xlane.f32.xlu2 %v2358_v46  ;;  %2973 = vmatpush.bf16.msra.mxu0 %v7281_v3  ;;  %v7276_v55 = vld [vmem:[%s13284_s8 + $0x10] sm:$0xff] }
 0x98b   :  { %v2583_v15 = vmul.f32 %v10162_v51, %v2566_v49  ;;  %v7284_v46 = vld [vmem:[%s13284_s8 + $0x50] sm:$0xff]  ;;  %v7275_v49 = vld [vmem:[%s13284_s8 + $0x8] sm:$0xff] }
 0x98c   :  { %v2456_v4 = vsub.f32 1.5, %v2455_v37 }
 0x98d   :  { %v10236_v26 = vadd.f32 %v10169_v31, %v2583_v15 }
 0x98e   :  { %v2457_v63 = vmul.f32 %v7623_v50, %v2456_v4  ;;  %2974 = vmatpush.bf16.msra.mxu0 %v7280_v0 }
 0x990   :  { %v2461_v24 = vsel %vm2460_vm4, %v7623_v50, %v2457_v63  ;;  %v7283_v63 = vld [vmem:[%s13284_s8 + $0x48] sm:$0xff] }
 0x991   :  { %v2567_v61 = vmul.f32 %v2461_v24, %v10072_v41 }
 0x992   :  { %2975 = vmatpush.bf16.msra.mxu0 %v7279_v53 }
 0x993   :  { %v2584_v6 = vmul.f32 %v10162_v51, %v2567_v61 }
 0x995   :  { %v10239_v57 = vadd.f32 %v10169_v31, %v2584_v6 }
 0x996   :  { %2976 = vmatpush.bf16.msra.mxu0 %v7278_v60 }
 0x997   :  { %v2622_v11 = vpack.c.bf16 %v10239_v57, %v10236_v26 }
 0x999   :  { %6853 = vmatmul.msk.bf16.gmra.mxu2 %vm115_vm0, %v2622_v11  ;;  %6861 = vmatmul.msk.bf16.gmra.mxu3 %vm115_vm0, %v2622_v11 }
 0x9b8   :  { %v2342_v41 = vpop.xlane.xlu1 %2341 }
 0x9b9   :  { %v2376_v34 = vmul.f32 %v2342_v41, %v9991_v35 }
 0x9bb   :  { %v2392_v39 = vadd.f32 1e-05, %v2376_v34 }
 0x9bd   :  { %7624 = vrsqrt.f32 %v2392_v39  ;;  %vm2468_vm6 = vweird.f32 %v2392_v39 }
 0x9c0   :  { %v2260_v28 = vpop.xlane.xlu1 %2259 }
 0x9c1   :  { %v2287_v27 = vmul.f32 %v9991_v35, %v2260_v28  ;;  %v7282_v28 = vld [vmem:[%s13284_s8 + $0x40] sm:$0xff] }
 0x9c3   :  { %v10251_v9 = vsub.f32 %v10109_v33, %v2287_v27  ;;  %v7625_v62 = vpop.eup %7624  ;;  %v7288_v33 = vld [vmem:[%s13284_s8 + $0x70] sm:$0xff] }
 0x9c4   :  { %v2463_v22 = vmul.f32 %v7625_v62, %v2392_v39  ;;  %3023 = vmatpush.bf16.msra.mxu1 %v7288_v33  ;;  %vm2469_vm5 = vweird.f32 %v7625_v62  ;;  %v7274_v39 = vld [vmem:[%s13284_s8] sm:$0xff] }
 0x9c5   :  { %v2319_v38 = vmul.f32 %v10251_v9, %v10251_v9  ;;  %vm2470_vm7 = vmor %vm2468_vm6, %vm2469_vm5 }
 0x9c6   :  { %v2464_v29 = vmul.f32 %v7625_v62, %v2463_v22 }
 0x9c7   :  { %v2361_v23 = vsel %vm115_vm0, %v2319_v38, 0.0 }
 0x9c8   :  { %2362 = vadd.xlane.f32.xlu0 %v2361_v23  ;;  %3024 = vmatpush.bf16.msra.mxu1 %v7287_v17  ;;  %v2465_v18 = vmul.f32 0.5, %v2464_v29 }
 0x9ca   :  { %v2466_v50 = vsub.f32 1.5, %v2465_v18 }
 0x9cc   :  { %v2263_v1 = vpop.xlane.xlu1 %2262  ;;  %3025 = vmatpush.bf16.msra.mxu1 %v7286_v52  ;;  %v2467_v36 = vmul.f32 %v7625_v62, %v2466_v50 }
 0x9cd   :  { %v2288_v14 = vmul.f32 %v9991_v35, %v2263_v1  ;;  %v2345_v5 = vpop.xlane.xlu2 %2344 }
 0x9ce   :  { %v2377_v7 = vmul.f32 %v2345_v5, %v9991_v35  ;;  %v2471_v24 = vsel %vm2470_vm7, %v7625_v62, %v2467_v36 }
 0x9cf   :  { %v10274_v59 = vsub.f32 %v10145_v12, %v2288_v14  ;;  %v7277_v12 = vld [vmem:[%s13284_s8 + $0x18] sm:$0xff]  ;;  %v2568_v41 = vmul.f32 %v2471_v24, %v10090_v21 }
 0x9d0   :  { %v2393_v25 = vadd.f32 1e-05, %v2377_v7  ;;  %2977 = vmatpush.bf16.msra.mxu0 %v7277_v12  ;;  %3026 = vmatpush.bf16.msra.mxu1 %v7285_v8  ;;  %v2628_v12 = vld [vmem:[%s13285_s9] sm:$0x3] }
 0x9d1   :  { %v2320_v16 = vmul.f32 %v10274_v59, %v10274_v59  ;;  %v2585_v23 = vmul.f32 %v10162_v51, %v2568_v41  ;;  %v10342_v36 = vperm.slane %v2628_v12, 0 }
 0x9d2   :  { %7626 = vrsqrt.f32 %v2393_v25  ;;  %vm2478_vm9 = vweird.f32 %v2393_v25 }
 0x9d3   :  { %v2364_v47 = vsel %vm115_vm0, %v2320_v16, 0.0  ;;  %v10327_v17 = vadd.f32 %v10169_v31, %v2585_v23 }
 0x9d4   :  { %2365 = vadd.xlane.f32.xlu1 %v2364_v47  ;;  %2978 = vmatpush.bf16.msra.mxu0 %v7276_v55 }
 0x9d5   :  { %v2348_v20 = vpop.xlane.xlu2 %2347  ;;  %3027 = vmatpush.bf16.msra.mxu1 %v7284_v46 }
 0x9d6   :  { %v2378_v13 = vmul.f32 %v2348_v20, %v9991_v35 }
 0x9d8   :  { %v7627_v43 = vpop.eup %7626  ;;  %v10292_v56 = vadd.f32 1e-05, %v2378_v13  ;;  %2979 = vmatpush.bf16.msra.mxu0 %v7275_v49 }
 0x9d9   :  { %v2473_v37 = vmul.f32 %v7627_v43, %v2393_v25  ;;  %3028 = vmatpush.bf16.msra.mxu1 %v7283_v63  ;;  %vm2479_vm8 = vweird.f32 %v7627_v43 }
 0x9da   :  { %7628 = vrsqrt.f32 %v10292_v56  ;;  %vm2480_vm10 = vmor %vm2478_vm9, %vm2479_vm8  ;;  %vm2488_vm12 = vweird.f32 %v10292_v56 }
 0x9db   :  { %v2474_v4 = vmul.f32 %v7627_v43, %v2473_v37 }
 0x9dc   :  { %2980 = vmatpush.bf16.msra.mxu0 %v7274_v39 }
 0x9dd   :  { %v2475_v61 = vmul.f32 0.5, %v2474_v4  ;;  %v2266_v15 = vpop.xlane.xlu2 %2265  ;;  %3029 = vmatpush.bf16.msra.mxu1 %v7282_v28  ;;  %v10345_v4 = vperm.slane %v2628_v12, 1 }
 0x9de   :  { %v2289_v6 = vmul.f32 %v9991_v35, %v2266_v15 }
 0x9df   :  { %v2476_v11 = vsub.f32 1.5, %v2475_v61 }
 0x9e0   :  { %v7629_v3 = vpop.eup %7628  ;;  %v10310_v34 = vsub.f32 %v10166_v58, %v2289_v6 }
 0x9e1   :  { %v2477_v27 = vmul.f32 %v7627_v43, %v2476_v11  ;;  %v2483_v19 = vmul.f32 %v7629_v3, %v10292_v56  ;;  %vm2489_vm11 = vweird.f32 %v7629_v3 }
 0x9e2   :  { %v2321_v38 = vmul.f32 %v10310_v34, %v10310_v34  ;;  %vm2490_vm13 = vmor %vm2488_vm12, %vm2489_vm11 }
 0x9e3   :  { %v2481_v21 = vsel %vm2480_vm10, %v7627_v43, %v2477_v27  ;;  %v2484_v0 = vmul.f32 %v7629_v3, %v2483_v19 }
 0x9e4   :  { %v2569_v58 = vmul.f32 %v2481_v21, %v10142_v48  ;;  %v2367_v62 = vsel %vm115_vm0, %v2321_v38, 0.0 }
 0x9e5   :  { %v2351_v33 = vpop.xlane.xlu0 %2350  ;;  %2368 = vadd.xlane.f32.xlu2 %v2367_v62  ;;  %v2485_v14 = vmul.f32 0.5, %v2484_v0 }
 0x9e6   :  { %v2379_v22 = vmul.f32 %v2351_v33, %v9991_v35  ;;  %v2586_v1 = vmul.f32 %v10162_v51, %v2569_v58 }
 0x9e7   :  { %v2486_v5 = vsub.f32 1.5, %v2485_v14 }
 0x9e8   :  { %v2395_v53 = vadd.f32 1e-05, %v2379_v22  ;;  %v10330_v29 = vadd.f32 %v10169_v31, %v2586_v1 }
 0x9e9   :  { %v2487_v18 = vmul.f32 %v7629_v3, %v2486_v5 }
 0x9ea   :  { %7630 = vrsqrt.f32 %v2395_v53  ;;  %v2623_v48 = vpack.c.bf16 %v10330_v29, %v10327_v17  ;;  %vm2498_vm15 = vweird.f32 %v2395_v53 }
 0x9eb   :  { %v2491_v20 = vsel %vm2490_vm13, %v7629_v3, %v2487_v18 }
 0x9ec   :  { %6854 = vmatmul.msk.bf16.gmra.mxu2 %vm115_vm0, %v2623_v48  ;;  %6862 = vmatmul.msk.bf16.gmra.mxu3 %vm115_vm0, %v2623_v48  ;;  %v2570_v56 = vmul.f32 %v2491_v20, %v10154_v54 }
 0x9ed   :  { %v2354_v7 = vpop.xlane.xlu0 %2353 }
 0x9ee   :  { %v2380_v25 = vmul.f32 %v2354_v7, %v9991_v35  ;;  %v2587_v54 = vmul.f32 %v10162_v51, %v2570_v56 }
 0x9f0   :  { %v7631_v60 = vpop.eup %7630  ;;  %v2396_v52 = vadd.f32 1e-05, %v2380_v25 }
 0x9f1   :  { %v2493_v16 = vmul.f32 %v7631_v60, %v2395_v53  ;;  %vm2499_vm14 = vweird.f32 %v7631_v60 }
 0x9f2   :  { %7632 = vrsqrt.f32 %v2396_v52  ;;  %vm2500_vm1 = vmor %vm2498_vm15, %vm2499_vm14  ;;  %vm2508_vm3 = vweird.f32 %v2396_v52 }
 0x9f3   :  { %v2494_v47 = vmul.f32 %v7631_v60, %v2493_v16 }
 0x9f4   :  { %v2707_v8 = vpop.f32.mrf.mxu2  ;;  %v2756_v50 = vpop.f32.mrf.mxu3 }
 0x9f5   :  { %v2495_v13 = vmul.f32 0.5, %v2494_v47  ;;  %v2357_v43 = vpop.xlane.xlu1 %2356  ;;  %v2708_v6 = vadd.f32 %v2707_v8, %v10342_v36  ;;  %v2757_v3 = vadd.f32 %v2756_v50, %v10345_v4 }
 0x9f6   :  { %v2381_v55 = vmul.f32 %v2357_v43, %v9991_v35 }
 0x9f7   :  { %v2496_v46 = vsub.f32 1.5, %v2495_v13  ;;  %v2796_v58 = vmax.f32 %v2708_v6, 0.0  ;;  %v2797_v33 = vmax.f32 %v2757_v3, 0.0 }
 0x9f8   :  { %v7633_v37 = vpop.eup %7632  ;;  %v2397_v49 = vadd.f32 1e-05, %v2381_v55 }
 0x9f9   :  { %v2497_v63 = vmul.f32 %v7631_v60, %v2496_v46  ;;  %v2503_v24 = vmul.f32 %v7633_v37, %v2396_v52  ;;  %vm2509_vm2 = vweird.f32 %v7633_v37 }
 0x9fa   :  { %7634 = vrsqrt.f32 %v2397_v49  ;;  %vm2510_vm4 = vmor %vm2508_vm3, %vm2509_vm2  ;;  %vm2518_vm6 = vweird.f32 %v2397_v49 }
 0x9fb   :  { %v2501_v61 = vsel %vm2500_vm1, %v7631_v60, %v2497_v63  ;;  %v2504_v15 = vmul.f32 %v7633_v37, %v2503_v24 }
 0x9fc   :  { %v2571_v11 = vmul.f32 %v2501_v61, %v10185_v32  ;;  %v2709_v41 = vpop.f32.mrf.mxu2  ;;  %v2758_v39 = vpop.f32.mrf.mxu3  ;;  %v10355_v32 = vadd.f32 %v10169_v31, %v2587_v54 }
 0x9fd   :  { %v2505_v28 = vmul.f32 0.5, %v2504_v15  ;;  %v2710_v27 = vadd.f32 %v2709_v41, %v10342_v36  ;;  %v2759_v19 = vadd.f32 %v2758_v39, %v10345_v4  ;;  %v2360_v54 = vpop.xlane.xlu2 %2359 }
 0x9fe   :  { %v2588_v38 = vmul.f32 %v10162_v51, %v2571_v11 }
 0x9ff   :  { %v2506_v21 = vsub.f32 1.5, %v2505_v28  ;;  %v2798_v62 = vmax.f32 %v2710_v27, 0.0  ;;  %v2799_v23 = vmax.f32 %v2759_v19, 0.0 }
 0xa00   :  { %v7635_v0 = vpop.eup %7634  ;;  %v10358_v22 = vadd.f32 %v10169_v31, %v2588_v38 }
 0xa01   :  { %v2507_v1 = vmul.f32 %v7633_v37, %v2506_v21  ;;  %v2513_v53 = vmul.f32 %v7635_v0, %v2397_v49  ;;  %v2860_v14 = vpack.c.bf16 %v2798_v62, %v2796_v58  ;;  %v2861_v48 = vpack.c.bf16 %v2799_v23, %v2797_v33 }
 0xa02   :  { %v2624_v5 = vpack.c.bf16 %v10358_v22, %v10355_v32  ;;  %vm2519_vm5 = vweird.f32 %v7635_v0  ;;  %v2382_v62 = vmul.f32 %v2360_v54, %v9991_v35 }
 0xa03   :  { %v2514_v7 = vmul.f32 %v7635_v0, %v2513_v53  ;;  %2981 = vmatmul.bf16.vlgmr.msra.gmra.mxu0 %v2860_v14  ;;  %3030 = vmatmul.bf16.vlgmr.msra.gmra.mxu1 %v2861_v48  ;;  %v2511_v25 = vsel %vm2510_vm4, %v7633_v37, %v2507_v1  ;;  %vm2520_vm7 = vmor %vm2518_vm6, %vm2519_vm5 }
 0xa04   :  { %6855 = vmatmul.msk.bf16.gmra.mxu2 %vm115_vm0, %v2624_v5  ;;  %6863 = vmatmul.msk.bf16.gmra.mxu3 %vm115_vm0, %v2624_v5  ;;  %v2572_v16 = vmul.f32 %v2511_v25, %v10197_v40  ;;  %v2398_v48 = vadd.f32 1e-05, %v2382_v62 }
 0xa05   :  { %v2515_v60 = vmul.f32 0.5, %v2514_v7 }
 0xa06   :  { %v2589_v20 = vmul.f32 %v10162_v51, %v2572_v16  ;;  %7636 = vrsqrt.f32 %v2398_v48  ;;  %vm2528_vm9 = vweird.f32 %v2398_v48 }
 0xa07   :  { %v2516_v18 = vsub.f32 1.5, %v2515_v60 }
 0xa08   :  { %v10369_v43 = vadd.f32 %v10169_v31, %v2589_v20 }
 0xa09   :  { %v2517_v47 = vmul.f32 %v7635_v0, %v2516_v18 }
 0xa0b   :  { %v2521_v12 = vsel %vm2520_vm7, %v7635_v0, %v2517_v47 }
 0xa0c   :  { %v2573_v52 = vmul.f32 %v2521_v12, %v10206_v45  ;;  %v2712_v8 = vpop.f32.mrf.mxu2  ;;  %v2761_v50 = vpop.f32.mrf.mxu3 }
 0xa0d   :  { %v2713_v46 = vadd.f32 %v2712_v8, %v10342_v36  ;;  %v2762_v37 = vadd.f32 %v2761_v50, %v10345_v4  ;;  %v7637_v5 = vpop.eup %7636 }
 0xa0e   :  { %v2590_v13 = vmul.f32 %v10162_v51, %v2573_v52  ;;  %v2523_v7 = vmul.f32 %v7637_v5, %v2398_v48  ;;  %vm2529_vm8 = vweird.f32 %v7637_v5 }
 0xa0f   :  { %v2800_v24 = vmax.f32 %v2713_v46, 0.0  ;;  %v2801_v61 = vmax.f32 %v2762_v37, 0.0  ;;  %vm2530_vm10 = vmor %vm2528_vm9, %vm2529_vm8 }
 0xa10   :  { %v10372_v55 = vadd.f32 %v10169_v31, %v2590_v13  ;;  %v2524_v25 = vmul.f32 %v7637_v5, %v2523_v7 }
 0xa12   :  { %v2625_v40 = vpack.c.bf16 %v10372_v55, %v10369_v43  ;;  %v2525_v47 = vmul.f32 0.5, %v2524_v25 }
 0xa14   :  { %v2714_v45 = vpop.f32.mrf.mxu2  ;;  %6856 = vmatmul.msk.bf16.gmra.mxu2 %vm115_vm0, %v2625_v40  ;;  %v2763_v56 = vpop.f32.mrf.mxu3  ;;  %6864 = vmatmul.msk.bf16.gmra.mxu3 %vm115_vm0, %v2625_v40  ;;  %v2526_v12 = vsub.f32 1.5, %v2525_v47 }
 0xa15   :  { %v2715_v49 = vadd.f32 %v2714_v45, %v10342_v36  ;;  %v2764_v63 = vadd.f32 %v2763_v56, %v10345_v4 }
 0xa16   :  { %v2527_v8 = vmul.f32 %v7637_v5, %v2526_v12 }
 0xa17   :  { %v2802_v15 = vmax.f32 %v2715_v49, 0.0  ;;  %v2803_v6 = vmax.f32 %v2764_v63, 0.0 }
 0xa18   :  { %v2531_v37 = vsel %vm2530_vm10, %v7637_v5, %v2527_v8 }
 0xa19   :  { %v2862_v11 = vpack.c.bf16 %v2802_v15, %v2800_v24  ;;  %v2863_v3 = vpack.c.bf16 %v2803_v6, %v2801_v61  ;;  %v2574_v49 = vmul.f32 %v2531_v37, %v10216_v10 }
 0xa1b   :  { %2986 = vmatmul.bf16.gmra.mxu0 %v2862_v11  ;;  %3035 = vmatmul.bf16.gmra.mxu1 %v2863_v3  ;;  %v2591_v6 = vmul.f32 %v10162_v51, %v2574_v49 }
 0xa1c   :  { %v2717_v41 = vpop.f32.mrf.mxu2  ;;  %v2766_v39 = vpop.f32.mrf.mxu3 }
 0xa1d   :  { %v2718_v28 = vadd.f32 %v2717_v41, %v10342_v36  ;;  %v2767_v27 = vadd.f32 %v2766_v39, %v10345_v4  ;;  %v10394_v41 = vadd.f32 %v10169_v31, %v2591_v6 }
 0xa1f   :  { %v2804_v23 = vmax.f32 %v2718_v28, 0.0  ;;  %v2805_v0 = vmax.f32 %v2767_v27, 0.0 }
 0xa24   :  { %v2719_v19 = vpop.f32.mrf.mxu2  ;;  %v2768_v38 = vpop.f32.mrf.mxu3 }
 0xa25   :  { %v2720_v21 = vadd.f32 %v2719_v19, %v10342_v36  ;;  %v2769_v58 = vadd.f32 %v2768_v38, %v10345_v4 }
 0xa27   :  { %v2806_v33 = vmax.f32 %v2720_v21, 0.0  ;;  %v2807_v1 = vmax.f32 %v2769_v58, 0.0 }
 0xa29   :  { %v2864_v53 = vpack.c.bf16 %v2806_v33, %v2804_v23  ;;  %v2865_v14 = vpack.c.bf16 %v2807_v1, %v2805_v0 }
 0xa2b   :  { %2991 = vmatmul.bf16.gmra.mxu0 %v2864_v53  ;;  %3040 = vmatmul.bf16.gmra.mxu1 %v2865_v14 }
 0xa3b   :  { %v2363_v60 = vpop.xlane.xlu0 %2362 }
 0xa3c   :  { %v2383_v18 = vmul.f32 %v2363_v60, %v9991_v35 }
 0xa3e   :  { %v2399_v16 = vadd.f32 1e-05, %v2383_v18 }
 0xa40   :  { %7638 = vrsqrt.f32 %v2399_v16  ;;  %vm2538_vm12 = vweird.f32 %v2399_v16 }
 0xa46   :  { %v7639_v52 = vpop.eup %7638 }
 0xa47   :  { %v2533_v50 = vmul.f32 %v7639_v52, %v2399_v16  ;;  %v2366_v20 = vpop.xlane.xlu1 %2365  ;;  %vm2539_vm11 = vweird.f32 %v7639_v52 }
 0xa48   :  { %v2384_v13 = vmul.f32 %v2366_v20, %v9991_v35  ;;  %vm2540_vm13 = vmor %vm2538_vm12, %vm2539_vm11 }
 0xa49   :  { %v2534_v40 = vmul.f32 %v7639_v52, %v2533_v50 }
 0xa4a   :  { %v2400_v46 = vadd.f32 1e-05, %v2384_v13 }
 0xa4b   :  { %v2535_v45 = vmul.f32 0.5, %v2534_v40 }
 0xa4c   :  { %7640 = vrsqrt.f32 %v2400_v46  ;;  %vm2548_vm15 = vweird.f32 %v2400_v46 }
 0xa4d   :  { %v2536_v56 = vsub.f32 1.5, %v2535_v45  ;;  %v10425_v45 = vld [vmem:[%s13278_s10] sm:$0xff] }
 0xa4f   :  { %v2537_v63 = vmul.f32 %v7639_v52, %v2536_v56  ;;  %v10428_v56 = vperm.slane %v10425_v45, 4 }
 0xa51   :  { %v2541_v24 = vsel %vm2540_vm13, %v7639_v52, %v2537_v63 }
 0xa52   :  { %v7641_v61 = vpop.eup %7640  ;;  %v2575_v15 = vmul.f32 %v2541_v24, %v10251_v9 }
 0xa53   :  { %v2543_v11 = vmul.f32 %v7641_v61, %v2400_v46  ;;  %vm2549_vm14 = vweird.f32 %v7641_v61 }
 0xa54   :  { %v2592_v3 = vmul.f32 %v10162_v51, %v2575_v15  ;;  %vm2550_vm1 = vmor %vm2548_vm15, %vm2549_vm14 }
 0xa55   :  { %v2544_v54 = vmul.f32 %v7641_v61, %v2543_v11 }
 0xa56   :  { %v10397_v39 = vadd.f32 %v10169_v31, %v2592_v3 }
 0xa57   :  { %v2545_v19 = vmul.f32 0.5, %v2544_v54 }
 0xa58   :  { %v2369_v10 = vpop.xlane.xlu2 %2368  ;;  %v2626_v28 = vpack.c.bf16 %v10397_v39, %v10394_v41 }
 0xa59   :  { %v2385_v27 = vmul.f32 %v2369_v10, %v9991_v35  ;;  %v2546_v38 = vsub.f32 1.5, %v2545_v19 }
 0xa5a   :  { %6857 = vmatmul.msk.bf16.gmra.mxu2 %vm115_vm0, %v2626_v28  ;;  %6865 = vmatmul.msk.bf16.gmra.mxu3 %vm115_vm0, %v2626_v28 }
 0xa5b   :  { %v2401_v9 = vadd.f32 1e-05, %v2385_v27  ;;  %v2547_v58 = vmul.f32 %v7641_v61, %v2546_v38 }
 0xa5d   :  { %7642 = vrsqrt.f32 %v2401_v9  ;;  %v2551_v0 = vsel %vm2550_vm1, %v7641_v61, %v2547_v58  ;;  %vm2558_vm3 = vweird.f32 %v2401_v9 }
 0xa5e   :  { %v2576_v53 = vmul.f32 %v2551_v0, %v10274_v59 }
 0xa60   :  { %v2593_v60 = vmul.f32 %v10162_v51, %v2576_v53 }
 0xa62   :  { %v10409_v16 = vadd.f32 %v10169_v31, %v2593_v60 }
 0xa63   :  { %v7643_v21 = vpop.eup %7642 }
 0xa64   :  { %v2553_v62 = vmul.f32 %v7643_v21, %v2401_v9  ;;  %vm2559_vm2 = vweird.f32 %v7643_v21 }
 0xa65   :  { %vm2560_vm4 = vmor %vm2558_vm3, %vm2559_vm2 }
 0xa66   :  { %v2554_v23 = vmul.f32 %v7643_v21, %v2553_v62 }
 0xa68   :  { %v2555_v33 = vmul.f32 0.5, %v2554_v23 }
 0xa6a   :  { %v2556_v1 = vsub.f32 1.5, %v2555_v33 }
 0xa6c   :  { %v2557_v14 = vmul.f32 %v7643_v21, %v2556_v1 }
 0xa6e   :  { %v2561_v48 = vsel %vm2560_vm4, %v7643_v21, %v2557_v14 }
 0xa6f   :  { %v2577_v5 = vmul.f32 %v2561_v48, %v10310_v34  ;;  %v2722_v7 = vpop.f32.mrf.mxu2  ;;  %v2771_v25 = vpop.f32.mrf.mxu3 }
 0xa70   :  { %v2723_v12 = vadd.f32 %v2722_v7, %v10342_v36  ;;  %v2772_v52 = vadd.f32 %v2771_v25, %v10345_v4 }
 0xa71   :  { %v2594_v18 = vmul.f32 %v10162_v51, %v2577_v5 }
 0xa72   :  { %v2808_v20 = vmax.f32 %v2723_v12, 0.0 }
 0xa73   :  { %v10412_v47 = vadd.f32 %v10169_v31, %v2594_v18  ;;  %v2809_v31 = vmax.f32 %v2772_v52, 0.0 }
 0xa75   :  { %v2627_v59 = vpack.c.bf16 %v10412_v47, %v10409_v16 }
 0xa77   :  { %v2724_v34 = vpop.f32.mrf.mxu2  ;;  %6858 = vmatmul.msk.bf16.gmra.mxu2 %vm115_vm0, %v2627_v59  ;;  %v2773_v8 = vpop.f32.mrf.mxu3  ;;  %6866 = vmatmul.msk.bf16.gmra.mxu3 %vm115_vm0, %v2627_v59 }
 0xa78   :  { %v2725_v51 = vadd.f32 %v2724_v34, %v10342_v36  ;;  %v2774_v50 = vadd.f32 %v2773_v8, %v10345_v4 }
 0xa7a   :  { %v2810_v13 = vmax.f32 %v2725_v51, 0.0  ;;  %v2811_v40 = vmax.f32 %v2774_v50, 0.0 }
 0xa7c   :  { %v2866_v46 = vpack.c.bf16 %v2810_v13, %v2808_v20  ;;  %v2867_v37 = vpack.c.bf16 %v2811_v40, %v2809_v31 }
 0xa7e   :  { %2996 = vmatmul.bf16.gmra.mxu0 %v2866_v46  ;;  %3045 = vmatmul.bf16.gmra.mxu1 %v2867_v37 }
 0xa80   :  { %v2982_v49 = vpop.f32.mrf.mxu0  ;;  %v3031_v24 = vpop.f32.mrf.mxu1 }
 0xa81   :  { %v2983_v63 = vadd.f32 %v2982_v49, %v10428_v56 }
 0xa83   :  { %v3032_v61 = vadd.f32 %v3031_v24, %v2983_v63 }
 0xa85   :  { %v10432_v15 = vadd.f32 %v3032_v61, %v10179_v2 }
 0xa87   :  { %v2727_v6 = vpop.f32.mrf.mxu2  ;;  %v3087_v11 = vsel %vm115_vm0, %v10432_v15, 0.0  ;;  %v2776_v3 = vpop.f32.mrf.mxu3 }
 0xa88   :  { %v2984_v54 = vpop.f32.mrf.mxu0  ;;  %3088 = vadd.xlane.f32.xlu0 %v3087_v11  ;;  %v3033_v28 = vpop.f32.mrf.mxu1  ;;  %v2728_v19 = vadd.f32 %v2727_v6, %v10342_v36  ;;  %v2777_v38 = vadd.f32 %v2776_v3, %v10345_v4 }
 0xa89   :  { %v2985_v10 = vadd.f32 %v2984_v54, %v10428_v56 }
 0xa8a   :  { %v2812_v0 = vmax.f32 %v2728_v19, 0.0  ;;  %v2813_v1 = vmax.f32 %v2777_v38, 0.0 }
 0xa8b   :  { %v3034_v27 = vadd.f32 %v3033_v28, %v2985_v10 }
 0xa8d   :  { %v10438_v9 = vadd.f32 %v3034_v27, %v10182_v30 }
 0xa8f   :  { %v2729_v2 = vpop.f32.mrf.mxu2  ;;  %v3090_v21 = vsel %vm115_vm0, %v10438_v9, 0.0  ;;  %v2778_v62 = vpop.f32.mrf.mxu3 }
 0xa90   :  { %v2730_v58 = vadd.f32 %v2729_v2, %v10342_v36  ;;  %3091 = vadd.xlane.f32.xlu1 %v3090_v21  ;;  %v2779_v23 = vadd.f32 %v2778_v62, %v10345_v4 }
 0xa92   :  { %v2814_v33 = vmax.f32 %v2730_v58, 0.0  ;;  %v2815_v53 = vmax.f32 %v2779_v23, 0.0 }
 0xa94   :  { %v2868_v30 = vpack.c.bf16 %v2814_v33, %v2812_v0  ;;  %v2869_v14 = vpack.c.bf16 %v2815_v53, %v2813_v1 }
 0xa96   :  { %3001 = vmatmul.bf16.gmra.mxu0 %v2868_v30  ;;  %3050 = vmatmul.bf16.gmra.mxu1 %v2869_v14 }
 0xa97   :  { %v2732_v48 = vpop.f32.mrf.mxu2  ;;  %v2781_v5 = vpop.f32.mrf.mxu3 }
 0xa98   :  { %v2987_v7 = vpop.f32.mrf.mxu0  ;;  %v3036_v60 = vpop.f32.mrf.mxu1  ;;  %v2733_v12 = vadd.f32 %v2732_v48, %v10342_v36  ;;  %v2782_v52 = vadd.f32 %v2781_v5, %v10345_v4 }
 0xa99   :  { %v2988_v25 = vadd.f32 %v2987_v7, %v10428_v56 }
 0xa9a   :  { %v2817_v37 = vmax.f32 %v2782_v52, 0.0 }
 0xa9b   :  { %v3037_v18 = vadd.f32 %v3036_v60, %v2988_v25 }
 0xa9d   :  { %v10448_v59 = vadd.f32 %v3037_v18, %v10219_v44  ;;  %v2816_v44 = vmax.f32 %v2733_v12, 0.0 }
 0xa9f   :  { %v2734_v34 = vpop.f32.mrf.mxu2  ;;  %v3093_v8 = vsel %vm115_vm0, %v10448_v59, 0.0  ;;  %v2783_v50 = vpop.f32.mrf.mxu3 }
 0xaa0   :  { %v2735_v51 = vadd.f32 %v2734_v34, %v10342_v36  ;;  %v2989_v20 = vpop.f32.mrf.mxu0  ;;  %3094 = vadd.xlane.f32.xlu2 %v3093_v8  ;;  %v2784_v31 = vadd.f32 %v2783_v50, %v10345_v4  ;;  %v3038_v40 = vpop.f32.mrf.mxu1 }
 0xaa1   :  { %v2990_v13 = vadd.f32 %v2989_v20, %v10428_v56 }
 0xaa2   :  { %v2818_v46 = vmax.f32 %v2735_v51, 0.0  ;;  %v2819_v49 = vmax.f32 %v2784_v31, 0.0 }
 0xaa3   :  { %v3039_v63 = vadd.f32 %v3038_v40, %v2990_v13 }
 0xaa4   :  { %v2870_v24 = vpack.c.bf16 %v2818_v46, %v2816_v44  ;;  %v2871_v61 = vpack.c.bf16 %v2819_v49, %v2817_v37 }
 0xaa5   :  { %v10458_v6 = vadd.f32 %v3039_v63, %v10222_v42 }
 0xaa6   :  { %3006 = vmatmul.bf16.gmra.mxu0 %v2870_v24  ;;  %3055 = vmatmul.bf16.gmra.mxu1 %v2871_v61 }
 0xaa7   :  { %v3096_v11 = vsel %vm115_vm0, %v10458_v6, 0.0 }
 0xaa8   :  { %v2992_v3 = vpop.f32.mrf.mxu0  ;;  %3097 = vadd.xlane.f32.xlu0 %v3096_v11  ;;  %v3041_v10 = vpop.f32.mrf.mxu1 }
 0xaa9   :  { %v2993_v54 = vadd.f32 %v2992_v3, %v10428_v56 }
 0xaab   :  { %v3042_v28 = vadd.f32 %v3041_v10, %v2993_v54 }
 0xaad   :  { %v10464_v27 = vadd.f32 %v3042_v28, %v10236_v26 }
 0xaaf   :  { %v3099_v19 = vsel %vm115_vm0, %v10464_v27, 0.0 }
 0xab0   :  { %v2994_v38 = vpop.f32.mrf.mxu0  ;;  %3100 = vadd.xlane.f32.xlu1 %v3099_v19  ;;  %v3043_v2 = vpop.f32.mrf.mxu1 }
 0xab1   :  { %v2995_v42 = vadd.f32 %v2994_v38, %v10428_v56 }
 0xab3   :  { %v3044_v21 = vadd.f32 %v3043_v2, %v2995_v42 }
 0xab5   :  { %v10470_v58 = vadd.f32 %v3044_v21, %v10239_v57 }
 0xab7   :  { %v3102_v62 = vsel %vm115_vm0, %v10470_v58, 0.0 }
 0xab8   :  { %3103 = vadd.xlane.f32.xlu2 %v3102_v62 }
 0xadd   :  { %v2737_v23 = vpop.f32.mrf.mxu2  ;;  %v2786_v0 = vpop.f32.mrf.mxu3 }
 0xade   :  { %v2738_v26 = vadd.f32 %v2737_v23, %v10342_v36  ;;  %v2787_v33 = vadd.f32 %v2786_v0, %v10345_v4 }
 0xae0   :  { %v2820_v48 = vmax.f32 %v2738_v26, 0.0  ;;  %v2821_v5 = vmax.f32 %v2787_v33, 0.0 }
 0xae5   :  { %v2739_v1 = vpop.f32.mrf.mxu2  ;;  %v2788_v53 = vpop.f32.mrf.mxu3 }
 0xae6   :  { %v2740_v30 = vadd.f32 %v2739_v1, %v10342_v36  ;;  %v2789_v14 = vadd.f32 %v2788_v53, %v10345_v4 }
 0xae8   :  { %v2822_v57 = vmax.f32 %v2740_v30, 0.0  ;;  %v2823_v7 = vmax.f32 %v2789_v14, 0.0 }
 0xaea   :  { %v2872_v25 = vpack.c.bf16 %v2822_v57, %v2820_v48  ;;  %v2873_v60 = vpack.c.bf16 %v2823_v7, %v2821_v5 }
 0xaec   :  { %3011 = vmatmul.bf16.gmra.mxu0 %v2872_v25  ;;  %3060 = vmatmul.bf16.gmra.mxu1 %v2873_v60 }
 0xafa   :  { %v2742_v18 = vpop.f32.mrf.mxu2  ;;  %v2791_v12 = vpop.f32.mrf.mxu3 }
 0xafb   :  { %v3089_v52 = vpop.xlane.xlu0 %3088  ;;  %v2997_v34 = vpop.f32.mrf.mxu0  ;;  %v2743_v44 = vadd.f32 %v2742_v18, %v10342_v36  ;;  %v2792_v46 = vadd.f32 %v2791_v12, %v10345_v4 }
 0xafc   :  { %v3135_v8 = vmul.f32 %v3089_v52, %v9991_v35  ;;  %v2998_v51 = vadd.f32 %v2997_v34, %v10428_v56  ;;  %v3046_v50 = vpop.f32.mrf.mxu1 }
 0xafd   :  { %v2824_v10 = vmax.f32 %v2743_v44, 0.0  ;;  %v2825_v28 = vmax.f32 %v2792_v46, 0.0 }
 0xafe   :  { %v10481_v20 = vsub.f32 %v10432_v15, %v3135_v8  ;;  %v3047_v31 = vadd.f32 %v3046_v50, %v2998_v51 }
 0xb00   :  { %v10484_v13 = vadd.f32 %v3047_v31, %v10327_v17  ;;  %v3167_v40 = vmul.f32 %v10481_v20, %v10481_v20 }
 0xb02   :  { %v2744_v37 = vpop.f32.mrf.mxu2  ;;  %v2793_v49 = vpop.f32.mrf.mxu3  ;;  %v3183_v63 = vsel %vm115_vm0, %v3167_v40, 0.0  ;;  %v3105_v24 = vsel %vm115_vm0, %v10484_v13, 0.0 }
 0xb03   :  { %v2745_v15 = vadd.f32 %v2744_v37, %v10342_v36  ;;  %v2794_v61 = vadd.f32 %v2793_v49, %v10345_v4  ;;  %v3092_v17 = vpop.xlane.xlu1 %3091  ;;  %3184 = vadd.xlane.f32.xlu0 %v3183_v63  ;;  %v2999_v11 = vpop.f32.mrf.mxu0  ;;  %3106 = vadd.xlane.f32.xlu2 %v3105_v24 }
 0xb04   :  { %v3136_v3 = vmul.f32 %v3092_v17, %v9991_v35  ;;  %v3000_v54 = vadd.f32 %v2999_v11, %v10428_v56  ;;  %v3048_v42 = vpop.f32.mrf.mxu1 }
 0xb05   :  { %v2826_v19 = vmax.f32 %v2745_v15, 0.0  ;;  %v2827_v38 = vmax.f32 %v2794_v61, 0.0 }
 0xb06   :  { %v10498_v2 = vsub.f32 %v10438_v9, %v3136_v3  ;;  %v3049_v21 = vadd.f32 %v3048_v42, %v3000_v54 }
 0xb07   :  { %v2874_v36 = vpack.c.bf16 %v2826_v19, %v2824_v10  ;;  %v2875_v62 = vpack.c.bf16 %v2827_v38, %v2825_v28 }
 0xb08   :  { %v3168_v4 = vmul.f32 %v10498_v2, %v10498_v2  ;;  %v10503_v23 = vadd.f32 %v3049_v21, %v10330_v29 }
 0xb09   :  { %3016 = vmatmul.bf16.gmra.mxu0 %v2874_v36  ;;  %3065 = vmatmul.bf16.gmra.mxu1 %v2875_v62 }
 0xb0a   :  { %v3186_v0 = vsel %vm115_vm0, %v3168_v4, 0.0  ;;  %v3108_v26 = vsel %vm115_vm0, %v10503_v23, 0.0  ;;  %v7296_v4 = vld [vmem:[%s13279_s5 + $0x74] sm:$0xf] }
 0xb0b   :  { %3187 = vadd.xlane.f32.xlu1 %v3186_v0  ;;  %3109 = vadd.xlane.f32.xlu0 %v3108_v26 }
 0xb13   :  { %v3002_v9 = vpop.f32.mrf.mxu0  ;;  %v3095_v33 = vpop.xlane.xlu2 %3094 }
 0xb14   :  { %v3003_v1 = vadd.f32 %v3002_v9, %v10428_v56  ;;  %v3051_v53 = vpop.f32.mrf.mxu1  ;;  %v3137_v30 = vmul.f32 %v3095_v33, %v9991_v35  ;;  %v6969_v9 = vld [vmem:[%s13279_s5 + $0x78] sm:$0xf0] }
 0xb15   :  { %v6972_v33 = vor.u32 %v7296_v4, %v6969_v9 }
 0xb16   :  { %v3052_v14 = vadd.f32 %v3051_v53, %v3003_v1  ;;  %v10511_v29 = vsub.f32 %v10448_v59, %v3137_v30  ;;  %v6959_v53 = vld [vmem:[%s13279_s5 + $0x60] sm:$0xf]  ;;  %v7294_v30 = vld [vmem:[%s13279_s5 + $0x64] sm:$0xf] }
 0xb17   :  { %3610 = vmatpush.bf16.msrb.mxu3 %v6972_v33 }
 0xb18   :  { %v10514_v48 = vadd.f32 %v3052_v14, %v10355_v32  ;;  %v3169_v5 = vmul.f32 %v10511_v29, %v10511_v29 }
 0xb1a   :  { %v3111_v57 = vsel %vm115_vm0, %v10514_v48, 0.0  ;;  %v3189_v7 = vsel %vm115_vm0, %v3169_v5, 0.0  ;;  %v6961_v5 = vld [vmem:[%s13279_s5 + $0x68] sm:$0xf0] }
 0xb1b   :  { %v3098_v25 = vpop.xlane.xlu0 %3097  ;;  %v3004_v60 = vpop.f32.mrf.mxu0  ;;  %3112 = vadd.xlane.f32.xlu0 %v3111_v57  ;;  %3190 = vadd.xlane.f32.xlu1 %v3189_v7  ;;  %v6964_v57 = vor.u32 %v7294_v30, %v6961_v5 }
 0xb1c   :  { %v3138_v18 = vmul.f32 %v3098_v25, %v9991_v35  ;;  %v3005_v59 = vadd.f32 %v3004_v60, %v10428_v56  ;;  %v3053_v12 = vpop.f32.mrf.mxu1  ;;  %v6951_v25 = vld [vmem:[%s13279_s5 + $0x50] sm:$0xf]  ;;  %v7293_v60 = vld [vmem:[%s13279_s5 + $0x54] sm:$0xf0] }
 0xb1d   :  { %3611 = vmatpush.bf16.msrb.mxu3 %v6964_v57 }
 0xb1e   :  { %v10524_v32 = vsub.f32 %v10458_v6, %v3138_v18  ;;  %v3054_v52 = vadd.f32 %v3053_v12, %v3005_v59  ;;  %v7292_v18 = vld [vmem:[%s13279_s5 + $0x54] sm:$0xf] }
 0xb20   :  { %v3170_v34 = vmul.f32 %v10524_v32, %v10524_v32  ;;  %v10529_v8 = vadd.f32 %v3054_v52, %v10358_v22  ;;  %v6952_v52 = vor.u32 %v7293_v60, %v6951_v25 }
 0xb22   :  { %v3192_v51 = vsel %vm115_vm0, %v3170_v34, 0.0  ;;  %v3114_v50 = vsel %vm115_vm0, %v10529_v8, 0.0  ;;  %v6953_v34 = vld [vmem:[%s13279_s5 + $0x58] sm:$0xf0] }
 0xb23   :  { %v3101_v31 = vpop.xlane.xlu1 %3100  ;;  %v3007_v40 = vpop.f32.mrf.mxu0  ;;  %3193 = vadd.xlane.f32.xlu2 %v3192_v51  ;;  %3115 = vadd.xlane.f32.xlu1 %v3114_v50 }
 0xb24   :  { %v3139_v44 = vmul.f32 %v3101_v31, %v9991_v35  ;;  %v3008_v6 = vadd.f32 %v3007_v40, %v10428_v56  ;;  %v3056_v46 = vpop.f32.mrf.mxu1  ;;  %v6956_v31 = vor.u32 %v7292_v18, %v6953_v34 }
 0xb26   :  { %v10537_v37 = vsub.f32 %v10464_v27, %v3139_v44  ;;  %v3057_v49 = vadd.f32 %v3056_v46, %v3008_v6  ;;  %3612 = vmatpush.bf16.msrb.mxu3 %v6956_v31  ;;  %v6943_v46 = vld [vmem:[%s13279_s5 + $0x40] sm:$0xf] }
 0xb28   :  { %v10540_v22 = vadd.f32 %v3057_v49, %v10369_v43  ;;  %v3171_v63 = vmul.f32 %v10537_v37, %v10537_v37  ;;  %v7291_v49 = vld [vmem:[%s13279_s5 + $0x44] sm:$0xf0] }
 0xb2a   :  { %v3195_v24 = vsel %vm115_vm0, %v3171_v63, 0.0  ;;  %v3117_v15 = vsel %vm115_vm0, %v10540_v22, 0.0  ;;  %v6944_v63 = vor.u32 %v7291_v49, %v6943_v46 }
 0xb2b   :  { %v3009_v61 = vpop.f32.mrf.mxu0  ;;  %3196 = vadd.xlane.f32.xlu2 %v3195_v24  ;;  %3118 = vadd.xlane.f32.xlu1 %v3117_v15  ;;  %v3104_v17 = vpop.xlane.xlu2 %3103  ;;  %v7290_v24 = vld [vmem:[%s13279_s5 + $0x44] sm:$0xf]  ;;  %v6945_v15 = vld [vmem:[%s13279_s5 + $0x48] sm:$0xf0] }
 0xb2c   :  { %v3010_v11 = vadd.f32 %v3009_v61, %v10428_v56  ;;  %v3140_v27 = vmul.f32 %v3104_v17, %v9991_v35  ;;  %v3058_v3 = vpop.f32.mrf.mxu1  ;;  %v6948_v61 = vor.u32 %v7290_v24, %v6945_v15 }
 0xb2e   :  { %v3059_v54 = vadd.f32 %v3058_v3, %v3010_v11  ;;  %v10550_v43 = vsub.f32 %v10470_v58, %v3140_v27  ;;  %v7297_v58 = vld [vmem:[%s13279_s5 + $0x74] sm:$0xf0]  ;;  %3613 = vmatpush.bf16.msrb.mxu3 %v6948_v61 }
 0xb30   :  { %v10553_v10 = vadd.f32 %v3059_v54, %v10372_v55  ;;  %v3172_v28 = vmul.f32 %v10550_v43, %v10550_v43  ;;  %v6967_v55 = vld [vmem:[%s13279_s5 + $0x70] sm:$0xf] }
 0xb31   :  { %v6968_v26 = vor.u32 %v7297_v58, %v6967_v55 }
 0xb32   :  { %v3120_v19 = vsel %vm115_vm0, %v10553_v10, 0.0  ;;  %v3198_v38 = vsel %vm115_vm0, %v3172_v28, 0.0 }
 0xb33   :  { %3121 = vadd.xlane.f32.xlu2 %v3120_v19  ;;  %3199 = vadd.xlane.f32.xlu0 %v3198_v38 }
 0xb34   :  { %3561 = vmatpush.bf16.msrb.mxu2 %v6968_v26 }
 0xb69   :  { %v3012_v42 = vpop.f32.mrf.mxu0  ;;  %v3061_v36 = vpop.f32.mrf.mxu1 }
 0xb6a   :  { %v3013_v21 = vadd.f32 %v3012_v42, %v10428_v56 }
 0xb6c   :  { %v3062_v62 = vadd.f32 %v3061_v36, %v3013_v21 }
 0xb6e   :  { %v10571_v0 = vadd.f32 %v3062_v62, %v10394_v41  ;;  %v7295_v41 = vld [vmem:[%s13279_s5 + $0x64] sm:$0xf0] }
 0xb6f   :  { %v6960_v14 = vor.u32 %v7295_v41, %v6959_v53 }
 0xb70   :  { %v3123_v1 = vsel %vm115_vm0, %v10571_v0, 0.0 }
 0xb71   :  { %3124 = vadd.xlane.f32.xlu2 %v3123_v1  ;;  %3562 = vmatpush.bf16.msrb.mxu2 %v6960_v14  ;;  %v3014_v7 = vpop.f32.mrf.mxu0  ;;  %v3063_v17 = vpop.f32.mrf.mxu1 }
 0xb72   :  { %v3015_v40 = vadd.f32 %v3014_v7, %v10428_v56 }
 0xb74   :  { %v3064_v11 = vadd.f32 %v3063_v17, %v3015_v40 }
 0xb75   :  { %3563 = vmatpush.bf16.msrb.mxu2 %v6952_v52 }
 0xb76   :  { %v3185_v59 = vpop.xlane.xlu0 %3184  ;;  %v3107_v12 = vpop.xlane.xlu2 %3106  ;;  %v10629_v36 = vadd.f32 %v3064_v11, %v10397_v39 }
 0xb77   :  { %v3231_v51 = vmul.f32 %v3185_v59, %v9991_v35  ;;  %v3141_v50 = vmul.f32 %v3107_v12, %v9991_v35 }
 0xb78   :  { %v3126_v26 = vsel %vm115_vm0, %v10629_v36, 0.0 }
 0xb79   :  { %v3247_v44 = vadd.f32 1e-05, %v3231_v51  ;;  %v10606_v6 = vsub.f32 %v10484_v13, %v3141_v50  ;;  %3564 = vmatpush.bf16.msrb.mxu2 %v6944_v63 }
 0xb7b   :  { %7644 = vrsqrt.f32 %v3247_v44  ;;  %v3173_v13 = vmul.f32 %v10606_v6, %v10606_v6  ;;  %vm3269_vm6 = vweird.f32 %v3247_v44 }
 0xb7d   :  { %v3201_v27 = vsel %vm115_vm0, %v3173_v13, 0.0 }
 0xb7e   :  { %v3188_v3 = vpop.xlane.xlu1 %3187  ;;  %v3110_v54 = vpop.xlane.xlu0 %3109  ;;  %3202 = vadd.xlane.f32.xlu0 %v3201_v27 }
 0xb7f   :  { %v3232_v28 = vmul.f32 %v3188_v3, %v9991_v35  ;;  %v3142_v19 = vmul.f32 %v3110_v54, %v9991_v35 }
 0xb81   :  { %v7645_v38 = vpop.eup %7644  ;;  %v3248_v42 = vadd.f32 1e-05, %v3232_v28  ;;  %v10626_v21 = vsub.f32 %v10503_v23, %v3142_v19 }
 0xb82   :  { %v3264_v62 = vmul.f32 %v7645_v38, %v3247_v44  ;;  %vm3270_vm5 = vweird.f32 %v7645_v38 }
 0xb83   :  { %7646 = vrsqrt.f32 %v3248_v42  ;;  %v3174_v55 = vmul.f32 %v10626_v21, %v10626_v21  ;;  %vm3271_vm7 = vmor %vm3269_vm6, %vm3270_vm5  ;;  %vm3279_vm9 = vweird.f32 %v3248_v42 }
 0xb84   :  { %v3265_v58 = vmul.f32 %v7645_v38, %v3264_v62 }
 0xb85   :  { %v3204_v4 = vsel %vm115_vm0, %v3174_v55, 0.0 }
 0xb86   :  { %v3266_v9 = vmul.f32 0.5, %v3265_v58  ;;  %v3017_v33 = vpop.f32.mrf.mxu0  ;;  %3205 = vadd.xlane.f32.xlu1 %v3204_v4  ;;  %3127 = vadd.xlane.f32.xlu0 %v3126_v26  ;;  %v3066_v39 = vpop.f32.mrf.mxu1 }
 0xb87   :  { %v3018_v23 = vadd.f32 %v3017_v33, %v10428_v56 }
 0xb88   :  { %v3267_v1 = vsub.f32 1.5, %v3266_v9 }
 0xb89   :  { %v7647_v53 = vpop.eup %7646  ;;  %v3067_v41 = vadd.f32 %v3066_v39, %v3018_v23 }
 0xb8a   :  { %v3268_v30 = vmul.f32 %v7645_v38, %v3267_v1  ;;  %v3274_v14 = vmul.f32 %v7647_v53, %v3248_v42  ;;  %vm3280_vm8 = vweird.f32 %v7647_v53 }
 0xb8b   :  { %v10638_v5 = vadd.f32 %v3067_v41, %v10409_v16  ;;  %v10645_v16 = vperm.slane %v10425_v45, 7  ;;  %vm3281_vm10 = vmor %vm3279_vm9, %vm3280_vm8  ;;  %v10657_v45 = vld [vmem:[%s13278_s10 + $0x8] ss:$0 sm:$0xff] }
 0xb8c   :  { %v3275_v57 = vmul.f32 %v7647_v53, %v3274_v14  ;;  %v3272_v25 = vsel %vm3271_vm7, %v7645_v38, %v3268_v30 }
 0xb8d   :  { %v3129_v7 = vsel %vm115_vm0, %v10638_v5, 0.0  ;;  %v3423_v50 = vmul.f32 %v3272_v25, %v10481_v20 }
 0xb8e   :  { %v3276_v60 = vmul.f32 0.5, %v3275_v57  ;;  %v3113_v18 = vpop.xlane.xlu0 %3112  ;;  %v3019_v59 = vpop.f32.mrf.mxu0  ;;  %3130 = vadd.xlane.f32.xlu0 %v3129_v7 }
 0xb8f   :  { %v3143_v12 = vmul.f32 %v3113_v18, %v9991_v35  ;;  %v3191_v52 = vpop.xlane.xlu1 %3190  ;;  %v3020_v40 = vadd.f32 %v3019_v59, %v10428_v56  ;;  %v3068_v24 = vpop.f32.mrf.mxu1  ;;  %v3440_v20 = vmul.f32 %v10645_v16, %v3423_v50 }
 0xb90   :  { %v3277_v34 = vsub.f32 1.5, %v3276_v60  ;;  %v3233_v51 = vmul.f32 %v3191_v52, %v9991_v35 }
 0xb91   :  { %v10649_v31 = vsub.f32 %v10514_v48, %v3143_v12  ;;  %v3069_v56 = vadd.f32 %v3068_v24, %v3020_v40  ;;  %v10666_v3 = vadd.f32 %v10657_v45, %v3440_v20 }
 0xb92   :  { %v3278_v44 = vmul.f32 %v7647_v53, %v3277_v34  ;;  %v3249_v46 = vadd.f32 1e-05, %v3233_v51 }
 0xb93   :  { %v3175_v49 = vmul.f32 %v10649_v31, %v10649_v31  ;;  %13547 = vst [vmem:[#allocation33_spill] sm:$0xff] %v10666_v3 }
 0xb94   :  { %v3282_v63 = vsel %vm3281_vm10, %v7647_v53, %v3278_v44  ;;  %7648 = vrsqrt.f32 %v3249_v46  ;;  %vm3289_vm12 = vweird.f32 %v3249_v46 }
 0xb95   :  { %v3424_v48 = vmul.f32 %v3282_v63, %v10498_v2  ;;  %v3207_v15 = vsel %vm115_vm0, %v3175_v49, 0.0  ;;  %v10672_v2 = vadd.f32 %v3069_v56, %v10412_v47 }
 0xb96   :  { %3208 = vadd.xlane.f32.xlu1 %v3207_v15  ;;  %v3194_v13 = vpop.xlane.xlu2 %3193 }
 0xb97   :  { %v3441_v61 = vmul.f32 %v10645_v16, %v3424_v48  ;;  %v3116_v17 = vpop.xlane.xlu1 %3115  ;;  %v3234_v11 = vmul.f32 %v3194_v13, %v9991_v35  ;;  %v3132_v47 = vsel %vm115_vm0, %v10672_v2, 0.0 }
 0xb98   :  { %v3144_v27 = vmul.f32 %v3116_v17, %v9991_v35 }
 0xb99   :  { %v10669_v54 = vadd.f32 %v10657_v45, %v3441_v61  ;;  %v3250_v28 = vadd.f32 1e-05, %v3234_v11 }
 0xb9a   :  { %v7649_v19 = vpop.eup %7648  ;;  %v10675_v38 = vsub.f32 %v10529_v8, %v3144_v27 }
 0xb9b   :  { %13548 = vst [vmem:[#allocation32_spill] sm:$0xff] %v10669_v54  ;;  %v3485_v42 = vpack.c.bf16 %v10669_v54, %v10666_v3  ;;  %v3284_v62 = vmul.f32 %v7649_v19, %v3249_v46  ;;  %7650 = vrsqrt.f32 %v3250_v28  ;;  %vm3290_vm11 = vweird.f32 %v7649_v19 }
 0xb9c   :  { %v3176_v55 = vmul.f32 %v10675_v38, %v10675_v38  ;;  %vm3291_vm13 = vmor %vm3289_vm12, %vm3290_vm11  ;;  %vm3299_vm15 = vweird.f32 %v3250_v28 }
 0xb9d   :  { %v3285_v58 = vmul.f32 %v7649_v19, %v3284_v62  ;;  %6973 = vmatmul.msk.bf16.vlgmr.msrb.gmra.mxu2 %vm115_vm0, %v3485_v42  ;;  %6981 = vmatmul.msk.bf16.vlgmr.msrb.gmra.mxu3 %vm115_vm0, %v3485_v42 }
 0xb9e   :  { %3133 = vadd.xlane.f32.xlu1 %v3132_v47  ;;  %v3210_v8 = vsel %vm115_vm0, %v3176_v55, 0.0  ;;  %v3197_v4 = vpop.xlane.xlu2 %3196 }
 0xb9f   :  { %v3286_v26 = vmul.f32 0.5, %v3285_v58  ;;  %3211 = vadd.xlane.f32.xlu2 %v3210_v8  ;;  %v3119_v9 = vpop.xlane.xlu1 %3118  ;;  %v3235_v33 = vmul.f32 %v3197_v4, %v9991_v35 }
 0xba0   :  { %v3145_v23 = vmul.f32 %v3119_v9, %v9991_v35 }
 0xba1   :  { %v7651_v1 = vpop.eup %7650  ;;  %v3287_v39 = vsub.f32 1.5, %v3286_v26  ;;  %v3251_v53 = vadd.f32 1e-05, %v3235_v33 }
 0xba2   :  { %v3294_v41 = vmul.f32 %v7651_v1, %v3250_v28  ;;  %v10689_v30 = vsub.f32 %v10540_v22, %v3145_v23  ;;  %vm3300_vm14 = vweird.f32 %v7651_v1 }
 0xba3   :  { %v3288_v14 = vmul.f32 %v7649_v19, %v3287_v39  ;;  %7652 = vrsqrt.f32 %v3251_v53  ;;  %vm3301_vm1 = vmor %vm3299_vm15, %vm3300_vm14  ;;  %vm3309_vm3 = vweird.f32 %v3251_v53 }
 0xba4   :  { %v3295_v57 = vmul.f32 %v7651_v1, %v3294_v41  ;;  %v3177_v7 = vmul.f32 %v10689_v30, %v10689_v30 }
 0xba5   :  { %v3292_v25 = vsel %vm3291_vm13, %v7649_v19, %v3288_v14 }
 0xba6   :  { %v3296_v60 = vmul.f32 0.5, %v3295_v57  ;;  %v3213_v18 = vsel %vm115_vm0, %v3177_v7, 0.0  ;;  %v3200_v59 = vpop.xlane.xlu0 %3199  ;;  %v3122_v12 = vpop.xlane.xlu2 %3121  ;;  %v3425_v50 = vmul.f32 %v3292_v25, %v10511_v29 }
 0xba7   :  { %3214 = vadd.xlane.f32.xlu2 %v3213_v18  ;;  %v3236_v52 = vmul.f32 %v3200_v59, %v9991_v35  ;;  %v3146_v22 = vmul.f32 %v3122_v12, %v9991_v35 }
 0xba8   :  { %v3297_v34 = vsub.f32 1.5, %v3296_v60  ;;  %v3442_v29 = vmul.f32 %v10645_v16, %v3425_v50 }
 0xba9   :  { %v7653_v51 = vpop.eup %7652  ;;  %v3252_v40 = vadd.f32 1e-05, %v3236_v52  ;;  %v10698_v44 = vsub.f32 %v10553_v10, %v3146_v22 }
 0xbaa   :  { %v3298_v46 = vmul.f32 %v7651_v1, %v3297_v34  ;;  %v3304_v49 = vmul.f32 %v7653_v51, %v3251_v53  ;;  %v10707_v17 = vadd.f32 %v10657_v45, %v3442_v29  ;;  %vm3310_vm2 = vweird.f32 %v7653_v51 }
 0xbab   :  { %7654 = vrsqrt.f32 %v3252_v40  ;;  %v3178_v63 = vmul.f32 %v10698_v44, %v10698_v44  ;;  %vm3311_vm4 = vmor %vm3309_vm3, %vm3310_vm2  ;;  %vm3319_vm6 = vweird.f32 %v3252_v40 }
 0xbac   :  { %v3302_v24 = vsel %vm3301_vm1, %v7651_v1, %v3298_v46  ;;  %v3305_v20 = vmul.f32 %v7653_v51, %v3304_v49  ;;  %13549 = vst [vmem:[#allocation39_spill] sm:$0xff] %v10707_v17 }
 0xbad   :  { %v3426_v48 = vmul.f32 %v3302_v24, %v10524_v32  ;;  %v3216_v56 = vsel %vm115_vm0, %v3178_v63, 0.0 }
 0xbae   :  { %v3306_v15 = vmul.f32 0.5, %v3305_v20  ;;  %3217 = vadd.xlane.f32.xlu0 %v3216_v56 }
 0xbaf   :  { %v3443_v10 = vmul.f32 %v10645_v16, %v3426_v48 }
 0xbb0   :  { %v3307_v13 = vsub.f32 1.5, %v3306_v15 }
 0xbb1   :  { %v7655_v61 = vpop.eup %7654  ;;  %v10710_v11 = vadd.f32 %v10657_v45, %v3443_v10 }
 0xbb2   :  { %v3308_v27 = vmul.f32 %v7653_v51, %v3307_v13  ;;  %v3314_v28 = vmul.f32 %v7655_v61, %v3252_v40  ;;  %vm3320_vm5 = vweird.f32 %v7655_v61 }
 0xbb3   :  { %13550 = vst [vmem:[#allocation38_spill] sm:$0xff] %v10710_v11  ;;  %v3486_v32 = vpack.c.bf16 %v10710_v11, %v10707_v17  ;;  %vm3321_vm7 = vmor %vm3319_vm6, %vm3320_vm5 }
 0xbb4   :  { %v3315_v19 = vmul.f32 %v7655_v61, %v3314_v28  ;;  %v3312_v42 = vsel %vm3311_vm4, %v7653_v51, %v3308_v27 }
 0xbb5   :  { %6974 = vmatmul.msk.bf16.gmra.mxu2 %vm115_vm0, %v3486_v32  ;;  %6982 = vmatmul.msk.bf16.gmra.mxu3 %vm115_vm0, %v3486_v32  ;;  %v3427_v58 = vmul.f32 %v3312_v42, %v10537_v37 }
 0xbb6   :  { %v3316_v62 = vmul.f32 0.5, %v3315_v19 }
 0xbb7   :  { %v3444_v26 = vmul.f32 %v10645_v16, %v3427_v58 }
 0xbb8   :  { %v3317_v55 = vsub.f32 1.5, %v3316_v62 }
 0xbb9   :  { %v10721_v33 = vadd.f32 %v10657_v45, %v3444_v26 }
 0xbba   :  { %v3318_v47 = vmul.f32 %v7655_v61, %v3317_v55 }
 0xbbb   :  { %13551 = vst [vmem:[#allocation45_spill] sm:$0xff] %v10721_v33 }
 0xbbc   :  { %v3322_v8 = vsel %vm3321_vm7, %v7655_v61, %v3318_v47  ;;  %v6931_v47 = vld [vmem:[%s13278_s10 + $0x10] sm:$0xff] }
 0xbbd   :  { %v3428_v4 = vmul.f32 %v3322_v8, %v10550_v43 }
 0xbbf   :  { %v3445_v9 = vmul.f32 %v10645_v16, %v3428_v4 }
 0xbc1   :  { %v10724_v23 = vadd.f32 %v10657_v45, %v3445_v9 }
 0xbc3   :  { %13552 = vst [vmem:[#allocation44_spill] sm:$0xff] %v10724_v23  ;;  %v3487_v1 = vpack.c.bf16 %v10724_v23, %v10721_v33 }
 0xbc5   :  { %6975 = vmatmul.msk.bf16.gmra.mxu2 %vm115_vm0, %v3487_v1  ;;  %6983 = vmatmul.msk.bf16.gmra.mxu3 %vm115_vm0, %v3487_v1 }
 0xbe4   :  { %v3125_v37 = vpop.xlane.xlu2 %3124 }
 0xbe5   :  { %v3147_v43 = vmul.f32 %v3125_v37, %v9991_v35 }
 0xbe7   :  { %v10732_v39 = vsub.f32 %v10571_v0, %v3147_v43 }
 0xbe9   :  { %v3179_v53 = vmul.f32 %v10732_v39, %v10732_v39 }
 0xbeb   :  { %v3219_v41 = vsel %vm115_vm0, %v3179_v53, 0.0 }
 0xbec   :  { %3220 = vadd.xlane.f32.xlu1 %v3219_v41  ;;  %v3672_v41 = vperm.slane %v6931_v47, 1 }
 0xbf1   :  { %v3203_v14 = vpop.xlane.xlu0 %3202 }
 0xbf2   :  { %v3237_v57 = vmul.f32 %v3203_v14, %v9991_v35 }
 0xbf4   :  { %v3253_v7 = vadd.f32 1e-05, %v3237_v57 }
 0xbf6   :  { %7656 = vrsqrt.f32 %v3253_v7  ;;  %vm3329_vm9 = vweird.f32 %v3253_v7 }
 0xbf9   :  { %v3206_v25 = vpop.xlane.xlu1 %3205  ;;  %v3128_v60 = vpop.xlane.xlu0 %3127 }
 0xbfa   :  { %v3238_v18 = vmul.f32 %v3206_v25, %v9991_v35  ;;  %v3148_v59 = vmul.f32 %v3128_v60, %v9991_v35 }
 0xbfc   :  { %v7657_v12 = vpop.eup %7656  ;;  %v3254_v0 = vadd.f32 1e-05, %v3238_v18  ;;  %v10741_v52 = vsub.f32 %v10629_v36, %v3148_v59 }
 0xbfd   :  { %v3324_v22 = vmul.f32 %v7657_v12, %v3253_v7  ;;  %vm3330_vm8 = vweird.f32 %v7657_v12 }
 0xbfe   :  { %7658 = vrsqrt.f32 %v3254_v0  ;;  %v3180_v34 = vmul.f32 %v10741_v52, %v10741_v52  ;;  %vm3331_vm10 = vmor %vm3329_vm9, %vm3330_vm8  ;;  %vm3339_vm12 = vweird.f32 %v3254_v0 }
 0xbff   :  { %v3325_v51 = vmul.f32 %v7657_v12, %v3324_v22 }
 0xc00   :  { %v3222_v50 = vsel %vm115_vm0, %v3180_v34, 0.0 }
 0xc01   :  { %v3326_v40 = vmul.f32 0.5, %v3325_v51  ;;  %3223 = vadd.xlane.f32.xlu2 %v3222_v50  ;;  %v3131_v46 = vpop.xlane.xlu0 %3130 }
 0xc02   :  { %v3149_v49 = vmul.f32 %v3131_v46, %v9991_v35 }
 0xc03   :  { %v3327_v63 = vsub.f32 1.5, %v3326_v40 }
 0xc04   :  { %v7659_v24 = vpop.eup %7658  ;;  %v10748_v20 = vsub.f32 %v10638_v5, %v3149_v49 }
 0xc05   :  { %v3328_v36 = vmul.f32 %v7657_v12, %v3327_v63  ;;  %v3334_v48 = vmul.f32 %v7659_v24, %v3254_v0  ;;  %vm3340_vm11 = vweird.f32 %v7659_v24 }
 0xc06   :  { %v3181_v56 = vmul.f32 %v10748_v20, %v10748_v20  ;;  %vm3341_vm13 = vmor %vm3339_vm12, %vm3340_vm11 }
 0xc07   :  { %v3335_v29 = vmul.f32 %v7659_v24, %v3334_v48  ;;  %v3332_v10 = vsel %vm3331_vm10, %v7657_v12, %v3328_v36  ;;  %v10784_v36 = vperm.slane %v6931_v47, 0 }
 0xc08   :  { %v3225_v15 = vsel %vm115_vm0, %v3181_v56, 0.0  ;;  %v3429_v5 = vmul.f32 %v3332_v10, %v10606_v6 }
 0xc09   :  { %v3336_v13 = vmul.f32 0.5, %v3335_v29  ;;  %v3209_v61 = vpop.xlane.xlu1 %3208  ;;  %3226 = vadd.xlane.f32.xlu0 %v3225_v15 }
 0xc0a   :  { %v3239_v27 = vmul.f32 %v3209_v61, %v9991_v35  ;;  %v3446_v55 = vmul.f32 %v10645_v16, %v3429_v5 }
 0xc0b   :  { %v3337_v28 = vsub.f32 1.5, %v3336_v13 }
 0xc0c   :  { %v3255_v32 = vadd.f32 1e-05, %v3239_v27  ;;  %v10794_v27 = vld [vmem:[%s13280_s4 + $0x2] ss:$0 sm:$0xff] }
 0xc0d   :  { %v3338_v19 = vmul.f32 %v7659_v24, %v3337_v28  ;;  %v10796_v28 = vperm.slane %v6931_v47, 2 }
 0xc0e   :  { %7660 = vrsqrt.f32 %v3255_v32  ;;  %vm3349_vm15 = vweird.f32 %v3255_v32 }
 0xc0f   :  { %v3342_v42 = vsel %vm3341_vm13, %v7659_v24, %v3338_v19 }
 0xc10   :  { %v3430_v62 = vmul.f32 %v3342_v42, %v10626_v21  ;;  %v10767_v21 = vadd.f32 %v10657_v45, %v3446_v55 }
 0xc11   :  { %v3134_v58 = vpop.xlane.xlu1 %3133 }
 0xc12   :  { %v3150_v8 = vmul.f32 %v3134_v58, %v9991_v35  ;;  %v3212_v4 = vpop.xlane.xlu2 %3211  ;;  %v3447_v6 = vmul.f32 %v10645_v16, %v3430_v62  ;;  %13553 = vst [vmem:[#allocation51_spill] sm:$0xff] %v10767_v21 }
 0xc13   :  { %v3240_v26 = vmul.f32 %v3212_v4, %v9991_v35 }
 0xc14   :  { %v7661_v9 = vpop.eup %7660  ;;  %v10764_v1 = vsub.f32 %v10672_v2, %v3150_v8  ;;  %v10770_v37 = vadd.f32 %v10657_v45, %v3447_v6 }
 0xc15   :  { %v3344_v43 = vmul.f32 %v7661_v9, %v3255_v32  ;;  %v3256_v53 = vadd.f32 1e-05, %v3240_v26  ;;  %vm3350_vm14 = vweird.f32 %v7661_v9 }
 0xc16   :  { %13554 = vst [vmem:[#allocation50_spill] sm:$0xff] %v10770_v37  ;;  %v3488_v14 = vpack.c.bf16 %v10770_v37, %v10767_v21  ;;  %v3182_v57 = vmul.f32 %v10764_v1, %v10764_v1  ;;  %vm3351_vm1 = vmor %vm3349_vm15, %vm3350_vm14 }
 0xc17   :  { %v3345_v7 = vmul.f32 %v7661_v9, %v3344_v43  ;;  %7662 = vrsqrt.f32 %v3256_v53  ;;  %vm3359_vm3 = vweird.f32 %v3256_v53 }
 0xc18   :  { %6976 = vmatmul.msk.bf16.gmra.mxu2 %vm115_vm0, %v3488_v14  ;;  %6984 = vmatmul.msk.bf16.gmra.mxu3 %vm115_vm0, %v3488_v14  ;;  %v3228_v2 = vsel %vm115_vm0, %v3182_v57, 0.0 }
 0xc19   :  { %v3346_v25 = vmul.f32 0.5, %v3345_v7  ;;  %3229 = vadd.xlane.f32.xlu1 %v3228_v2  ;;  %3674 = vrot.lane.b32.xlu2 %v3672_v41, %s8031_s13 }
 0xc1a   :  { %v3215_v60 = vpop.xlane.xlu2 %3214 }
 0xc1b   :  { %v3347_v18 = vsub.f32 1.5, %v3346_v25  ;;  %v3241_v59 = vmul.f32 %v3215_v60, %v9991_v35 }
 0xc1d   :  { %v7663_v12 = vpop.eup %7662  ;;  %v3257_v0 = vadd.f32 1e-05, %v3241_v59  ;;  %v3348_v22 = vmul.f32 %v7661_v9, %v3347_v18 }
 0xc1e   :  { %v3354_v34 = vmul.f32 %v7663_v12, %v3256_v53  ;;  %vm3360_vm2 = vweird.f32 %v7663_v12 }
 0xc1f   :  { %7664 = vrsqrt.f32 %v3257_v0  ;;  %v3352_v49 = vsel %vm3351_vm1, %v7661_v9, %v3348_v22  ;;  %vm3361_vm4 = vmor %vm3359_vm3, %vm3360_vm2  ;;  %vm3369_vm6 = vweird.f32 %v3257_v0 }
 0xc20   :  { %v3355_v51 = vmul.f32 %v7663_v12, %v3354_v34  ;;  %v10781_v50 = vpop.f32.mrf.mxu2  ;;  %v3615_v40 = vpop.f32.mrf.mxu3  ;;  %v3431_v15 = vmul.f32 %v3352_v49, %v10649_v31  ;;  %v10801_v31 = vld [vmem:[%s13280_s4 + $0x3] ss:$0 sm:$0xff] }
 0xc21   :  { %v3218_v46 = vpop.xlane.xlu0 %3217  ;;  %v10789_v61 = vadd.f32 %v10784_v36, %v10781_v50  ;;  %v10816_v4 = vadd.f32 %v10796_v28, %v3615_v40 }
 0xc22   :  { %v3356_v63 = vmul.f32 0.5, %v3355_v51  ;;  %v3242_v24 = vmul.f32 %v3218_v46, %v9991_v35  ;;  %v3448_v58 = vmul.f32 %v10645_v16, %v3431_v15 }
 0xc23   :  { %v10813_v8 = vmul.f32 %v10794_v27, %v10789_v61  ;;  %v10828_v43 = vmul.f32 %v10801_v31, %v10789_v61 }
 0xc24   :  { %v3357_v48 = vsub.f32 1.5, %v3356_v63  ;;  %v3258_v56 = vadd.f32 1e-05, %v3242_v24  ;;  %v10835_v57 = vadd.f32 %v10657_v45, %v3448_v58 }
 0xc25   :  { %v7665_v29 = vpop.eup %7664  ;;  %13555 = vst [vmem:[#allocation20_spill] sm:$0xff] %v10813_v8 }
 0xc26   :  { %v3358_v10 = vmul.f32 %v7663_v12, %v3357_v48  ;;  %v3364_v13 = vmul.f32 %v7665_v29, %v3257_v0  ;;  %7666 = vrsqrt.f32 %v3258_v56  ;;  %13558 = vst [vmem:[#allocation22_spill] sm:$0xff] %v10828_v43  ;;  %vm3370_vm5 = vweird.f32 %v7665_v29 }
 0xc27   :  { %13559 = vst [vmem:[#allocation29_spill] sm:$0xff] %v10835_v57  ;;  %vm3371_vm7 = vmor %vm3369_vm6, %vm3370_vm5  ;;  %vm3379_vm9 = vweird.f32 %v3258_v56 }
 0xc28   :  { %v3362_v5 = vsel %vm3361_vm4, %v7663_v12, %v3358_v10  ;;  %v3365_v32 = vmul.f32 %v7665_v29, %v3364_v13  ;;  %v10803_v19 = vpop.f32.mrf.mxu2  ;;  %v3617_v55 = vpop.f32.mrf.mxu3  ;;  %v10848_v12 = vmul.f32 %v10794_v27, %v10816_v4 }
 0xc29   :  { %v3432_v42 = vmul.f32 %v3362_v5, %v10675_v38  ;;  %v10808_v62 = vadd.f32 %v10784_v36, %v10803_v19  ;;  %v10831_v53 = vadd.f32 %v10796_v28, %v3617_v55 }
 0xc2a   :  { %v3366_v47 = vmul.f32 0.5, %v3365_v32 }
 0xc2b   :  { %v10820_v6 = vmul.f32 %v10794_v27, %v10808_v62  ;;  %v10824_v38 = vmul.f32 %v10801_v31, %v10808_v62  ;;  %v3449_v41 = vmul.f32 %v10645_v16, %v3432_v42  ;;  %v10852_v22 = vmul.f32 %v10794_v27, %v10831_v53 }
 0xc2c   :  { %v7667_v26 = vpop.eup %7666  ;;  %v3367_v9 = vsub.f32 1.5, %v3366_v47 }
 0xc2d   :  { %13556 = vst [vmem:[#allocation18_spill] sm:$0xff] %v10820_v6  ;;  %v3374_v14 = vmul.f32 %v7667_v26, %v3258_v56  ;;  %v10842_v60 = vadd.f32 %v10657_v45, %v3449_v41  ;;  %vm3380_vm8 = vweird.f32 %v7667_v26 }
 0xc2e   :  { %13557 = vst [vmem:[#allocation23_spill] sm:$0xff] %v10824_v38  ;;  %v3368_v7 = vmul.f32 %v7665_v29, %v3367_v9  ;;  %vm3381_vm10 = vmor %vm3379_vm9, %vm3380_vm8 }
 0xc2f   :  { %13560 = vst [vmem:[#allocation28_spill] sm:$0xff] %v10842_v60  ;;  %v3375_v18 = vmul.f32 %v7667_v26, %v3374_v14  ;;  %v3489_v59 = vpack.c.bf16 %v10842_v60, %v10835_v57 }
 0xc30   :  { %v3372_v34 = vsel %vm3371_vm7, %v7665_v29, %v3368_v7 }
 0xc31   :  { %v3376_v51 = vmul.f32 0.5, %v3375_v18  ;;  %6977 = vmatmul.msk.bf16.gmra.mxu2 %vm115_vm0, %v3489_v59  ;;  %6985 = vmatmul.msk.bf16.gmra.mxu3 %vm115_vm0, %v3489_v59  ;;  %v3433_v46 = vmul.f32 %v3372_v34, %v10689_v30 }
 0xc33   :  { %v3377_v40 = vsub.f32 1.5, %v3376_v51  ;;  %v3450_v15 = vmul.f32 %v10645_v16, %v3433_v46 }
 0xc35   :  { %v3378_v49 = vmul.f32 %v7667_v26, %v3377_v40  ;;  %v10865_v13 = vadd.f32 %v10657_v45, %v3450_v15 }
 0xc37   :  { %v3382_v63 = vsel %vm3381_vm10, %v7667_v26, %v3378_v49  ;;  %13561 = vst [vmem:[#allocation35_spill] sm:$0xff] %v10865_v13 }
 0xc38   :  { %v3434_v24 = vmul.f32 %v3382_v63, %v10698_v44  ;;  %v10860_v48 = vpop.f32.mrf.mxu2  ;;  %v3620_v29 = vpop.f32.mrf.mxu3 }
 0xc39   :  { %v10874_v56 = vadd.f32 %v10784_v36, %v10860_v48  ;;  %v10877_v44 = vadd.f32 %v10796_v28, %v3620_v29 }
 0xc3a   :  { %v3451_v10 = vmul.f32 %v10645_v16, %v3434_v24 }
 0xc3b   :  { %v10892_v47 = vmul.f32 %v10794_v27, %v10877_v44  ;;  %v10896_v26 = vmul.f32 %v10794_v27, %v10874_v56  ;;  %v10908_v14 = vmul.f32 %v10801_v31, %v10874_v56 }
 0xc3c   :  { %v10868_v5 = vadd.f32 %v10657_v45, %v3451_v10 }
 0xc3d   :  { %13563 = vst [vmem:[#allocation41_spill] sm:$0xff] %v10896_v26 }
 0xc3e   :  { %13562 = vst [vmem:[#allocation34_spill] sm:$0xff] %v10868_v5  ;;  %v3490_v30 = vpack.c.bf16 %v10868_v5, %v10865_v13 }
 0xc3f   :  { %13565 = vst [vmem:[#allocation47_spill] sm:$0xff] %v10908_v14 }
 0xc40   :  { %v10879_v32 = vpop.f32.mrf.mxu2  ;;  %v3622_v42 = vpop.f32.mrf.mxu3 }
 0xc41   :  { %v10883_v55 = vadd.f32 %v10784_v36, %v10879_v32  ;;  %v10886_v58 = vadd.f32 %v10796_v28, %v3622_v42  ;;  %6978 = vmatmul.msk.bf16.gmra.mxu2 %vm115_vm0, %v3490_v30  ;;  %6986 = vmatmul.msk.bf16.gmra.mxu3 %vm115_vm0, %v3490_v30 }
 0xc43   :  { %v10900_v9 = vmul.f32 %v10794_v27, %v10886_v58  ;;  %v10904_v41 = vmul.f32 %v10794_v27, %v10883_v55  ;;  %v10912_v7 = vmul.f32 %v10801_v31, %v10883_v55 }
 0xc45   :  { %13564 = vst [vmem:[#allocation40_spill] sm:$0xff] %v10904_v41 }
 0xc46   :  { %13566 = vst [vmem:[#allocation46_spill] sm:$0xff] %v10912_v7 }
 0xc48   :  { %v10920_v51 = vpop.f32.mrf.mxu2  ;;  %v3625_v40 = vpop.f32.mrf.mxu3 }
 0xc49   :  { %v10923_v46 = vadd.f32 %v10796_v28, %v3625_v40  ;;  %v10927_v49 = vadd.f32 %v10784_v36, %v10920_v51 }
 0xc4b   :  { %v10940_v10 = vmul.f32 %v10794_v27, %v10923_v46  ;;  %v10948_v42 = vmul.f32 %v10794_v27, %v10927_v49 }
 0xc4d   :  { %13567 = vst [vmem:[#allocation53_spill] sm:$0xff] %v10948_v42 }
 0xc50   :  { %v10929_v63 = vpop.f32.mrf.mxu2  ;;  %v3627_v24 = vpop.f32.mrf.mxu3 }
 0xc51   :  { %v10933_v29 = vadd.f32 %v10784_v36, %v10929_v63  ;;  %v10936_v15 = vadd.f32 %v10796_v28, %v3627_v24  ;;  %v10956_v24 = vmul.f32 %v10801_v31, %v10927_v49 }
 0xc53   :  { %v10944_v30 = vmul.f32 %v10794_v27, %v10936_v15  ;;  %v10952_v40 = vmul.f32 %v10794_v27, %v10933_v29  ;;  %13569 = vst [vmem:[#allocation21_spill] sm:$0xff] %v10956_v24  ;;  %v10960_v34 = vmul.f32 %v10801_v31, %v10933_v29 }
 0xc55   :  { %13568 = vst [vmem:[#allocation52_spill] sm:$0xff] %v10952_v40 }
 0xc56   :  { %13570 = vst [vmem:[#allocation19_spill] sm:$0xff] %v10960_v34 }
 0xc5f   :  { %v3221_v0 = vpop.xlane.xlu1 %3220 }
 0xc60   :  { %v3243_v18 = vmul.f32 %v3221_v0, %v9991_v35 }
 0xc62   :  { %v3259_v5 = vadd.f32 1e-05, %v3243_v18 }
 0xc64   :  { %7668 = vrsqrt.f32 %v3259_v5  ;;  %vm3389_vm12 = vweird.f32 %v3259_v5 }
 0xc6a   :  { %v7669_v13 = vpop.eup %7668 }
 0xc6b   :  { %v3384_v60 = vmul.f32 %v7669_v13, %v3259_v5  ;;  %vm3390_vm11 = vweird.f32 %v7669_v13 }
 0xc6c   :  { %vm3391_vm13 = vmor %vm3389_vm12, %vm3390_vm11 }
 0xc6d   :  { %v3385_v57 = vmul.f32 %v7669_v13, %v3384_v60 }
 0xc6f   :  { %v3386_v33 = vmul.f32 0.5, %v3385_v57 }
 0xc71   :  { %v3387_v25 = vsub.f32 1.5, %v3386_v33 }
 0xc73   :  { %v3388_v54 = vmul.f32 %v7669_v13, %v3387_v25 }
 0xc74   :  { %v3224_v37 = vpop.xlane.xlu2 %3223 }
 0xc75   :  { %v3244_v21 = vmul.f32 %v3224_v37, %v9991_v35  ;;  %v3392_v60 = vsel %vm3391_vm13, %v7669_v13, %v3388_v54 }
 0xc76   :  { %v3435_v37 = vmul.f32 %v3392_v60, %v10732_v39 }
 0xc77   :  { %v3260_v23 = vadd.f32 1e-05, %v3244_v21 }
 0xc79   :  { %7670 = vrsqrt.f32 %v3260_v23  ;;  %vm3399_vm15 = vweird.f32 %v3260_v23 }
 0xc7c   :  { %v3227_v11 = vpop.xlane.xlu0 %3226 }
 0xc7d   :  { %v3245_v59 = vmul.f32 %v3227_v11, %v9991_v35 }
 0xc7f   :  { %v7671_v17 = vpop.eup %7670  ;;  %v3261_v2 = vadd.f32 1e-05, %v3245_v59  ;;  %v3452_v59 = vmul.f32 %v10645_v16, %v3435_v37 }
 0xc80   :  { %v3394_v0 = vmul.f32 %v7671_v17, %v3260_v23  ;;  %vm3400_vm14 = vweird.f32 %v7671_v17 }
 0xc81   :  { %7672 = vrsqrt.f32 %v3261_v2  ;;  %vm3401_vm1 = vmor %vm3399_vm15, %vm3400_vm14  ;;  %v10977_v13 = vadd.f32 %v10657_v45, %v3452_v59  ;;  %vm3409_vm3 = vweird.f32 %v3261_v2 }
 0xc82   :  { %v3395_v18 = vmul.f32 %v7671_v17, %v3394_v0 }
 0xc83   :  { %13571 = vst [vmem:[#allocation25_spill] sm:$0xff] %v10977_v13 }
 0xc84   :  { %v3396_v3 = vmul.f32 0.5, %v3395_v18 }
 0xc86   :  { %v3397_v24 = vsub.f32 1.5, %v3396_v3 }
 0xc87   :  { %v7673_v21 = vpop.eup %7672 }
 0xc88   :  { %v3398_v33 = vmul.f32 %v7671_v17, %v3397_v24  ;;  %v3404_v57 = vmul.f32 %v7673_v21, %v3261_v2  ;;  %vm3410_vm2 = vweird.f32 %v7673_v21 }
 0xc89   :  { %vm3411_vm4 = vmor %vm3409_vm3, %vm3410_vm2 }
 0xc8a   :  { %v3402_v11 = vsel %vm3401_vm1, %v7671_v17, %v3398_v33  ;;  %v3405_v34 = vmul.f32 %v7673_v21, %v3404_v57 }
 0xc8b   :  { %v3436_v25 = vmul.f32 %v3402_v11, %v10741_v52 }
 0xc8c   :  { %v3230_v5 = vpop.xlane.xlu1 %3229  ;;  %v3406_v23 = vmul.f32 0.5, %v3405_v34 }
 0xc8d   :  { %v3246_v0 = vmul.f32 %v3230_v5, %v9991_v35  ;;  %v3453_v54 = vmul.f32 %v10645_v16, %v3436_v25 }
 0xc8e   :  { %v3407_v52 = vsub.f32 1.5, %v3406_v23 }
 0xc8f   :  { %v3262_v3 = vadd.f32 1e-05, %v3246_v0  ;;  %v10980_v39 = vadd.f32 %v10657_v45, %v3453_v54 }
 0xc90   :  { %v3408_v18 = vmul.f32 %v7673_v21, %v3407_v52 }
 0xc91   :  { %13572 = vst [vmem:[#allocation24_spill] sm:$0xff] %v10980_v39  ;;  %7674 = vrsqrt.f32 %v3262_v3  ;;  %v3491_v17 = vpack.c.bf16 %v10980_v39, %v10977_v13  ;;  %vm3419_vm6 = vweird.f32 %v3262_v3 }
 0xc92   :  { %v3412_v34 = vsel %vm3411_vm4, %v7673_v21, %v3408_v18 }
 0xc93   :  { %6979 = vmatmul.msk.bf16.gmra.mxu2 %vm115_vm0, %v3491_v17  ;;  %6987 = vmatmul.msk.bf16.gmra.mxu3 %vm115_vm0, %v3491_v17  ;;  %v3437_v59 = vmul.f32 %v3412_v34, %v10748_v20 }
 0xc95   :  { %v3454_v52 = vmul.f32 %v10645_v16, %v3437_v59 }
 0xc97   :  { %v7675_v24 = vpop.eup %7674 }
 0xc98   :  { %v3414_v60 = vmul.f32 %v7675_v24, %v3262_v3  ;;  %vm3420_vm5 = vweird.f32 %v7675_v24 }
 0xc99   :  { %vm3421_vm7 = vmor %vm3419_vm6, %vm3420_vm5 }
 0xc9a   :  { %v3415_v37 = vmul.f32 %v7675_v24, %v3414_v60 }
 0xc9b   :  { %v10986_v33 = vpop.f32.mrf.mxu2  ;;  %v3630_v57 = vpop.f32.mrf.mxu3 }
 0xc9c   :  { %v3416_v11 = vmul.f32 0.5, %v3415_v37  ;;  %v10991_v23 = vadd.f32 %v10796_v28, %v3630_v57  ;;  %v10998_v21 = vadd.f32 %v10784_v36, %v10986_v33 }
 0xc9e   :  { %v3417_v25 = vsub.f32 1.5, %v3416_v11  ;;  %13573 = vst [vmem:[#allocation31_spill] sm:$0xff] %v10998_v21  ;;  %v11016_v60 = vmul.f32 %v10794_v27, %v10991_v23  ;;  %v11024_v57 = vmul.f32 %v10794_v27, %v10998_v21 }
 0xca0   :  { %v3418_v5 = vmul.f32 %v7675_v24, %v3417_v25  ;;  %13577 = vst [vmem:[#allocation43_spill] sm:$0xff] %v11024_v57  ;;  %v11038_v25 = vmul.f32 %v10801_v31, %v10998_v21 }
 0xca2   :  { %v3422_v0 = vsel %vm3421_vm7, %v7675_v24, %v3418_v5  ;;  %v11009_v24 = vadd.f32 %v10657_v45, %v3454_v52  ;;  %13579 = vst [vmem:[#allocation49_spill] sm:$0xff] %v11038_v25 }
 0xca3   :  { %v3438_v54 = vmul.f32 %v3422_v0, %v10764_v1  ;;  %v10993_v2 = vpop.f32.mrf.mxu2  ;;  %v3632_v17 = vpop.f32.mrf.mxu3 }
 0xca4   :  { %v11002_v20 = vadd.f32 %v10784_v36, %v10993_v2  ;;  %v11005_v3 = vadd.f32 %v10796_v28, %v3632_v17  ;;  %13575 = vst [vmem:[#allocation37_spill] sm:$0xff] %v11009_v24  ;;  %v11048_v17 = vpop.permute.xlu2 %3674 }
 0xca5   :  { %v3455_v1 = vmul.f32 %v10645_v16, %v3438_v54  ;;  %v3679_v25 = vadd.f32 %v11048_v17, %v10860_v48  ;;  %v3683_v6 = vadd.f32 %v11048_v17, %v10986_v33 }
 0xca6   :  { %13574 = vst [vmem:[#allocation30_spill] sm:$0xff] %v11002_v20  ;;  %v11020_v37 = vmul.f32 %v10794_v27, %v11005_v3  ;;  %v11028_v16 = vmul.f32 %v10794_v27, %v11002_v20  ;;  %v11042_v59 = vmul.f32 %v10801_v31, %v11002_v20 }
 0xca7   :  { %v11012_v18 = vadd.f32 %v10657_v45, %v3455_v1 }
 0xca8   :  { %13578 = vst [vmem:[#allocation42_spill] sm:$0xff] %v11028_v16 }
 0xca9   :  { %13576 = vst [vmem:[#allocation36_spill] sm:$0xff] %v11012_v18  ;;  %v3492_v45 = vpack.c.bf16 %v11012_v18, %v11009_v24 }
 0xcaa   :  { %13580 = vst [vmem:[#allocation48_spill] sm:$0xff] %v11042_v59 }
 0xcab   :  { %6980 = vmatmul.msk.bf16.gmra.mxu2 %vm115_vm0, %v3492_v45  ;;  %6988 = vmatmul.msk.bf16.gmra.mxu3 %vm115_vm0, %v3492_v45 }
 0xcb4   :  { %v3586_v0 = vpop.f32.mrf.mxu2  ;;  %v3635_v54 = vpop.f32.mrf.mxu3 }
 0xcb5   :  { %v11051_v52 = vadd.f32 %v10784_v36, %v3586_v0  ;;  %v11054_v1 = vadd.f32 %v10796_v28, %v3635_v54  ;;  %v3685_v18 = vadd.f32 %v11048_v17, %v3586_v0 }
 0xcb7   :  { %13581 = vst [vmem:[#allocation55_spill] sm:$0xff] %v11051_v52  ;;  %v11066_v13 = vmul.f32 %v10794_v27, %v11054_v1  ;;  %v11074_v0 = vmul.f32 %v10794_v27, %v11051_v52 }
 0xcb9   :  { %13583 = vst [vmem:[#allocation2_spill] sm:$0xff] %v11074_v0 }
 0xcbc   :  { %v3588_v11 = vpop.f32.mrf.mxu2  ;;  %v3637_v34 = vpop.f32.mrf.mxu3 }
 0xcbd   :  { %v11058_v24 = vadd.f32 %v10784_v36, %v3588_v11  ;;  %v3686_v45 = vadd.f32 %v11048_v17, %v3588_v11  ;;  %v11062_v5 = vadd.f32 %v10796_v28, %v3637_v34 }
 0xcbf   :  { %13582 = vst [vmem:[#allocation54_spill] sm:$0xff] %v11058_v24  ;;  %v3714_v39 = vpack.c.bf16 %v3686_v45, %v3685_v18  ;;  %v11070_v54 = vmul.f32 %v10794_v27, %v11062_v5  ;;  %v11078_v35 = vmul.f32 %v10794_v27, %v11058_v24  ;;  %v11083_v18 = vmul.f32 %v10801_v31, %v11051_v52 }
 0xcc0   :  { %v11087_v34 = vmul.f32 %v10801_v31, %v11058_v24 }
 0xcc1   :  { %13584 = vst [vmem:[#allocation3_spill] sm:$0xff] %v11078_v35  ;;  %3762 = vrot.lane.b32.xlu2 %v3714_v39, %s8031_s13  ;;  %v3680_v39 = vadd.f32 %v11048_v17, %v10879_v32 }
 0xcc2   :  { %13585 = vst [vmem:[#allocation4_spill] sm:$0xff] %v11083_v18 }
 0xcc3   :  { %13586 = vst [vmem:[#allocation27_spill] sm:$0xff] %v11087_v34  ;;  %v3711_v43 = vpack.c.bf16 %v3680_v39, %v3679_v25 }
 0xcc4   :  { %v11099_v14 = vpop.f32.mrf.mxu2  ;;  %v3640_v7 = vpop.f32.mrf.mxu3 }
 0xcc5   :  { %v11104_v11 = vadd.f32 %v10784_v36, %v11099_v14  ;;  %v11107_v45 = vadd.f32 %v10796_v28, %v3640_v7 }
 0xcc7   :  { %13587 = vst [vmem:[#allocation5_spill] sm:$0xff] %v11104_v11  ;;  %v11128_v7 = vmul.f32 %v10794_v27, %v11104_v11 }
 0xcc9   :  { %3756 = vrot.lane.b32.xlu2 %v3711_v43, %s8031_s13  ;;  %v11120_v43 = vmul.f32 %v10794_v27, %v11107_v45  ;;  %13589 = vst [vmem:[#allocation7_spill] sm:$0xff] %v11128_v7 }
 0xccc   :  { %v11109_v48 = vpop.f32.mrf.mxu2  ;;  %v3642_v38 = vpop.f32.mrf.mxu3 }
 0xccd   :  { %v11113_v32 = vadd.f32 %v10784_v36, %v11109_v48  ;;  %v11116_v59 = vadd.f32 %v10796_v28, %v3642_v38  ;;  %v11136_v38 = vmul.f32 %v10801_v31, %v11104_v11  ;;  %v3688_v21 = vadd.f32 %v11048_v17, %v11109_v48 }
 0xcce   :  { %v3687_v48 = vadd.f32 %v11048_v17, %v11099_v14 }
 0xccf   :  { %13588 = vst [vmem:[#allocation6_spill] sm:$0xff] %v11113_v32  ;;  %v11124_v25 = vmul.f32 %v10794_v27, %v11116_v59  ;;  %v11132_v39 = vmul.f32 %v10794_v27, %v11113_v32  ;;  %v11140_v18 = vmul.f32 %v10801_v31, %v11113_v32 }
 0xcd0   :  { %13591 = vst [vmem:[#allocation9_spill] sm:$0xff] %v11136_v38 }
 0xcd1   :  { %13590 = vst [vmem:[#allocation8_spill] sm:$0xff] %v11132_v39  ;;  %v3684_v39 = vadd.f32 %v11048_v17, %v10993_v2 }
 0xcd2   :  { %13592 = vst [vmem:[#allocation10_spill] sm:$0xff] %v11140_v18 }
 0xd16   :  { %v3596_v57 = vpop.f32.mrf.mxu2  ;;  %v3645_v16 = vpop.f32.mrf.mxu3 }
 0xd17   :  { %v11149_v42 = vadd.f32 %v10784_v36, %v3596_v57  ;;  %v11152_v40 = vadd.f32 %v10796_v28, %v3645_v16  ;;  %v3689_v8 = vadd.f32 %v11048_v17, %v3596_v57 }
 0xd19   :  { %13593 = vst [vmem:[#allocation11_spill] sm:$0xff] %v11149_v42  ;;  %v11164_v38 = vmul.f32 %v10794_v27, %v11152_v40  ;;  %v11172_v57 = vmul.f32 %v10794_v27, %v11149_v42 }
 0xd1b   :  { %13595 = vst [vmem:[#allocation13_spill] sm:$0xff] %v11172_v57 }
 0xd1e   :  { %v3598_v26 = vpop.f32.mrf.mxu2  ;;  %v3647_v41 = vpop.f32.mrf.mxu3 }
 0xd1f   :  { %v11156_v34 = vadd.f32 %v10784_v36, %v3598_v26  ;;  %v3690_v0 = vadd.f32 %v11048_v17, %v3598_v26  ;;  %v11160_v7 = vadd.f32 %v10796_v28, %v3647_v41  ;;  %v3678_v41 = vadd.f32 %v11048_v17, %v10803_v19 }
 0xd21   :  { %13594 = vst [vmem:[#allocation12_spill] sm:$0xff] %v11156_v34  ;;  %v3716_v35 = vpack.c.bf16 %v3690_v0, %v3689_v8  ;;  %v11168_v16 = vmul.f32 %v10794_v27, %v11160_v7  ;;  %v11176_v18 = vmul.f32 %v10794_v27, %v11156_v34  ;;  %v11181_v8 = vmul.f32 %v10801_v31, %v11149_v42 }
 0xd22   :  { %v11185_v26 = vmul.f32 %v10801_v31, %v11156_v34  ;;  %v3713_v42 = vpack.c.bf16 %v3684_v39, %v3683_v6  ;;  %v3677_v34 = vadd.f32 %v11048_v17, %v10781_v50  ;;  %v11209_v6 = vld [vmem:[%s13280_s4] ss:$0 sm:$0xff]  ;;  %v11214_v50 = vld [vmem:[%s13280_s4 + $0x1] ss:$0 sm:$0xff] }
 0xd23   :  { %13596 = vst [vmem:[#allocation14_spill] sm:$0xff] %v11176_v18  ;;  %3766 = vrot.lane.b32.xlu1 %v3716_v35, %s8031_s13  ;;  %v4301_v35 = vmul.f32 %v11214_v50, %v11160_v7  ;;  %v4299_v20 = vmul.f32 %v11214_v50, %v11116_v59 }
 0xd24   :  { %13597 = vst [vmem:[#allocation15_spill] sm:$0xff] %v11181_v8  ;;  %v3710_v57 = vpack.c.bf16 %v3678_v41, %v3677_v34  ;;  %v4024_v8 = vmul.f32 %v11209_v6, %v11160_v7 }
 0xd25   :  { %13598 = vst [vmem:[#allocation16_spill] sm:$0xff] %v11185_v26 }
 0xd2b   :  { %3760 = vrot.lane.b32.xlu1 %v3713_v42, %s8031_s13 }
 0xd2e   :  { %v3601_v11 = vpop.f32.mrf.mxu2  ;;  %v3650_v0 = vpop.f32.mrf.mxu3 }
 0xd2f   :  { %v11204_v2 = vadd.f32 %v10796_v28, %v3650_v0  ;;  %v11217_v19 = vadd.f32 %v10784_v36, %v3601_v11  ;;  %v3691_v34 = vadd.f32 %v11048_v17, %v3601_v11 }
 0xd31   :  { %v4025_v0 = vmul.f32 %v11209_v6, %v11204_v2  ;;  %v4302_v11 = vmul.f32 %v11214_v50, %v11204_v2  ;;  %v11249_v18 = vmul.f32 %v10794_v27, %v11217_v19  ;;  %v11258_v52 = vmul.f32 %v10801_v31, %v11217_v19 }
 0xd33   :  { %3754 = vrot.lane.b32.xlu1 %v3710_v57, %s8031_s13 }
 0xd36   :  { %v3603_v42 = vpop.f32.mrf.mxu2  ;;  %v3652_v33 = vpop.f32.mrf.mxu3 }
 0xd37   :  { %v11221_v39 = vadd.f32 %v10784_v36, %v3603_v42  ;;  %v3692_v57 = vadd.f32 %v11048_v17, %v3603_v42  ;;  %v11225_v41 = vadd.f32 %v10796_v28, %v3652_v33  ;;  %v11241_v42 = vmul.f32 %v10794_v27, %v11204_v2 }
 0xd39   :  { %v3717_v26 = vpack.c.bf16 %v3692_v57, %v3691_v34  ;;  %v4303_v36 = vmul.f32 %v11214_v50, %v11225_v41  ;;  %v4026_v28 = vmul.f32 %v11209_v6, %v11225_v41  ;;  %v11245_v33 = vmul.f32 %v10794_v27, %v11225_v41 }
 0xd3a   :  { %v11253_v34 = vmul.f32 %v10794_v27, %v11221_v39  ;;  %v11262_v24 = vmul.f32 %v10801_v31, %v11221_v39  ;;  %v4298_v27 = vmul.f32 %v11214_v50, %v11107_v45 }
 0xd3b   :  { %3768 = vrot.lane.b32.xlu0 %v3717_v26, %s8031_s13  ;;  %v4311_v57 = vpack.c.bf16 %v4303_v36, %v4302_v11  ;;  %v4034_v32 = vpack.c.bf16 %v4026_v28, %v4025_v0  ;;  %v4300_v26 = vmul.f32 %v11214_v50, %v11152_v40  ;;  %v4023_v0 = vmul.f32 %v11209_v6, %v11152_v40 }
 0xd3c   :  { %v4021_v11 = vmul.f32 %v11209_v6, %v11107_v45  ;;  %v4309_v14 = vpack.c.bf16 %v4299_v20, %v4298_v27  ;;  %v3682_v20 = vadd.f32 %v11048_v17, %v10929_v63 }
 0xd3d   :  { %4320 = vmatpush.bf16.msra.mxu2 %v4311_v57  ;;  %4369 = vmatpush.bf16.msra.mxu3 %v4034_v32  ;;  %v4310_v36 = vpack.c.bf16 %v4301_v35, %v4300_v26  ;;  %v4033_v28 = vpack.c.bf16 %v4024_v8, %v4023_v0  ;;  %v4022_v32 = vmul.f32 %v11209_v6, %v11116_v59 }
 0xd3e   :  { %v3715_v57 = vpack.c.bf16 %v3688_v21, %v3687_v48  ;;  %v4297_v8 = vmul.f32 %v11214_v50, %v11062_v5  ;;  %v4020_v26 = vmul.f32 %v11209_v6, %v11062_v5  ;;  %v3681_v21 = vadd.f32 %v11048_v17, %v10920_v51 }
 0xd3f   :  { %v4032_v35 = vpack.c.bf16 %v4022_v32, %v4021_v11  ;;  %v4296_v0 = vmul.f32 %v11214_v50, %v11054_v1  ;;  %v4019_v48 = vmul.f32 %v11209_v6, %v11054_v1  ;;  %v4294_v32 = vmul.f32 %v11214_v50, %v10991_v23 }
 0xd40   :  { %v3712_v51 = vpack.c.bf16 %v3682_v20, %v3681_v21  ;;  %v4014_v20 = vmul.f32 %v11209_v6, %v10886_v58 }
 0xd41   :  { %4321 = vmatpush.bf16.msra.mxu2 %v4310_v36  ;;  %4370 = vmatpush.bf16.msra.mxu3 %v4033_v28  ;;  %v4308_v27 = vpack.c.bf16 %v4297_v8, %v4296_v0  ;;  %v4031_v11 = vpack.c.bf16 %v4020_v26, %v4019_v48  ;;  %v4295_v36 = vmul.f32 %v11214_v50, %v11005_v3 }
 0xd42   :  { %v4018_v28 = vmul.f32 %v11209_v6, %v11005_v3  ;;  %v4292_v8 = vmul.f32 %v11214_v50, %v10923_v46  ;;  %v4015_v26 = vmul.f32 %v11209_v6, %v10923_v46  ;;  %v4291_v48 = vmul.f32 %v11214_v50, %v10886_v58 }
 0xd43   :  { %3764 = vrot.lane.b32.xlu0 %v3715_v57, %s8031_s13  ;;  %v4017_v57 = vmul.f32 %v11209_v6, %v10991_v23  ;;  %v4307_v63 = vpack.c.bf16 %v4295_v36, %v4294_v32  ;;  %v4012_v32 = vmul.f32 %v11209_v6, %v10831_v53 }
 0xd45   :  { %4322 = vmatpush.bf16.msra.mxu2 %v4309_v14  ;;  %4371 = vmatpush.bf16.msra.mxu3 %v4032_v35  ;;  %v4030_v17 = vpack.c.bf16 %v4018_v28, %v4017_v57  ;;  %v4293_v14 = vmul.f32 %v11214_v50, %v10936_v15  ;;  %v4016_v35 = vmul.f32 %v11209_v6, %v10936_v15 }
 0xd46   :  { %v5020_v57 = vmul.f32 %v10801_v31, %v11225_v41  ;;  %v5017_v41 = vmul.f32 %v10801_v31, %v11152_v40  ;;  %v5012_v40 = vmul.f32 %v10801_v31, %v11005_v3  ;;  %v5007_v3 = vmul.f32 %v10801_v31, %v10877_v44 }
 0xd47   :  { %v4306_v21 = vpack.c.bf16 %v4293_v14, %v4292_v8  ;;  %v4029_v0 = vpack.c.bf16 %v4016_v35, %v4015_v26  ;;  %v5019_v14 = vmul.f32 %v10801_v31, %v11204_v2  ;;  %v5015_v2 = vmul.f32 %v10801_v31, %v11107_v45 }
 0xd48   :  { %v5010_v45 = vmul.f32 %v10801_v31, %v10936_v15  ;;  %v5005_v15 = vmul.f32 %v10801_v31, %v10816_v4 }
 0xd49   :  { %4323 = vmatpush.bf16.msra.mxu2 %v4308_v27  ;;  %4372 = vmatpush.bf16.msra.mxu3 %v4031_v11  ;;  %v4290_v27 = vmul.f32 %v11214_v50, %v10877_v44  ;;  %v4013_v11 = vmul.f32 %v11209_v6, %v10877_v44  ;;  %v5028_v26 = vpack.c.bf16 %v5020_v57, %v5019_v14 }
 0xd4b   :  { %3758 = vrot.lane.b32.xlu0 %v3712_v51, %s8031_s13  ;;  %v4305_v36 = vpack.c.bf16 %v4291_v48, %v4290_v27  ;;  %v4028_v28 = vpack.c.bf16 %v4014_v20, %v4013_v11  ;;  %v4289_v51 = vmul.f32 %v11214_v50, %v10831_v53  ;;  %v5016_v48 = vmul.f32 %v10801_v31, %v11116_v59 }
 0xd4c   :  { %v5014_v27 = vmul.f32 %v10801_v31, %v11062_v5  ;;  %v5011_v59 = vmul.f32 %v10801_v31, %v10991_v23  ;;  %v5009_v5 = vmul.f32 %v10801_v31, %v10923_v46  ;;  %v5006_v23 = vmul.f32 %v10801_v31, %v10831_v53 }
 0xd4d   :  { %4324 = vmatpush.bf16.msra.mxu2 %v4307_v63  ;;  %4373 = vmatpush.bf16.msra.mxu3 %v4030_v17  ;;  %v4288_v63 = vmul.f32 %v11214_v50, %v10816_v4  ;;  %v4011_v17 = vmul.f32 %v11209_v6, %v10816_v4  ;;  %v5026_v20 = vpack.c.bf16 %v5016_v48, %v5015_v2 }
 0xd4e   :  { %v3723_v48 = vmul.f32 %v11209_v6, %v10808_v62  ;;  %v4048_v2 = vmul.f32 %v11214_v50, %v10808_v62  ;;  %v13601_v62 = vpack.c.bf16 %v11124_v25, %v11120_v43  ;;  %v4049_v43 = vmul.f32 %v11214_v50, %v10874_v56 }
 0xd4f   :  { %v4304_v35 = vpack.c.bf16 %v4289_v51, %v4288_v63  ;;  %v4027_v8 = vpack.c.bf16 %v4012_v32, %v4011_v17  ;;  %v5021_v32 = vpack.c.bf16 %v5006_v23, %v5005_v15  ;;  %v13610_v23 = vld [vmem:[#allocation55_spill] sm:$0xff] }
 0xd50   :  { %v3730_v15 = vmul.f32 %v11209_v6, %v13610_v23 }
 0xd51   :  { %4325 = vmatpush.bf16.msra.mxu2 %v4306_v21  ;;  %4374 = vmatpush.bf16.msra.mxu3 %v4029_v0  ;;  %v5018_v21 = vmul.f32 %v10801_v31, %v11160_v7  ;;  %v5013_v7 = vmul.f32 %v10801_v31, %v11054_v1  ;;  %v5008_v1 = vmul.f32 %v10801_v31, %v10886_v58  ;;  %v3763_v31 = vpop.permute.xlu2 %3762 }
 0xd52   :  { %v3807_v4 = vsel %vm115_vm0, %v3763_v31, 0 }
 0xd53   :  { %v5027_v0 = vpack.c.bf16 %v5018_v21, %v5017_v41  ;;  %v5025_v11 = vpack.c.bf16 %v5014_v27, %v5013_v7  ;;  %v5022_v51 = vpack.c.bf16 %v5008_v1, %v5007_v3  ;;  %v3722_v27 = vmul.f32 %v11209_v6, %v10789_v61  ;;  %v13609_v1 = vld [vmem:[#allocation54_spill] sm:$0xff] }
 0xd54   :  { %v4047_v7 = vmul.f32 %v11214_v50, %v10789_v61  ;;  %v3725_v61 = vmul.f32 %v11209_v6, %v10883_v55  ;;  %v3731_v3 = vmul.f32 %v11209_v6, %v13609_v1 }
 0xd55   :  { %4326 = vmatpush.bf16.msra.mxu2 %v4305_v36  ;;  %4375 = vmatpush.bf16.msra.mxu3 %v4028_v28  ;;  %v5024_v36 = vpack.c.bf16 %v5012_v40, %v5011_v59  ;;  %v5023_v28 = vpack.c.bf16 %v5010_v45, %v5009_v5  ;;  %v13600_v59 = vpack.c.bf16 %v11168_v16, %v11164_v38 }
 0xd56   :  { %v4063_v40 = vpack.c.bf16 %v4048_v2, %v4047_v7  ;;  %v4050_v38 = vmul.f32 %v11214_v50, %v10883_v55  ;;  %v13603_v16 = vpack.c.bf16 %v11020_v37, %v11016_v60  ;;  %v13605_v55 = vpack.c.bf16 %v10900_v9, %v10892_v47 }
 0xd57   :  { %v13606_v60 = vpack.c.bf16 %v10852_v22, %v10848_v12  ;;  %v4051_v37 = vmul.f32 %v11214_v50, %v10927_v49  ;;  %v13607_v12 = vld [vmem:[#allocation30_spill] sm:$0xff]  ;;  %v3736_v7 = vmul.f32 %v11209_v6, %v11217_v19 }
 0xd58   :  { %v3729_v22 = vmul.f32 %v11209_v6, %v13607_v12  ;;  %v4054_v9 = vmul.f32 %v11214_v50, %v13607_v12  ;;  %v13622_v12 = vld [vmem:[#allocation53_spill] sm:$0xff] }
 0xd59   :  { %4327 = vmatpush.bf16.msra.mxu2 %v4304_v35  ;;  %4376 = vmatpush.bf16.msra.mxu3 %v4027_v8 }
 0xd5d   :  { %5037 = vmatpush.bf16.msrb.mxu3 %v5028_v26  ;;  %v3757_v26 = vpop.permute.xlu2 %3756 }
 0xd5e   :  { %v3798_v21 = vsel %vm115_vm0, %v3757_v26, 0 }
 0xd61   :  { %5038 = vmatpush.bf16.msrb.mxu3 %v5027_v0 }
 0xd65   :  { %5039 = vmatpush.bf16.msrb.mxu3 %v5026_v20  ;;  %v13599_v20 = vpack.c.bf16 %v11245_v33, %v11241_v42  ;;  %v13602_v42 = vpack.c.bf16 %v11070_v54, %v11066_v13  ;;  %v3724_v33 = vmul.f32 %v11209_v6, %v10874_v56  ;;  %v4064_v13 = vpack.c.bf16 %v4050_v38, %v4049_v43  ;;  %v11495_v43 = vld [vmem:[%s13281_s1 + $0x10] sm:$0xff] }
 0xd66   :  { %v13604_v54 = vpack.c.bf16 %v10944_v30, %v10940_v10  ;;  %v3727_v56 = vmul.f32 %v11209_v6, %v10933_v29  ;;  %v4052_v10 = vmul.f32 %v11214_v50, %v10933_v29  ;;  %v3726_v30 = vmul.f32 %v11209_v6, %v10927_v49  ;;  %v13608_v29 = vld [vmem:[#allocation31_spill] sm:$0xff] }
 0xd67   :  { %v3739_v25 = vpack.c.bf16 %v3725_v61, %v3724_v33  ;;  %v3728_v45 = vmul.f32 %v11209_v6, %v13608_v29  ;;  %v4053_v49 = vmul.f32 %v11214_v50, %v13608_v29  ;;  %v13615_v61 = vld [vmem:[#allocation18_spill] sm:$0xff]  ;;  %v11527_v29 = vld [vmem:[%s13281_s1 + $0x28] sm:$0xff] }
 0xd68   :  { %v4065_v47 = vpack.c.bf16 %v4052_v10, %v4051_v37  ;;  %v11514_v37 = vld [vmem:[%s13281_s1 + $0x20] sm:$0xff] }
 0xd69   :  { %5040 = vmatpush.bf16.msrb.mxu3 %v5025_v11  ;;  %v3738_v11 = vpack.c.bf16 %v3723_v48, %v3722_v27  ;;  %v3741_v5 = vpack.c.bf16 %v3729_v22, %v3728_v45  ;;  %v4062_v27 = vmul.f32 %v11214_v50, %v11221_v39 }
 0xd6d   :  { %5041 = vmatpush.bf16.msrb.mxu3 %v5024_v36  ;;  %v3740_v36 = vpack.c.bf16 %v3727_v56, %v3726_v30  ;;  %v11505_v56 = vld [vmem:[%s13281_s1 + $0x18] sm:$0xff] }
 0xd71   :  { %5042 = vmatpush.bf16.msrb.mxu3 %v5023_v28  ;;  %v4066_v28 = vpack.c.bf16 %v4054_v9, %v4053_v49 }
 0xd75   :  { %5043 = vmatpush.bf16.msrb.mxu3 %v5022_v51  ;;  %v4056_v51 = vmul.f32 %v11214_v50, %v13609_v1 }
 0xd79   :  { %5044 = vmatpush.bf16.msrb.mxu3 %v5021_v32  ;;  %v4055_v32 = vmul.f32 %v11214_v50, %v13610_v23 }
 0xd95   :  { %v3767_v58 = vpop.permute.xlu1 %3766 }
 0xd96   :  { %v3813_v63 = vsel %vm115_vm0, %v3767_v58, 0  ;;  %v13611_v58 = vld [vmem:[#allocation6_spill] sm:$0xff] }
 0xd9d   :  { %v3761_v17 = vpop.permute.xlu1 %3760 }
 0xd9e   :  { %v3804_v14 = vsel %vm115_vm0, %v3761_v17, 0 }
 0xda5   :  { %v3755_v41 = vpop.permute.xlu1 %3754 }
 0xda6   :  { %v3795_v0 = vsel %vm115_vm0, %v3755_v41, 0 }
 0xdad   :  { %v3769_v57 = vpop.permute.xlu0 %3768 }
 0xdae   :  { %v3816_v46 = vsel %vm115_vm0, %v3769_v57, 0  ;;  %v3742_v57 = vpack.c.bf16 %v3731_v3, %v3730_v15  ;;  %v13624_v3 = vld [vmem:[#allocation42_spill] sm:$0xff] }
 0xdaf   :  { %3818 = vmatpush.bf16.xpose.msrb.mxu0 %v3816_v46  ;;  %4095 = vmatpush.bf16.xpose.msrb.mxu1 %v3816_v46 }
 0xdb0   :  { %4812 = vmatpush.bf16.xpose.msrb.mxu2 %v3816_v46 }
 0xdb5   :  { %v3765_v44 = vpop.permute.xlu0 %3764 }
 0xdb6   :  { %v3810_v53 = vsel %vm115_vm0, %v3765_v44, 0  ;;  %v4058_v44 = vmul.f32 %v11214_v50, %v13611_v58 }
 0xdb7   :  { %3819 = vmatpush.bf16.xpose.msrb.mxu0 %v3813_v63  ;;  %4096 = vmatpush.bf16.xpose.msrb.mxu1 %v3813_v63 }
 0xdb8   :  { %4813 = vmatpush.bf16.xpose.msrb.mxu2 %v3813_v63 }
 0xdbd   :  { %v3759_v35 = vpop.permute.xlu0 %3758 }
 0xdbe   :  { %v3801_v8 = vsel %vm115_vm0, %v3759_v35, 0  ;;  %v13613_v35 = vld [vmem:[#allocation12_spill] sm:$0xff] }
 0xdbf   :  { %3820 = vmatpush.bf16.xpose.msrb.mxu0 %v3810_v53  ;;  %4097 = vmatpush.bf16.xpose.msrb.mxu1 %v3810_v53  ;;  %v4060_v26 = vmul.f32 %v11214_v50, %v13613_v35 }
 0xdc0   :  { %4814 = vmatpush.bf16.xpose.msrb.mxu2 %v3810_v53 }
 0xdc7   :  { %3821 = vmatpush.bf16.xpose.msrb.mxu0 %v3807_v4  ;;  %4098 = vmatpush.bf16.xpose.msrb.mxu1 %v3807_v4 }
 0xdc8   :  { %4815 = vmatpush.bf16.xpose.msrb.mxu2 %v3807_v4 }
 0xdcf   :  { %3822 = vmatpush.bf16.xpose.msrb.mxu0 %v3804_v14  ;;  %4099 = vmatpush.bf16.xpose.msrb.mxu1 %v3804_v14 }
 0xdd0   :  { %4816 = vmatpush.bf16.xpose.msrb.mxu2 %v3804_v14 }
 0xdd7   :  { %3823 = vmatpush.bf16.xpose.msrb.mxu0 %v3801_v8  ;;  %4100 = vmatpush.bf16.xpose.msrb.mxu1 %v3801_v8 }
 0xdd8   :  { %4817 = vmatpush.bf16.xpose.msrb.mxu2 %v3801_v8 }
 0xddf   :  { %3824 = vmatpush.bf16.xpose.msrb.mxu0 %v3798_v21  ;;  %4101 = vmatpush.bf16.xpose.msrb.mxu1 %v3798_v21 }
 0xde0   :  { %4818 = vmatpush.bf16.xpose.msrb.mxu2 %v3798_v21 }
 0xde7   :  { %3825 = vmatpush.bf16.xpose.msrb.mxu0 %v3795_v0  ;;  %4102 = vmatpush.bf16.xpose.msrb.mxu1 %v3795_v0 }
 0xde8   :  { %4819 = vmatpush.bf16.xpose.msrb.mxu2 %v3795_v0 }
 0xdee   :  { %6989 = vmatmul.msk.bf16.vlgmr.msrb.gmra.mxu0 %vm115_vm0, %v3738_v11  ;;  %6998 = vmatmul.msk.bf16.vlgmr.msrb.gmra.mxu1 %vm115_vm0, %v4063_v40  ;;  %v4061_v11 = vmul.f32 %v11214_v50, %v11217_v19  ;;  %v11489_v19 = vld [vmem:[%s13281_s1 + $0x8] sm:$0xff] }
 0xdef   :  { %4470 = vmatpush.bf16.xpose.msra.mxu0 %v3816_v46  ;;  %4695 = vmatpush.bf16.msra.mxu1 %v13599_v20  ;;  %v4067_v46 = vpack.c.bf16 %v4056_v51, %v4055_v32  ;;  %v3737_v20 = vmul.f32 %v11209_v6, %v11221_v39  ;;  %v13625_v51 = vld [vmem:[#allocation43_spill] sm:$0xff] }
 0xdf0   :  { %v13626_v23 = vpack.c.bf16 %v13624_v3, %v13625_v51  ;;  %v11628_v3 = vld [vmem:[%s13281_s1 + $0x58] sm:$0xff] }
 0xdf1   :  { %v3745_v40 = vpack.c.bf16 %v3737_v20, %v3736_v7  ;;  %v13636_v7 = vpack.c.bf16 %v11253_v34, %v11249_v18  ;;  %v11602_v18 = vld [vmem:[%s13281_s1 + $0x48] sm:$0xff] }
 0xdf3   :  { %4696 = vmatpush.bf16.msra.mxu1 %v13600_v59  ;;  %v4070_v59 = vpack.c.bf16 %v4062_v27, %v4061_v11 }
 0xdf7   :  { %4471 = vmatpush.bf16.xpose.msra.mxu0 %v3813_v63  ;;  %4697 = vmatpush.bf16.msra.mxu1 %v13601_v62  ;;  %v3733_v63 = vmul.f32 %v11209_v6, %v13611_v58 }
 0xdfb   :  { %4698 = vmatpush.bf16.msra.mxu1 %v13602_v42  ;;  %v11479_v42 = vld [vmem:[%s13281_s1] sm:$0xff] }
 0xdfe   :  { %6990 = vmatmul.msk.bf16.gmra.mxu0 %vm115_vm0, %v3739_v25  ;;  %6999 = vmatmul.msk.bf16.gmra.mxu1 %vm115_vm0, %v4064_v13  ;;  %v13618_v13 = vld [vmem:[#allocation40_spill] sm:$0xff] }
 0xdff   :  { %4472 = vmatpush.bf16.xpose.msra.mxu0 %v3810_v53  ;;  %4699 = vmatpush.bf16.msra.mxu1 %v13603_v16  ;;  %v13612_v53 = vld [vmem:[#allocation5_spill] sm:$0xff] }
 0xe00   :  { %v3732_v31 = vmul.f32 %v11209_v6, %v13612_v53 }
 0xe02   :  { %v3743_v17 = vpack.c.bf16 %v3733_v63, %v3732_v31  ;;  %v13627_v31 = vld [vmem:[#allocation3_spill] sm:$0xff] }
 0xe03   :  { %4700 = vmatpush.bf16.msra.mxu1 %v13604_v54  ;;  %v13619_v54 = vld [vmem:[#allocation41_spill] sm:$0xff] }
 0xe07   :  { %4473 = vmatpush.bf16.xpose.msra.mxu0 %v3807_v4  ;;  %4701 = vmatpush.bf16.msra.mxu1 %v13605_v55  ;;  %v4057_v4 = vmul.f32 %v11214_v50, %v13612_v53  ;;  %v13620_v55 = vpack.c.bf16 %v13618_v13, %v13619_v54 }
 0xe0b   :  { %4702 = vmatpush.bf16.msra.mxu1 %v13606_v60 }
 0xe0e   :  { %6991 = vmatmul.msk.bf16.gmra.mxu0 %vm115_vm0, %v3740_v36  ;;  %7000 = vmatmul.msk.bf16.gmra.mxu1 %vm115_vm0, %v4065_v47  ;;  %v13621_v47 = vld [vmem:[#allocation52_spill] sm:$0xff] }
 0xe0f   :  { %4474 = vmatpush.bf16.xpose.msra.mxu0 %v3804_v14  ;;  %v4068_v14 = vpack.c.bf16 %v4058_v44, %v4057_v4  ;;  %v13623_v22 = vpack.c.bf16 %v13621_v47, %v13622_v12  ;;  %v11564_v44 = vld [vmem:[%s13281_s1 + $0x40] sm:$0xff] }
 0xe10   :  { %v13628_v4 = vld [vmem:[#allocation2_spill] sm:$0xff] }
 0xe17   :  { %4475 = vmatpush.bf16.xpose.msra.mxu0 %v3801_v8  ;;  %v3735_v8 = vmul.f32 %v11209_v6, %v13613_v35  ;;  %v13630_v35 = vld [vmem:[#allocation8_spill] sm:$0xff] }
 0xe1e   :  { %6992 = vmatmul.msk.bf16.gmra.mxu0 %vm115_vm0, %v3741_v5  ;;  %7001 = vmatmul.msk.bf16.gmra.mxu1 %vm115_vm0, %v4066_v28  ;;  %v11538_v28 = vld [vmem:[%s13281_s1 + $0x30] sm:$0xff] }
 0xe1f   :  { %4476 = vmatpush.bf16.xpose.msra.mxu0 %v3798_v21  ;;  %v13614_v21 = vld [vmem:[#allocation11_spill] sm:$0xff] }
 0xe20   :  { %v3734_v41 = vmul.f32 %v11209_v6, %v13614_v21  ;;  %v13616_v6 = vld [vmem:[#allocation20_spill] sm:$0xff] }
 0xe21   :  { %v13617_v38 = vpack.c.bf16 %v13615_v61, %v13616_v6 }
 0xe22   :  { %v3744_v48 = vpack.c.bf16 %v3735_v8, %v3734_v41  ;;  %v13631_v8 = vld [vmem:[#allocation7_spill] sm:$0xff] }
 0xe27   :  { %4477 = vmatpush.bf16.xpose.msra.mxu0 %v3795_v0  ;;  %v4059_v0 = vmul.f32 %v11214_v50, %v13614_v21 }
 0xe29   :  { %v4069_v2 = vpack.c.bf16 %v4060_v26, %v4059_v0  ;;  %v13632_v26 = vpack.c.bf16 %v13630_v35, %v13631_v8  ;;  %v13633_v0 = vld [vmem:[#allocation14_spill] sm:$0xff] }
 0xe2e   :  { %6993 = vmatmul.msk.bf16.gmra.mxu0 %vm115_vm0, %v3742_v57  ;;  %7002 = vmatmul.msk.bf16.gmra.mxu1 %vm115_vm0, %v4067_v46  ;;  %v11553_v57 = vld [vmem:[%s13281_s1 + $0x38] sm:$0xff] }
 0xe3e   :  { %6994 = vmatmul.msk.bf16.gmra.mxu0 %vm115_vm0, %v3743_v17  ;;  %7003 = vmatmul.msk.bf16.gmra.mxu1 %vm115_vm0, %v4068_v14  ;;  %v13629_v17 = vpack.c.bf16 %v13627_v31, %v13628_v4 }
 0xe4e   :  { %6995 = vmatmul.msk.bf16.gmra.mxu0 %vm115_vm0, %v3744_v48  ;;  %7004 = vmatmul.msk.bf16.gmra.mxu1 %vm115_vm0, %v4069_v2  ;;  %v13634_v48 = vld [vmem:[#allocation13_spill] sm:$0xff] }
 0xe4f   :  { %v13635_v2 = vpack.c.bf16 %v13633_v0, %v13634_v48  ;;  %v11654_v0 = vld [vmem:[%s13281_s1 + $0x68] sm:$0xff] }
 0xe5e   :  { %6996 = vmatmul.msk.bf16.gmra.mxu0 %vm115_vm0, %v3745_v40  ;;  %7005 = vmatmul.msk.bf16.gmra.mxu1 %vm115_vm0, %v4070_v59 }
 0xe6b   :  { %v4104_v62 = vpop.f32.mrf.mxu1  ;;  %v11533_v49 = vpop.f32.mrf.mxu0 }
 0xe6c   :  { %v4105_v39 = vadd.f32 %v11479_v42, %v4104_v62 }
 0xe6e   :  { %4144 = vmax.xlane.f32.xlu0 %v4105_v39  ;;  %7007 = vmatmul.msk.bf16.vlgmr.msra.gmra.mxu0 %vm115_vm0, %v13617_v38 }
 0xe73   :  { %v4106_v50 = vpop.f32.mrf.mxu1  ;;  %v11548_v15 = vpop.f32.mrf.mxu0 }
 0xe74   :  { %v4107_v16 = vadd.f32 %v11489_v19, %v4106_v50 }
 0xe76   :  { %4146 = vmax.xlane.f32.xlu2 %v4107_v16 }
 0xe7b   :  { %v4109_v33 = vpop.f32.mrf.mxu1  ;;  %v11559_v63 = vpop.f32.mrf.mxu0 }
 0xe7c   :  { %v4110_v25 = vadd.f32 %v11495_v43, %v4109_v33 }
 0xe7e   :  { %4148 = vmax.xlane.f32.xlu1 %v4110_v25  ;;  %7008 = vmatmul.msk.bf16.gmra.mxu0 %vm115_vm0, %v13620_v55 }
 0xe83   :  { %v4111_v60 = vpop.f32.mrf.mxu1  ;;  %v11574_v14 = vpop.f32.mrf.mxu0 }
 0xe84   :  { %v11508_v10 = vadd.f32 %v11505_v56, %v4111_v60 }
 0xe86   :  { %4150 = vmax.xlane.f32.xlu0 %v11508_v10 }
 0xe8b   :  { %v4114_v30 = vpop.f32.mrf.mxu1  ;;  %v11580_v21 = vpop.f32.mrf.mxu0 }
 0xe8c   :  { %v11517_v36 = vadd.f32 %v11514_v37, %v4114_v30  ;;  %v11615_v30 = vld [vmem:[%s13281_s1 + $0x50] sm:$0xff] }
 0xe8e   :  { %4152 = vmax.xlane.f32.xlu2 %v11517_v36  ;;  %7009 = vmatmul.msk.bf16.gmra.mxu0 %vm115_vm0, %v13623_v22 }
 0xe93   :  { %v4116_v9 = vpop.f32.mrf.mxu1  ;;  %v11582_v41 = vpop.f32.mrf.mxu0 }
 0xe94   :  { %v11530_v45 = vadd.f32 %v11527_v29, %v4116_v9 }
 0xe96   :  { %4154 = vmax.xlane.f32.xlu1 %v11530_v45 }
 0xe9b   :  { %v4119_v5 = vpop.f32.mrf.mxu1  ;;  %v11588_v20 = vpop.f32.mrf.mxu0 }
 0xe9c   :  { %v11541_v1 = vadd.f32 %v11538_v28, %v4119_v5 }
 0xe9e   :  { %4156 = vmax.xlane.f32.xlu0 %v11541_v1  ;;  %7010 = vmatmul.msk.bf16.gmra.mxu0 %vm115_vm0, %v13626_v23 }
 0xea3   :  { %v4121_v32 = vpop.f32.mrf.mxu1  ;;  %v11590_v27 = vpop.f32.mrf.mxu0 }
 0xea4   :  { %v11556_v46 = vadd.f32 %v11553_v57, %v4121_v32 }
 0xea6   :  { %4158 = vmax.xlane.f32.xlu2 %v11556_v46 }
 0xeab   :  { %v4124_v58 = vpop.f32.mrf.mxu1 }
 0xeac   :  { %v11567_v53 = vadd.f32 %v11564_v44, %v4124_v58 }
 0xeae   :  { %4160 = vmax.xlane.f32.xlu2 %v11567_v53  ;;  %7011 = vmatmul.msk.bf16.gmra.mxu0 %vm115_vm0, %v13629_v17 }
 0xeb3   :  { %v4126_v59 = vpop.f32.mrf.mxu1 }
 0xeb4   :  { %v11605_v34 = vadd.f32 %v11602_v18, %v4126_v59  ;;  %v11667_v59 = vld [vmem:[%s13281_s1 + $0x70] sm:$0xff] }
 0xebb   :  { %v4129_v33 = vpop.f32.mrf.mxu1 }
 0xebc   :  { %v11618_v47 = vadd.f32 %v11615_v30, %v4129_v33 }
 0xebe   :  { %7012 = vmatmul.msk.bf16.gmra.mxu0 %vm115_vm0, %v13632_v26 }
 0xec3   :  { %v4131_v55 = vpop.f32.mrf.mxu1 }
 0xec4   :  { %v11631_v51 = vadd.f32 %v11628_v3, %v4131_v55 }
 0xecb   :  { %v4134_v5 = vpop.f32.mrf.mxu1 }
 0xece   :  { %7013 = vmatmul.msk.bf16.gmra.mxu0 %vm115_vm0, %v13635_v2 }
 0xed3   :  { %v4136_v35 = vpop.f32.mrf.mxu1 }
 0xed4   :  { %v11657_v48 = vadd.f32 %v11654_v0, %v4136_v35 }
 0xede   :  { %7014 = vmatmul.msk.bf16.gmra.mxu0 %vm115_vm0, %v13636_v7 }
 0xee1   :  { %v4145_v11 = vpop.xlane.xlu0 %4144 }
 0xee2   :  { %v4176_v40 = vsub.f32 %v4105_v39, %v4145_v11  ;;  %v4139_v11 = vpop.f32.mrf.mxu1 }
 0xee4   :  { %v4192_v62 = vmul.f32 1.442695, %v4176_v40 }
 0xee6   :  { %7676 = vpow2.f32 %v4192_v62  ;;  %v11670_v62 = vadd.f32 %v11667_v59, %v4139_v11 }
 0xee9   :  { %v4147_v61 = vpop.xlane.xlu2 %4146 }
 0xeea   :  { %v4177_v6 = vsub.f32 %v4107_v16, %v4147_v61 }
 0xeec   :  { %v11596_v38 = vpop.eup %7676  ;;  %v4194_v50 = vmul.f32 1.442695, %v4177_v6 }
 0xeed   :  { %4224 = vadd.xlane.f32.xlu1 %v11596_v38 }
 0xeee   :  { %7678 = vpow2.f32 %v4194_v50  ;;  %v4141_v50 = vpop.f32.mrf.mxu1 }
 0xef1   :  { %v4149_v13 = vpop.xlane.xlu1 %4148 }
 0xef2   :  { %v4178_v54 = vsub.f32 %v4110_v25, %v4149_v13  ;;  %v11680_v13 = vld [vmem:[%s13281_s1 + $0x78] sm:$0xff] }
 0xef4   :  { %v11607_v39 = vpop.eup %7678  ;;  %v4196_v16 = vmul.f32 1.442695, %v4178_v54  ;;  %v11683_v54 = vadd.f32 %v11680_v13, %v4141_v50 }
 0xef5   :  { %4226 = vadd.xlane.f32.xlu0 %v11607_v39  ;;  %4162 = vmax.xlane.f32.xlu1 %v11605_v34 }
 0xef6   :  { %7680 = vpow2.f32 %v4196_v16 }
 0xef9   :  { %v4151_v60 = vpop.xlane.xlu0 %4150 }
 0xefa   :  { %v4179_v25 = vsub.f32 %v11508_v10, %v4151_v60 }
 0xefc   :  { %v11620_v12 = vpop.eup %7680  ;;  %v4198_v22 = vmul.f32 1.442695, %v4179_v25 }
 0xefd   :  { %4228 = vadd.xlane.f32.xlu0 %v11620_v12  ;;  %4164 = vmax.xlane.f32.xlu1 %v11618_v47 }
 0xefe   :  { %7682 = vpow2.f32 %v4198_v22 }
 0xf01   :  { %v4153_v9 = vpop.xlane.xlu2 %4152 }
 0xf02   :  { %v4180_v10 = vsub.f32 %v11517_v36, %v4153_v9  ;;  %v11641_v36 = vld [vmem:[%s13281_s1 + $0x60] sm:$0xff] }
 0xf03   :  { %v11644_v4 = vadd.f32 %v11641_v36, %v4134_v5 }
 0xf04   :  { %v11633_v23 = vpop.eup %7682  ;;  %v4200_v32 = vmul.f32 1.442695, %v4180_v10 }
 0xf05   :  { %4166 = vmax.xlane.f32.xlu0 %v11631_v51  ;;  %4230 = vadd.xlane.f32.xlu2 %v11633_v23 }
 0xf06   :  { %7684 = vpow2.f32 %v4200_v32 }
 0xf09   :  { %v4155_v58 = vpop.xlane.xlu1 %4154 }
 0xf0a   :  { %v4181_v31 = vsub.f32 %v11530_v45, %v4155_v58 }
 0xf0c   :  { %v11646_v17 = vpop.eup %7684  ;;  %v4202_v8 = vmul.f32 1.442695, %v4181_v31 }
 0xf0d   :  { %4168 = vmax.xlane.f32.xlu0 %v11644_v4  ;;  %4232 = vadd.xlane.f32.xlu2 %v11646_v17 }
 0xf0e   :  { %7686 = vpow2.f32 %v4202_v8 }
 0xf11   :  { %v4157_v26 = vpop.xlane.xlu0 %4156 }
 0xf12   :  { %v4182_v45 = vsub.f32 %v11541_v1, %v4157_v26 }
 0xf14   :  { %v11659_v2 = vpop.eup %7686  ;;  %v4204_v7 = vmul.f32 1.442695, %v4182_v45 }
 0xf15   :  { %4234 = vadd.xlane.f32.xlu1 %v11659_v2  ;;  %4170 = vmax.xlane.f32.xlu2 %v11657_v48 }
 0xf16   :  { %7688 = vpow2.f32 %v4204_v7 }
 0xf19   :  { %v4159_v40 = vpop.xlane.xlu2 %4158 }
 0xf1a   :  { %v4183_v1 = vsub.f32 %v11556_v46, %v4159_v40 }
 0xf1c   :  { %v11672_v61 = vpop.eup %7688  ;;  %v4206_v6 = vmul.f32 1.442695, %v4183_v1 }
 0xf1d   :  { %4172 = vmax.xlane.f32.xlu2 %v11670_v62  ;;  %4236 = vadd.xlane.f32.xlu1 %v11672_v61 }
 0xf1e   :  { %7690 = vpow2.f32 %v4206_v6 }
 0xf21   :  { %v4161_v33 = vpop.xlane.xlu2 %4160 }
 0xf22   :  { %v4184_v46 = vsub.f32 %v11567_v53, %v4161_v33 }
 0xf24   :  { %v11685_v16 = vpop.eup %7690  ;;  %v4208_v55 = vmul.f32 1.442695, %v4184_v46 }
 0xf25   :  { %4238 = vadd.xlane.f32.xlu0 %v11685_v16  ;;  %4174 = vmax.xlane.f32.xlu1 %v11683_v54 }
 0xf26   :  { %7692 = vpow2.f32 %v4208_v55 }
 0xf2c   :  { %v11689_v60 = vpop.eup %7692 }
 0xf2d   :  { %4240 = vadd.xlane.f32.xlu0 %v11689_v60 }
 0xf60   :  { %v4225_v53 = vpop.xlane.xlu1 %4224 }
 0xf61   :  { %7694 = vrcp.f32 %v4225_v53 }
 0xf67   :  { %v7695_v10 = vpop.eup %7694 }
 0xf68   :  { %v4163_v25 = vpop.xlane.xlu1 %4162  ;;  %v4227_v22 = vpop.xlane.xlu0 %4226  ;;  %v4272_v58 = vmul.f32 %v7695_v10, %v11596_v38 }
 0xf69   :  { %v4185_v9 = vsub.f32 %v11605_v34, %v4163_v25  ;;  %7696 = vrcp.f32 %v4227_v22 }
 0xf6b   :  { %v4210_v5 = vmul.f32 1.442695, %v4185_v9 }
 0xf6d   :  { %7698 = vpow2.f32 %v4210_v5 }
 0xf6f   :  { %v7697_v32 = vpop.eup %7696 }
 0xf70   :  { %v4273_v31 = vmul.f32 %v7697_v32, %v11607_v39  ;;  %v4165_v35 = vpop.xlane.xlu1 %4164  ;;  %v4229_v8 = vpop.xlane.xlu0 %4228 }
 0xf71   :  { %v4186_v26 = vsub.f32 %v11618_v47, %v4165_v35 }
 0xf72   :  { %v4312_v45 = vpack.c.bf16 %v4273_v31, %v4272_v58 }
 0xf73   :  { %v11696_v7 = vpop.eup %7698  ;;  %v4212_v11 = vmul.f32 1.442695, %v4186_v26 }
 0xf74   :  { %4242 = vadd.xlane.f32.xlu2 %v11696_v7  ;;  %4328 = vmatmul.bf16.vlgmr.msra.gmra.mxu2 %v4312_v45 }
 0xf75   :  { %7700 = vpow2.f32 %v4212_v11 }
 0xf76   :  { %7702 = vrcp.f32 %v4229_v8 }
 0xf78   :  { %v4231_v34 = vpop.xlane.xlu2 %4230  ;;  %v4167_v40 = vpop.xlane.xlu0 %4166 }
 0xf79   :  { %7704 = vrcp.f32 %v4231_v34  ;;  %v4187_v38 = vsub.f32 %v11631_v51, %v4167_v40 }
 0xf7b   :  { %v11700_v1 = vpop.eup %7700  ;;  %v4214_v39 = vmul.f32 1.442695, %v4187_v38 }
 0xf7c   :  { %4244 = vadd.xlane.f32.xlu1 %v11700_v1  ;;  %v7703_v47 = vpop.eup %7702 }
 0xf7d   :  { %7706 = vpow2.f32 %v4214_v39  ;;  %v4274_v46 = vmul.f32 %v7703_v47, %v11620_v12 }
 0xf7f   :  { %v7705_v6 = vpop.eup %7704 }
 0xf80   :  { %v4233_v50 = vpop.xlane.xlu2 %4232  ;;  %v4169_v33 = vpop.xlane.xlu0 %4168  ;;  %v4275_v55 = vmul.f32 %v7705_v6, %v11633_v23 }
 0xf81   :  { %v4188_v53 = vsub.f32 %v11644_v4, %v4169_v33 }
 0xf82   :  { %v4313_v25 = vpack.c.bf16 %v4275_v55, %v4274_v46  ;;  %v11738_v46 = vadd.f32 %v11505_v56, %v11574_v14  ;;  %v11760_v14 = vadd.f32 %v11527_v29, %v11582_v41 }
 0xf83   :  { %v11706_v22 = vpop.eup %7706  ;;  %v4216_v51 = vmul.f32 1.442695, %v4188_v53 }
 0xf84   :  { %4333 = vmatmul.bf16.gmra.mxu2 %v4313_v25  ;;  %4246 = vadd.xlane.f32.xlu0 %v11706_v22 }
 0xf85   :  { %7708 = vpow2.f32 %v4216_v51 }
 0xf86   :  { %7710 = vrcp.f32 %v4233_v50 }
 0xf88   :  { %v4235_v9 = vpop.xlane.xlu1 %4234  ;;  %v4171_v5 = vpop.xlane.xlu2 %4170 }
 0xf89   :  { %7712 = vrcp.f32 %v4235_v9  ;;  %v4189_v10 = vsub.f32 %v11657_v48, %v4171_v5 }
 0xf8b   :  { %v11710_v32 = vpop.eup %7708  ;;  %v4218_v12 = vmul.f32 1.442695, %v4189_v10 }
 0xf8c   :  { %4248 = vadd.xlane.f32.xlu2 %v11710_v32  ;;  %v7711_v23 = vpop.eup %7710 }
 0xf8d   :  { %7714 = vpow2.f32 %v4218_v12  ;;  %v4276_v35 = vmul.f32 %v7711_v23, %v11646_v17  ;;  %v11722_v17 = vadd.f32 %v11479_v42, %v11533_v49  ;;  %v11734_v49 = vadd.f32 %v11489_v19, %v11548_v15 }
 0xf8e   :  { %v11753_v15 = vadd.f32 %v11538_v28, %v11588_v20 }
 0xf8f   :  { %v7713_v4 = vpop.eup %7712 }
 0xf90   :  { %v4173_v58 = vpop.xlane.xlu2 %4172  ;;  %v4237_v31 = vpop.xlane.xlu1 %4236  ;;  %v4277_v8 = vmul.f32 %v7713_v4, %v11659_v2 }
 0xf91   :  { %v4190_v26 = vsub.f32 %v11670_v62, %v4173_v58 }
 0xf92   :  { %v4314_v45 = vpack.c.bf16 %v4277_v8, %v4276_v35 }
 0xf93   :  { %v11716_v11 = vpop.eup %7714  ;;  %v4220_v48 = vmul.f32 1.442695, %v4190_v26 }
 0xf94   :  { %4250 = vadd.xlane.f32.xlu1 %v11716_v11  ;;  %4338 = vmatmul.bf16.gmra.mxu2 %v4314_v45 }
 0xf95   :  { %7716 = vpow2.f32 %v4220_v48 }
 0xf96   :  { %7718 = vrcp.f32 %v4237_v31 }
 0xf98   :  { %v4175_v34 = vpop.xlane.xlu1 %4174  ;;  %v4239_v40 = vpop.xlane.xlu0 %4238 }
 0xf99   :  { %v4191_v38 = vsub.f32 %v11683_v54, %v4175_v34  ;;  %7720 = vrcp.f32 %v4239_v40 }
 0xf9b   :  { %v11724_v2 = vpop.eup %7716  ;;  %v4222_v62 = vmul.f32 1.442695, %v4191_v38 }
 0xf9c   :  { %4252 = vadd.xlane.f32.xlu0 %v11724_v2  ;;  %3867 = vmax.xlane.f32.xlu1 %v11722_v17  ;;  %v7719_v39 = vpop.eup %7718 }
 0xf9d   :  { %7722 = vpow2.f32 %v4222_v62  ;;  %v4278_v6 = vmul.f32 %v7719_v39, %v11672_v61  ;;  %v11745_v61 = vadd.f32 %v11495_v43, %v11559_v63  ;;  %v11764_v63 = vadd.f32 %v11553_v57, %v11590_v27 }
 0xf9f   :  { %v7721_v47 = vpop.eup %7720 }
 0xfa0   :  { %v4279_v50 = vmul.f32 %v7721_v47, %v11685_v16  ;;  %v11749_v16 = vadd.f32 %v11514_v37, %v11580_v21  ;;  %v3847_v21 = vpop.f32.mrf.mxu0  ;;  %v4241_v55 = vpop.xlane.xlu0 %4240 }
 0xfa1   :  { %v11769_v20 = vadd.f32 %v11564_v44, %v3847_v21  ;;  %7724 = vrcp.f32 %v4241_v55 }
 0xfa2   :  { %v4315_v54 = vpack.c.bf16 %v4279_v50, %v4278_v6 }
 0xfa3   :  { %v11730_v33 = vpop.eup %7722 }
 0xfa4   :  { %4254 = vadd.xlane.f32.xlu2 %v11730_v33  ;;  %4343 = vmatmul.bf16.gmra.mxu2 %v4315_v54 }
 0xfa5   :  { %3869 = vmax.xlane.f32.xlu0 %v11734_v49  ;;  %3873 = vmax.xlane.f32.xlu1 %v11738_v46 }
 0xfa7   :  { %v7725_v41 = vpop.eup %7724 }
 0xfa8   :  { %v4280_v51 = vmul.f32 %v7725_v41, %v11689_v60  ;;  %v3849_v9 = vpop.f32.mrf.mxu0 }
 0xfac   :  { %3871 = vmax.xlane.f32.xlu2 %v11745_v61 }
 0xfad   :  { %3875 = vmax.xlane.f32.xlu0 %v11749_v16  ;;  %3879 = vmax.xlane.f32.xlu1 %v11753_v15 }
 0xfb0   :  { %v11774_v23 = vpop.f32.mrf.mxu0 }
 0xfb4   :  { %3877 = vmax.xlane.f32.xlu2 %v11760_v14 }
 0xfb5   :  { %3881 = vmax.xlane.f32.xlu0 %v11764_v63 }
 0xfb8   :  { %v11778_v60 = vpop.f32.mrf.mxu0 }
 0xfbd   :  { %3883 = vmax.xlane.f32.xlu0 %v11769_v20 }
 0xfc0   :  { %v11780_v34 = vpop.f32.mrf.mxu0 }
 0xfc8   :  { %v3859_v21 = vpop.f32.mrf.mxu0 }
 0xfe7   :  { %v4243_v53 = vpop.xlane.xlu2 %4242 }
 0xfe8   :  { %7726 = vrcp.f32 %v4243_v53 }
 0xfee   :  { %v7727_v25 = vpop.eup %7726 }
 0xfef   :  { %v4281_v27 = vmul.f32 %v7727_v25, %v11696_v7  ;;  %v4245_v10 = vpop.xlane.xlu1 %4244 }
 0xff0   :  { %7728 = vrcp.f32 %v4245_v10 }
 0xff1   :  { %v4316_v5 = vpack.c.bf16 %v4281_v27, %v4280_v51 }
 0xff3   :  { %4348 = vmatmul.bf16.gmra.mxu2 %v4316_v5 }
 0xff6   :  { %v7729_v4 = vpop.eup %7728 }
 0xff7   :  { %v4247_v12 = vpop.xlane.xlu0 %4246  ;;  %v4282_v31 = vmul.f32 %v7729_v4, %v11700_v1  ;;  %v11795_v4 = vadd.f32 %v11602_v18, %v3849_v9  ;;  %v11811_v9 = vadd.f32 %v11615_v30, %v11774_v23  ;;  %v11823_v30 = vadd.f32 %v11628_v3, %v11778_v60 }
 0xff8   :  { %7730 = vrcp.f32 %v4247_v12 }
 0xffe   :  { %v7731_v58 = vpop.eup %7730 }
 0xfff   :  { %v4283_v35 = vmul.f32 %v7731_v58, %v11706_v22  ;;  %v4249_v26 = vpop.xlane.xlu2 %4248 }
0x1000   :  { %7732 = vrcp.f32 %v4249_v26 }
0x1001   :  { %v4317_v8 = vpack.c.bf16 %v4283_v35, %v4282_v31  ;;  %v3862_v35 = vpop.f32.mrf.mxu0 }
0x1003   :  { %4353 = vmatmul.bf16.gmra.mxu2 %v4317_v8 }
0x1006   :  { %v7733_v45 = vpop.eup %7732 }
0x1007   :  { %v4251_v7 = vpop.xlane.xlu1 %4250  ;;  %v4284_v38 = vmul.f32 %v7733_v45, %v11710_v32 }
0x1008   :  { %7734 = vrcp.f32 %v4251_v7 }
0x100e   :  { %v7735_v48 = vpop.eup %7734 }
0x100f   :  { %v4253_v40 = vpop.xlane.xlu0 %4252  ;;  %v4285_v62 = vmul.f32 %v7735_v48, %v11716_v11  ;;  %v3868_v1 = vpop.xlane.xlu1 %3867 }
0x1010   :  { %v3899_v22 = vsub.f32 %v11722_v17, %v3868_v1 }
0x1011   :  { %v4318_v39 = vpack.c.bf16 %v4285_v62, %v4284_v38 }
0x1012   :  { %v3915_v47 = vmul.f32 1.442695, %v3899_v22  ;;  %v11828_v22 = vadd.f32 %v11654_v0, %v3859_v21  ;;  %v11840_v0 = vadd.f32 %v11641_v36, %v11780_v34 }
0x1013   :  { %4358 = vmatmul.bf16.gmra.mxu2 %v4318_v39  ;;  %v13637_v39 = vld [vmem:[#allocation23_spill] sm:$0xff] }
0x1014   :  { %7736 = vpow2.f32 %v3915_v47  ;;  %v13638_v47 = vld [vmem:[#allocation22_spill] sm:$0xff] }
0x1015   :  { %7738 = vrcp.f32 %v4253_v40  ;;  %v3864_v40 = vpop.f32.mrf.mxu0 }
0x1016   :  { %v11856_v34 = vadd.f32 %v11680_v13, %v3864_v40 }
0x1017   :  { %v4255_v6 = vpop.xlane.xlu2 %4254 }
0x1018   :  { %7740 = vrcp.f32 %v4255_v6  ;;  %v3870_v50 = vpop.xlane.xlu0 %3869  ;;  %v3874_v54 = vpop.xlane.xlu1 %3873  ;;  %v13639_v6 = vpack.c.bf16 %v13637_v39, %v13638_v47 }
0x1019   :  { %v3900_v55 = vsub.f32 %v11734_v49, %v3870_v50  ;;  %v3902_v53 = vsub.f32 %v11738_v46, %v3874_v54 }
0x101a   :  { %v11787_v32 = vpop.eup %7736 }
0x101b   :  { %v3917_v11 = vmul.f32 1.442695, %v3900_v55  ;;  %v3921_v41 = vmul.f32 1.442695, %v3902_v53  ;;  %v7739_v25 = vpop.eup %7738  ;;  %3947 = vadd.xlane.f32.xlu2 %v11787_v32  ;;  %v11845_v55 = vadd.f32 %v11667_v59, %v3862_v35  ;;  %v13640_v59 = vld [vmem:[#allocation46_spill] sm:$0xff] }
0x101c   :  { %v4286_v27 = vmul.f32 %v7739_v25, %v11724_v2  ;;  %v13641_v25 = vld [vmem:[#allocation47_spill] sm:$0xff] }
0x101d   :  { %7742 = vpow2.f32 %v3917_v11  ;;  %v4479_v60 = vpop.f32.mrf.mxu0 }
0x101e   :  { %v7741_v17 = vpop.eup %7740  ;;  %7744 = vpow2.f32 %v3921_v41 }
0x101f   :  { %v3872_v51 = vpop.xlane.xlu2 %3871  ;;  %v4287_v5 = vmul.f32 %v7741_v17, %v11730_v33  ;;  %v11804_v33 = vpop.f32.mrf.mxu2  ;;  %v13642_v17 = vpack.c.bf16 %v13640_v59, %v13641_v25  ;;  %v13655_v59 = vld [vmem:[#allocation16_spill] sm:$0xff]  ;;  %v13656_v25 = vld [vmem:[#allocation15_spill] sm:$0xff] }
0x1020   :  { %v3901_v10 = vsub.f32 %v11745_v61, %v3872_v51  ;;  %v3876_v49 = vpop.xlane.xlu0 %3875  ;;  %v3880_v7 = vpop.xlane.xlu1 %3879 }
0x1021   :  { %v3903_v46 = vsub.f32 %v11749_v16, %v3876_v49  ;;  %v4319_v12 = vpack.c.bf16 %v4287_v5, %v4286_v27  ;;  %v3905_v38 = vsub.f32 %v11753_v15, %v3880_v7  ;;  %v11874_v5 = vadd.f32 %v11479_v42, %v4479_v60  ;;  %v13644_v49 = vld [vmem:[#allocation21_spill] sm:$0xff] }
0x1022   :  { %v3919_v58 = vmul.f32 1.442695, %v3901_v10  ;;  %v13643_v10 = vld [vmem:[#allocation19_spill] sm:$0xff]  ;;  %v13647_v7 = vld [vmem:[#allocation49_spill] sm:$0xff] }
0x1023   :  { %v11797_v31 = vpop.eup %7742  ;;  %v3923_v8 = vmul.f32 1.442695, %v3903_v46  ;;  %4363 = vmatmul.bf16.gmra.mxu2 %v4319_v12  ;;  %3885 = vmax.xlane.f32.xlu2 %v11795_v4  ;;  %v3927_v62 = vmul.f32 1.442695, %v3905_v38  ;;  %v13645_v46 = vpack.c.bf16 %v13643_v10, %v13644_v49  ;;  %v13653_v60 = vld [vmem:[#allocation9_spill] sm:$0xff] }
0x1024   :  { %v11799_v26 = vpop.eup %7744  ;;  %7746 = vpow2.f32 %v3919_v58  ;;  %3949 = vadd.xlane.f32.xlu1 %v11797_v31 }
0x1025   :  { %7748 = vpow2.f32 %v3923_v8  ;;  %3953 = vadd.xlane.f32.xlu0 %v11799_v26  ;;  %v11853_v11 = vpop.f32.mrf.mxu0 }
0x1027   :  { %v3878_v2 = vpop.xlane.xlu2 %3877  ;;  %v11825_v23 = vpop.f32.mrf.mxu2 }
0x1028   :  { %v3904_v61 = vsub.f32 %v11760_v14, %v3878_v2  ;;  %v3882_v14 = vpop.xlane.xlu0 %3881 }
0x1029   :  { %v3906_v15 = vsub.f32 %v11764_v63, %v3882_v14  ;;  %v13649_v14 = vld [vmem:[#allocation27_spill] sm:$0xff] }
0x102a   :  { %v11807_v16 = vpop.eup %7746  ;;  %v3925_v45 = vmul.f32 1.442695, %v3904_v61  ;;  %v13646_v61 = vld [vmem:[#allocation48_spill] sm:$0xff] }
0x102b   :  { %v11813_v48 = vpop.eup %7748  ;;  %3887 = vmax.xlane.f32.xlu2 %v11811_v9  ;;  %v3929_v50 = vmul.f32 1.442695, %v3906_v15  ;;  %v13652_v15 = vld [vmem:[#allocation10_spill] sm:$0xff] }
0x102c   :  { %7750 = vpow2.f32 %v3925_v45  ;;  %3951 = vadd.xlane.f32.xlu1 %v11807_v16  ;;  %v13648_v45 = vpack.c.bf16 %v13646_v61, %v13647_v7 }
0x102d   :  { %3955 = vadd.xlane.f32.xlu0 %v11813_v48  ;;  %7752 = vpow2.f32 %v3927_v62  ;;  %v4484_v27 = vpop.f32.mrf.mxu0  ;;  %v13650_v62 = vld [vmem:[#allocation4_spill] sm:$0xff] }
0x102e   :  { %7754 = vpow2.f32 %v3929_v50  ;;  %v11884_v58 = vadd.f32 %v11495_v43, %v4484_v27  ;;  %v13651_v39 = vpack.c.bf16 %v13649_v14, %v13650_v62  ;;  %v13654_v50 = vpack.c.bf16 %v13652_v15, %v13653_v60 }
0x102f   :  { %v11847_v53 = vpop.f32.mrf.mxu2 }
0x1030   :  { %v3884_v54 = vpop.xlane.xlu0 %3883 }
0x1031   :  { %v3907_v63 = vsub.f32 %v11769_v20, %v3884_v54 }
0x1032   :  { %v11819_v1 = vpop.eup %7750 }
0x1033   :  { %7016 = vmatmul.msk.bf16.vlgmr.msrb.gmra.mxu2 %vm115_vm0, %v13639_v6  ;;  %3957 = vadd.xlane.f32.xlu2 %v11819_v1  ;;  %v11842_v21 = vpop.eup %7752  ;;  %v3931_v36 = vmul.f32 1.442695, %v3907_v63 }
0x1034   :  { %3889 = vmax.xlane.f32.xlu1 %v11823_v30  ;;  %v11858_v41 = vpop.eup %7754 }
0x1035   :  { %3893 = vmax.xlane.f32.xlu0 %v11828_v22  ;;  %7756 = vpow2.f32 %v3931_v36  ;;  %v11881_v12 = vpop.f32.mrf.mxu0 }
0x1037   :  { %v11866_v20 = vpop.f32.mrf.mxu2 }
0x103b   :  { %3959 = vadd.xlane.f32.xlu2 %v11842_v21  ;;  %v11868_v51 = vpop.eup %7756 }
0x103c   :  { %3891 = vmax.xlane.f32.xlu1 %v11840_v0 }
0x103d   :  { %3895 = vmax.xlane.f32.xlu0 %v11845_v55  ;;  %v4489_v8 = vpop.f32.mrf.mxu0 }
0x103e   :  { %v11890_v2 = vadd.f32 %v11514_v37, %v4489_v8 }
0x103f   :  { %v11871_v13 = vpop.f32.mrf.mxu2 }
0x1043   :  { %7017 = vmatmul.msk.bf16.gmra.mxu2 %vm115_vm0, %v13642_v17  ;;  %3897 = vmax.xlane.f32.xlu2 %v11856_v34  ;;  %v13657_v17 = vpack.c.bf16 %v13655_v59, %v13656_v25 }
0x1044   :  { %3961 = vadd.xlane.f32.xlu1 %v11858_v41 }
0x1047   :  { %v11886_v35 = vpop.f32.mrf.mxu2 }
0x104c   :  { %3963 = vadd.xlane.f32.xlu1 %v11868_v51 }
0x104f   :  { %v11896_v40 = vpop.f32.mrf.mxu2 }
0x1053   :  { %7018 = vmatmul.msk.bf16.gmra.mxu2 %vm115_vm0, %v13645_v46 }
0x1054   :  { %4519 = vmax.xlane.f32.xlu1 %v11874_v5 }
0x1057   :  { %v11899_v38 = vpop.f32.mrf.mxu2 }
0x105c   :  { %4523 = vmax.xlane.f32.xlu1 %v11884_v58 }
0x1063   :  { %7019 = vmatmul.msk.bf16.gmra.mxu2 %vm115_vm0, %v13648_v45 }
0x1064   :  { %4527 = vmax.xlane.f32.xlu1 %v11890_v2 }
0x1073   :  { %7020 = vmatmul.msk.bf16.gmra.mxu2 %vm115_vm0, %v13651_v39 }
0x1076   :  { %v11905_v47 = vpop.f32.mrf.mxu2 }
0x107e   :  { %v11907_v6 = vpop.f32.mrf.mxu2 }
0x1083   :  { %7021 = vmatmul.msk.bf16.gmra.mxu2 %vm115_vm0, %v13654_v50 }
0x1086   :  { %v11913_v54 = vpop.f32.mrf.mxu2 }
0x108e   :  { %v11915_v63 = vpop.f32.mrf.mxu2  ;;  %v3948_v36 = vpop.xlane.xlu2 %3947 }
0x108f   :  { %7758 = vrcp.f32 %v3948_v36 }
0x1093   :  { %7022 = vmatmul.msk.bf16.gmra.mxu2 %vm115_vm0, %v13657_v17  ;;  %v13658_v17 = vpack.c.bf16 %v11262_v24, %v11258_v52 }
0x1095   :  { %v7759_v7 = vpop.eup %7758 }
0x1096   :  { %v11921_v27 = vpop.f32.mrf.mxu2  ;;  %v3886_v10 = vpop.xlane.xlu2 %3885  ;;  %v3995_v62 = vmul.f32 %v7759_v7, %v11787_v32 }
0x1097   :  { %v3950_v49 = vpop.xlane.xlu1 %3949  ;;  %v3908_v46 = vsub.f32 %v11795_v4, %v3886_v10 }
0x1098   :  { %v3954_v8 = vpop.xlane.xlu0 %3953  ;;  %7760 = vrcp.f32 %v3950_v49 }
0x1099   :  { %v3933_v61 = vmul.f32 1.442695, %v3908_v46 }
0x109b   :  { %7762 = vpow2.f32 %v3933_v61 }
0x109e   :  { %v7761_v45 = vpop.eup %7760  ;;  %v11924_v14 = vpop.f32.mrf.mxu2 }
0x109f   :  { %v3996_v39 = vmul.f32 %v7761_v45, %v11797_v31  ;;  %v3888_v15 = vpop.xlane.xlu2 %3887  ;;  %v3952_v60 = vpop.xlane.xlu1 %3951 }
0x10a0   :  { %v3909_v50 = vsub.f32 %v11811_v9, %v3888_v15  ;;  %v3956_v36 = vpop.xlane.xlu0 %3955  ;;  %7764 = vrcp.f32 %v3952_v60  ;;  %v11950_v60 = vadd.f32 %v11489_v19, %v11853_v11 }
0x10a1   :  { %v4035_v59 = vpack.c.bf16 %v3996_v39, %v3995_v62  ;;  %v11929_v25 = vpop.eup %7762 }
0x10a2   :  { %v3935_v4 = vmul.f32 1.442695, %v3909_v50  ;;  %3965 = vadd.xlane.f32.xlu0 %v11929_v25 }
0x10a3   :  { %4377 = vmatmul.bf16.vlgmr.msra.gmra.mxu3 %v4035_v59  ;;  %7023 = vmatmul.msk.bf16.gmra.mxu2 %vm115_vm0, %v13658_v17 }
0x10a4   :  { %7766 = vpow2.f32 %v3935_v4 }
0x10a5   :  { %7768 = vrcp.f32 %v3954_v8 }
0x10a6   :  { %v11936_v32 = vpop.f32.mrf.mxu2  ;;  %v7765_v49 = vpop.eup %7764 }
0x10a7   :  { %13659 = vst [vmem:[#allocation17_spill] sm:$0xff] %v11936_v32  ;;  %v3958_v31 = vpop.xlane.xlu2 %3957  ;;  %v3890_v9 = vpop.xlane.xlu1 %3889  ;;  %v3997_v52 = vmul.f32 %v7765_v49, %v11807_v16  ;;  %v7298_v32 = vld [vmem:[%s13282_s6 + $0x20] sm:$0xff] }
0x10a8   :  { %v3910_v10 = vsub.f32 %v11823_v30, %v3890_v9  ;;  %v3894_v61 = vpop.xlane.xlu0 %3893  ;;  %v4491_v49 = vpop.f32.mrf.mxu0 }
0x10a9   :  { %v3912_v24 = vsub.f32 %v11828_v22, %v3894_v61 }
0x10aa   :  { %v11939_v46 = vpop.eup %7766  ;;  %v3937_v7 = vmul.f32 1.442695, %v3910_v10 }
0x10ab   :  { %3967 = vadd.xlane.f32.xlu0 %v11939_v46  ;;  %v7769_v45 = vpop.eup %7768  ;;  %v3941_v50 = vmul.f32 1.442695, %v3912_v24 }
0x10ac   :  { %7770 = vpow2.f32 %v3937_v7  ;;  %v3998_v15 = vmul.f32 %v7769_v45, %v11799_v26 }
0x10ad   :  { %7772 = vrcp.f32 %v3958_v31 }
0x10ae   :  { %v11944_v8 = vpop.f32.mrf.mxu2  ;;  %v4036_v59 = vpack.c.bf16 %v3998_v15, %v3997_v52 }
0x10af   :  { %13660 = vst [vmem:[#allocation30_spill] sm:$0xff] %v11944_v8  ;;  %v3960_v62 = vpop.xlane.xlu2 %3959  ;;  %v3892_v39 = vpop.xlane.xlu1 %3891 }
0x10b0   :  { %v3911_v30 = vsub.f32 %v11840_v0, %v3892_v39  ;;  %v3896_v0 = vpop.xlane.xlu0 %3895 }
0x10b1   :  { %v3913_v7 = vsub.f32 %v11845_v55, %v3896_v0  ;;  %v11973_v55 = vadd.f32 %v11505_v56, %v11881_v12 }
0x10b2   :  { %v11952_v4 = vpop.eup %7770  ;;  %v3939_v17 = vmul.f32 1.442695, %v3911_v30 }
0x10b3   :  { %4521 = vmax.xlane.f32.xlu0 %v11950_v60  ;;  %4382 = vmatmul.bf16.gmra.mxu3 %v4036_v59  ;;  %v7773_v9 = vpop.eup %7772  ;;  %v3943_v52 = vmul.f32 1.442695, %v3913_v7  ;;  %v11998_v7 = vadd.f32 %v11527_v29, %v4491_v49 }
0x10b4   :  { %7774 = vpow2.f32 %v3939_v17  ;;  %3969 = vadd.xlane.f32.xlu2 %v11952_v4 }
0x10b5   :  { %7776 = vpow2.f32 %v3941_v50 }
0x10b6   :  { %7778 = vrcp.f32 %v3956_v36  ;;  %v4821_v26 = vpop.f32.mrf.mxu2  ;;  %v4000_v36 = vmul.f32 %v7773_v9, %v11819_v1  ;;  %v4494_v1 = vpop.f32.mrf.mxu0 }
0x10b7   :  { %v3898_v16 = vpop.xlane.xlu2 %3897  ;;  %v3962_v22 = vpop.xlane.xlu1 %3961  ;;  %v11988_v0 = vadd.f32 %v11479_v42, %v4821_v26 }
0x10b8   :  { %v3914_v11 = vsub.f32 %v11856_v34, %v3898_v16 }
0x10ba   :  { %v11957_v10 = vpop.eup %7774  ;;  %v3945_v61 = vmul.f32 1.442695, %v3914_v11 }
0x10bb   :  { %v11959_v31 = vpop.eup %7776  ;;  %3971 = vadd.xlane.f32.xlu0 %v11957_v10 }
0x10bc   :  { %v7779_v45 = vpop.eup %7778  ;;  %7780 = vpow2.f32 %v3945_v61  ;;  %3973 = vadd.xlane.f32.xlu2 %v11959_v31 }
0x10bd   :  { %v3999_v15 = vmul.f32 %v7779_v45, %v11813_v48  ;;  %7782 = vpow2.f32 %v3943_v52  ;;  %v11981_v48 = vadd.f32 %v11538_v28, %v4494_v1 }
0x10be   :  { %v4823_v24 = vpop.f32.mrf.mxu2  ;;  %7784 = vrcp.f32 %v3962_v22 }
0x10bf   :  { %v11966_v34 = vadd.f32 %v11489_v19, %v4823_v24  ;;  %v11968_v39 = vpop.xlane.xlu1 %3963  ;;  %v4037_v30 = vpack.c.bf16 %v4000_v36, %v3999_v15  ;;  %7786 = vrcp.f32 %v3960_v62 }
0x10c1   :  { %4863 = vmax.xlane.f32.xlu1 %v11966_v34 }
0x10c2   :  { %v11976_v50 = vpop.eup %7780 }
0x10c3   :  { %4387 = vmatmul.bf16.gmra.mxu3 %v4037_v30  ;;  %4525 = vmax.xlane.f32.xlu0 %v11973_v55  ;;  %v11984_v17 = vpop.eup %7782 }
0x10c4   :  { %3977 = vadd.xlane.f32.xlu2 %v11976_v50  ;;  %v7785_v16 = vpop.eup %7784 }
0x10c5   :  { %v7787_v22 = vpop.eup %7786  ;;  %v4002_v62 = vmul.f32 %v7785_v16, %v11858_v41 }
0x10c6   :  { %v4826_v19 = vpop.f32.mrf.mxu2  ;;  %v4001_v61 = vmul.f32 %v7787_v22, %v11842_v21 }
0x10c7   :  { %v4520_v12 = vpop.xlane.xlu1 %4519  ;;  %v12010_v29 = vadd.f32 %v11495_v43, %v4826_v19 }
0x10c8   :  { %v4551_v59 = vsub.f32 %v11874_v5, %v4520_v12  ;;  %v4038_v26 = vpack.c.bf16 %v4002_v62, %v4001_v61 }
0x10c9   :  { %4531 = vmax.xlane.f32.xlu1 %v11981_v48 }
0x10ca   :  { %v4567_v11 = vmul.f32 1.442695, %v4551_v59 }
0x10cb   :  { %3975 = vadd.xlane.f32.xlu0 %v11984_v17 }
0x10cc   :  { %7788 = vpow2.f32 %v4567_v11  ;;  %4861 = vmax.xlane.f32.xlu2 %v11988_v0 }
0x10ce   :  { %v4828_v9 = vpop.f32.mrf.mxu2 }
0x10cf   :  { %v11994_v5 = vadd.f32 %v11505_v56, %v4828_v9  ;;  %v4524_v42 = vpop.xlane.xlu1 %4523  ;;  %v4496_v56 = vpop.f32.mrf.mxu0 }
0x10d0   :  { %v4553_v41 = vsub.f32 %v11884_v58, %v4524_v42  ;;  %v12007_v21 = vadd.f32 %v11553_v57, %v4496_v56 }
0x10d1   :  { %4867 = vmax.xlane.f32.xlu1 %v11994_v5 }
0x10d2   :  { %v12001_v45 = vpop.eup %7788  ;;  %v4571_v24 = vmul.f32 1.442695, %v4553_v41 }
0x10d3   :  { %4529 = vmax.xlane.f32.xlu0 %v11998_v7  ;;  %4392 = vmatmul.bf16.gmra.mxu3 %v4038_v26 }
0x10d4   :  { %4599 = vadd.xlane.f32.xlu2 %v12001_v45  ;;  %7790 = vpow2.f32 %v4571_v24 }
0x10d5   :  { %7792 = vrcp.f32 %v11968_v39 }
0x10d6   :  { %v4831_v36 = vpop.f32.mrf.mxu2 }
0x10d7   :  { %v4499_v52 = vpop.f32.mrf.mxu0  ;;  %v12022_v43 = vadd.f32 %v11514_v37, %v4831_v36  ;;  %v12043_v56 = vpop.xlane.xlu1 %4527 }
0x10d8   :  { %v12017_v58 = vadd.f32 %v11564_v44, %v4499_v52 }
0x10da   :  { %v12014_v15 = vpop.eup %7790 }
0x10db   :  { %4533 = vmax.xlane.f32.xlu0 %v12007_v21 }
0x10dc   :  { %4865 = vmax.xlane.f32.xlu2 %v12010_v29 }
0x10de   :  { %v4833_v49 = vpop.f32.mrf.mxu2 }
0x10e3   :  { %4603 = vadd.xlane.f32.xlu0 %v12014_v15 }
0x10e4   :  { %4535 = vmax.xlane.f32.xlu2 %v12017_v58 }
0x10e6   :  { %v4836_v57 = vpop.f32.mrf.mxu2 }
0x10e7   :  { %v12028_v1 = vadd.f32 %v11538_v28, %v4836_v57  ;;  %v7793_v28 = vpop.eup %7792 }
0x10e8   :  { %v4003_v62 = vmul.f32 %v7793_v28, %v11868_v51  ;;  %v4501_v28 = vpop.f32.mrf.mxu0 }
0x10ec   :  { %4869 = vmax.xlane.f32.xlu2 %v12022_v43 }
0x10ee   :  { %v12025_v30 = vpop.f32.mrf.mxu2 }
0x10f4   :  { %4873 = vmax.xlane.f32.xlu2 %v12028_v1 }
0x10f6   :  { %v4841_v19 = vpop.f32.mrf.mxu2 }
0x10f7   :  { %v12032_v12 = vadd.f32 %v11564_v44, %v4841_v19 }
0x10f9   :  { %4877 = vmax.xlane.f32.xlu0 %v12032_v12 }
0x10fe   :  { %v4843_v59 = vpop.f32.mrf.mxu2 }
0x10ff   :  { %v12036_v16 = vadd.f32 %v11602_v18, %v4843_v59 }
0x1101   :  { %4879 = vmax.xlane.f32.xlu2 %v12036_v16 }
0x1115   :  { %v3966_v37 = vpop.xlane.xlu0 %3965 }
0x1116   :  { %7794 = vrcp.f32 %v3966_v37 }
0x111c   :  { %v7795_v11 = vpop.eup %7794 }
0x111d   :  { %v4004_v44 = vmul.f32 %v7795_v11, %v11929_v25 }
0x111e   :  { %v3968_v22 = vpop.xlane.xlu0 %3967 }
0x111f   :  { %v4039_v9 = vpack.c.bf16 %v4004_v44, %v4003_v62  ;;  %7796 = vrcp.f32 %v3968_v22 }
0x1121   :  { %4397 = vmatmul.bf16.gmra.mxu3 %v4039_v9 }
0x1125   :  { %v7797_v39 = vpop.eup %7796 }
0x1126   :  { %v4522_v61 = vpop.xlane.xlu0 %4521  ;;  %v4005_v51 = vmul.f32 %v7797_v39, %v11939_v46  ;;  %v8021_v46 = vld [vmem:[%s13281_s1 + $0x28] sm:$0xff]  ;;  %v4846_v39 = vpop.f32.mrf.mxu2 }
0x1127   :  { %v4552_v42 = vsub.f32 %v11950_v60, %v4522_v61  ;;  %v3970_v26 = vpop.xlane.xlu2 %3969 }
0x1128   :  { %7798 = vrcp.f32 %v3970_v26 }
0x1129   :  { %v4569_v41 = vmul.f32 1.442695, %v4552_v42 }
0x112b   :  { %7800 = vpow2.f32 %v4569_v41 }
0x112e   :  { %v7799_v36 = vpop.eup %7798  ;;  %v3972_v24 = vpop.xlane.xlu0 %3971 }
0x112f   :  { %v3974_v52 = vpop.xlane.xlu2 %3973  ;;  %v4006_v25 = vmul.f32 %v7799_v36, %v11952_v4  ;;  %7802 = vrcp.f32 %v3972_v24  ;;  %v12054_v4 = vadd.f32 %v8021_v46, %v4833_v49  ;;  %v12065_v49 = vadd.f32 %v11602_v18, %v4501_v28  ;;  %v8022_v18 = vld [vmem:[%s13281_s1 + $0x38] sm:$0xff] }
0x1130   :  { %7804 = vrcp.f32 %v3974_v52  ;;  %v4504_v52 = vpop.f32.mrf.mxu0 }
0x1131   :  { %v12047_v57 = vpop.eup %7800  ;;  %v4040_v19 = vpack.c.bf16 %v4006_v25, %v4005_v51 }
0x1132   :  { %4601 = vadd.xlane.f32.xlu1 %v12047_v57 }
0x1133   :  { %4402 = vmatmul.bf16.gmra.mxu3 %v4040_v19 }
0x1134   :  { %v4864_v60 = vpop.xlane.xlu1 %4863 }
0x1135   :  { %v4894_v59 = vsub.f32 %v11966_v34, %v4864_v60  ;;  %v7803_v62 = vpop.eup %7802 }
0x1136   :  { %v4526_v37 = vpop.xlane.xlu0 %4525  ;;  %v7805_v9 = vpop.eup %7804  ;;  %v4007_v34 = vmul.f32 %v7803_v62, %v11957_v10 }
0x1137   :  { %v4911_v11 = vmul.f32 1.442695, %v4894_v59  ;;  %v3978_v22 = vpop.xlane.xlu2 %3977  ;;  %v4554_v44 = vsub.f32 %v11973_v55, %v4526_v37  ;;  %v4008_v42 = vmul.f32 %v7805_v9, %v11959_v31  ;;  %v4848_v59 = vpop.f32.mrf.mxu2 }
0x1138   :  { %v4506_v28 = vpop.f32.mrf.mxu0 }
0x1139   :  { %7806 = vpow2.f32 %v4911_v11  ;;  %v4573_v61 = vmul.f32 1.442695, %v4554_v44  ;;  %v4041_v51 = vpack.c.bf16 %v4008_v42, %v4007_v34 }
0x113a   :  { %4871 = vmax.xlane.f32.xlu1 %v12054_v4 }
0x113b   :  { %7808 = vpow2.f32 %v4573_v61  ;;  %v8023_v61 = vld [vmem:[%s13281_s1 + $0x50] sm:$0xff] }
0x113c   :  { %v12060_v26 = vpop.xlane.xlu1 %4531  ;;  %v12094_v34 = vadd.f32 %v8023_v61, %v4846_v39  ;;  %v12110_v39 = vld [vmem:[%s13281_s1 + $0x60] sm:$0xff] }
0x113e   :  { %v3976_v55 = vpop.xlane.xlu0 %3975 }
0x113f   :  { %v12062_v41 = vpop.eup %7806  ;;  %v4862_v36 = vpop.xlane.xlu2 %4861  ;;  %7810 = vrcp.f32 %v3976_v55 }
0x1140   :  { %v4893_v24 = vsub.f32 %v11988_v0, %v4862_v36  ;;  %4943 = vadd.xlane.f32.xlu2 %v12062_v41  ;;  %v12078_v0 = vadd.f32 %v8022_v18, %v12025_v30  ;;  %v12088_v30 = vadd.f32 %v11628_v3, %v4506_v28  ;;  %v12124_v28 = vadd.f32 %v8023_v61, %v4504_v52 }
0x1141   :  { %v12070_v31 = vpop.eup %7808 }
0x1142   :  { %v4909_v10 = vmul.f32 1.442695, %v4893_v24  ;;  %4537 = vmax.xlane.f32.xlu1 %v12065_v49 }
0x1143   :  { %4407 = vmatmul.bf16.gmra.mxu3 %v4041_v51 }
0x1144   :  { %7812 = vpow2.f32 %v4909_v10  ;;  %v4868_v19 = vpop.xlane.xlu1 %4867 }
0x1145   :  { %7814 = vrcp.f32 %v3978_v22  ;;  %v7811_v60 = vpop.eup %7810  ;;  %v4896_v11 = vsub.f32 %v11994_v5, %v4868_v19 }
0x1146   :  { %v4009_v46 = vmul.f32 %v7811_v60, %v11984_v17  ;;  %v8024_v17 = vld [vmem:[%s13281_s1 + $0x58] sm:$0xff]  ;;  %v4530_v10 = vpop.xlane.xlu0 %4529 }
0x1147   :  { %v12072_v25 = vpop.xlane.xlu2 %4599  ;;  %v4915_v62 = vmul.f32 1.442695, %v4896_v11  ;;  %v12101_v3 = vadd.f32 %v8024_v17, %v4848_v59 }
0x1148   :  { %4605 = vadd.xlane.f32.xlu2 %v12070_v31 }
0x1149   :  { %7816 = vpow2.f32 %v4915_v62 }
0x114a   :  { %v12081_v37 = vpop.eup %7812  ;;  %4875 = vmax.xlane.f32.xlu1 %v12078_v0 }
0x114b   :  { %4941 = vadd.xlane.f32.xlu0 %v12081_v37  ;;  %v7815_v22 = vpop.eup %7814 }
0x114c   :  { %v4010_v9 = vmul.f32 %v7815_v22, %v11976_v50  ;;  %v4851_v50 = vpop.f32.mrf.mxu2 }
0x114d   :  { %v12113_v24 = vadd.f32 %v12110_v39, %v4851_v50 }
0x114e   :  { %v4042_v42 = vpack.c.bf16 %v4010_v9, %v4009_v46  ;;  %v4557_v46 = vsub.f32 %v11981_v48, %v12060_v26  ;;  %v8026_v48 = vld [vmem:[%s13281_s1 + $0x68] sm:$0xff] }
0x114f   :  { %v4866_v44 = vpop.xlane.xlu2 %4865  ;;  %v12116_v18 = vpop.eup %7816 }
0x1150   :  { %v4895_v5 = vsub.f32 %v12010_v29, %v4866_v44  ;;  %4541 = vmax.xlane.f32.xlu2 %v12088_v30  ;;  %v4555_v29 = vsub.f32 %v11890_v2, %v12043_v56  ;;  %v4556_v2 = vsub.f32 %v11998_v7, %v4530_v10  ;;  %v12130_v7 = vpop.f32.mrf.mxu0  ;;  %v4579_v62 = vmul.f32 1.442695, %v4557_v46  ;;  %v12157_v10 = vld [vmem:[%s13281_s1 + $0x70] sm:$0xff] }
0x1152   :  { %v4913_v36 = vmul.f32 1.442695, %v4895_v5  ;;  %4881 = vmax.xlane.f32.xlu1 %v12094_v34  ;;  %v4575_v51 = vmul.f32 1.442695, %v4555_v29  ;;  %v4577_v56 = vmul.f32 1.442695, %v4556_v2 }
0x1153   :  { %4412 = vmatmul.bf16.gmra.mxu3 %v4042_v42  ;;  %4883 = vmax.xlane.f32.xlu0 %v12101_v3 }
0x1154   :  { %7818 = vpow2.f32 %v4913_v36  ;;  %v4853_v42 = vpop.f32.mrf.mxu2 }
0x1155   :  { %7820 = vpow2.f32 %v4575_v51 }
0x1156   :  { %7822 = vpow2.f32 %v4577_v56 }
0x1157   :  { %v4536_v55 = vpop.xlane.xlu2 %4535 }
0x1158   :  { %4885 = vmax.xlane.f32.xlu2 %v12113_v24  ;;  %v4511_v61 = vpop.f32.mrf.mxu0  ;;  %v4559_v56 = vsub.f32 %v12017_v58, %v4536_v55 }
0x1159   :  { %v12144_v26 = vadd.f32 %v8026_v48, %v4511_v61 }
0x115a   :  { %v12118_v19 = vpop.eup %7818 }
0x115b   :  { %4945 = vadd.xlane.f32.xlu1 %v12118_v19  ;;  %4947 = vadd.xlane.f32.xlu0 %v12116_v18  ;;  %v12126_v11 = vpop.eup %7820 }
0x115c   :  { %v12134_v44 = vpop.eup %7822  ;;  %v4856_v29 = vpop.f32.mrf.mxu2 }
0x115d   :  { %v12160_v2 = vadd.f32 %v12157_v10, %v4856_v29  ;;  %v12174_v29 = vpop.f32.mrf.mxu3 }
0x115f   :  { %v4870_v60 = vpop.xlane.xlu2 %4869 }
0x1160   :  { %v4897_v59 = vsub.f32 %v12022_v43, %v4870_v60  ;;  %v4583_v60 = vmul.f32 1.442695, %v4559_v56 }
0x1162   :  { %v4917_v22 = vmul.f32 1.442695, %v4897_v59 }
0x1163   :  { %4607 = vadd.xlane.f32.xlu1 %v12126_v11  ;;  %4539 = vmax.xlane.f32.xlu0 %v12124_v28 }
0x1164   :  { %7824 = vpow2.f32 %v4917_v22  ;;  %v4534_v22 = vpop.xlane.xlu0 %4533 }
0x1165   :  { %7826 = vpow2.f32 %v4579_v62 }
0x1167   :  { %v4874_v43 = vpop.xlane.xlu2 %4873 }
0x1168   :  { %v4899_v9 = vsub.f32 %v12028_v1, %v4874_v43 }
0x116a   :  { %v12136_v52 = vpop.eup %7824  ;;  %v4921_v5 = vmul.f32 1.442695, %v4899_v9 }
0x116b   :  { %4949 = vadd.xlane.f32.xlu2 %v12136_v52  ;;  %4609 = vadd.xlane.f32.xlu0 %v12134_v44  ;;  %v12146_v17 = vpop.eup %7826 }
0x116c   :  { %7828 = vpow2.f32 %v4921_v5  ;;  %v4604_v61 = vpop.xlane.xlu0 %4603 }
0x1172   :  { %v12150_v50 = vpop.eup %7828 }
0x1173   :  { %4611 = vadd.xlane.f32.xlu2 %v12146_v17  ;;  %4545 = vmax.xlane.f32.xlu0 %v12144_v26 }
0x1174   :  { %v4880_v36 = vpop.xlane.xlu2 %4879  ;;  %v4878_v56 = vpop.xlane.xlu0 %4877 }
0x1175   :  { %v4902_v1 = vsub.f32 %v12036_v16, %v4880_v36 }
0x1177   :  { %v4927_v51 = vmul.f32 1.442695, %v4902_v1 }
0x1179   :  { %7830 = vpow2.f32 %v4927_v51 }
0x117a   :  { %7832 = vpow2.f32 %v4583_v60 }
0x117b   :  { %4953 = vadd.xlane.f32.xlu0 %v12150_v50  ;;  %7834 = vrcp.f32 %v12072_v25 }
0x117f   :  { %v12164_v59 = vpop.eup %7830 }
0x1180   :  { %v12167_v16 = vpop.eup %7832 }
0x1181   :  { %v7835_v62 = vpop.eup %7834 }
0x1182   :  { %v4647_v58 = vmul.f32 %v7835_v62, %v12001_v45  ;;  %v12181_v45 = vpop.f32.mrf.mxu3 }
0x1183   :  { %4889 = vmax.xlane.f32.xlu0 %v12160_v2 }
0x118b   :  { %4959 = vadd.xlane.f32.xlu0 %v12164_v59 }
0x1193   :  { %4615 = vadd.xlane.f32.xlu0 %v12167_v16 }
0x11a5   :  { %v4602_v46 = vpop.xlane.xlu1 %4601 }
0x11a6   :  { %7836 = vrcp.f32 %v4602_v46 }
0x11ac   :  { %v7837_v43 = vpop.eup %7836 }
0x11ad   :  { %v4648_v55 = vmul.f32 %v7837_v43, %v12047_v57  ;;  %v4872_v9 = vpop.xlane.xlu1 %4871  ;;  %v12184_v43 = vadd.f32 %v8026_v48, %v4853_v42 }
0x11ae   :  { %v4898_v5 = vsub.f32 %v12054_v4, %v4872_v9 }
0x11af   :  { %v4687_v36 = vpack.c.bf16 %v4648_v55, %v4647_v58 }
0x11b0   :  { %v4919_v1 = vmul.f32 1.442695, %v4898_v5  ;;  %v4558_v5 = vsub.f32 %v12007_v21, %v4534_v22  ;;  %v12198_v21 = vadd.f32 %v12110_v39, %v12130_v7 }
0x11b1   :  { %4703 = vmatmul.bf16.vlgmr.msra.gmra.mxu1 %v4687_v36 }
0x11b2   :  { %7838 = vpow2.f32 %v4919_v1 }
0x11b3   :  { %v4944_v25 = vpop.xlane.xlu2 %4943  ;;  %7840 = vrcp.f32 %v4604_v61 }
0x11b5   :  { %v12176_v51 = vpop.xlane.xlu1 %4537 }
0x11b8   :  { %v12178_v60 = vpop.eup %7838 }
0x11b9   :  { %4951 = vadd.xlane.f32.xlu1 %v12178_v60  ;;  %v7841_v58 = vpop.eup %7840 }
0x11ba   :  { %v4649_v1 = vmul.f32 %v7841_v58, %v12014_v15 }
0x11bb   :  { %v4606_v57 = vpop.xlane.xlu2 %4605 }
0x11bc   :  { %7842 = vrcp.f32 %v4606_v57 }
0x11bd   :  { %7844 = vrcp.f32 %v4944_v25  ;;  %v4876_v4 = vpop.xlane.xlu1 %4875 }
0x11be   :  { %v4942_v46 = vpop.xlane.xlu0 %4941  ;;  %v4900_v62 = vsub.f32 %v12078_v0, %v4876_v4  ;;  %v12192_v0 = vpop.f32.mrf.mxu3  ;;  %v4581_v4 = vmul.f32 1.442695, %v4558_v5 }
0x11bf   :  { %7846 = vrcp.f32 %v4942_v46 }
0x11c0   :  { %v4923_v55 = vmul.f32 1.442695, %v4900_v62 }
0x11c1   :  { %4887 = vmax.xlane.f32.xlu1 %v12184_v43 }
0x11c2   :  { %v7843_v9 = vpop.eup %7842  ;;  %7848 = vpow2.f32 %v4923_v55  ;;  %v4858_v55 = vpop.f32.mrf.mxu2 }
0x11c3   :  { %v7845_v61 = vpop.eup %7844  ;;  %v12188_v36 = vpop.xlane.xlu2 %4541  ;;  %v4650_v25 = vmul.f32 %v7843_v9, %v12070_v31  ;;  %7850 = vpow2.f32 %v4581_v4  ;;  %v8028_v9 = vld [vmem:[%s13281_s1 + $0x78] sm:$0xff] }
0x11c4   :  { %v4990_v46 = vmul.f32 %v7845_v61, %v12062_v41  ;;  %v4901_v41 = vsub.f32 %v12032_v12, %v4878_v56  ;;  %v12210_v5 = vadd.f32 %v8028_v9, %v4858_v55 }
0x11c5   :  { %v7847_v57 = vpop.eup %7846  ;;  %v4882_v48 = vpop.xlane.xlu1 %4881  ;;  %v4688_v42 = vpack.c.bf16 %v4650_v25, %v4649_v1  ;;  %v4560_v25 = vsub.f32 %v12065_v49, %v12176_v51 }
0x11c6   :  { %v4989_v62 = vmul.f32 %v7847_v57, %v12081_v37  ;;  %v4884_v8 = vpop.xlane.xlu0 %4883  ;;  %v4925_v7 = vmul.f32 1.442695, %v4901_v41  ;;  %v12212_v61 = vpop.f32.mrf.mxu3  ;;  %v4903_v49 = vsub.f32 %v12094_v34, %v4882_v48 }
0x11c7   :  { %v4904_v22 = vsub.f32 %v12101_v3, %v4884_v8  ;;  %4708 = vmatmul.bf16.gmra.mxu1 %v4688_v42  ;;  %v4585_v4 = vmul.f32 1.442695, %v4560_v25 }
0x11c8   :  { %v12201_v15 = vpop.eup %7848  ;;  %v5029_v31 = vpack.c.bf16 %v4990_v46, %v4989_v62 }
0x11c9   :  { %v4931_v58 = vmul.f32 1.442695, %v4904_v22  ;;  %4543 = vmax.xlane.f32.xlu1 %v12198_v21  ;;  %4955 = vadd.xlane.f32.xlu2 %v12201_v15  ;;  %v12214_v12 = vpop.eup %7850 }
0x11ca   :  { %5045 = vmatmul.bf16.vlgmr.msrb.gmra.mxu3 %v5029_v31 }
0x11cb   :  { %7852 = vpow2.f32 %v4931_v58  ;;  %v4886_v37 = vpop.xlane.xlu2 %4885 }
0x11cc   :  { %v4905_v39 = vsub.f32 %v12113_v24, %v4886_v37  ;;  %v4514_v24 = vpop.f32.mrf.mxu0 }
0x11cd   :  { %v12227_v31 = vadd.f32 %v12157_v10, %v4514_v24 }
0x11ce   :  { %v4933_v8 = vmul.f32 1.442695, %v4905_v39  ;;  %v4948_v3 = vpop.xlane.xlu0 %4947  ;;  %v4946_v1 = vpop.xlane.xlu1 %4945  ;;  %v4929_v39 = vmul.f32 1.442695, %v4903_v49 }
0x11cf   :  { %7854 = vrcp.f32 %v4948_v3  ;;  %v12232_v37 = vpop.f32.mrf.mxu3 }
0x11d0   :  { %7856 = vpow2.f32 %v4933_v8 }
0x11d1   :  { %v12216_v56 = vpop.eup %7852  ;;  %7858 = vrcp.f32 %v4946_v1  ;;  %4613 = vadd.xlane.f32.xlu1 %v12214_v12  ;;  %4891 = vmax.xlane.f32.xlu2 %v12210_v5 }
0x11d2   :  { %7860 = vpow2.f32 %v4925_v7  ;;  %4963 = vadd.xlane.f32.xlu0 %v12216_v56 }
0x11d3   :  { %7862 = vpow2.f32 %v4585_v4 }
0x11d4   :  { %v4516_v55 = vpop.f32.mrf.mxu0 }
0x11d5   :  { %v7855_v57 = vpop.eup %7854 }
0x11d6   :  { %v12223_v42 = vpop.eup %7856  ;;  %v4540_v46 = vpop.xlane.xlu0 %4539  ;;  %v4992_v62 = vmul.f32 %v7855_v57, %v12116_v18 }
0x11d7   :  { %v7859_v22 = vpop.eup %7858  ;;  %v4561_v51 = vsub.f32 %v12124_v28, %v4540_v46  ;;  %v4608_v10 = vpop.xlane.xlu1 %4607  ;;  %v4562_v28 = vsub.f32 %v12088_v30, %v12188_v36  ;;  %v7301_v30 = vld [vmem:[%s13282_s6 + $0x38] sm:$0xff] }
0x11d8   :  { %v12229_v58 = vpop.eup %7860  ;;  %v4991_v41 = vmul.f32 %v7859_v22, %v12118_v19  ;;  %7864 = vrcp.f32 %v4608_v10  ;;  %v12239_v19 = vadd.f32 %v8028_v9, %v4516_v55  ;;  %v12247_v48 = vpop.f32.mrf.mxu3  ;;  %5172 = vmatpush.bf16.msrb.mxu0 %v7301_v30 }
0x11d9   :  { %4957 = vadd.xlane.f32.xlu1 %v12229_v58  ;;  %4547 = vmax.xlane.f32.xlu2 %v12227_v31  ;;  %v4587_v7 = vmul.f32 1.442695, %v4561_v51  ;;  %v12241_v34 = vpop.eup %7862  ;;  %v4589_v24 = vmul.f32 1.442695, %v4562_v28 }
0x11da   :  { %4965 = vadd.xlane.f32.xlu0 %v12223_v42  ;;  %v5030_v18 = vpack.c.bf16 %v4992_v62, %v4991_v41 }
0x11dc   :  { %5050 = vmatmul.bf16.gmra.mxu3 %v5030_v18 }
0x11de   :  { %v4610_v8 = vpop.xlane.xlu0 %4609  ;;  %v7865_v3 = vpop.eup %7864 }
0x11df   :  { %7866 = vrcp.f32 %v4610_v8  ;;  %v4651_v57 = vmul.f32 %v7865_v3, %v12126_v11 }
0x11e0   :  { %7868 = vpow2.f32 %v4929_v39  ;;  %v12261_v11 = vpop.f32.mrf.mxu3  ;;  %v4950_v39 = vpop.xlane.xlu2 %4949 }
0x11e1   :  { %4549 = vmax.xlane.f32.xlu1 %v12239_v19  ;;  %4617 = vadd.xlane.f32.xlu2 %v12241_v34  ;;  %7870 = vpow2.f32 %v4587_v7  ;;  %v7300_v7 = vld [vmem:[%s13282_s6 + $0x30] sm:$0xff] }
0x11e2   :  { %7872 = vpow2.f32 %v4589_v24  ;;  %5173 = vmatpush.bf16.msrb.mxu0 %v7300_v7  ;;  %v7299_v24 = vld [vmem:[%s13282_s6 + $0x28] sm:$0xff] }
0x11e5   :  { %v7867_v1 = vpop.eup %7866 }
0x11e6   :  { %v12249_v9 = vpop.eup %7868  ;;  %v4546_v25 = vpop.xlane.xlu0 %4545  ;;  %v4652_v4 = vmul.f32 %v7867_v1, %v12134_v44  ;;  %5174 = vmatpush.bf16.msrb.mxu0 %v7299_v24 }
0x11e7   :  { %v12253_v46 = vpop.eup %7870  ;;  %v4564_v62 = vsub.f32 %v12144_v26, %v4546_v25 }
0x11e8   :  { %v4689_v36 = vpack.c.bf16 %v4652_v4, %v4651_v57  ;;  %v12263_v44 = vpop.eup %7872  ;;  %v12269_v41 = vpop.f32.mrf.mxu3 }
0x11e9   :  { %4619 = vadd.xlane.f32.xlu2 %v12253_v46  ;;  %4961 = vadd.xlane.f32.xlu1 %v12249_v9  ;;  %v4593_v22 = vmul.f32 1.442695, %v4564_v62  ;;  %v4612_v57 = vpop.xlane.xlu2 %4611 }
0x11ea   :  { %4713 = vmatmul.bf16.gmra.mxu1 %v4689_v36  ;;  %5175 = vmatpush.bf16.msrb.mxu0 %v7298_v32 }
0x11eb   :  { %7874 = vpow2.f32 %v4593_v22 }
0x11ec   :  { %7876 = vrcp.f32 %v4950_v39 }
0x11ee   :  { %v4954_v8 = vpop.xlane.xlu0 %4953 }
0x11f0   :  { %v12271_v49 = vpop.f32.mrf.mxu3 }
0x11f1   :  { %4621 = vadd.xlane.f32.xlu1 %v12263_v44  ;;  %v12266_v26 = vpop.eup %7874 }
0x11f2   :  { %4625 = vadd.xlane.f32.xlu0 %v12266_v26  ;;  %v7877_v3 = vpop.eup %7876 }
0x11f3   :  { %v4993_v62 = vmul.f32 %v7877_v3, %v12136_v52 }
0x11f6   :  { %v4890_v36 = vpop.xlane.xlu0 %4889 }
0x11f8   :  { %v12273_v51 = vpop.f32.mrf.mxu3 }
0x1200   :  { %v12275_v18 = vpop.f32.mrf.mxu3 }
0x1208   :  { %v12277_v10 = vpop.f32.mrf.mxu3 }
0x1210   :  { %v12279_v55 = vpop.f32.mrf.mxu3 }
0x1218   :  { %v12284_v1 = vpop.f32.mrf.mxu3 }
0x1220   :  { %v12296_v24 = vpop.f32.mrf.mxu3 }
0x122c   :  { %v4952_v28 = vpop.xlane.xlu1 %4951 }
0x122d   :  { %7878 = vrcp.f32 %v4952_v28  ;;  %v4907_v28 = vsub.f32 %v12160_v2, %v4890_v36 }
0x122f   :  { %v4937_v52 = vmul.f32 1.442695, %v4907_v28 }
0x1233   :  { %v7879_v25 = vpop.eup %7878 }
0x1234   :  { %v4888_v4 = vpop.xlane.xlu1 %4887  ;;  %v4994_v30 = vmul.f32 %v7879_v25, %v12178_v60 }
0x1235   :  { %v4906_v22 = vsub.f32 %v12184_v43, %v4888_v4 }
0x1236   :  { %v5031_v39 = vpack.c.bf16 %v4994_v30, %v4993_v62 }
0x1237   :  { %v4935_v7 = vmul.f32 1.442695, %v4906_v22  ;;  %v12304_v22 = vpop.f32.mrf.mxu3 }
0x1238   :  { %5055 = vmatmul.bf16.gmra.mxu3 %v5031_v39 }
0x1239   :  { %7880 = vpow2.f32 %v4935_v7  ;;  %v4960_v7 = vpop.xlane.xlu0 %4959 }
0x123a   :  { %7882 = vrcp.f32 %v4954_v8 }
0x123c   :  { %v4956_v3 = vpop.xlane.xlu2 %4955  ;;  %v4544_v60 = vpop.xlane.xlu1 %4543 }
0x123d   :  { %7884 = vrcp.f32 %v4956_v3  ;;  %v4563_v43 = vsub.f32 %v12198_v21, %v4544_v60  ;;  %v4704_v3 = vpop.f32.mrf.mxu1 }
0x123e   :  { %7886 = vpow2.f32 %v4937_v52 }
0x123f   :  { %v12299_v25 = vpop.eup %7880  ;;  %v4591_v4 = vmul.f32 1.442695, %v4563_v43 }
0x1240   :  { %4967 = vadd.xlane.f32.xlu2 %v12299_v25  ;;  %v7883_v2 = vpop.eup %7882 }
0x1241   :  { %7888 = vpow2.f32 %v4591_v4  ;;  %v4995_v8 = vmul.f32 %v7883_v2, %v12150_v50 }
0x1242   :  { %7890 = vrcp.f32 %v4612_v57 }
0x1243   :  { %v7885_v62 = vpop.eup %7884 }
0x1244   :  { %v4892_v32 = vpop.xlane.xlu2 %4891  ;;  %v4614_v30 = vpop.xlane.xlu1 %4613  ;;  %v4996_v36 = vmul.f32 %v7885_v62, %v12201_v15 }
0x1245   :  { %v4908_v21 = vsub.f32 %v12210_v5, %v4892_v32  ;;  %7892 = vrcp.f32 %v4614_v30  ;;  %v12307_v39 = vpop.eup %7886 }
0x1246   :  { %v5032_v28 = vpack.c.bf16 %v4996_v36, %v4995_v8  ;;  %v4616_v36 = vpop.xlane.xlu0 %4615 }
0x1247   :  { %v12309_v52 = vpop.eup %7888  ;;  %v4939_v60 = vmul.f32 1.442695, %v4908_v21 }
0x1248   :  { %5060 = vmatmul.bf16.gmra.mxu3 %v5032_v28  ;;  %4969 = vadd.xlane.f32.xlu2 %v12307_v39  ;;  %v7891_v57 = vpop.eup %7890  ;;  %v4706_v28 = vpop.f32.mrf.mxu1 }
0x1249   :  { %7894 = vpow2.f32 %v4939_v60  ;;  %4623 = vadd.xlane.f32.xlu1 %v12309_v52  ;;  %v4653_v43 = vmul.f32 %v7891_v57, %v12146_v17  ;;  %v4379_v17 = vadd.f32 %v12174_v29, %v11804_v33 }
0x124a   :  { %7896 = vrcp.f32 %v4960_v7 }
0x124b   :  { %v7893_v50 = vpop.eup %7892 }
0x124c   :  { %v4548_v15 = vpop.xlane.xlu2 %4547  ;;  %v4958_v5 = vpop.xlane.xlu1 %4957  ;;  %v4654_v4 = vmul.f32 %v7893_v50, %v12214_v12  ;;  %v4381_v12 = vadd.f32 %v12181_v45, %v11825_v23 }
0x124d   :  { %v5046_v2 = vpop.f32.mrf.mxu3  ;;  %v4565_v62 = vsub.f32 %v12227_v31, %v4548_v15  ;;  %7898 = vrcp.f32 %v4958_v5  ;;  %v4744_v31 = vadd.f32 %v4704_v3, %v4379_v17 }
0x124e   :  { %v4690_v32 = vpack.c.bf16 %v4654_v4, %v4653_v43  ;;  %v4745_v60 = vadd.f32 %v4706_v28, %v4381_v12 }
0x124f   :  { %v12316_v30 = vpop.eup %7894  ;;  %v4595_v8 = vmul.f32 1.442695, %v4565_v62  ;;  %v5086_v62 = vadd.f32 %v5046_v2, %v4744_v31 }
0x1250   :  { %4718 = vmatmul.bf16.gmra.mxu1 %v4690_v32  ;;  %v7897_v21 = vpop.eup %7896 }
0x1251   :  { %7900 = vpow2.f32 %v4595_v8  ;;  %4971 = vadd.xlane.f32.xlu1 %v12316_v30  ;;  %v4998_v5 = vmul.f32 %v7897_v21, %v12164_v59  ;;  %v4964_v8 = vpop.xlane.xlu0 %4963 }
0x1252   :  { %7902 = vrcp.f32 %v4616_v36  ;;  %v4709_v36 = vpop.f32.mrf.mxu1 }
0x1253   :  { %v7899_v7 = vpop.eup %7898 }
0x1254   :  { %v4618_v57 = vpop.xlane.xlu2 %4617  ;;  %v4550_v50 = vpop.xlane.xlu1 %4549  ;;  %v4997_v15 = vmul.f32 %v7899_v7, %v12229_v58 }
0x1255   :  { %v5048_v43 = vpop.f32.mrf.mxu3  ;;  %7904 = vrcp.f32 %v4618_v57  ;;  %v4566_v4 = vsub.f32 %v12239_v19, %v4550_v50  ;;  %v4384_v57 = vadd.f32 %v12192_v0, %v11847_v53 }
0x1256   :  { %v5087_v32 = vadd.f32 %v5048_v43, %v4745_v60  ;;  %v5033_v33 = vpack.c.bf16 %v4998_v5, %v4997_v15 }
0x1257   :  { %v12326_v29 = vpop.eup %7900  ;;  %v4597_v23 = vmul.f32 1.442695, %v4566_v4  ;;  %v4746_v5 = vadd.f32 %v4709_v36, %v4384_v57 }
0x1258   :  { %v5111_v45 = vpack.c.bf16 %v5087_v32, %v5086_v62  ;;  %4627 = vadd.xlane.f32.xlu0 %v12326_v29  ;;  %5065 = vmatmul.bf16.gmra.mxu3 %v5033_v33  ;;  %v7903_v3 = vpop.eup %7902 }
0x1259   :  { %7906 = vpow2.f32 %v4597_v23  ;;  %v4655_v19 = vmul.f32 %v7903_v3, %v12167_v16  ;;  %v4386_v16 = vadd.f32 %v12212_v61, %v11866_v20  ;;  %v4966_v61 = vpop.xlane.xlu0 %4965 }
0x125a   :  { %7048 = vmatmul.msk.bf16.vlgmr.msrb.gmra.mxu0 %vm115_vm0, %v5111_v45  ;;  %7908 = vrcp.f32 %v4964_v8  ;;  %v4711_v31 = vpop.f32.mrf.mxu1 }
0x125b   :  { %v7905_v59 = vpop.eup %7904  ;;  %v4747_v43 = vadd.f32 %v4711_v31, %v4386_v16 }
0x125c   :  { %v4962_v58 = vpop.xlane.xlu1 %4961  ;;  %v4656_v2 = vmul.f32 %v7905_v59, %v12241_v34  ;;  %v4620_v12 = vpop.xlane.xlu2 %4619 }
0x125d   :  { %7910 = vrcp.f32 %v4962_v58 }
0x125e   :  { %v4691_v21 = vpack.c.bf16 %v4656_v2, %v4655_v19  ;;  %7912 = vrcp.f32 %v4620_v12  ;;  %v4391_v12 = vadd.f32 %v12247_v48, %v11886_v35 }
0x125f   :  { %v12332_v28 = vpop.eup %7906  ;;  %v5051_v17 = vpop.f32.mrf.mxu3 }
0x1260   :  { %4723 = vmatmul.bf16.gmra.mxu1 %v4691_v21  ;;  %4629 = vadd.xlane.f32.xlu2 %v12332_v28  ;;  %v7909_v7 = vpop.eup %7908  ;;  %v5088_v32 = vadd.f32 %v5051_v17, %v4746_v5  ;;  %v4389_v17 = vadd.f32 %v12232_v37, %v11871_v13 }
0x1261   :  { %v5000_v15 = vmul.f32 %v7909_v7, %v12216_v56 }
0x1263   :  { %v7911_v60 = vpop.eup %7910 }
0x1264   :  { %v4622_v34 = vpop.xlane.xlu1 %4621  ;;  %v4999_v50 = vmul.f32 %v7911_v60, %v12249_v9  ;;  %v7913_v23 = vpop.eup %7912 }
0x1265   :  { %7914 = vrcp.f32 %v4622_v34  ;;  %v4657_v53 = vmul.f32 %v7913_v23, %v12253_v46  ;;  %v4626_v36 = vpop.xlane.xlu0 %4625 }
0x1266   :  { %v5034_v62 = vpack.c.bf16 %v5000_v15, %v4999_v50  ;;  %7916 = vrcp.f32 %v4966_v61 }
0x1267   :  { %v5053_v4 = vpop.f32.mrf.mxu3  ;;  %v4714_v9 = vpop.f32.mrf.mxu1 }
0x1268   :  { %v5089_v33 = vadd.f32 %v5053_v4, %v4747_v43  ;;  %5070 = vmatmul.bf16.gmra.mxu3 %v5034_v62  ;;  %v4748_v60 = vadd.f32 %v4714_v9, %v4389_v17 }
0x126a   :  { %v5112_v45 = vpack.c.bf16 %v5089_v33, %v5088_v32 }
0x126b   :  { %v7915_v3 = vpop.eup %7914 }
0x126c   :  { %7049 = vmatmul.msk.bf16.gmra.mxu0 %vm115_vm0, %v5112_v45  ;;  %v4658_v20 = vmul.f32 %v7915_v3, %v12263_v44  ;;  %v7917_v8 = vpop.eup %7916  ;;  %v4396_v3 = vadd.f32 %v12269_v41, %v11899_v38  ;;  %v13661_v41 = vld [vmem:[#allocation33_spill] sm:$0xff] }
0x126d   :  { %v5001_v19 = vmul.f32 %v7917_v8, %v12223_v42 }
0x126e   :  { %v4692_v0 = vpack.c.bf16 %v4658_v20, %v4657_v53 }
0x126f   :  { %v4716_v44 = vpop.f32.mrf.mxu1 }
0x1270   :  { %4728 = vmatmul.bf16.gmra.mxu1 %v4692_v0  ;;  %v4749_v57 = vadd.f32 %v4716_v44, %v4391_v12  ;;  %v4399_v12 = vadd.f32 %v12271_v49, %v11905_v47  ;;  %v13663_v49 = vld [vmem:[#allocation39_spill] sm:$0xff] }
0x12b3   :  { %v4968_v56 = vpop.xlane.xlu2 %4967 }
0x12b4   :  { %7918 = vrcp.f32 %v4968_v56 }
0x12b5   :  { %7920 = vrcp.f32 %v4626_v36 }
0x12ba   :  { %v7919_v59 = vpop.eup %7918 }
0x12bb   :  { %v5056_v58 = vpop.f32.mrf.mxu3  ;;  %v5002_v2 = vmul.f32 %v7919_v59, %v12299_v25  ;;  %v4970_v7 = vpop.xlane.xlu2 %4969 }
0x12bc   :  { %v4624_v21 = vpop.xlane.xlu1 %4623  ;;  %v7921_v31 = vpop.eup %7920  ;;  %v5090_v34 = vadd.f32 %v5056_v58, %v4748_v60 }
0x12bd   :  { %7922 = vrcp.f32 %v4624_v21  ;;  %v5035_v46 = vpack.c.bf16 %v5002_v2, %v5001_v19  ;;  %v4660_v5 = vmul.f32 %v7921_v31, %v12266_v26  ;;  %v4394_v26 = vadd.f32 %v12261_v11, %v11896_v40 }
0x12be   :  { %7924 = vrcp.f32 %v4970_v7  ;;  %v13662_v7 = vld [vmem:[#allocation32_spill] sm:$0xff] }
0x12bf   :  { %5075 = vmatmul.bf16.gmra.mxu3 %v5035_v46 }
0x12c3   :  { %v7923_v16 = vpop.eup %7922  ;;  %v5058_v42 = vpop.f32.mrf.mxu3 }
0x12c4   :  { %v5091_v25 = vadd.f32 %v5058_v42, %v4749_v57  ;;  %v4972_v50 = vpop.xlane.xlu1 %4971  ;;  %v4659_v15 = vmul.f32 %v7923_v16, %v12309_v52  ;;  %v7925_v35 = vpop.eup %7924 }
0x12c5   :  { %7926 = vrcp.f32 %v4972_v50  ;;  %v5003_v4 = vmul.f32 %v7925_v35, %v12307_v39  ;;  %v12362_v39 = vld [vmem:[%s13278_s10 + $0x10] sm:$0xff]  ;;  %v4404_v35 = vadd.f32 %v12275_v18, %v11913_v54 }
0x12c6   :  { %v5113_v43 = vpack.c.bf16 %v5091_v25, %v5090_v34  ;;  %v4693_v13 = vpack.c.bf16 %v4660_v5, %v4659_v15 }
0x12c8   :  { %4733 = vmatmul.bf16.gmra.mxu1 %v4693_v13  ;;  %7050 = vmatmul.msk.bf16.gmra.mxu0 %vm115_vm0, %v5113_v43 }
0x12cb   :  { %v7927_v37 = vpop.eup %7926  ;;  %v5061_v48 = vpop.f32.mrf.mxu3 }
0x12cc   :  { %v5004_v62 = vmul.f32 %v7927_v37, %v12316_v30  ;;  %v4628_v23 = vpop.xlane.xlu0 %4627  ;;  %v12365_v30 = vperm.slane %v12362_v39, 3 }
0x12cd   :  { %v4719_v32 = vpop.f32.mrf.mxu1  ;;  %7928 = vrcp.f32 %v4628_v23 }
0x12ce   :  { %v5036_v33 = vpack.c.bf16 %v5004_v62, %v5003_v4  ;;  %v4750_v53 = vadd.f32 %v4719_v32, %v4394_v26  ;;  %v13664_v62 = vld [vmem:[#allocation38_spill] sm:$0xff] }
0x12d0   :  { %5080 = vmatmul.bf16.gmra.mxu3 %v5036_v33  ;;  %v5092_v11 = vadd.f32 %v5061_v48, %v4750_v53  ;;  %v4406_v48 = vadd.f32 %v12277_v10, %v11915_v63  ;;  %v13665_v10 = vld [vmem:[#allocation45_spill] sm:$0xff] }
0x12d3   :  { %v5063_v52 = vpop.f32.mrf.mxu3  ;;  %v4630_v45 = vpop.xlane.xlu2 %4629 }
0x12d4   :  { %7930 = vrcp.f32 %v4630_v45  ;;  %v7929_v40 = vpop.eup %7928 }
0x12d5   :  { %v4721_v20 = vpop.f32.mrf.mxu1  ;;  %v4661_v58 = vmul.f32 %v7929_v40, %v12326_v29 }
0x12d6   :  { %v4751_v0 = vadd.f32 %v4721_v20, %v4396_v3 }
0x12d7   :  { %v5177_v61 = vpop.f32.mrf.mxu0 }
0x12d8   :  { %v5093_v56 = vadd.f32 %v5063_v52, %v4751_v0  ;;  %v5178_v9 = vadd.f32 %v5177_v61, %v12365_v30  ;;  %v4409_v61 = vadd.f32 %v12279_v55, %v11921_v27  ;;  %v13667_v27 = vld [vmem:[#allocation26_spill] sm:$0xff] }
0x12da   :  { %v7931_v8 = vpop.eup %7930  ;;  %v5114_v38 = vpack.c.bf16 %v5093_v56, %v5092_v11  ;;  %v12369_v36 = vadd.f32 %v5178_v9, %v13661_v41  ;;  %v4411_v11 = vadd.f32 %v12284_v1, %v11924_v14 }
0x12db   :  { %v5066_v59 = vpop.f32.mrf.mxu3  ;;  %v4662_v19 = vmul.f32 %v7931_v8, %v12332_v28  ;;  %v4401_v28 = vadd.f32 %v12273_v51, %v11907_v6 }
0x12dc   :  { %v5233_v2 = vsel %vm115_vm0, %v12369_v36, 0.0  ;;  %7051 = vmatmul.msk.bf16.gmra.mxu0 %vm115_vm0, %v5114_v38 }
0x12dd   :  { %5234 = vadd.xlane.f32.xlu1 %v5233_v2  ;;  %v4724_v21 = vpop.f32.mrf.mxu1  ;;  %v4694_v46 = vpack.c.bf16 %v4662_v19, %v4661_v58 }
0x12de   :  { %v4752_v60 = vadd.f32 %v4724_v21, %v4399_v12  ;;  %v13666_v21 = vld [vmem:[#allocation44_spill] sm:$0xff] }
0x12df   :  { %v5179_v44 = vpop.f32.mrf.mxu0  ;;  %4738 = vmatmul.bf16.gmra.mxu1 %v4694_v46 }
0x12e0   :  { %v5180_v17 = vadd.f32 %v5179_v44, %v12365_v30  ;;  %v5094_v34 = vadd.f32 %v5066_v59, %v4752_v60 }
0x12e2   :  { %v12380_v31 = vadd.f32 %v5180_v17, %v13662_v7 }
0x12e3   :  { %v5068_v29 = vpop.f32.mrf.mxu3 }
0x12e4   :  { %v5236_v57 = vsel %vm115_vm0, %v12380_v31, 0.0 }
0x12e5   :  { %5237 = vadd.xlane.f32.xlu0 %v5236_v57  ;;  %v4726_v16 = vpop.f32.mrf.mxu1 }
0x12e6   :  { %v4753_v42 = vadd.f32 %v4726_v16, %v4401_v28  ;;  %v13668_v16 = vld [vmem:[#allocation51_spill] sm:$0xff] }
0x12e8   :  { %v5095_v25 = vadd.f32 %v5068_v29, %v4753_v42 }
0x12e9   :  { %v5182_v50 = vpop.f32.mrf.mxu0 }
0x12ea   :  { %v5115_v15 = vpack.c.bf16 %v5095_v25, %v5094_v34  ;;  %v5183_v47 = vadd.f32 %v5182_v50, %v12365_v30 }
0x12eb   :  { %v5071_v43 = vpop.f32.mrf.mxu3 }
0x12ec   :  { %v12388_v5 = vadd.f32 %v5183_v47, %v13663_v49  ;;  %7052 = vmatmul.msk.bf16.gmra.mxu0 %vm115_vm0, %v5115_v15  ;;  %v13669_v47 = vld [vmem:[#allocation17_spill] sm:$0xff] }
0x12ed   :  { %v4729_v6 = vpop.f32.mrf.mxu1  ;;  %v4414_v49 = vadd.f32 %v12296_v24, %v13669_v47  ;;  %v7309_v24 = vld [vmem:[%s13283_s7 + $0x74] sm:$0xf0]  ;;  %v7083_v47 = vld [vmem:[%s13283_s7 + $0x60] sm:$0xf] }
0x12ee   :  { %v5239_v51 = vsel %vm115_vm0, %v12388_v5, 0.0  ;;  %v4754_v4 = vadd.f32 %v4729_v6, %v4404_v35 }
0x12ef   :  { %5240 = vadd.xlane.f32.xlu2 %v5239_v51  ;;  %v13670_v51 = vld [vmem:[#allocation30_spill] sm:$0xff] }
0x12f0   :  { %v5096_v45 = vadd.f32 %v5071_v43, %v4754_v4  ;;  %v13671_v4 = vld [vmem:[#allocation50_spill] sm:$0xff] }
0x12f1   :  { %v5184_v13 = vpop.f32.mrf.mxu0 }
0x12f2   :  { %v5185_v37 = vadd.f32 %v5184_v13, %v12365_v30  ;;  %v4416_v13 = vadd.f32 %v12304_v22, %v13670_v51 }
0x12f3   :  { %v5073_v52 = vpop.f32.mrf.mxu3 }
0x12f4   :  { %v12399_v32 = vadd.f32 %v5185_v37, %v13664_v62 }
0x12f5   :  { %v4731_v33 = vpop.f32.mrf.mxu1 }
0x12f6   :  { %v5242_v23 = vsel %vm115_vm0, %v12399_v32, 0.0  ;;  %v4755_v26 = vadd.f32 %v4731_v33, %v4406_v48  ;;  %v7091_v33 = vld [vmem:[%s13283_s7 + $0x70] sm:$0xf] }
0x12f7   :  { %5243 = vadd.xlane.f32.xlu1 %v5242_v23  ;;  %v7092_v22 = vor.u32 %v7309_v24, %v7091_v33  ;;  %v7305_v33 = vld [vmem:[%s13283_s7 + $0x54] sm:$0xf0] }
0x12f8   :  { %v5097_v3 = vadd.f32 %v5073_v52, %v4755_v26 }
0x12f9   :  { %5711 = vmatpush.bf16.msrb.mxu1 %v7092_v22  ;;  %v7077_v22 = vld [vmem:[%s13283_s7 + $0x58] sm:$0xf0] }
0x12fa   :  { %v5116_v53 = vpack.c.bf16 %v5097_v3, %v5096_v45 }
0x12fc   :  { %7053 = vmatmul.msk.bf16.gmra.mxu0 %vm115_vm0, %v5116_v53 }
0x1342   :  { %v5076_v54 = vpop.f32.mrf.mxu3 }
0x1345   :  { %v4734_v18 = vpop.f32.mrf.mxu1  ;;  %v5187_v20 = vpop.f32.mrf.mxu0 }
0x1346   :  { %v5188_v63 = vadd.f32 %v5187_v20, %v12365_v30  ;;  %v4756_v56 = vadd.f32 %v4734_v18, %v4409_v61 }
0x1348   :  { %v12406_v0 = vadd.f32 %v5188_v63, %v13665_v10  ;;  %v5098_v58 = vadd.f32 %v5076_v54, %v4756_v56 }
0x134a   :  { %v5245_v40 = vsel %vm115_vm0, %v12406_v0, 0.0  ;;  %v5078_v59 = vpop.f32.mrf.mxu3 }
0x134b   :  { %5246 = vadd.xlane.f32.xlu0 %v5245_v40  ;;  %v13672_v40 = vld [vmem:[#allocation29_spill] sm:$0xff] }
0x134d   :  { %v4736_v9 = vpop.f32.mrf.mxu1  ;;  %v5189_v8 = vpop.f32.mrf.mxu0 }
0x134e   :  { %v4757_v38 = vadd.f32 %v4736_v9, %v4411_v11  ;;  %v5190_v41 = vadd.f32 %v5189_v8, %v12365_v30 }
0x1350   :  { %v5099_v19 = vadd.f32 %v5078_v59, %v4757_v38  ;;  %v5235_v2 = vpop.xlane.xlu1 %5234  ;;  %v12416_v46 = vadd.f32 %v5190_v41, %v13666_v21 }
0x1351   :  { %v5281_v55 = vmul.f32 %v5235_v2, %v13667_v27 }
0x1352   :  { %v5117_v44 = vpack.c.bf16 %v5099_v19, %v5098_v58  ;;  %v5248_v17 = vsel %vm115_vm0, %v12416_v46, 0.0  ;;  %v13673_v58 = vld [vmem:[#allocation28_spill] sm:$0xff] }
0x1353   :  { %v12422_v14 = vsub.f32 %v12369_v36, %v5281_v55  ;;  %5249 = vadd.xlane.f32.xlu2 %v5248_v17  ;;  %v5081_v36 = vpop.f32.mrf.mxu3  ;;  %v13674_v55 = vld [vmem:[#allocation35_spill] sm:$0xff] }
0x1354   :  { %7054 = vmatmul.msk.bf16.gmra.mxu0 %vm115_vm0, %v5117_v44 }
0x1355   :  { %v5313_v1 = vmul.f32 %v12422_v14, %v12422_v14 }
0x1357   :  { %v5329_v12 = vsel %vm115_vm0, %v5313_v1, 0.0  ;;  %v7308_v1 = vld [vmem:[%s13283_s7 + $0x74] sm:$0xf] }
0x1358   :  { %v5238_v7 = vpop.xlane.xlu0 %5237  ;;  %5330 = vadd.xlane.f32.xlu1 %v5329_v12  ;;  %v7093_v12 = vld [vmem:[%s13283_s7 + $0x78] sm:$0xf0] }
0x1359   :  { %v5282_v29 = vmul.f32 %v5238_v7, %v13667_v27  ;;  %v5192_v28 = vpop.f32.mrf.mxu0  ;;  %v7096_v7 = vor.u32 %v7308_v1, %v7093_v12 }
0x135a   :  { %v5193_v60 = vadd.f32 %v5192_v28, %v12365_v30 }
0x135b   :  { %v12431_v57 = vsub.f32 %v12380_v31, %v5282_v29  ;;  %v5083_v52 = vpop.f32.mrf.mxu3  ;;  %5760 = vmatpush.bf16.msra.mxu2 %v7096_v7 }
0x135c   :  { %v12434_v42 = vadd.f32 %v5193_v60, %v13668_v16  ;;  %v4739_v34 = vpop.f32.mrf.mxu1 }
0x135d   :  { %v5314_v25 = vmul.f32 %v12431_v57, %v12431_v57  ;;  %v4758_v35 = vadd.f32 %v4739_v34, %v4414_v49  ;;  %v7306_v49 = vld [vmem:[%s13283_s7 + $0x64] sm:$0xf] }
0x135e   :  { %v5251_v50 = vsel %vm115_vm0, %v12434_v42, 0.0 }
0x135f   :  { %v5332_v15 = vsel %vm115_vm0, %v5314_v25, 0.0  ;;  %5252 = vadd.xlane.f32.xlu2 %v5251_v50  ;;  %v5100_v3 = vadd.f32 %v5081_v36, %v4758_v35 }
0x1360   :  { %5333 = vadd.xlane.f32.xlu0 %v5332_v15 }
0x1361   :  { %v5194_v31 = vpop.f32.mrf.mxu0 }
0x1362   :  { %v5241_v43 = vpop.xlane.xlu2 %5240  ;;  %v5195_v6 = vadd.f32 %v5194_v31, %v12365_v30 }
0x1363   :  { %v5283_v37 = vmul.f32 %v5241_v43, %v13667_v27  ;;  %v7085_v43 = vld [vmem:[%s13283_s7 + $0x68] sm:$0xf0] }
0x1364   :  { %v4741_v48 = vpop.f32.mrf.mxu1  ;;  %v12448_v62 = vadd.f32 %v5195_v6, %v13671_v4  ;;  %v13675_v6 = vld [vmem:[#allocation34_spill] sm:$0xff]  ;;  %v7088_v35 = vor.u32 %v7306_v49, %v7085_v43  ;;  %v7075_v4 = vld [vmem:[%s13283_s7 + $0x50] sm:$0xf] }
0x1365   :  { %v12457_v23 = vsub.f32 %v12388_v5, %v5283_v37  ;;  %v4759_v26 = vadd.f32 %v4741_v48, %v4416_v13 }
0x1366   :  { %v5254_v45 = vsel %vm115_vm0, %v12448_v62, 0.0  ;;  %5761 = vmatpush.bf16.msra.mxu2 %v7088_v35 }
0x1367   :  { %v5101_v53 = vadd.f32 %v5083_v52, %v4759_v26  ;;  %v5315_v54 = vmul.f32 %v12457_v23, %v12457_v23  ;;  %5255 = vadd.xlane.f32.xlu1 %v5254_v45  ;;  %v7076_v26 = vor.u32 %v7305_v33, %v7075_v4 }
0x1369   :  { %v5118_v18 = vpack.c.bf16 %v5101_v53, %v5100_v3  ;;  %v5335_v20 = vsel %vm115_vm0, %v5315_v54, 0.0  ;;  %v5197_v63 = vpop.f32.mrf.mxu0  ;;  %v7067_v54 = vld [vmem:[%s13283_s7 + $0x40] sm:$0xf] }
0x136a   :  { %5336 = vadd.xlane.f32.xlu0 %v5335_v20  ;;  %v5244_v5 = vpop.xlane.xlu1 %5243  ;;  %v5198_v10 = vadd.f32 %v5197_v63, %v12365_v30  ;;  %v7302_v20 = vld [vmem:[%s13283_s7 + $0x44] sm:$0xf] }
0x136b   :  { %v5284_v61 = vmul.f32 %v5244_v5, %v13667_v27  ;;  %7055 = vmatmul.msk.bf16.gmra.mxu0 %vm115_vm0, %v5118_v18  ;;  %v7303_v18 = vld [vmem:[%s13283_s7 + $0x44] sm:$0xf0]  ;;  %v7069_v5 = vld [vmem:[%s13283_s7 + $0x48] sm:$0xf0] }
0x136c   :  { %v12468_v11 = vadd.f32 %v5198_v10, %v13672_v40  ;;  %v7068_v63 = vor.u32 %v7303_v18, %v7067_v54 }
0x136d   :  { %v12471_v56 = vsub.f32 %v12399_v32, %v5284_v61  ;;  %v7072_v61 = vor.u32 %v7302_v20, %v7069_v5 }
0x136e   :  { %v5257_v9 = vsel %vm115_vm0, %v12468_v11, 0.0 }
0x136f   :  { %5258 = vadd.xlane.f32.xlu1 %v5257_v9  ;;  %v5316_v8 = vmul.f32 %v12471_v56, %v12471_v56 }
0x1371   :  { %v5338_v38 = vsel %vm115_vm0, %v5316_v8, 0.0  ;;  %v5199_v41 = vpop.f32.mrf.mxu0 }
0x1372   :  { %5339 = vadd.xlane.f32.xlu2 %v5338_v38  ;;  %v5200_v59 = vadd.f32 %v5199_v41, %v12365_v30  ;;  %v13676_v41 = vld [vmem:[#allocation25_spill] sm:$0xff] }
0x1374   :  { %v12480_v19 = vadd.f32 %v5200_v59, %v13673_v58 }
0x1376   :  { %v5260_v32 = vsel %vm115_vm0, %v12480_v19, 0.0 }
0x1377   :  { %5261 = vadd.xlane.f32.xlu0 %v5260_v32 }
0x1379   :  { %v5202_v2 = vpop.f32.mrf.mxu0 }
0x137a   :  { %v5203_v21 = vadd.f32 %v5202_v2, %v12365_v30 }
0x137c   :  { %v12486_v44 = vadd.f32 %v5203_v21, %v13674_v55 }
0x137e   :  { %v5263_v17 = vsel %vm115_vm0, %v12486_v44, 0.0 }
0x137f   :  { %5264 = vadd.xlane.f32.xlu0 %v5263_v17 }
0x1381   :  { %v5204_v36 = vpop.f32.mrf.mxu0 }
0x1382   :  { %v5205_v34 = vadd.f32 %v5204_v36, %v12365_v30 }
0x1384   :  { %v12518_v51 = vadd.f32 %v5205_v34, %v13675_v6 }
0x1386   :  { %v5266_v45 = vsel %vm115_vm0, %v12518_v51, 0.0 }
0x13be   :  { %v5247_v29 = vpop.xlane.xlu0 %5246 }
0x13bf   :  { %v5285_v28 = vmul.f32 %v5247_v29, %v13667_v27 }
0x13c1   :  { %v12498_v60 = vsub.f32 %v12406_v0, %v5285_v28  ;;  %v7307_v0 = vld [vmem:[%s13283_s7 + $0x64] sm:$0xf0] }
0x13c2   :  { %v7084_v31 = vor.u32 %v7307_v0, %v7083_v47 }
0x13c3   :  { %v5317_v16 = vmul.f32 %v12498_v60, %v12498_v60 }
0x13c4   :  { %5712 = vmatpush.bf16.msrb.mxu1 %v7084_v31 }
0x13c5   :  { %v5341_v25 = vsel %vm115_vm0, %v5317_v16, 0.0 }
0x13c6   :  { %v5250_v50 = vpop.xlane.xlu2 %5249  ;;  %5342 = vadd.xlane.f32.xlu2 %v5341_v25  ;;  %v13677_v25 = vld [vmem:[#allocation24_spill] sm:$0xff] }
0x13c7   :  { %v5286_v15 = vmul.f32 %v5250_v50, %v13667_v27 }
0x13c8   :  { %5713 = vmatpush.bf16.msrb.mxu1 %v7076_v26 }
0x13c9   :  { %v12521_v13 = vsub.f32 %v12416_v46, %v5286_v15  ;;  %v7304_v46 = vld [vmem:[%s13283_s7 + $0x54] sm:$0xf] }
0x13ca   :  { %v7080_v3 = vor.u32 %v7304_v46, %v7077_v22 }
0x13cb   :  { %v5331_v37 = vpop.xlane.xlu1 %5330  ;;  %v5318_v48 = vmul.f32 %v12521_v13, %v12521_v13 }
0x13cc   :  { %v5377_v24 = vmul.f32 %v5331_v37, %v13667_v27  ;;  %5762 = vmatpush.bf16.msra.mxu2 %v7080_v3  ;;  %5714 = vmatpush.bf16.msrb.mxu1 %v7068_v63 }
0x13cd   :  { %v5344_v52 = vsel %vm115_vm0, %v5318_v48, 0.0 }
0x13ce   :  { %v5393_v53 = vadd.f32 1e-05, %v5377_v24  ;;  %5345 = vadd.xlane.f32.xlu1 %v5344_v52  ;;  %5267 = vadd.xlane.f32.xlu2 %v5266_v45  ;;  %v12589_v45 = vperm.slane %v12362_v39, 5 }
0x13d0   :  { %7932 = vrsqrt.f32 %v5393_v53  ;;  %5763 = vmatpush.bf16.msra.mxu2 %v7072_v61  ;;  %vm5415_vm9 = vweird.f32 %v5393_v53 }
0x13d1   :  { %v5207_v10 = vpop.f32.mrf.mxu0 }
0x13d2   :  { %v5208_v40 = vadd.f32 %v5207_v10, %v12365_v30  ;;  %v5253_v9 = vpop.xlane.xlu2 %5252  ;;  %v12596_v10 = vperm.slane %v12362_v39, 6 }
0x13d3   :  { %v5334_v8 = vpop.xlane.xlu0 %5333  ;;  %v5287_v38 = vmul.f32 %v5253_v9, %v13667_v27 }
0x13d4   :  { %v12556_v59 = vadd.f32 %v5208_v40, %v13676_v41  ;;  %v5378_v58 = vmul.f32 %v5334_v8, %v13667_v27 }
0x13d5   :  { %v12560_v32 = vsub.f32 %v12434_v42, %v5287_v38 }
0x13d6   :  { %v7933_v2 = vpop.eup %7932  ;;  %v5394_v21 = vadd.f32 1e-05, %v5378_v58  ;;  %v5269_v55 = vsel %vm115_vm0, %v12556_v59, 0.0  ;;  %v13678_v58 = vld [vmem:[#allocation37_spill] sm:$0xff] }
0x13d7   :  { %v5410_v17 = vmul.f32 %v7933_v2, %v5393_v53  ;;  %5270 = vadd.xlane.f32.xlu2 %v5269_v55  ;;  %v5319_v1 = vmul.f32 %v12560_v32, %v12560_v32  ;;  %vm5416_vm8 = vweird.f32 %v7933_v2 }
0x13d8   :  { %7934 = vrsqrt.f32 %v5394_v21  ;;  %vm5417_vm10 = vmor %vm5415_vm9, %vm5416_vm8  ;;  %vm5425_vm12 = vweird.f32 %v5394_v21 }
0x13d9   :  { %v5411_v12 = vmul.f32 %v7933_v2, %v5410_v17  ;;  %v5209_v7 = vpop.f32.mrf.mxu0  ;;  %v5347_v29 = vsel %vm115_vm0, %v5319_v1, 0.0 }
0x13da   :  { %v5210_v28 = vadd.f32 %v5209_v7, %v12365_v30  ;;  %5348 = vadd.xlane.f32.xlu1 %v5347_v29  ;;  %v5256_v42 = vpop.xlane.xlu1 %5255 }
0x13db   :  { %v5412_v36 = vmul.f32 0.5, %v5411_v12  ;;  %v5288_v16 = vmul.f32 %v5256_v42, %v13667_v27 }
0x13dc   :  { %v12570_v50 = vadd.f32 %v5210_v28, %v13677_v25 }
0x13dd   :  { %v5413_v34 = vsub.f32 1.5, %v5412_v36  ;;  %v5337_v15 = vpop.xlane.xlu0 %5336  ;;  %v12573_v47 = vsub.f32 %v12448_v62, %v5288_v16 }
0x13de   :  { %v7935_v0 = vpop.eup %7934  ;;  %v5379_v49 = vmul.f32 %v5337_v15, %v13667_v27  ;;  %v5272_v48 = vsel %vm115_vm0, %v12570_v50, 0.0 }
0x13df   :  { %v5414_v31 = vmul.f32 %v7933_v2, %v5413_v34  ;;  %v5420_v43 = vmul.f32 %v7935_v0, %v5394_v21  ;;  %v5320_v6 = vmul.f32 %v12573_v47, %v12573_v47  ;;  %vm5426_vm11 = vweird.f32 %v7935_v0 }
0x13e0   :  { %v12578_v35 = vadd.f32 1e-05, %v5379_v49  ;;  %vm5427_vm13 = vmor %vm5425_vm12, %vm5426_vm11  ;;  %v13679_v49 = vld [vmem:[#allocation36_spill] sm:$0xff] }
0x13e1   :  { %v5421_v37 = vmul.f32 %v7935_v0, %v5420_v43  ;;  %v5350_v4 = vsel %vm115_vm0, %v5320_v6, 0.0  ;;  %v5418_v33 = vsel %vm5417_vm10, %v7933_v2, %v5414_v31 }
0x13e2   :  { %7936 = vrsqrt.f32 %v12578_v35  ;;  %5273 = vadd.xlane.f32.xlu1 %v5272_v48  ;;  %5351 = vadd.xlane.f32.xlu0 %v5350_v4  ;;  %v5259_v62 = vpop.xlane.xlu1 %5258  ;;  %v5569_v3 = vmul.f32 %v5418_v33, %v12422_v14  ;;  %vm5435_vm15 = vweird.f32 %v12578_v35 }
0x13e3   :  { %v5422_v46 = vmul.f32 0.5, %v5421_v37  ;;  %v5289_v24 = vmul.f32 %v5259_v62, %v13667_v27 }
0x13e4   :  { %v5586_v14 = vmul.f32 %v12589_v45, %v5569_v3 }
0x13e5   :  { %v5423_v26 = vsub.f32 1.5, %v5422_v46  ;;  %v5340_v22 = vpop.xlane.xlu2 %5339  ;;  %v12586_v52 = vsub.f32 %v12468_v11, %v5289_v24 }
0x13e6   :  { %v5380_v53 = vmul.f32 %v5340_v22, %v13667_v27  ;;  %v12614_v1 = vadd.f32 %v12596_v10, %v5586_v14 }
0x13e7   :  { %v5424_v54 = vmul.f32 %v7935_v0, %v5423_v26  ;;  %v5321_v18 = vmul.f32 %v12586_v52, %v12586_v52 }
0x13e8   :  { %v7937_v20 = vpop.eup %7936  ;;  %v5396_v63 = vadd.f32 1e-05, %v5380_v53  ;;  %v5212_v5 = vpop.f32.mrf.mxu0 }
0x13e9   :  { %v5428_v11 = vsel %vm5427_vm13, %v7935_v0, %v5424_v54  ;;  %v5430_v61 = vmul.f32 %v7937_v20, %v12578_v35  ;;  %v5213_v40 = vadd.f32 %v5212_v5, %v12365_v30  ;;  %v5353_v38 = vsel %vm115_vm0, %v5321_v18, 0.0 }
0x13ea   :  { %v5570_v9 = vmul.f32 %v5428_v11, %v12431_v57  ;;  %7938 = vrsqrt.f32 %v5396_v63  ;;  %v5262_v8 = vpop.xlane.xlu0 %5261  ;;  %5354 = vadd.xlane.f32.xlu0 %v5353_v38  ;;  %vm5436_vm14 = vweird.f32 %v7937_v20  ;;  %vm5445_vm3 = vweird.f32 %v5396_v63  ;;  %v7316_v38 = vld [vmem:[%s13284_s8 + $0xb0] sm:$0xff] }
0x13eb   :  { %v5431_v41 = vmul.f32 %v7937_v20, %v5430_v61  ;;  %v12604_v2 = vadd.f32 %v5213_v40, %v13678_v58  ;;  %v5290_v39 = vmul.f32 %v5262_v8, %v13667_v27  ;;  %vm5437_vm1 = vmor %vm5435_vm15, %vm5436_vm14  ;;  %v7325_v8 = vld [vmem:[%s13284_s8 + $0xf8] sm:$0xff] }
0x13ec   :  { %v5587_v21 = vmul.f32 %v12589_v45, %v5570_v9  ;;  %6032 = vmatpush.bf16.msra.mxu0 %v7325_v8 }
0x13ed   :  { %v5432_v55 = vmul.f32 0.5, %v5431_v41  ;;  %v12609_v17 = vsub.f32 %v12480_v19, %v5290_v39  ;;  %v5275_v57 = vsel %vm115_vm0, %v12604_v2, 0.0 }
0x13ee   :  { %v12617_v12 = vadd.f32 %v12596_v10, %v5587_v21  ;;  %5276 = vadd.xlane.f32.xlu1 %v5275_v57  ;;  %v7315_v21 = vld [vmem:[%s13284_s8 + $0xa8] sm:$0xff] }
0x13ef   :  { %v5433_v7 = vsub.f32 1.5, %v5432_v55  ;;  %v5322_v29 = vmul.f32 %v12609_v17, %v12609_v17 }
0x13f0   :  { %v7939_v28 = vpop.eup %7938  ;;  %v5628_v42 = vpack.c.bf16 %v12617_v12, %v12614_v1  ;;  %v5214_v19 = vpop.f32.mrf.mxu0 }
0x13f1   :  { %v5434_v36 = vmul.f32 %v7937_v20, %v5433_v7  ;;  %v5440_v16 = vmul.f32 %v7939_v28, %v5396_v63  ;;  %v5215_v34 = vadd.f32 %v5214_v19, %v12365_v30  ;;  %v5356_v15 = vsel %vm115_vm0, %v5322_v29, 0.0  ;;  %v7324_v7 = vld [vmem:[%s13284_s8 + $0xf0] sm:$0xff]  ;;  %v7314_v19 = vld [vmem:[%s13284_s8 + $0xa0] sm:$0xff] }
0x13f2   :  { %7097 = vmatmul.msk.bf16.vlgmr.msrb.gmra.mxu1 %vm115_vm0, %v5628_v42  ;;  %7105 = vmatmul.msk.bf16.vlgmr.msra.gmra.mxu2 %vm115_vm0, %v5628_v42  ;;  %v5265_v25 = vpop.xlane.xlu0 %5264  ;;  %vm5446_vm2 = vweird.f32 %v7939_v28 }
0x13f3   :  { %v5441_v0 = vmul.f32 %v7939_v28, %v5440_v16  ;;  %v12629_v31 = vadd.f32 %v5215_v34, %v13679_v49  ;;  %v5291_v43 = vmul.f32 %v5265_v25, %v13667_v27  ;;  %5357 = vadd.xlane.f32.xlu2 %v5356_v15  ;;  %v5438_v6 = vsel %vm5437_vm1, %v7937_v20, %v5434_v36  ;;  %vm5447_vm4 = vmor %vm5445_vm3, %vm5446_vm2 }
0x13f4   :  { %v5571_v62 = vmul.f32 %v5438_v6, %v12457_v23  ;;  %6033 = vmatpush.bf16.msra.mxu0 %v7324_v7 }
0x13f5   :  { %v5442_v37 = vmul.f32 0.5, %v5441_v0  ;;  %v12633_v30 = vsub.f32 %v12486_v44, %v5291_v43  ;;  %v5278_v48 = vsel %vm115_vm0, %v12629_v31, 0.0  ;;  %v7323_v0 = vld [vmem:[%s13284_s8 + $0xe8] sm:$0xff] }
0x13f6   :  { %5279 = vadd.xlane.f32.xlu0 %v5278_v48  ;;  %v5588_v26 = vmul.f32 %v12589_v45, %v5571_v62 }
0x13f7   :  { %v5443_v4 = vsub.f32 1.5, %v5442_v37  ;;  %v5323_v35 = vmul.f32 %v12633_v30, %v12633_v30 }
0x13f8   :  { %v12645_v3 = vadd.f32 %v12596_v10, %v5588_v26  ;;  %6034 = vmatpush.bf16.msra.mxu0 %v7323_v0 }
0x13f9   :  { %v5444_v33 = vmul.f32 %v7939_v28, %v5443_v4  ;;  %v5359_v46 = vsel %vm115_vm0, %v5323_v35, 0.0  ;;  %v7322_v35 = vld [vmem:[%s13284_s8 + $0xe0] sm:$0xff] }
0x13fb   :  { %v5448_v24 = vsel %vm5447_vm4, %v7939_v28, %v5444_v33  ;;  %5360 = vadd.xlane.f32.xlu2 %v5359_v46  ;;  %v7312_v46 = vld [vmem:[%s13284_s8 + $0x90] sm:$0xff] }
0x13fc   :  { %v5572_v44 = vmul.f32 %v5448_v24, %v12471_v56  ;;  %v7317_v56 = vld [vmem:[%s13284_s8 + $0xb8] sm:$0xff]  ;;  %6035 = vmatpush.bf16.msra.mxu0 %v7322_v35 }
0x13fd   :  { %5983 = vmatpush.bf16.msra.mxu3 %v7317_v56  ;;  %v7321_v56 = vld [vmem:[%s13284_s8 + $0xd8] sm:$0xff] }
0x13fe   :  { %v5589_v22 = vmul.f32 %v12589_v45, %v5572_v44 }
0x1400   :  { %v12648_v53 = vadd.f32 %v12596_v10, %v5589_v22  ;;  %6036 = vmatpush.bf16.msra.mxu0 %v7321_v56 }
0x1401   :  { %5984 = vmatpush.bf16.msra.mxu3 %v7316_v38 }
0x1402   :  { %v5629_v23 = vpack.c.bf16 %v12648_v53, %v12645_v3 }
0x1404   :  { %7098 = vmatmul.msk.bf16.gmra.mxu1 %vm115_vm0, %v5629_v23  ;;  %7106 = vmatmul.msk.bf16.gmra.mxu2 %vm115_vm0, %v5629_v23 }
0x1405   :  { %5985 = vmatpush.bf16.msra.mxu3 %v7315_v21 }
0x1409   :  { %5986 = vmatpush.bf16.msra.mxu3 %v7314_v19 }
0x1439   :  { %v5343_v54 = vpop.xlane.xlu2 %5342 }
0x143a   :  { %v5381_v18 = vmul.f32 %v5343_v54, %v13667_v27 }
0x143c   :  { %v5397_v20 = vadd.f32 1e-05, %v5381_v18 }
0x143e   :  { %7940 = vrsqrt.f32 %v5397_v20  ;;  %vm5455_vm6 = vweird.f32 %v5397_v20 }
0x1441   :  { %v5268_v63 = vpop.xlane.xlu2 %5267  ;;  %v5346_v5 = vpop.xlane.xlu1 %5345 }
0x1442   :  { %v5292_v11 = vmul.f32 %v5268_v63, %v13667_v27  ;;  %v5382_v61 = vmul.f32 %v5346_v5, %v13667_v27 }
0x1444   :  { %v7941_v40 = vpop.eup %7940  ;;  %v12661_v14 = vsub.f32 %v12518_v51, %v5292_v11  ;;  %v5398_v9 = vadd.f32 1e-05, %v5382_v61  ;;  %v7311_v11 = vld [vmem:[%s13284_s8 + $0x88] sm:$0xff] }
0x1445   :  { %v5450_v41 = vmul.f32 %v7941_v40, %v5397_v20  ;;  %vm5456_vm5 = vweird.f32 %v7941_v40 }
0x1446   :  { %7942 = vrsqrt.f32 %v5398_v9  ;;  %v5324_v58 = vmul.f32 %v12661_v14, %v12661_v14  ;;  %vm5457_vm7 = vmor %vm5455_vm6, %vm5456_vm5  ;;  %vm5465_vm9 = vweird.f32 %v5398_v9 }
0x1447   :  { %v5451_v39 = vmul.f32 %v7941_v40, %v5450_v41 }
0x1448   :  { %v5362_v51 = vsel %vm115_vm0, %v5324_v58, 0.0  ;;  %v7310_v58 = vld [vmem:[%s13284_s8 + $0x80] sm:$0xff] }
0x1449   :  { %v5452_v55 = vmul.f32 0.5, %v5451_v39  ;;  %5363 = vadd.xlane.f32.xlu1 %v5362_v51 }
0x144a   :  { %v5271_v57 = vpop.xlane.xlu2 %5270 }
0x144b   :  { %v5453_v29 = vsub.f32 1.5, %v5452_v55  ;;  %v5293_v28 = vmul.f32 %v5271_v57, %v13667_v27  ;;  %v7319_v55 = vld [vmem:[%s13284_s8 + $0xc8] sm:$0xff] }
0x144c   :  { %v7943_v42 = vpop.eup %7942 }
0x144d   :  { %v5454_v36 = vmul.f32 %v7941_v40, %v5453_v29  ;;  %v5460_v16 = vmul.f32 %v7943_v42, %v5398_v9  ;;  %v12683_v34 = vsub.f32 %v12556_v59, %v5293_v28  ;;  %v5349_v25 = vpop.xlane.xlu1 %5348  ;;  %v7313_v59 = vld [vmem:[%s13284_s8 + $0x98] sm:$0xff]  ;;  %vm5466_vm8 = vweird.f32 %v7943_v42 }
0x144e   :  { %v5383_v15 = vmul.f32 %v5349_v25, %v13667_v27  ;;  %5987 = vmatpush.bf16.msra.mxu3 %v7313_v59  ;;  %vm5467_vm10 = vmor %vm5465_vm9, %vm5466_vm8  ;;  %v7318_v25 = vld [vmem:[%s13284_s8 + $0xc0] sm:$0xff] }
0x144f   :  { %v5461_v49 = vmul.f32 %v7943_v42, %v5460_v16  ;;  %v5325_v43 = vmul.f32 %v12683_v34, %v12683_v34  ;;  %v5458_v37 = vsel %vm5457_vm7, %v7941_v40, %v5454_v36 }
0x1450   :  { %v12691_v6 = vadd.f32 1e-05, %v5383_v15  ;;  %v5573_v33 = vmul.f32 %v5458_v37, %v12498_v60 }
0x1451   :  { %v5462_v48 = vmul.f32 0.5, %v5461_v49  ;;  %v5365_v4 = vsel %vm115_vm0, %v5325_v43, 0.0 }
0x1452   :  { %7944 = vrsqrt.f32 %v12691_v6  ;;  %5366 = vadd.xlane.f32.xlu0 %v5365_v4  ;;  %5988 = vmatpush.bf16.msra.mxu3 %v7312_v46  ;;  %v5590_v5 = vmul.f32 %v12589_v45, %v5573_v33  ;;  %vm5475_vm12 = vweird.f32 %v12691_v6 }
0x1453   :  { %v5463_v62 = vsub.f32 1.5, %v5462_v48 }
0x1454   :  { %v12727_v38 = vadd.f32 %v12596_v10, %v5590_v5 }
0x1455   :  { %v5464_v24 = vmul.f32 %v7943_v42, %v5463_v62  ;;  %v5352_v44 = vpop.xlane.xlu0 %5351  ;;  %v5274_v26 = vpop.xlane.xlu1 %5273 }
0x1456   :  { %v5384_v22 = vmul.f32 %v5352_v44, %v13667_v27  ;;  %v5294_v23 = vmul.f32 %v5274_v26, %v13667_v27  ;;  %5989 = vmatpush.bf16.msra.mxu3 %v7311_v11 }
0x1457   :  { %v5468_v60 = vsel %vm5467_vm10, %v7943_v42, %v5464_v24 }
0x1458   :  { %v7945_v54 = vpop.eup %7944  ;;  %v5574_v18 = vmul.f32 %v5468_v60, %v12521_v13  ;;  %v5400_v20 = vadd.f32 1e-05, %v5384_v22  ;;  %v12712_v63 = vsub.f32 %v12570_v50, %v5294_v23  ;;  %v7320_v13 = vld [vmem:[%s13284_s8 + $0xd0] sm:$0xff] }
0x1459   :  { %v5470_v61 = vmul.f32 %v7945_v54, %v12691_v6  ;;  %6037 = vmatpush.bf16.msra.mxu0 %v7320_v13  ;;  %vm5476_vm11 = vweird.f32 %v7945_v54 }
0x145a   :  { %7946 = vrsqrt.f32 %v5400_v20  ;;  %v5326_v40 = vmul.f32 %v12712_v63, %v12712_v63  ;;  %v5591_v9 = vmul.f32 %v12589_v45, %v5574_v18  ;;  %5990 = vmatpush.bf16.msra.mxu3 %v7310_v58  ;;  %vm5477_vm13 = vmor %vm5475_vm12, %vm5476_vm11  ;;  %vm5485_vm15 = vweird.f32 %v5400_v20 }
0x145b   :  { %v5471_v50 = vmul.f32 %v7945_v54, %v5470_v61 }
0x145c   :  { %v5368_v8 = vsel %vm115_vm0, %v5326_v40, 0.0  ;;  %v12730_v41 = vadd.f32 %v12596_v10, %v5591_v9 }
0x145d   :  { %v5472_v39 = vmul.f32 0.5, %v5471_v50  ;;  %5369 = vadd.xlane.f32.xlu2 %v5368_v8  ;;  %v5355_v51 = vpop.xlane.xlu0 %5354  ;;  %6038 = vmatpush.bf16.msra.mxu0 %v7319_v55 }
0x145e   :  { %v5630_v21 = vpack.c.bf16 %v12730_v41, %v12727_v38  ;;  %v5385_v7 = vmul.f32 %v5355_v51, %v13667_v27 }
0x145f   :  { %v5473_v57 = vsub.f32 1.5, %v5472_v39 }
0x1460   :  { %v7947_v29 = vpop.eup %7946  ;;  %7099 = vmatmul.msk.bf16.gmra.mxu1 %vm115_vm0, %v5630_v21  ;;  %7107 = vmatmul.msk.bf16.gmra.mxu2 %vm115_vm0, %v5630_v21  ;;  %v5401_v42 = vadd.f32 1e-05, %v5385_v7 }
0x1461   :  { %v5480_v28 = vmul.f32 %v7947_v29, %v5400_v20  ;;  %v5277_v19 = vpop.xlane.xlu1 %5276  ;;  %v5474_v36 = vmul.f32 %v7945_v54, %v5473_v57  ;;  %6039 = vmatpush.bf16.msra.mxu0 %v7318_v25  ;;  %vm5486_vm14 = vweird.f32 %v7947_v29  ;;  %v7064_v20 = vld [vmem:[%s13285_s9 + $0x2] sm:$0x3] }
0x1462   :  { %v5295_v16 = vmul.f32 %v5277_v19, %v13667_v27  ;;  %7948 = vrsqrt.f32 %v5401_v42  ;;  %vm5487_vm1 = vmor %vm5485_vm15, %vm5486_vm14  ;;  %v12775_v50 = vperm.slane %v7064_v20, 0  ;;  %vm5495_vm3 = vweird.f32 %v5401_v42 }
0x1463   :  { %v5481_v15 = vmul.f32 %v7947_v29, %v5480_v28  ;;  %v5478_v43 = vsel %vm5477_vm13, %v7945_v54, %v5474_v36 }
0x1464   :  { %v12749_v0 = vsub.f32 %v12604_v2, %v5295_v16  ;;  %v5575_v6 = vmul.f32 %v5478_v43, %v12560_v32 }
0x1465   :  { %v5482_v49 = vmul.f32 0.5, %v5481_v15 }
0x1466   :  { %v5358_v59 = vpop.xlane.xlu2 %5357  ;;  %v5327_v37 = vmul.f32 %v12749_v0, %v12749_v0  ;;  %v5592_v60 = vmul.f32 %v12589_v45, %v5575_v6 }
0x1467   :  { %v5483_v48 = vsub.f32 1.5, %v5482_v49  ;;  %v5386_v4 = vmul.f32 %v5358_v59, %v13667_v27 }
0x1468   :  { %v5371_v35 = vsel %vm115_vm0, %v5327_v37, 0.0  ;;  %v7949_v62 = vpop.eup %7948  ;;  %v12773_v40 = vadd.f32 %v12596_v10, %v5592_v60 }
0x1469   :  { %v5484_v33 = vmul.f32 %v7947_v29, %v5483_v48  ;;  %v5402_v2 = vadd.f32 1e-05, %v5386_v4  ;;  %v5280_v46 = vpop.xlane.xlu0 %5279  ;;  %5372 = vadd.xlane.f32.xlu1 %v5371_v35  ;;  %v5490_v24 = vmul.f32 %v7949_v62, %v5401_v42  ;;  %vm5496_vm2 = vweird.f32 %v7949_v62 }
0x146a   :  { %v5296_v44 = vmul.f32 %v5280_v46, %v13667_v27  ;;  %vm5497_vm4 = vmor %vm5495_vm3, %vm5496_vm2 }
0x146b   :  { %v5488_v26 = vsel %vm5487_vm1, %v7947_v29, %v5484_v33  ;;  %7950 = vrsqrt.f32 %v5402_v2  ;;  %v5491_v23 = vmul.f32 %v7949_v62, %v5490_v24  ;;  %v12782_v29 = vperm.slane %v7064_v20, 1 }
0x146c   :  { %v5576_v22 = vmul.f32 %v5488_v26, %v12573_v47  ;;  %v12759_v56 = vsub.f32 %v12629_v31, %v5296_v44  ;;  %vm5505_vm6 = vweird.f32 %v5402_v2 }
0x146d   :  { %v5492_v32 = vmul.f32 0.5, %v5491_v23 }
0x146e   :  { %v5328_v54 = vmul.f32 %v12759_v56, %v12759_v56  ;;  %v5593_v18 = vmul.f32 %v12589_v45, %v5576_v22 }
0x146f   :  { %v5716_v5 = vpop.f32.mrf.mxu1  ;;  %v5493_v11 = vsub.f32 1.5, %v5492_v32 }
0x1470   :  { %v5374_v47 = vsel %vm115_vm0, %v5328_v54, 0.0  ;;  %v12770_v61 = vadd.f32 %v12596_v10, %v5593_v18  ;;  %v5717_v55 = vadd.f32 %v5716_v5, %v12775_v50 }
0x1471   :  { %v7951_v31 = vpop.eup %7950  ;;  %5375 = vadd.xlane.f32.xlu0 %v5374_v47  ;;  %v5494_v9 = vmul.f32 %v7949_v62, %v5493_v11  ;;  %v5361_v47 = vpop.xlane.xlu2 %5360 }
0x1472   :  { %v5500_v13 = vmul.f32 %v7951_v31, %v5402_v2  ;;  %v5631_v8 = vpack.c.bf16 %v12770_v61, %v12773_v40  ;;  %vm5506_vm5 = vweird.f32 %v7951_v31  ;;  %v5805_v36 = vmax.f32 %v5717_v55, 0.0 }
0x1473   :  { %v5498_v51 = vsel %vm5497_vm4, %v7949_v62, %v5494_v9  ;;  %vm5507_vm7 = vmor %vm5505_vm6, %vm5506_vm5 }
0x1474   :  { %v5501_v58 = vmul.f32 %v7951_v31, %v5500_v13  ;;  %7100 = vmatmul.msk.bf16.gmra.mxu1 %vm115_vm0, %v5631_v8  ;;  %7108 = vmatmul.msk.bf16.gmra.mxu2 %vm115_vm0, %v5631_v8  ;;  %v5577_v42 = vmul.f32 %v5498_v51, %v12586_v52 }
0x1475   :  { %v5765_v39 = vpop.f32.mrf.mxu2 }
0x1476   :  { %v5502_v21 = vmul.f32 0.5, %v5501_v58  ;;  %v5766_v15 = vadd.f32 %v5765_v39, %v12782_v29  ;;  %v5594_v37 = vmul.f32 %v12589_v45, %v5577_v42 }
0x1477   :  { %v5718_v57 = vpop.f32.mrf.mxu1 }
0x1478   :  { %v5503_v7 = vsub.f32 1.5, %v5502_v21  ;;  %v5719_v28 = vadd.f32 %v5718_v57, %v12775_v50  ;;  %v5806_v52 = vmax.f32 %v5766_v15, 0.0  ;;  %v12792_v6 = vadd.f32 %v12596_v10, %v5594_v37 }
0x147a   :  { %v5504_v19 = vmul.f32 %v7951_v31, %v5503_v7  ;;  %v5807_v16 = vmax.f32 %v5719_v28, 0.0 }
0x147c   :  { %v5508_v25 = vsel %vm5507_vm7, %v7951_v31, %v5504_v19  ;;  %v5870_v49 = vpack.c.bf16 %v5807_v16, %v5805_v36  ;;  %v5387_v31 = vmul.f32 %v5361_v47, %v13667_v27 }
0x147d   :  { %v5578_v43 = vmul.f32 %v5508_v25, %v12609_v17  ;;  %v5767_v59 = vpop.f32.mrf.mxu2 }
0x147e   :  { %v5768_v48 = vadd.f32 %v5767_v59, %v12782_v29  ;;  %5991 = vmatmul.bf16.vlgmr.msra.gmra.mxu3 %v5870_v49  ;;  %v5403_v9 = vadd.f32 1e-05, %v5387_v31 }
0x147f   :  { %v5595_v4 = vmul.f32 %v12589_v45, %v5578_v43 }
0x1480   :  { %v5808_v35 = vmax.f32 %v5768_v48, 0.0  ;;  %7952 = vrsqrt.f32 %v5403_v9  ;;  %vm5515_vm9 = vweird.f32 %v5403_v9 }
0x1481   :  { %v5721_v62 = vpop.f32.mrf.mxu1  ;;  %v12795_v33 = vadd.f32 %v12596_v10, %v5595_v4 }
0x1482   :  { %v5871_v2 = vpack.c.bf16 %v5808_v35, %v5806_v52  ;;  %v5722_v24 = vadd.f32 %v5721_v62, %v12775_v50 }
0x1483   :  { %v5632_v17 = vpack.c.bf16 %v12795_v33, %v12792_v6 }
0x1484   :  { %6040 = vmatmul.bf16.vlgmr.msra.gmra.mxu0 %v5871_v2  ;;  %v5809_v22 = vmax.f32 %v5722_v24, 0.0 }
0x1485   :  { %7101 = vmatmul.msk.bf16.gmra.mxu1 %vm115_vm0, %v5632_v17  ;;  %7109 = vmatmul.msk.bf16.gmra.mxu2 %vm115_vm0, %v5632_v17 }
0x1486   :  { %v7953_v13 = vpop.eup %7952 }
0x1487   :  { %v5770_v46 = vpop.f32.mrf.mxu2  ;;  %v5510_v8 = vmul.f32 %v7953_v13, %v5403_v9  ;;  %vm5516_vm8 = vweird.f32 %v7953_v13 }
0x1488   :  { %v5771_v60 = vadd.f32 %v5770_v46, %v12782_v29  ;;  %vm5517_vm10 = vmor %vm5515_vm9, %vm5516_vm8 }
0x1489   :  { %v5723_v44 = vpop.f32.mrf.mxu1  ;;  %v5511_v58 = vmul.f32 %v7953_v13, %v5510_v8 }
0x148a   :  { %v5724_v26 = vadd.f32 %v5723_v44, %v12775_v50  ;;  %v5810_v20 = vmax.f32 %v5771_v60, 0.0 }
0x148b   :  { %v5512_v55 = vmul.f32 0.5, %v5511_v58 }
0x148c   :  { %v5811_v23 = vmax.f32 %v5724_v26, 0.0 }
0x148d   :  { %v5513_v57 = vsub.f32 1.5, %v5512_v55 }
0x148e   :  { %v5872_v32 = vpack.c.bf16 %v5811_v23, %v5809_v22 }
0x148f   :  { %v5772_v54 = vpop.f32.mrf.mxu2  ;;  %v5514_v19 = vmul.f32 %v7953_v13, %v5513_v57 }
0x1490   :  { %v5773_v18 = vadd.f32 %v5772_v54, %v12782_v29  ;;  %5996 = vmatmul.bf16.gmra.mxu3 %v5872_v32 }
0x1491   :  { %v5518_v15 = vsel %vm5517_vm10, %v7953_v13, %v5514_v19 }
0x1492   :  { %v5812_v5 = vmax.f32 %v5773_v18, 0.0  ;;  %v5579_v59 = vmul.f32 %v5518_v15, %v12633_v30 }
0x1494   :  { %v5873_v11 = vpack.c.bf16 %v5812_v5, %v5810_v20  ;;  %v5596_v24 = vmul.f32 %v12589_v45, %v5579_v59 }
0x1496   :  { %6045 = vmatmul.bf16.gmra.mxu0 %v5873_v11  ;;  %v12814_v30 = vadd.f32 %v12596_v10, %v5596_v24 }
0x14bc   :  { %v5364_v39 = vpop.xlane.xlu1 %5363 }
0x14bd   :  { %v5388_v51 = vmul.f32 %v5364_v39, %v13667_v27 }
0x14bf   :  { %v5404_v21 = vadd.f32 1e-05, %v5388_v51 }
0x14c1   :  { %7954 = vrsqrt.f32 %v5404_v21  ;;  %vm5525_vm12 = vweird.f32 %v5404_v21 }
0x14c5   :  { %v5367_v7 = vpop.xlane.xlu0 %5366 }
0x14c6   :  { %v5389_v28 = vmul.f32 %v5367_v7, %v13667_v27 }
0x14c7   :  { %v7955_v42 = vpop.eup %7954 }
0x14c8   :  { %v5520_v36 = vmul.f32 %v7955_v42, %v5404_v21  ;;  %v5405_v16 = vadd.f32 1e-05, %v5389_v28  ;;  %vm5526_vm11 = vweird.f32 %v7955_v42 }
0x14c9   :  { %vm5527_vm13 = vmor %vm5525_vm12, %vm5526_vm11 }
0x14ca   :  { %v5521_v25 = vmul.f32 %v7955_v42, %v5520_v36  ;;  %7956 = vrsqrt.f32 %v5405_v16  ;;  %vm5535_vm15 = vweird.f32 %v5405_v16 }
0x14cc   :  { %v5522_v49 = vmul.f32 0.5, %v5521_v25 }
0x14ce   :  { %v5523_v43 = vsub.f32 1.5, %v5522_v49 }
0x14d0   :  { %v7957_v37 = vpop.eup %7956  ;;  %v5524_v48 = vmul.f32 %v7955_v42, %v5523_v43  ;;  %v5370_v4 = vpop.xlane.xlu2 %5369 }
0x14d1   :  { %v5530_v52 = vmul.f32 %v7957_v37, %v5405_v16  ;;  %v5390_v35 = vmul.f32 %v5370_v4, %v13667_v27  ;;  %vm5536_vm14 = vweird.f32 %v7957_v37 }
0x14d2   :  { %v5528_v62 = vsel %vm5527_vm13, %v7955_v42, %v5524_v48  ;;  %vm5537_vm1 = vmor %vm5535_vm15, %vm5536_vm14 }
0x14d3   :  { %v5580_v2 = vmul.f32 %v5528_v62, %v12661_v14  ;;  %v5531_v17 = vmul.f32 %v7957_v37, %v5530_v52  ;;  %v5406_v46 = vadd.f32 1e-05, %v5390_v35 }
0x14d5   :  { %v5532_v44 = vmul.f32 0.5, %v5531_v17  ;;  %7958 = vrsqrt.f32 %v5406_v46  ;;  %v5597_v26 = vmul.f32 %v12589_v45, %v5580_v2  ;;  %vm5545_vm3 = vweird.f32 %v5406_v46 }
0x14d7   :  { %v12817_v22 = vadd.f32 %v12596_v10, %v5597_v26  ;;  %v5533_v23 = vsub.f32 1.5, %v5532_v44 }
0x14d9   :  { %v5633_v60 = vpack.c.bf16 %v12817_v22, %v12814_v30  ;;  %v5534_v14 = vmul.f32 %v7957_v37, %v5533_v23 }
0x14db   :  { %v7959_v32 = vpop.eup %7958  ;;  %7102 = vmatmul.msk.bf16.gmra.mxu1 %vm115_vm0, %v5633_v60  ;;  %7110 = vmatmul.msk.bf16.gmra.mxu2 %vm115_vm0, %v5633_v60  ;;  %v5538_v31 = vsel %vm5537_vm1, %v7957_v37, %v5534_v14 }
0x14dc   :  { %v5540_v54 = vmul.f32 %v7959_v32, %v5406_v46  ;;  %v5373_v18 = vpop.xlane.xlu1 %5372  ;;  %vm5546_vm2 = vweird.f32 %v7959_v32  ;;  %v5581_v8 = vmul.f32 %v5538_v31, %v12683_v34 }
0x14dd   :  { %v5391_v20 = vmul.f32 %v5373_v18, %v13667_v27  ;;  %v5726_v5 = vpop.f32.mrf.mxu1  ;;  %vm5547_vm4 = vmor %vm5545_vm3, %vm5546_vm2 }
0x14de   :  { %v5541_v11 = vmul.f32 %v7959_v32, %v5540_v54  ;;  %v5727_v51 = vadd.f32 %v5726_v5, %v12775_v50  ;;  %v5598_v16 = vmul.f32 %v12589_v45, %v5581_v8 }
0x14df   :  { %v5407_v47 = vadd.f32 1e-05, %v5391_v20 }
0x14e0   :  { %v5542_v9 = vmul.f32 0.5, %v5541_v11  ;;  %v5813_v25 = vmax.f32 %v5727_v51, 0.0  ;;  %v12833_v4 = vadd.f32 %v12596_v10, %v5598_v16 }
0x14e1   :  { %7960 = vrsqrt.f32 %v5407_v47  ;;  %vm5555_vm6 = vweird.f32 %v5407_v47 }
0x14e2   :  { %v5543_v13 = vsub.f32 1.5, %v5542_v9 }
0x14e3   :  { %v5775_v58 = vpop.f32.mrf.mxu2 }
0x14e4   :  { %v5544_v39 = vmul.f32 %v7959_v32, %v5543_v13  ;;  %v5376_v21 = vpop.xlane.xlu0 %5375  ;;  %v5776_v59 = vadd.f32 %v5775_v58, %v12782_v29 }
0x14e5   :  { %v5392_v55 = vmul.f32 %v5376_v21, %v13667_v27  ;;  %v5728_v57 = vpop.f32.mrf.mxu1 }
0x14e6   :  { %v5548_v7 = vsel %vm5547_vm4, %v7959_v32, %v5544_v39  ;;  %v5729_v28 = vadd.f32 %v5728_v57, %v12775_v50  ;;  %v5814_v17 = vmax.f32 %v5776_v59, 0.0 }
0x14e7   :  { %v7961_v42 = vpop.eup %7960  ;;  %v5582_v19 = vmul.f32 %v5548_v7, %v12712_v63  ;;  %v5408_v36 = vadd.f32 1e-05, %v5392_v55 }
0x14e8   :  { %v5550_v34 = vmul.f32 %v7961_v42, %v5407_v47  ;;  %v5815_v15 = vmax.f32 %v5729_v28, 0.0  ;;  %vm5556_vm5 = vweird.f32 %v7961_v42 }
0x14e9   :  { %7962 = vrsqrt.f32 %v5408_v36  ;;  %v5599_v49 = vmul.f32 %v12589_v45, %v5582_v19  ;;  %vm5557_vm7 = vmor %vm5555_vm6, %vm5556_vm5  ;;  %vm5565_vm9 = vweird.f32 %v5408_v36 }
0x14ea   :  { %v5551_v43 = vmul.f32 %v7961_v42, %v5550_v34  ;;  %v5874_v37 = vpack.c.bf16 %v5815_v15, %v5813_v25 }
0x14eb   :  { %v5777_v48 = vpop.f32.mrf.mxu2  ;;  %v12836_v52 = vadd.f32 %v12596_v10, %v5599_v49 }
0x14ec   :  { %v5552_v63 = vmul.f32 0.5, %v5551_v43  ;;  %v5778_v35 = vadd.f32 %v5777_v48, %v12782_v29  ;;  %6001 = vmatmul.bf16.gmra.mxu3 %v5874_v37 }
0x14ed   :  { %v5634_v62 = vpack.c.bf16 %v12836_v52, %v12833_v4 }
0x14ee   :  { %v5553_v2 = vsub.f32 1.5, %v5552_v63  ;;  %v5816_v46 = vmax.f32 %v5778_v35, 0.0 }
0x14ef   :  { %v7963_v24 = vpop.eup %7962  ;;  %7103 = vmatmul.msk.bf16.gmra.mxu1 %vm115_vm0, %v5634_v62  ;;  %7111 = vmatmul.msk.bf16.gmra.mxu2 %vm115_vm0, %v5634_v62 }
0x14f0   :  { %v5554_v44 = vmul.f32 %v7961_v42, %v5553_v2  ;;  %v5560_v26 = vmul.f32 %v7963_v24, %v5408_v36  ;;  %v5875_v23 = vpack.c.bf16 %v5816_v46, %v5814_v17  ;;  %vm5566_vm8 = vweird.f32 %v7963_v24 }
0x14f1   :  { %v5731_v32 = vpop.f32.mrf.mxu1  ;;  %vm5567_vm10 = vmor %vm5565_vm9, %vm5566_vm8 }
0x14f2   :  { %v5561_v60 = vmul.f32 %v7963_v24, %v5560_v26  ;;  %6050 = vmatmul.bf16.gmra.mxu0 %v5875_v23  ;;  %v5558_v14 = vsel %vm5557_vm7, %v7961_v42, %v5554_v44  ;;  %v5732_v31 = vadd.f32 %v5731_v32, %v12775_v50 }
0x14f3   :  { %v5583_v20 = vmul.f32 %v5558_v14, %v12749_v0  ;;  %v12852_v0 = vld [vmem:[%s13278_s10 + $0x10] sm:$0xff] }
0x14f4   :  { %v5562_v54 = vmul.f32 0.5, %v5561_v60  ;;  %v5817_v39 = vmax.f32 %v5732_v31, 0.0  ;;  %v12855_v55 = vperm.slane %v12852_v0, 4 }
0x14f5   :  { %v5600_v58 = vmul.f32 %v12589_v45, %v5583_v20 }
0x14f6   :  { %v5563_v18 = vsub.f32 1.5, %v5562_v54 }
0x14f7   :  { %v5780_v11 = vpop.f32.mrf.mxu2 }
0x14f8   :  { %v5564_v5 = vmul.f32 %v7963_v24, %v5563_v18  ;;  %v5781_v57 = vadd.f32 %v5780_v11, %v12782_v29 }
0x14f9   :  { %v5733_v13 = vpop.f32.mrf.mxu1 }
0x14fa   :  { %v5568_v9 = vsel %vm5567_vm10, %v7963_v24, %v5564_v5  ;;  %v5734_v8 = vadd.f32 %v5733_v13, %v12775_v50  ;;  %v5818_v15 = vmax.f32 %v5781_v57, 0.0 }
0x14fb   :  { %v5584_v47 = vmul.f32 %v5568_v9, %v12759_v56  ;;  %v12859_v56 = vadd.f32 %v12596_v10, %v5600_v58 }
0x14fc   :  { %v5819_v51 = vmax.f32 %v5734_v8, 0.0 }
0x14fd   :  { %v5601_v21 = vmul.f32 %v12589_v45, %v5584_v47 }
0x14fe   :  { %v5876_v7 = vpack.c.bf16 %v5819_v51, %v5817_v39 }
0x14ff   :  { %v12862_v28 = vadd.f32 %v12596_v10, %v5601_v21  ;;  %v5782_v42 = vpop.f32.mrf.mxu2 }
0x1500   :  { %v5783_v45 = vadd.f32 %v5782_v42, %v12782_v29  ;;  %6006 = vmatmul.bf16.gmra.mxu3 %v5876_v7 }
0x1501   :  { %v5992_v19 = vpop.f32.mrf.mxu3  ;;  %v6041_v36 = vpop.f32.mrf.mxu0  ;;  %v5635_v16 = vpack.c.bf16 %v12862_v28, %v12859_v56 }
0x1502   :  { %v5993_v34 = vadd.f32 %v5992_v19, %v12855_v55  ;;  %v5736_v25 = vpop.f32.mrf.mxu1  ;;  %v5820_v49 = vmax.f32 %v5783_v45, 0.0 }
0x1503   :  { %7104 = vmatmul.msk.bf16.gmra.mxu1 %vm115_vm0, %v5635_v16  ;;  %7112 = vmatmul.msk.bf16.gmra.mxu2 %vm115_vm0, %v5635_v16  ;;  %v5737_v63 = vadd.f32 %v5736_v25, %v12775_v50 }
0x1504   :  { %v6042_v10 = vadd.f32 %v6041_v36, %v5993_v34  ;;  %v5877_v43 = vpack.c.bf16 %v5820_v49, %v5818_v15 }
0x1505   :  { %v5821_v44 = vmax.f32 %v5737_v63, 0.0 }
0x1506   :  { %v12871_v59 = vadd.f32 %v6042_v10, %v12614_v1  ;;  %6055 = vmatmul.bf16.gmra.mxu0 %v5877_v43 }
0x1508   :  { %v5785_v37 = vpop.f32.mrf.mxu2  ;;  %v6097_v48 = vsel %vm115_vm0, %v12871_v59, 0.0 }
0x1509   :  { %v5994_v35 = vpop.f32.mrf.mxu3  ;;  %v6043_v62 = vpop.f32.mrf.mxu0  ;;  %6098 = vadd.xlane.f32.xlu2 %v6097_v48  ;;  %v5786_v23 = vadd.f32 %v5785_v37, %v12782_v29 }
0x150a   :  { %v5995_v2 = vadd.f32 %v5994_v35, %v12855_v55  ;;  %v5738_v17 = vpop.f32.mrf.mxu1 }
0x150b   :  { %v5739_v46 = vadd.f32 %v5738_v17, %v12775_v50  ;;  %v5822_v18 = vmax.f32 %v5786_v23, 0.0 }
0x150c   :  { %v6044_v24 = vadd.f32 %v6043_v62, %v5995_v2 }
0x150d   :  { %v5823_v26 = vmax.f32 %v5739_v46, 0.0 }
0x150e   :  { %v12879_v1 = vadd.f32 %v6044_v24, %v12617_v12 }
0x150f   :  { %v5878_v60 = vpack.c.bf16 %v5823_v26, %v5821_v44 }
0x1510   :  { %v5787_v32 = vpop.f32.mrf.mxu2  ;;  %v6100_v14 = vsel %vm115_vm0, %v12879_v1, 0.0 }
0x1511   :  { %v5788_v54 = vadd.f32 %v5787_v32, %v12782_v29  ;;  %6011 = vmatmul.bf16.gmra.mxu3 %v5878_v60  ;;  %6101 = vadd.xlane.f32.xlu1 %v6100_v14 }
0x1513   :  { %v5824_v20 = vmax.f32 %v5788_v54, 0.0  ;;  %v5997_v5 = vpop.f32.mrf.mxu3  ;;  %v6046_v11 = vpop.f32.mrf.mxu0 }
0x1514   :  { %v5998_v31 = vadd.f32 %v5997_v5, %v12855_v55 }
0x1515   :  { %v5879_v9 = vpack.c.bf16 %v5824_v20, %v5822_v18 }
0x1516   :  { %v6047_v12 = vadd.f32 %v6046_v11, %v5998_v31 }
0x1517   :  { %6060 = vmatmul.bf16.gmra.mxu0 %v5879_v9 }
0x1518   :  { %v12887_v13 = vadd.f32 %v6047_v12, %v12645_v3 }
0x151a   :  { %v6103_v47 = vsel %vm115_vm0, %v12887_v13, 0.0 }
0x151b   :  { %v5999_v8 = vpop.f32.mrf.mxu3  ;;  %6104 = vadd.xlane.f32.xlu0 %v6103_v47  ;;  %v6048_v39 = vpop.f32.mrf.mxu0 }
0x151c   :  { %v6000_v58 = vadd.f32 %v5999_v8, %v12855_v55 }
0x151e   :  { %v6049_v51 = vadd.f32 %v6048_v39, %v6000_v58 }
0x1520   :  { %v12893_v21 = vadd.f32 %v6049_v51, %v12648_v53 }
0x1522   :  { %v6106_v57 = vsel %vm115_vm0, %v12893_v21, 0.0 }
0x1523   :  { %6107 = vadd.xlane.f32.xlu2 %v6106_v57 }
0x1558   :  { %v5741_v7 = vpop.f32.mrf.mxu1 }
0x1559   :  { %v5742_v3 = vadd.f32 %v5741_v7, %v12775_v50 }
0x155b   :  { %v5825_v36 = vmax.f32 %v5742_v3, 0.0 }
0x155e   :  { %v5790_v42 = vpop.f32.mrf.mxu2 }
0x155f   :  { %v5791_v34 = vadd.f32 %v5790_v42, %v12782_v29 }
0x1560   :  { %v5743_v45 = vpop.f32.mrf.mxu1 }
0x1561   :  { %v5744_v19 = vadd.f32 %v5743_v45, %v12775_v50  ;;  %v5826_v49 = vmax.f32 %v5791_v34, 0.0 }
0x1563   :  { %v5827_v16 = vmax.f32 %v5744_v19, 0.0 }
0x1565   :  { %v5880_v25 = vpack.c.bf16 %v5827_v16, %v5825_v36 }
0x1566   :  { %v5792_v15 = vpop.f32.mrf.mxu2 }
0x1567   :  { %v5793_v53 = vadd.f32 %v5792_v15, %v12782_v29  ;;  %6016 = vmatmul.bf16.gmra.mxu3 %v5880_v25 }
0x1569   :  { %v5828_v10 = vmax.f32 %v5793_v53, 0.0 }
0x156b   :  { %v5881_v43 = vpack.c.bf16 %v5828_v10, %v5826_v49 }
0x156c   :  { %v5746_v37 = vpop.f32.mrf.mxu1 }
0x156d   :  { %6065 = vmatmul.bf16.gmra.mxu0 %v5881_v43  ;;  %v5747_v17 = vadd.f32 %v5746_v37, %v12775_v50 }
0x156f   :  { %v6002_v48 = vpop.f32.mrf.mxu3  ;;  %v6051_v63 = vpop.f32.mrf.mxu0  ;;  %v5829_v23 = vmax.f32 %v5747_v17, 0.0 }
0x1570   :  { %v6003_v35 = vadd.f32 %v6002_v48, %v12855_v55 }
0x1572   :  { %v6052_v62 = vadd.f32 %v6051_v63, %v6003_v35  ;;  %v5795_v2 = vpop.f32.mrf.mxu2 }
0x1573   :  { %v5796_v54 = vadd.f32 %v5795_v2, %v12782_v29 }
0x1574   :  { %v12904_v46 = vadd.f32 %v6052_v62, %v12727_v38  ;;  %v5748_v24 = vpop.f32.mrf.mxu1 }
0x1575   :  { %v5749_v44 = vadd.f32 %v5748_v24, %v12775_v50  ;;  %v5830_v12 = vmax.f32 %v5796_v54, 0.0 }
0x1576   :  { %v6109_v26 = vsel %vm115_vm0, %v12904_v46, 0.0 }
0x1577   :  { %v5831_v60 = vmax.f32 %v5749_v44, 0.0  ;;  %v6004_v32 = vpop.f32.mrf.mxu3  ;;  %6110 = vadd.xlane.f32.xlu1 %v6109_v26  ;;  %v6053_v20 = vpop.f32.mrf.mxu0 }
0x1578   :  { %v6005_v14 = vadd.f32 %v6004_v32, %v12855_v55 }
0x1579   :  { %v5882_v18 = vpack.c.bf16 %v5831_v60, %v5829_v23 }
0x157a   :  { %v6054_v5 = vadd.f32 %v6053_v20, %v6005_v14  ;;  %v5797_v11 = vpop.f32.mrf.mxu2 }
0x157b   :  { %v5798_v38 = vadd.f32 %v5797_v11, %v12782_v29  ;;  %6021 = vmatmul.bf16.gmra.mxu3 %v5882_v18 }
0x157c   :  { %v12913_v31 = vadd.f32 %v6054_v5, %v12730_v41  ;;  %v6099_v9 = vpop.xlane.xlu2 %6098 }
0x157d   :  { %v5832_v47 = vmax.f32 %v5798_v38, 0.0  ;;  %v6145_v8 = vmul.f32 %v6099_v9, %v13667_v27 }
0x157e   :  { %v6112_v58 = vsel %vm115_vm0, %v12913_v31, 0.0 }
0x157f   :  { %v5883_v39 = vpack.c.bf16 %v5832_v47, %v5830_v12  ;;  %v12919_v51 = vsub.f32 %v12871_v59, %v6145_v8  ;;  %6113 = vadd.xlane.f32.xlu0 %v6112_v58 }
0x1580   :  { %v5751_v57 = vpop.f32.mrf.mxu1 }
0x1581   :  { %6070 = vmatmul.bf16.gmra.mxu0 %v5883_v39  ;;  %v6177_v7 = vmul.f32 %v12919_v51, %v12919_v51  ;;  %v5752_v59 = vadd.f32 %v5751_v57, %v12775_v50 }
0x1583   :  { %v6193_v41 = vsel %vm115_vm0, %v6177_v7, 0.0  ;;  %v6007_v42 = vpop.f32.mrf.mxu3  ;;  %v6056_v3 = vpop.f32.mrf.mxu0  ;;  %v5833_v43 = vmax.f32 %v5752_v59, 0.0 }
0x1584   :  { %6194 = vadd.xlane.f32.xlu2 %v6193_v41  ;;  %v6008_v45 = vadd.f32 %v6007_v42, %v12855_v55  ;;  %v6102_v19 = vpop.xlane.xlu1 %6101 }
0x1585   :  { %v6146_v36 = vmul.f32 %v6102_v19, %v13667_v27 }
0x1586   :  { %v5800_v16 = vpop.f32.mrf.mxu2  ;;  %v6057_v34 = vadd.f32 %v6056_v3, %v6008_v45 }
0x1587   :  { %v12928_v25 = vsub.f32 %v12879_v1, %v6146_v36  ;;  %v5801_v62 = vadd.f32 %v5800_v16, %v12782_v29 }
0x1588   :  { %v5753_v15 = vpop.f32.mrf.mxu1  ;;  %v12931_v53 = vadd.f32 %v6057_v34, %v12773_v40 }
0x1589   :  { %v5754_v49 = vadd.f32 %v5753_v15, %v12775_v50  ;;  %v6178_v10 = vmul.f32 %v12928_v25, %v12928_v25  ;;  %v5834_v23 = vmax.f32 %v5801_v62, 0.0 }
0x158a   :  { %v6115_v48 = vsel %vm115_vm0, %v12931_v53, 0.0 }
0x158b   :  { %v5835_v37 = vmax.f32 %v5754_v49, 0.0  ;;  %v6009_v63 = vpop.f32.mrf.mxu3  ;;  %v6058_v35 = vpop.f32.mrf.mxu0  ;;  %6116 = vadd.xlane.f32.xlu0 %v6115_v48  ;;  %v6196_v1 = vsel %vm115_vm0, %v6178_v10, 0.0  ;;  %v7329_v49 = vld [vmem:[%s13275_s2 + $0x78] sm:$0xff] }
0x158c   :  { %v6010_v40 = vadd.f32 %v6009_v63, %v12855_v55  ;;  %6197 = vadd.xlane.f32.xlu1 %v6196_v1  ;;  %6557 = vmatpush.bf16.msra.mxu1 %v7329_v49 }
0x158d   :  { %v5884_v2 = vpack.c.bf16 %v5835_v37, %v5833_v43 }
0x158e   :  { %v6105_v50 = vpop.xlane.xlu0 %6104  ;;  %v5802_v17 = vpop.f32.mrf.mxu2  ;;  %v6059_v44 = vadd.f32 %v6058_v35, %v6010_v40  ;;  %v7328_v35 = vld [vmem:[%s13275_s2 + $0x70] sm:$0xff] }
0x158f   :  { %v6147_v24 = vmul.f32 %v6105_v50, %v13667_v27  ;;  %v5803_v26 = vadd.f32 %v5802_v17, %v12782_v29  ;;  %6026 = vmatmul.bf16.gmra.mxu3 %v5884_v2 }
0x1590   :  { %v12947_v32 = vadd.f32 %v6059_v44, %v12770_v61  ;;  %6558 = vmatpush.bf16.msra.mxu1 %v7328_v35 }
0x1591   :  { %v12944_v60 = vsub.f32 %v12887_v13, %v6147_v24  ;;  %v5836_v14 = vmax.f32 %v5803_v26, 0.0  ;;  %v7327_v24 = vld [vmem:[%s13275_s2 + $0x68] sm:$0xff] }
0x1592   :  { %v6118_v18 = vsel %vm115_vm0, %v12947_v32, 0.0 }
0x1593   :  { %v5885_v54 = vpack.c.bf16 %v5836_v14, %v5834_v23  ;;  %v6179_v20 = vmul.f32 %v12944_v60, %v12944_v60  ;;  %6119 = vadd.xlane.f32.xlu2 %v6118_v18 }
0x1594   :  { %v6012_v5 = vpop.f32.mrf.mxu3  ;;  %v6061_v11 = vpop.f32.mrf.mxu0  ;;  %6559 = vmatpush.bf16.msra.mxu1 %v7327_v24 }
0x1595   :  { %v6013_v29 = vadd.f32 %v6012_v5, %v12855_v55  ;;  %v6199_v38 = vsel %vm115_vm0, %v6179_v20, 0.0  ;;  %6075 = vmatmul.bf16.gmra.mxu0 %v5885_v54 }
0x1596   :  { %v6108_v13 = vpop.xlane.xlu2 %6107  ;;  %6200 = vadd.xlane.f32.xlu1 %v6199_v38 }
0x1597   :  { %v6062_v61 = vadd.f32 %v6061_v11, %v6013_v29  ;;  %v6148_v9 = vmul.f32 %v6108_v13, %v13667_v27 }
0x1599   :  { %v12957_v12 = vadd.f32 %v6062_v61, %v12792_v6  ;;  %v12960_v47 = vsub.f32 %v12893_v21, %v6148_v9 }
0x159b   :  { %v6121_v8 = vsel %vm115_vm0, %v12957_v12, 0.0  ;;  %v6180_v58 = vmul.f32 %v12960_v47, %v12960_v47 }
0x159c   :  { %v6014_v39 = vpop.f32.mrf.mxu3  ;;  %6122 = vadd.xlane.f32.xlu2 %v6121_v8  ;;  %v6063_v41 = vpop.f32.mrf.mxu0 }
0x159d   :  { %v6015_v57 = vadd.f32 %v6014_v39, %v12855_v55  ;;  %v6202_v7 = vsel %vm115_vm0, %v6180_v58, 0.0 }
0x159e   :  { %6203 = vadd.xlane.f32.xlu0 %v6202_v7 }
0x159f   :  { %v6064_v42 = vadd.f32 %v6063_v41, %v6015_v57 }
0x15a1   :  { %v12969_v6 = vadd.f32 %v6064_v42, %v12795_v33 }
0x15a3   :  { %v6124_v21 = vsel %vm115_vm0, %v12969_v6, 0.0 }
0x15a4   :  { %6125 = vadd.xlane.f32.xlu1 %v6124_v21 }
0x15ea   :  { %v6017_v3 = vpop.f32.mrf.mxu3  ;;  %v6066_v45 = vpop.f32.mrf.mxu0 }
0x15eb   :  { %v6018_v19 = vadd.f32 %v6017_v3, %v12855_v55  ;;  %v6111_v36 = vpop.xlane.xlu1 %6110 }
0x15ec   :  { %v6149_v16 = vmul.f32 %v6111_v36, %v13667_v27 }
0x15ed   :  { %v6067_v59 = vadd.f32 %v6066_v45, %v6018_v19 }
0x15ee   :  { %v12976_v34 = vsub.f32 %v12904_v46, %v6149_v16 }
0x15ef   :  { %v12979_v15 = vadd.f32 %v6067_v59, %v12814_v30 }
0x15f0   :  { %v6181_v33 = vmul.f32 %v12976_v34, %v12976_v34 }
0x15f1   :  { %v6127_v10 = vsel %vm115_vm0, %v12979_v15, 0.0 }
0x15f2   :  { %v6114_v43 = vpop.xlane.xlu0 %6113  ;;  %v6019_v37 = vpop.f32.mrf.mxu3  ;;  %6128 = vadd.xlane.f32.xlu1 %v6127_v10  ;;  %v6205_v48 = vsel %vm115_vm0, %v6181_v33, 0.0 }
0x15f3   :  { %v6150_v46 = vmul.f32 %v6114_v43, %v13667_v27  ;;  %v6020_v30 = vadd.f32 %v6019_v37, %v12855_v55  ;;  %6206 = vadd.xlane.f32.xlu0 %v6205_v48  ;;  %v6068_v63 = vpop.f32.mrf.mxu0 }
0x15f5   :  { %v12995_v1 = vsub.f32 %v12913_v31, %v6150_v46  ;;  %v6069_v62 = vadd.f32 %v6068_v63, %v6020_v30 }
0x15f7   :  { %v12998_v2 = vadd.f32 %v6069_v62, %v12817_v22  ;;  %v6195_v40 = vpop.xlane.xlu2 %6194  ;;  %v6182_v50 = vmul.f32 %v12995_v1, %v12995_v1  ;;  %v7326_v22 = vld [vmem:[%s13275_s2 + $0x60] sm:$0xff] }
0x15f8   :  { %v6241_v17 = vmul.f32 %v6195_v40, %v13667_v27  ;;  %6560 = vmatpush.bf16.msra.mxu1 %v7326_v22 }
0x15f9   :  { %v6208_v44 = vsel %vm115_vm0, %v6182_v50, 0.0  ;;  %v6130_v31 = vsel %vm115_vm0, %v12998_v2, 0.0 }
0x15fa   :  { %v6257_v26 = vadd.f32 1e-05, %v6241_v17  ;;  %6209 = vadd.xlane.f32.xlu2 %v6208_v44 }
0x15fb   :  { %6131 = vadd.xlane.f32.xlu0 %v6130_v31  ;;  %v13049_v31 = vperm.slane %v12852_v0, 7 }
0x15fc   :  { %7964 = vrsqrt.f32 %v6257_v26  ;;  %vm6279_vm12 = vweird.f32 %v6257_v26 }
0x15fe   :  { %v6022_v23 = vpop.f32.mrf.mxu3  ;;  %v6071_v14 = vpop.f32.mrf.mxu0 }
0x15ff   :  { %v6117_v54 = vpop.xlane.xlu0 %6116  ;;  %v6023_v18 = vadd.f32 %v6022_v23, %v12855_v55  ;;  %v6198_v5 = vpop.xlane.xlu1 %6197 }
0x1600   :  { %v6151_v20 = vmul.f32 %v6117_v54, %v13667_v27  ;;  %v6242_v29 = vmul.f32 %v6198_v5, %v13667_v27 }
0x1601   :  { %v6072_v11 = vadd.f32 %v6071_v14, %v6023_v18 }
0x1602   :  { %v7965_v38 = vpop.eup %7964  ;;  %v13016_v13 = vsub.f32 %v12931_v53, %v6151_v20  ;;  %v6258_v8 = vadd.f32 1e-05, %v6242_v29 }
0x1603   :  { %v6274_v61 = vmul.f32 %v7965_v38, %v6257_v26  ;;  %v13019_v9 = vadd.f32 %v6072_v11, %v12833_v4  ;;  %vm6280_vm11 = vweird.f32 %v7965_v38 }
0x1604   :  { %v6183_v58 = vmul.f32 %v13016_v13, %v13016_v13  ;;  %7966 = vrsqrt.f32 %v6258_v8  ;;  %vm6281_vm13 = vmor %vm6279_vm12, %vm6280_vm11  ;;  %vm6289_vm15 = vweird.f32 %v6258_v8 }
0x1605   :  { %v6275_v39 = vmul.f32 %v7965_v38, %v6274_v61  ;;  %v6133_v57 = vsel %vm115_vm0, %v13019_v9, 0.0 }
0x1606   :  { %v6211_v7 = vsel %vm115_vm0, %v6183_v58, 0.0  ;;  %v6024_v41 = vpop.f32.mrf.mxu3  ;;  %6134 = vadd.xlane.f32.xlu0 %v6133_v57  ;;  %v6120_v53 = vpop.xlane.xlu2 %6119 }
0x1607   :  { %v6276_v42 = vmul.f32 0.5, %v6275_v39  ;;  %6212 = vadd.xlane.f32.xlu2 %v6211_v7  ;;  %v6025_v21 = vadd.f32 %v6024_v41, %v12855_v55  ;;  %v6152_v4 = vmul.f32 %v6120_v53, %v13667_v27  ;;  %v6073_v3 = vpop.f32.mrf.mxu0 }
0x1609   :  { %v6277_v45 = vsub.f32 1.5, %v6276_v42  ;;  %v6074_v19 = vadd.f32 %v6073_v3, %v6025_v21  ;;  %v6201_v36 = vpop.xlane.xlu1 %6200  ;;  %v13029_v16 = vsub.f32 %v12947_v32, %v6152_v4 }
0x160a   :  { %v6243_v59 = vmul.f32 %v6201_v36, %v13667_v27  ;;  %v7967_v33 = vpop.eup %7966 }
0x160b   :  { %v13033_v49 = vadd.f32 %v6074_v19, %v12836_v52  ;;  %v6278_v10 = vmul.f32 %v7965_v38, %v6277_v45  ;;  %v6284_v43 = vmul.f32 %v7967_v33, %v6258_v8  ;;  %v6184_v48 = vmul.f32 %v13029_v16, %v13029_v16 }
0x160c   :  { %v13035_v37 = vadd.f32 1e-05, %v6243_v59  ;;  %vm6290_vm14 = vweird.f32 %v7967_v33 }
0x160d   :  { %v6136_v46 = vsel %vm115_vm0, %v13033_v49, 0.0  ;;  %v6285_v32 = vmul.f32 %v7967_v33, %v6284_v43  ;;  %v6214_v52 = vsel %vm115_vm0, %v6184_v48, 0.0  ;;  %v6282_v63 = vsel %vm6281_vm13, %v7965_v38, %v6278_v10  ;;  %vm6291_vm1 = vmor %vm6289_vm15, %vm6290_vm14 }
0x160e   :  { %7968 = vrsqrt.f32 %v13035_v37  ;;  %6215 = vadd.xlane.f32.xlu1 %v6214_v52  ;;  %v6433_v26 = vmul.f32 %v6282_v63, %v12919_v51  ;;  %v13060_v51 = vld [vmem:[%s13278_s10 + $0x18] ss:$0 sm:$0xff]  ;;  %vm6299_vm3 = vweird.f32 %v13035_v37 }
0x160f   :  { %v6123_v30 = vpop.xlane.xlu2 %6122  ;;  %6137 = vadd.xlane.f32.xlu2 %v6136_v46  ;;  %v6286_v35 = vmul.f32 0.5, %v6285_v32 }
0x1610   :  { %v6153_v62 = vmul.f32 %v6123_v30, %v13667_v27  ;;  %v6450_v29 = vmul.f32 %v13049_v31, %v6433_v26 }
0x1611   :  { %v6204_v40 = vpop.xlane.xlu0 %6203  ;;  %v6287_v50 = vsub.f32 1.5, %v6286_v35 }
0x1612   :  { %v6244_v17 = vmul.f32 %v6204_v40, %v13667_v27  ;;  %v13046_v24 = vsub.f32 %v12957_v12, %v6153_v62  ;;  %v6027_v44 = vpop.f32.mrf.mxu3  ;;  %v6076_v23 = vpop.f32.mrf.mxu0 }
0x1613   :  { %v6028_v22 = vadd.f32 %v6027_v44, %v12855_v55  ;;  %v6288_v54 = vmul.f32 %v7967_v33, %v6287_v50 }
0x1614   :  { %v7969_v14 = vpop.eup %7968  ;;  %v6260_v18 = vadd.f32 1e-05, %v6244_v17  ;;  %v6185_v20 = vmul.f32 %v13046_v24, %v13046_v24 }
0x1615   :  { %v6294_v12 = vmul.f32 %v7969_v14, %v13035_v37  ;;  %v6077_v5 = vadd.f32 %v6076_v23, %v6028_v22  ;;  %v6292_v11 = vsel %vm6291_vm1, %v7967_v33, %v6288_v54  ;;  %vm6300_vm2 = vweird.f32 %v7969_v14 }
0x1616   :  { %7970 = vrsqrt.f32 %v6260_v18  ;;  %v6217_v0 = vsel %vm115_vm0, %v6185_v20, 0.0  ;;  %v6434_v38 = vmul.f32 %v6292_v11, %v12928_v25  ;;  %v6467_v25 = vadd.f32 %v13060_v51, %v6450_v29  ;;  %vm6301_vm4 = vmor %vm6299_vm3, %vm6300_vm2 }
0x1617   :  { %v6295_v61 = vmul.f32 %v7969_v14, %v6294_v12  ;;  %v13065_v8 = vadd.f32 %v6077_v5, %v12859_v56  ;;  %v6126_v58 = vpop.xlane.xlu1 %6125  ;;  %6218 = vadd.xlane.f32.xlu1 %v6217_v0  ;;  %vm6309_vm6 = vweird.f32 %v6260_v18 }
0x1618   :  { %v6154_v39 = vmul.f32 %v6126_v58, %v13667_v27  ;;  %v6451_v57 = vmul.f32 %v13049_v31, %v6434_v38 }
0x1619   :  { %v6296_v7 = vmul.f32 0.5, %v6295_v61  ;;  %v6139_v41 = vsel %vm115_vm0, %v13065_v8, 0.0 }
0x161a   :  { %v13072_v42 = vsub.f32 %v12969_v6, %v6154_v39  ;;  %v6029_v53 = vpop.f32.mrf.mxu3  ;;  %6140 = vadd.xlane.f32.xlu2 %v6139_v41  ;;  %v6468_v56 = vadd.f32 %v13060_v51, %v6451_v57  ;;  %v6078_v33 = vpop.f32.mrf.mxu0 }
0x161b   :  { %v6297_v21 = vsub.f32 1.5, %v6296_v7  ;;  %v6030_v4 = vadd.f32 %v6029_v53, %v12855_v55 }
0x161c   :  { %v7971_v3 = vpop.eup %7970  ;;  %v6186_v45 = vmul.f32 %v13072_v42, %v13072_v42  ;;  %v6492_v19 = vpack.c.bf16 %v6468_v56, %v6467_v25 }
0x161d   :  { %v6298_v36 = vmul.f32 %v7969_v14, %v6297_v21  ;;  %v6304_v59 = vmul.f32 %v7971_v3, %v6260_v18  ;;  %v6079_v6 = vadd.f32 %v6078_v33, %v6030_v4  ;;  %vm6310_vm5 = vweird.f32 %v7971_v3 }
0x161e   :  { %v6220_v10 = vsel %vm115_vm0, %v6186_v45, 0.0  ;;  %7234 = vmatmul.msk.bf16.vlgmr.msra.gmra.mxu1 %vm115_vm0, %v6492_v19  ;;  %vm6311_vm7 = vmor %vm6309_vm6, %vm6310_vm5 }
0x161f   :  { %v6305_v43 = vmul.f32 %v7971_v3, %v6304_v59  ;;  %6221 = vadd.xlane.f32.xlu0 %v6220_v10  ;;  %v13083_v55 = vadd.f32 %v6079_v6, %v12862_v28  ;;  %v6302_v48 = vsel %vm6301_vm4, %v7969_v14, %v6298_v36 }
0x1620   :  { %v6435_v52 = vmul.f32 %v6302_v48, %v12944_v60 }
0x1621   :  { %v6306_v46 = vmul.f32 0.5, %v6305_v43  ;;  %v6142_v32 = vsel %vm115_vm0, %v13083_v55, 0.0 }
0x1622   :  { %6143 = vadd.xlane.f32.xlu1 %v6142_v32  ;;  %v6452_v62 = vmul.f32 %v13049_v31, %v6435_v52 }
0x1623   :  { %v6307_v30 = vsub.f32 1.5, %v6306_v46 }
0x1624   :  { %v6469_v40 = vadd.f32 %v13060_v51, %v6452_v62 }
0x1625   :  { %v6308_v63 = vmul.f32 %v7971_v3, %v6307_v30 }
0x1627   :  { %v6312_v37 = vsel %vm6311_vm7, %v7971_v3, %v6308_v63 }
0x1628   :  { %v6436_v35 = vmul.f32 %v6312_v37, %v12960_v47 }
0x162a   :  { %v6453_v28 = vmul.f32 %v13049_v31, %v6436_v35 }
0x162c   :  { %v6470_v50 = vadd.f32 %v13060_v51, %v6453_v28 }
0x162e   :  { %v6493_v17 = vpack.c.bf16 %v6470_v50, %v6469_v40 }
0x1630   :  { %7235 = vmatmul.msk.bf16.gmra.mxu1 %vm115_vm0, %v6493_v17 }
0x1665   :  { %v6129_v44 = vpop.xlane.xlu1 %6128 }
0x1666   :  { %v6207_v26 = vpop.xlane.xlu0 %6206  ;;  %v6155_v60 = vmul.f32 %v6129_v44, %v13667_v27 }
0x1667   :  { %v6245_v22 = vmul.f32 %v6207_v26, %v13667_v27 }
0x1668   :  { %v13097_v23 = vsub.f32 %v12979_v15, %v6155_v60 }
0x1669   :  { %v6261_v47 = vadd.f32 1e-05, %v6245_v22 }
0x166a   :  { %v6187_v14 = vmul.f32 %v13097_v23, %v13097_v23 }
0x166b   :  { %7972 = vrsqrt.f32 %v6261_v47  ;;  %vm6319_vm9 = vweird.f32 %v6261_v47 }
0x166c   :  { %v6223_v54 = vsel %vm115_vm0, %v6187_v14, 0.0 }
0x166d   :  { %v6210_v18 = vpop.xlane.xlu2 %6209  ;;  %6224 = vadd.xlane.f32.xlu0 %v6223_v54 }
0x166e   :  { %v6246_v20 = vmul.f32 %v6210_v18, %v13667_v27  ;;  %v6132_v12 = vpop.xlane.xlu0 %6131 }
0x166f   :  { %v6156_v5 = vmul.f32 %v6132_v12, %v13667_v27 }
0x1670   :  { %v6262_v11 = vadd.f32 1e-05, %v6246_v20 }
0x1671   :  { %v7973_v0 = vpop.eup %7972  ;;  %v13105_v29 = vsub.f32 %v12998_v2, %v6156_v5 }
0x1672   :  { %v6314_v15 = vmul.f32 %v7973_v0, %v6261_v47  ;;  %7974 = vrsqrt.f32 %v6262_v11  ;;  %vm6320_vm8 = vweird.f32 %v7973_v0  ;;  %vm6329_vm12 = vweird.f32 %v6262_v11 }
0x1673   :  { %v6188_v38 = vmul.f32 %v13105_v29, %v13105_v29  ;;  %vm6321_vm10 = vmor %vm6319_vm9, %vm6320_vm8 }
0x1674   :  { %v6315_v61 = vmul.f32 %v7973_v0, %v6314_v15 }
0x1675   :  { %v6226_v58 = vsel %vm115_vm0, %v6188_v38, 0.0 }
0x1676   :  { %v6316_v39 = vmul.f32 0.5, %v6315_v61  ;;  %6227 = vadd.xlane.f32.xlu2 %v6226_v58 }
0x1678   :  { %v7975_v57 = vpop.eup %7974  ;;  %v6317_v7 = vsub.f32 1.5, %v6316_v39 }
0x1679   :  { %v6324_v41 = vmul.f32 %v7975_v57, %v6262_v11  ;;  %v6135_v53 = vpop.xlane.xlu0 %6134  ;;  %vm6330_vm11 = vweird.f32 %v7975_v57 }
0x167a   :  { %v6318_v25 = vmul.f32 %v7973_v0, %v6317_v7  ;;  %v6213_v56 = vpop.xlane.xlu2 %6212  ;;  %v6157_v2 = vmul.f32 %v6135_v53, %v13667_v27  ;;  %vm6331_vm13 = vmor %vm6329_vm12, %vm6330_vm11 }
0x167b   :  { %v6325_v21 = vmul.f32 %v7975_v57, %v6324_v41  ;;  %v6247_v4 = vmul.f32 %v6213_v56, %v13667_v27 }
0x167c   :  { %v13113_v3 = vsub.f32 %v13019_v9, %v6157_v2  ;;  %v6322_v45 = vsel %vm6321_vm10, %v7973_v0, %v6318_v25 }
0x167d   :  { %v6326_v19 = vmul.f32 0.5, %v6325_v21  ;;  %v6263_v36 = vadd.f32 1e-05, %v6247_v4  ;;  %v6437_v6 = vmul.f32 %v6322_v45, %v12976_v34 }
0x167e   :  { %v6189_v59 = vmul.f32 %v13113_v3, %v13113_v3 }
0x167f   :  { %v6327_v33 = vsub.f32 1.5, %v6326_v19  ;;  %7976 = vrsqrt.f32 %v6263_v36  ;;  %v6454_v63 = vmul.f32 %v13049_v31, %v6437_v6  ;;  %vm6339_vm15 = vweird.f32 %v6263_v36  ;;  %v13147_v19 = vld [vmem:[%s13276_s3 + $0x3] ss:$0 sm:$0xff] }
0x1680   :  { %v6229_v10 = vsel %vm115_vm0, %v6189_v59, 0.0 }
0x1681   :  { %v6328_v43 = vmul.f32 %v7975_v57, %v6327_v33  ;;  %6230 = vadd.xlane.f32.xlu1 %v6229_v10  ;;  %v6216_v32 = vpop.xlane.xlu1 %6215  ;;  %v6471_v17 = vadd.f32 %v13060_v51, %v6454_v63 }
0x1682   :  { %v6138_v48 = vpop.xlane.xlu2 %6137  ;;  %v6248_v52 = vmul.f32 %v6216_v32, %v13667_v27 }
0x1683   :  { %v6332_v9 = vsel %vm6331_vm13, %v7975_v57, %v6328_v43  ;;  %v6158_v46 = vmul.f32 %v6138_v48, %v13667_v27 }
0x1684   :  { %v6438_v30 = vmul.f32 %v6332_v9, %v12995_v1  ;;  %v6264_v62 = vadd.f32 1e-05, %v6248_v52 }
0x1685   :  { %v7977_v37 = vpop.eup %7976  ;;  %v13124_v34 = vsub.f32 %v13033_v49, %v6158_v46 }
0x1686   :  { %v6334_v35 = vmul.f32 %v7977_v37, %v6263_v36  ;;  %v6455_v28 = vmul.f32 %v13049_v31, %v6438_v30  ;;  %7978 = vrsqrt.f32 %v6264_v62  ;;  %vm6340_vm14 = vweird.f32 %v7977_v37 }
0x1687   :  { %v6190_v40 = vmul.f32 %v13124_v34, %v13124_v34  ;;  %vm6341_vm1 = vmor %vm6339_vm15, %vm6340_vm14  ;;  %vm6349_vm3 = vweird.f32 %v6264_v62 }
0x1688   :  { %v6335_v50 = vmul.f32 %v7977_v37, %v6334_v35  ;;  %v6472_v1 = vadd.f32 %v13060_v51, %v6455_v28 }
0x1689   :  { %v6232_v44 = vsel %vm115_vm0, %v6190_v40, 0.0 }
0x168a   :  { %v6336_v26 = vmul.f32 0.5, %v6335_v50  ;;  %6233 = vadd.xlane.f32.xlu0 %v6232_v44  ;;  %v6494_v60 = vpack.c.bf16 %v6472_v1, %v6471_v17  ;;  %v6219_v49 = vpop.xlane.xlu1 %6218 }
0x168b   :  { %v6249_v47 = vmul.f32 %v6219_v49, %v13667_v27 }
0x168c   :  { %v6337_v22 = vsub.f32 1.5, %v6336_v26  ;;  %7236 = vmatmul.msk.bf16.gmra.mxu1 %vm115_vm0, %v6494_v60  ;;  %v7979_v54 = vpop.eup %7978 }
0x168d   :  { %v6141_v14 = vpop.xlane.xlu2 %6140  ;;  %v6265_v20 = vadd.f32 1e-05, %v6249_v47  ;;  %v6344_v5 = vmul.f32 %v7979_v54, %v6264_v62  ;;  %vm6350_vm2 = vweird.f32 %v7979_v54 }
0x168e   :  { %v6338_v18 = vmul.f32 %v7977_v37, %v6337_v22  ;;  %v6159_v12 = vmul.f32 %v6141_v14, %v13667_v27  ;;  %vm6351_vm4 = vmor %vm6349_vm3, %vm6350_vm2 }
0x168f   :  { %7980 = vrsqrt.f32 %v6265_v20  ;;  %v6345_v0 = vmul.f32 %v7979_v54, %v6344_v5  ;;  %vm6359_vm6 = vweird.f32 %v6265_v20 }
0x1690   :  { %v13136_v11 = vsub.f32 %v13065_v8, %v6159_v12  ;;  %v6342_v15 = vsel %vm6341_vm1, %v7977_v37, %v6338_v18 }
0x1691   :  { %v6346_v58 = vmul.f32 0.5, %v6345_v0  ;;  %v6439_v7 = vmul.f32 %v6342_v15, %v13016_v13 }
0x1692   :  { %v6222_v38 = vpop.xlane.xlu0 %6221  ;;  %v6191_v61 = vmul.f32 %v13136_v11, %v13136_v11 }
0x1693   :  { %v6250_v39 = vmul.f32 %v6222_v38, %v13667_v27  ;;  %v6347_v41 = vsub.f32 1.5, %v6346_v58  ;;  %v6456_v13 = vmul.f32 %v13049_v31, %v6439_v7 }
0x1694   :  { %v6235_v57 = vsel %vm115_vm0, %v6191_v61, 0.0 }
0x1695   :  { %v6266_v53 = vadd.f32 1e-05, %v6250_v39  ;;  %6236 = vadd.xlane.f32.xlu2 %v6235_v57  ;;  %v7981_v8 = vpop.eup %7980  ;;  %v6144_v25 = vpop.xlane.xlu1 %6143  ;;  %v6348_v56 = vmul.f32 %v7979_v54, %v6347_v41  ;;  %v6473_v32 = vadd.f32 %v13060_v51, %v6456_v13 }
0x1696   :  { %v6354_v2 = vmul.f32 %v7981_v8, %v6265_v20  ;;  %v6160_v21 = vmul.f32 %v6144_v25, %v13667_v27  ;;  %vm6360_vm5 = vweird.f32 %v7981_v8 }
0x1697   :  { %7982 = vrsqrt.f32 %v6266_v53  ;;  %v6352_v4 = vsel %vm6351_vm4, %v7979_v54, %v6348_v56  ;;  %vm6361_vm7 = vmor %vm6359_vm6, %vm6360_vm5  ;;  %vm6369_vm9 = vweird.f32 %v6266_v53 }
0x1698   :  { %v6355_v45 = vmul.f32 %v7981_v8, %v6354_v2  ;;  %v6440_v36 = vmul.f32 %v6352_v4, %v13029_v16  ;;  %v13152_v59 = vsub.f32 %v13083_v55, %v6160_v21 }
0x169a   :  { %v6356_v33 = vmul.f32 0.5, %v6355_v45  ;;  %v6192_v10 = vmul.f32 %v13152_v59, %v13152_v59  ;;  %v6457_v43 = vmul.f32 %v13049_v31, %v6440_v36 }
0x169b   :  { %v6562_v6 = vpop.f32.mrf.mxu1 }
0x169c   :  { %v6357_v9 = vsub.f32 1.5, %v6356_v33  ;;  %v6563_v46 = vadd.f32 %v13147_v19, %v6562_v6  ;;  %v6238_v16 = vsel %vm115_vm0, %v6192_v10, 0.0  ;;  %v6474_v55 = vadd.f32 %v13060_v51, %v6457_v43 }
0x169d   :  { %v7983_v48 = vpop.eup %7982  ;;  %6239 = vadd.xlane.f32.xlu1 %v6238_v16 }
0x169e   :  { %v6364_v30 = vmul.f32 %v7983_v48, %v6266_v53  ;;  %v6358_v52 = vmul.f32 %v7981_v8, %v6357_v9  ;;  %6602 = vst.msk [vmem:[%s13286_s11] sm:$0xff] %vm115_vm0, %v6563_v46  ;;  %v6495_v37 = vpack.c.bf16 %v6474_v55, %v6473_v32  ;;  %vm6370_vm8 = vweird.f32 %v7983_v48 }
0x169f   :  { %vm6371_vm10 = vmor %vm6369_vm9, %vm6370_vm8 }
0x16a0   :  { %v6365_v63 = vmul.f32 %v7983_v48, %v6364_v30  ;;  %v6362_v35 = vsel %vm6361_vm7, %v7981_v8, %v6358_v52  ;;  %7237 = vmatmul.msk.bf16.gmra.mxu1 %vm115_vm0, %v6495_v37 }
0x16a1   :  { %v6441_v50 = vmul.f32 %v6362_v35, %v13046_v24 }
0x16a2   :  { %v6366_v62 = vmul.f32 0.5, %v6365_v63 }
0x16a3   :  { %v6564_v40 = vpop.f32.mrf.mxu1  ;;  %v6458_v60 = vmul.f32 %v13049_v31, %v6441_v50 }
0x16a4   :  { %v6367_v28 = vsub.f32 1.5, %v6366_v62  ;;  %v6565_v17 = vadd.f32 %v13147_v19, %v6564_v40 }
0x16a5   :  { %v6475_v24 = vadd.f32 %v13060_v51, %v6458_v60 }
0x16a6   :  { %v6368_v1 = vmul.f32 %v7983_v48, %v6367_v28  ;;  %6603 = vst.msk [vmem:[%s13286_s11 + $0x8] sm:$0xff] %vm115_vm0, %v6565_v17 }
0x16a8   :  { %v6372_v44 = vsel %vm6371_vm10, %v7983_v48, %v6368_v1 }
0x16a9   :  { %v6442_v26 = vmul.f32 %v6372_v44, %v13072_v42 }
0x16ab   :  { %v6459_v49 = vmul.f32 %v13049_v31, %v6442_v26 }
0x16ad   :  { %v6567_v22 = vpop.f32.mrf.mxu1  ;;  %v6476_v47 = vadd.f32 %v13060_v51, %v6459_v49 }
0x16ae   :  { %v6568_v14 = vadd.f32 %v13147_v19, %v6567_v22 }
0x16af   :  { %v6496_v54 = vpack.c.bf16 %v6476_v47, %v6475_v24 }
0x16b0   :  { %6604 = vst.msk [vmem:[%s13286_s11 + $0x10] sm:$0xff] %vm115_vm0, %v6568_v14 }
0x16b1   :  { %7238 = vmatmul.msk.bf16.gmra.mxu1 %vm115_vm0, %v6496_v54 }
0x16b5   :  { %v6569_v42 = vpop.f32.mrf.mxu1 }
0x16b6   :  { %v6570_v18 = vadd.f32 %v13147_v19, %v6569_v42 }
0x16b8   :  { %6605 = vst.msk [vmem:[%s13286_s11 + $0x18] sm:$0xff] %vm115_vm0, %v6570_v18 }
0x16e0   :  { %v6225_v20 = vpop.xlane.xlu0 %6224 }
0x16e1   :  { %v6251_v12 = vmul.f32 %v6225_v20, %v13667_v27 }
0x16e3   :  { %v6267_v5 = vadd.f32 1e-05, %v6251_v12 }
0x16e5   :  { %7984 = vrsqrt.f32 %v6267_v5  ;;  %vm6379_vm12 = vweird.f32 %v6267_v5 }
0x16e9   :  { %v6228_v0 = vpop.xlane.xlu2 %6227 }
0x16ea   :  { %v6252_v15 = vmul.f32 %v6228_v0, %v13667_v27 }
0x16eb   :  { %v7985_v38 = vpop.eup %7984 }
0x16ec   :  { %v6374_v61 = vmul.f32 %v7985_v38, %v6267_v5  ;;  %v6268_v58 = vadd.f32 1e-05, %v6252_v15  ;;  %vm6380_vm11 = vweird.f32 %v7985_v38 }
0x16ed   :  { %vm6381_vm13 = vmor %vm6379_vm12, %vm6380_vm11 }
0x16ee   :  { %v6375_v39 = vmul.f32 %v7985_v38, %v6374_v61  ;;  %7986 = vrsqrt.f32 %v6268_v58  ;;  %vm6389_vm15 = vweird.f32 %v6268_v58 }
0x16f0   :  { %v6376_v57 = vmul.f32 0.5, %v6375_v39 }
0x16f2   :  { %v6377_v7 = vsub.f32 1.5, %v6376_v57 }
0x16f4   :  { %v7987_v41 = vpop.eup %7986  ;;  %v6231_v53 = vpop.xlane.xlu1 %6230  ;;  %v6378_v8 = vmul.f32 %v7985_v38, %v6377_v7 }
0x16f5   :  { %v6384_v25 = vmul.f32 %v7987_v41, %v6268_v58  ;;  %v6253_v56 = vmul.f32 %v6231_v53, %v13667_v27  ;;  %vm6390_vm14 = vweird.f32 %v7987_v41 }
0x16f6   :  { %v6382_v4 = vsel %vm6381_vm13, %v7985_v38, %v6378_v8  ;;  %vm6391_vm1 = vmor %vm6389_vm15, %vm6390_vm14 }
0x16f7   :  { %v6385_v2 = vmul.f32 %v7987_v41, %v6384_v25  ;;  %v6269_v21 = vadd.f32 1e-05, %v6253_v56  ;;  %v6443_v36 = vmul.f32 %v6382_v4, %v13097_v23 }
0x16f9   :  { %v6386_v45 = vmul.f32 0.5, %v6385_v2  ;;  %7988 = vrsqrt.f32 %v6269_v21  ;;  %v6460_v30 = vmul.f32 %v13049_v31, %v6443_v36  ;;  %vm6399_vm3 = vweird.f32 %v6269_v21 }
0x16fb   :  { %v6387_v13 = vsub.f32 1.5, %v6386_v45  ;;  %v6477_v23 = vadd.f32 %v13060_v51, %v6460_v30 }
0x16fd   :  { %v6388_v33 = vmul.f32 %v7987_v41, %v6387_v13  ;;  %v6234_v6 = vpop.xlane.xlu0 %6233 }
0x16fe   :  { %v6254_v10 = vmul.f32 %v6234_v6, %v13667_v27 }
0x16ff   :  { %v7989_v43 = vpop.eup %7988  ;;  %v6392_v48 = vsel %vm6391_vm1, %v7987_v41, %v6388_v33 }
0x1700   :  { %v6444_v9 = vmul.f32 %v6392_v48, %v13105_v29  ;;  %v6394_v46 = vmul.f32 %v7989_v43, %v6269_v21  ;;  %v6270_v32 = vadd.f32 1e-05, %v6254_v10  ;;  %vm6400_vm2 = vweird.f32 %v7989_v43 }
0x1701   :  { %vm6401_vm4 = vmor %vm6399_vm3, %vm6400_vm2 }
0x1702   :  { %v6395_v16 = vmul.f32 %v7989_v43, %v6394_v46  ;;  %7990 = vrsqrt.f32 %v6270_v32  ;;  %v6461_v55 = vmul.f32 %v13049_v31, %v6444_v9  ;;  %vm6409_vm6 = vweird.f32 %v6270_v32 }
0x1704   :  { %v6396_v52 = vmul.f32 0.5, %v6395_v16  ;;  %v6478_v63 = vadd.f32 %v13060_v51, %v6461_v55 }
0x1706   :  { %v6397_v37 = vsub.f32 1.5, %v6396_v52  ;;  %v6497_v35 = vpack.c.bf16 %v6478_v63, %v6477_v23 }
0x1708   :  { %v7991_v62 = vpop.eup %7990  ;;  %7239 = vmatmul.msk.bf16.gmra.mxu1 %vm115_vm0, %v6497_v35  ;;  %v6237_v28 = vpop.xlane.xlu2 %6236  ;;  %v6398_v29 = vmul.f32 %v7989_v43, %v6397_v37 }
0x1709   :  { %v6404_v40 = vmul.f32 %v7991_v62, %v6270_v32  ;;  %v6255_v50 = vmul.f32 %v6237_v28, %v13667_v27  ;;  %v6572_v17 = vpop.f32.mrf.mxu1  ;;  %vm6410_vm5 = vweird.f32 %v7991_v62 }
0x170a   :  { %v6573_v1 = vadd.f32 %v13147_v19, %v6572_v17  ;;  %v6402_v60 = vsel %vm6401_vm4, %v7989_v43, %v6398_v29  ;;  %vm6411_vm7 = vmor %vm6409_vm6, %vm6410_vm5 }
0x170b   :  { %v6405_v44 = vmul.f32 %v7991_v62, %v6404_v40  ;;  %v6271_v26 = vadd.f32 1e-05, %v6255_v50  ;;  %v6445_v24 = vmul.f32 %v6402_v60, %v13113_v3 }
0x170c   :  { %6606 = vst.msk [vmem:[%s13286_s11 + $0x20] sm:$0xff] %vm115_vm0, %v6573_v1 }
0x170d   :  { %v6406_v49 = vmul.f32 0.5, %v6405_v44  ;;  %7992 = vrsqrt.f32 %v6271_v26  ;;  %v6462_v3 = vmul.f32 %v13049_v31, %v6445_v24  ;;  %vm6419_vm9 = vweird.f32 %v6271_v26 }
0x170f   :  { %v6407_v22 = vsub.f32 1.5, %v6406_v49  ;;  %v6479_v39 = vadd.f32 %v13060_v51, %v6462_v3 }
0x1710   :  { %v6240_v54 = vpop.xlane.xlu1 %6239 }
0x1711   :  { %v6408_v47 = vmul.f32 %v7991_v62, %v6407_v22  ;;  %v6574_v14 = vpop.f32.mrf.mxu1  ;;  %v6256_v12 = vmul.f32 %v6240_v54, %v13667_v27 }
0x1712   :  { %v6575_v42 = vadd.f32 %v13147_v19, %v6574_v14 }
0x1713   :  { %v7993_v18 = vpop.eup %7992  ;;  %v6412_v20 = vsel %vm6411_vm7, %v7991_v62, %v6408_v47  ;;  %v6272_v15 = vadd.f32 1e-05, %v6256_v12 }
0x1714   :  { %v6446_v5 = vmul.f32 %v6412_v20, %v13124_v34  ;;  %v6414_v0 = vmul.f32 %v7993_v18, %v6271_v26  ;;  %6607 = vst.msk [vmem:[%s13286_s11 + $0x28] sm:$0xff] %vm115_vm0, %v6575_v42  ;;  %vm6420_vm8 = vweird.f32 %v7993_v18 }
0x1715   :  { %7994 = vrsqrt.f32 %v6272_v15  ;;  %vm6421_vm10 = vmor %vm6419_vm9, %vm6420_vm8  ;;  %vm6429_vm12 = vweird.f32 %v6272_v15 }
0x1716   :  { %v6415_v38 = vmul.f32 %v7993_v18, %v6414_v0  ;;  %v6463_v61 = vmul.f32 %v13049_v31, %v6446_v5 }
0x1718   :  { %v6416_v58 = vmul.f32 0.5, %v6415_v38  ;;  %v6480_v27 = vadd.f32 %v13060_v51, %v6463_v61 }
0x171a   :  { %v6417_v57 = vsub.f32 1.5, %v6416_v58  ;;  %v6498_v34 = vpack.c.bf16 %v6480_v27, %v6479_v39 }
0x171b   :  { %v7995_v7 = vpop.eup %7994 }
0x171c   :  { %7240 = vmatmul.msk.bf16.gmra.mxu1 %vm115_vm0, %v6498_v34  ;;  %v6418_v41 = vmul.f32 %v7993_v18, %v6417_v57  ;;  %v6424_v53 = vmul.f32 %v7995_v7, %v6272_v15  ;;  %vm6430_vm11 = vweird.f32 %v7995_v7 }
0x171d   :  { %v6577_v8 = vpop.f32.mrf.mxu1  ;;  %vm6431_vm13 = vmor %vm6429_vm12, %vm6430_vm11 }
0x171e   :  { %v6425_v25 = vmul.f32 %v7995_v7, %v6424_v53  ;;  %v6578_v56 = vadd.f32 %v13147_v19, %v6577_v8  ;;  %v6422_v2 = vsel %vm6421_vm10, %v7993_v18, %v6418_v41 }
0x171f   :  { %v6447_v45 = vmul.f32 %v6422_v2, %v13136_v11 }
0x1720   :  { %v6426_v21 = vmul.f32 0.5, %v6425_v25  ;;  %6608 = vst.msk [vmem:[%s13286_s11 + $0x30] sm:$0xff] %vm115_vm0, %v6578_v56 }
0x1721   :  { %v6464_v43 = vmul.f32 %v13049_v31, %v6447_v45 }
0x1722   :  { %v6427_v4 = vsub.f32 1.5, %v6426_v21 }
0x1723   :  { %v6481_v11 = vadd.f32 %v13060_v51, %v6464_v43 }
0x1724   :  { %v6428_v13 = vmul.f32 %v7995_v7, %v6427_v4 }
0x1725   :  { %v6579_v36 = vpop.f32.mrf.mxu1 }
0x1726   :  { %v6432_v33 = vsel %vm6431_vm13, %v7995_v7, %v6428_v13  ;;  %v6580_v6 = vadd.f32 %v13147_v19, %v6579_v36 }
0x1727   :  { %v6448_v10 = vmul.f32 %v6432_v33, %v13152_v59 }
0x1728   :  { %6609 = vst.msk [vmem:[%s13286_s11 + $0x38] sm:$0xff] %vm115_vm0, %v6580_v6 }
0x1729   :  { %v6465_v48 = vmul.f32 %v13049_v31, %v6448_v10 }
0x172b   :  { %v6482_v9 = vadd.f32 %v13060_v51, %v6465_v48 }
0x172d   :  { %v6499_v32 = vpack.c.bf16 %v6482_v9, %v6481_v11 }
0x172e   :  { %v6582_v46 = vpop.f32.mrf.mxu1 }
0x172f   :  { %v6583_v30 = vadd.f32 %v13147_v19, %v6582_v46  ;;  %7241 = vmatmul.msk.bf16.gmra.mxu1 %vm115_vm0, %v6499_v32 }
0x1731   :  { %6610 = vst.msk [vmem:[%s13286_s11 + $0x40] sm:$0xff] %vm115_vm0, %v6583_v30 }
0x1736   :  { %v6584_v59 = vpop.f32.mrf.mxu1 }
0x1737   :  { %v6585_v16 = vadd.f32 %v13147_v19, %v6584_v59 }
0x1739   :  { %6611 = vst.msk [vmem:[%s13286_s11 + $0x48] sm:$0xff] %vm115_vm0, %v6585_v16 }
0x1785   :  { %v6587_v31 = vpop.f32.mrf.mxu1 }
0x1786   :  { %v6588_v51 = vadd.f32 %v13147_v19, %v6587_v31 }
0x1788   :  { %6612 = vst.msk [vmem:[%s13286_s11 + $0x50] sm:$0xff] %vm115_vm0, %v6588_v51 }
0x178d   :  { %v6589_v55 = vpop.f32.mrf.mxu1 }
0x178e   :  { %v6590_v52 = vadd.f32 %v13147_v19, %v6589_v55 }
0x1790   :  { %6613 = vst.msk [vmem:[%s13286_s11 + $0x58] sm:$0xff] %vm115_vm0, %v6590_v52 }
0x1799   :  { %v6592_v23 = vpop.f32.mrf.mxu1 }
0x179a   :  { %v6593_v63 = vadd.f32 %v13147_v19, %v6592_v23 }
0x179c   :  { %6614 = vst.msk [vmem:[%s13286_s11 + $0x60] sm:$0xff] %vm115_vm0, %v6593_v63 }
0x17a1   :  { %v6594_v37 = vpop.f32.mrf.mxu1 }
0x17a2   :  { %v6595_v35 = vadd.f32 %v13147_v19, %v6594_v37 }
0x17a4   :  { %6615 = vst.msk [vmem:[%s13286_s11 + $0x68] sm:$0xff] %vm115_vm0, %v6595_v35 }
0x17ac   :  { %v6597_v62 = vpop.f32.mrf.mxu1 }
0x17ad   :  { %v6598_v28 = vadd.f32 %v13147_v19, %v6597_v62 }
0x17af   :  { %6616 = vst.msk [vmem:[%s13286_s11 + $0x70] sm:$0xff] %vm115_vm0, %v6598_v28 }
0x17b4   :  { %v6599_v29 = vpop.f32.mrf.mxu1 }
0x17b5   :  { %v6600_v40 = vadd.f32 %v13147_v19, %v6599_v29 }
0x17b7   :  { %6617 = vst.msk [vmem:[%s13286_s11 + $0x78] sm:$0xff] %vm115_vm0, %v6600_v40 }

</bundles_post_ra>
